<compile_context>
chip_gen: v7x
topology: tpu7x:2x2x1
jax: 0.10.0
libtpu: 0.0.40
codegen_flags: <defaults>
</compile_context>

<pallas_src>
import jax
import jax.numpy as jnp
from jax.experimental import pallas as pl
from jax.experimental.pallas import tpu as pltpu


def _round_up(x, m):
    return (x + m - 1) // m * m


def _pad2d(x, rows, cols):
    r, c = x.shape
    if r == rows and c == cols:
        return x
    return jnp.pad(x, ((0, rows - r), (0, cols - c)))


def _pick_tile(dim, max_tile=512, min_tiles=1, unit=128):
    """Largest multiple of `unit` that divides `dim`, is <= max_tile and leaves
    at least `min_tiles` blocks (falls back to `unit` / `dim`)."""
    best = min(unit, dim)
    t = unit
    while t <= min(max_tile, dim):
        if dim % t == 0 and dim // t >= min_tiles:
            best = t
        t += unit
    return best


def _vmem_limit_bytes(est_bytes):
    # Explicit scoped-VMEM request: above the v5e 16 MiB default, below the
    # v7x 64 MiB physical budget.
    return int(min(48 * 1024 * 1024, max(32 * 1024 * 1024, 2 * est_bytes)))


# ---------------------------------------------------------------------------
# Generic tiled matmul (feat @ W, decoder adj products)
# ---------------------------------------------------------------------------
def _matmul_kernel_single(a_ref, b_ref, o_ref):
    o_ref[...] = jnp.dot(a_ref[...], b_ref[...],
                         preferred_element_type=jnp.float32).astype(o_ref.dtype)


def _matmul_kernel_acc(a_ref, b_ref, o_ref):
    # Output block is resident across the K axis: accumulate directly into it
    # (f32 output), no separate VMEM scratch.
    @pl.when(pl.program_id(2) == 0)
    def _():
        o_ref[...] = jnp.zeros_like(o_ref)

    o_ref[...] += jnp.dot(a_ref[...], b_ref[...],
                          preferred_element_type=jnp.float32)


def pallas_matmul(a, b, *, tm=256, tn=512, tk=512, out_dtype=jnp.float32):
    m, k = a.shape
    k2, n = b.shape
    assert k == k2
    tm = min(tm, _round_up(m, 8))
    tk = min(tk, _round_up(k, 128))
    if n <= 512:
        tn = n                       # single full-width N block, no column pad
    else:
        tn = min(tn, _round_up(n, 128))
    mp, kp, npad = _round_up(m, tm), _round_up(k, tk), _round_up(n, tn)
    a_p = _pad2d(a, mp, kp)
    b_p = _pad2d(b, kp, npad)
    nk = kp // tk
    if nk > 1:
        out_dtype = jnp.float32      # in-place accumulation needs f32 output

    est = 2 * (tm * tk * a_p.dtype.itemsize
               + tk * tn * b_p.dtype.itemsize
               + tm * tn * jnp.dtype(out_dtype).itemsize)
    params = pltpu.CompilerParams(
        dimension_semantics=(("parallel", "parallel") if nk == 1
                             else ("parallel", "parallel", "arbitrary")),
        vmem_limit_bytes=_vmem_limit_bytes(est))

    if nk == 1:
        grid = (mp // tm, npad // tn)
        in_specs = [pl.BlockSpec((tm, tk), lambda i, j: (i, 0)),
                    pl.BlockSpec((tk, tn), lambda i, j: (0, j))]
        out_specs = pl.BlockSpec((tm, tn), lambda i, j: (i, j))
        kernel = _matmul_kernel_single
    else:
        grid = (mp // tm, npad // tn, nk)
        in_specs = [pl.BlockSpec((tm, tk), lambda i, j, kk: (i, kk)),
                    pl.BlockSpec((tk, tn), lambda i, j, kk: (kk, j))]
        out_specs = pl.BlockSpec((tm, tn), lambda i, j, kk: (i, j))
        kernel = _matmul_kernel_acc

    out = pl.pallas_call(
        kernel,
        out_shape=jax.ShapeDtypeStruct((mp, npad), out_dtype),
        grid_spec=pltpu.PrefetchScalarGridSpec(
            num_scalar_prefetch=0, grid=grid,
            in_specs=in_specs, out_specs=out_specs),
        compiler_params=params,
    )(a_p, b_p)
    if mp == m and npad == n:
        return out
    return out[:m, :n]


# ---------------------------------------------------------------------------
# Fused per-omics encoder:  (adj_spatial @ h, adj_feature @ h) + attention
# ---------------------------------------------------------------------------
def _encoder_attention_kernel(adj_s_ref, adj_f_ref, h_ref, w_ref, u_ref,
                              lat_ref, acc_s, acc_f):
    k = pl.program_id(1)

    @pl.when(k == 0)
    def _():
        acc_s[...] = jnp.zeros_like(acc_s)
        acc_f[...] = jnp.zeros_like(acc_f)

    h = h_ref[...]                                       # shared by both dots
    acc_s[...] += jnp.dot(adj_s_ref[...], h, preferred_element_type=jnp.float32)
    acc_f[...] += jnp.dot(adj_f_ref[...], h, preferred_element_type=jnp.float32)

    @pl.when(k == pl.num_programs(1) - 1)
    def _():
        e1 = acc_s[...]
        e2 = acc_f[...]
        w = w_ref[...]
        u = u_ref[...]                                   # (1, D) row
        v1 = jnp.tanh(jnp.dot(e1, w, preferred_element_type=jnp.float32))
        v2 = jnp.tanh(jnp.dot(e2, w, preferred_element_type=jnp.float32))
        # u_omega score as VPU multiply + lane reduce (no N=1 MXU matmul).
        s1 = jnp.sum(v1 * u, axis=-1, keepdims=True) + 1e-6
        s2 = jnp.sum(v2 * u, axis=-1, keepdims=True) + 1e-6
        mx = jnp.maximum(s1, s2)
        x1 = jnp.exp(s1 - mx)
        x2 = jnp.exp(s2 - mx)
        inv = pl.reciprocal(x1 + x2, approx=True)
        lat_ref[...] = ((x1 * inv) * e1 + (x2 * inv) * e2).astype(lat_ref.dtype)


def encoder_attention_forward(adj_s_pad, adj_f_pad, h_pad, w_omega, u_omega,
                              *, tm, tk):
    np_pad, d = h_pad.shape
    u_row = u_omega.reshape(1, -1)
    est = (2 * (2 * tm * tk * adj_s_pad.dtype.itemsize
                + tk * d * h_pad.dtype.itemsize
                + tm * d * 4)
           + 2 * tm * d * 4)
    return pl.pallas_call(
        _encoder_attention_kernel,
        out_shape=jax.ShapeDtypeStruct((np_pad, d), jnp.float32),
        grid_spec=pltpu.PrefetchScalarGridSpec(
            num_scalar_prefetch=0,
            grid=(np_pad // tm, np_pad // tk),
            in_specs=[pl.BlockSpec((tm, tk), lambda i, k: (i, k)),
                      pl.BlockSpec((tm, tk), lambda i, k: (i, k)),
                      pl.BlockSpec((tk, d), lambda i, k: (k, 0)),
                      pl.BlockSpec(w_omega.shape, lambda i, k: (0, 0)),
                      pl.BlockSpec(u_row.shape, lambda i, k: (0, 0))],
            out_specs=pl.BlockSpec((tm, d), lambda i, k: (i, 0)),
            scratch_shapes=[pltpu.VMEM((tm, d), jnp.float32),
                            pltpu.VMEM((tm, d), jnp.float32)]),
        compiler_params=pltpu.CompilerParams(
            dimension_semantics=("parallel", "arbitrary"),
            vmem_limit_bytes=_vmem_limit_bytes(est)),
    )(adj_s_pad, adj_f_pad, h_pad, w_omega, u_row)


# ---------------------------------------------------------------------------
# Fused post-latent stage: cross attention + translations + discriminators +
# decoder feature transforms, row-tiled over N.
# ---------------------------------------------------------------------------
def _latent_stage_kernel(l1_ref, l2_ref,
                         cw_ref, cu_ref,
                         t12_w1, t12_b1, t12_w2, t12_b2, t12_w3, t12_b3,
                         t21_w1, t21_b1, t21_w2, t21_b2, t21_w3, t21_b3,
                         d1_w1, d1_b1, d1_w2, d1_b2, d1_w3, d1_b3,
                         d2_w1, d2_b1, d2_w2, d2_b2, d2_w3, d2_b3,
                         dec1_w, dec2_w,
                         comb_ref, t12_ref, t21_ref, p1_ref, p2_ref,
                         inner1_ref, inner2_ref):
    l1 = l1_ref[...]
    l2 = l2_ref[...]

    # --- cross-modality attention ---
    cw = cw_ref[...]
    cu = cu_ref[...]
    v1 = jnp.tanh(jnp.dot(l1, cw, preferred_element_type=jnp.float32))
    v2 = jnp.tanh(jnp.dot(l2, cw, preferred_element_type=jnp.float32))
    s1 = jnp.sum(v1 * cu, axis=-1, keepdims=True) + 1e-6
    s2 = jnp.sum(v2 * cu, axis=-1, keepdims=True) + 1e-6
    mx = jnp.maximum(s1, s2)
    x1 = jnp.exp(s1 - mx)
    x2 = jnp.exp(s2 - mx)
    inv = pl.reciprocal(x1 + x2, approx=True)
    comb = (x1 * inv) * l1 + (x2 * inv) * l2
    comb_ref[...] = comb.astype(comb_ref.dtype)

    # --- translation MLPs ---
    def mlp3(x, w1, b1, w2, b2, w3, b3):
        h = jnp.maximum(
            jnp.dot(x, w1[...], preferred_element_type=jnp.float32) + b1[...], 0.0)
        h = jnp.maximum(
            jnp.dot(h, w2[...], preferred_element_type=jnp.float32) + b2[...], 0.0)
        return jnp.dot(h, w3[...], preferred_element_type=jnp.float32) + b3[...]

    t12_ref[...] = mlp3(l1, t12_w1, t12_b1, t12_w2, t12_b2,
                        t12_w3, t12_b3).astype(t12_ref.dtype)
    t21_ref[...] = mlp3(l2, t21_w1, t21_b1, t21_w2, t21_b2,
                        t21_w3, t21_b3).astype(t21_ref.dtype)

    # --- discriminators (last layer: VPU multiply + lane reduce) ---
    def disc(x, w1, b1, w2, b2, w3_row, b3):
        h = jnp.maximum(
            jnp.dot(x, w1[...], preferred_element_type=jnp.float32) + b1[...], 0.0)
        h = jnp.maximum(
            jnp.dot(h, w2[...], preferred_element_type=jnp.float32) + b2[...], 0.0)
        z = jnp.sum(h * w3_row[...], axis=-1, keepdims=True) + b3[...]
        return jax.nn.sigmoid(z)

    p1_ref[...] = disc(l1, d1_w1, d1_b1, d1_w2, d1_b2,
                       d1_w3, d1_b3).astype(p1_ref.dtype)
    p2_ref[...] = disc(l2, d2_w1, d2_b1, d2_w2, d2_b2,
                       d2_w3, d2_b3).astype(p2_ref.dtype)

    # --- decoder feature transforms (comb @ dec_w), emitted as bf16 ---
    inner1_ref[...] = jnp.dot(comb, dec1_w[...],
                              preferred_element_type=jnp.float32
                              ).astype(inner1_ref.dtype)
    inner2_ref[...] = jnp.dot(comb, dec2_w[...],
                              preferred_element_type=jnp.float32
                              ).astype(inner2_ref.dtype)


def latent_stage_forward(lat1, lat2, attc_w, attc_u, trans12, trans21,
                         disc1, disc2, dec1_w, dec2_w, *, tm):
    np_pad, d = lat1.shape
    u_row = attc_u.reshape(1, -1)
    d1_w3r = disc1[4].reshape(1, -1)
    d2_w3r = disc2[4].reshape(1, -1)

    weights = [attc_w, u_row,
               trans12[0], trans12[1], trans12[2], trans12[3], trans12[4], trans12[5],
               trans21[0], trans21[1], trans21[2], trans21[3], trans21[4], trans21[5],
               disc1[0], disc1[1], disc1[2], disc1[3], d1_w3r, disc1[5],
               disc2[0], disc2[1], disc2[2], disc2[3], d2_w3r, disc2[5],
               dec1_w, dec2_w]

    out_shapes = (
        jax.ShapeDtypeStruct((np_pad, d), jnp.float32),                   # comb
        jax.ShapeDtypeStruct((np_pad, trans12[4].shape[1]), jnp.float32), # t12
        jax.ShapeDtypeStruct((np_pad, trans21[4].shape[1]), jnp.float32), # t21
        jax.ShapeDtypeStruct((np_pad, 1), jnp.float32),                   # pred1
        jax.ShapeDtypeStruct((np_pad, 1), jnp.float32),                   # pred2
        jax.ShapeDtypeStruct((np_pad, dec1_w.shape[1]), jnp.bfloat16),    # inner1
        jax.ShapeDtypeStruct((np_pad, dec2_w.shape[1]), jnp.bfloat16),    # inner2
    )

    in_specs = ([pl.BlockSpec((tm, d), lambda i: (i, 0)),
                 pl.BlockSpec((tm, d), lambda i: (i, 0))]
                + [pl.BlockSpec(w.shape, lambda i: (0, 0)) for w in weights])
    out_specs = [pl.BlockSpec((tm, s.shape[1]), lambda i: (i, 0))
                 for s in out_shapes]

    return pl.pallas_call(
        _latent_stage_kernel,
        out_shape=out_shapes,
        grid_spec=pltpu.PrefetchScalarGridSpec(
            num_scalar_prefetch=0,
            grid=(np_pad // tm,),
            in_specs=in_specs,
            out_specs=out_specs),
        compiler_params=pltpu.CompilerParams(
            dimension_semantics=("parallel",)),
    )(lat1, lat2, *weights)


# ---------------------------------------------------------------------------
# Full Encoder_overall forward
# ---------------------------------------------------------------------------
def encoder_overall_forward(params, features_omics1, features_omics2,
                            adj_spatial_omics1, adj_feature_omics1,
                            adj_spatial_omics2, adj_feature_omics2):
    # TODO(synk): torch.spmm takes a sparse adjacency; here the adjacency is
    # dense and multiplied with the tiled MXU matmul kernels (no sparse SpMM).
    n, din1 = features_omics1.shape
    din2 = features_omics2.shape[1]
    d1 = params["enc1_w"].shape[1]
    d2 = params["enc2_w"].shape[1]

    np_pad = _round_up(n, 128)
    tm_adj = _pick_tile(np_pad, max_tile=512, min_tiles=2)   # >=2 parallel tiles
    tk_adj = _pick_tile(np_pad, max_tile=512, min_tiles=1)
    tm_lat = _pick_tile(np_pad, max_tile=512, min_tiles=2)

    bf16 = jnp.bfloat16
    # Pad + bf16-cast the big operands exactly once (halves DMA bytes on the
    # HBM-bandwidth-bound adjacency products); reused by encoders and decoders.
    adj_s1b = _pad2d(adj_spatial_omics1, np_pad, np_pad).astype(bf16)
    adj_f1b = _pad2d(adj_feature_omics1, np_pad, np_pad).astype(bf16)
    adj_s2b = _pad2d(adj_spatial_omics2, np_pad, np_pad).astype(bf16)
    adj_f2b = _pad2d(adj_feature_omics2, np_pad, np_pad).astype(bf16)
    din1_p = _round_up(din1, 128)
    din2_p = _round_up(din2, 128)
    f1b = _pad2d(features_omics1, np_pad, din1_p).astype(bf16)
    f2b = _pad2d(features_omics2, np_pad, din2_p).astype(bf16)
    enc1_wb = _pad2d(params["enc1_w"], din1_p, d1).astype(bf16)
    enc2_wb = _pad2d(params["enc2_w"], din2_p, d2).astype(bf16)

    # Shared feature transform per encoder: h = feat @ W (bf16 out, reused by
    # both adjacency products inside the fused encoder+attention kernel).
    h1 = pallas_matmul(f1b, enc1_wb, tm=tm_adj, tk=din1_p, out_dtype=bf16)
    h2 = pallas_matmul(f2b, enc2_wb, tm=tm_adj, tk=din2_p, out_dtype=bf16)

    # Fused encoder pair + within-modality attention (emb_spatial/emb_feature
    # stay in VMEM; unused alphas are not materialized).
    lat1 = encoder_attention_forward(adj_s1b, adj_f1b, h1,
                                     params["att1_w"], params["att1_u"],
                                     tm=tm_adj, tk=tk_adj)
    lat2 = encoder_attention_forward(adj_s2b, adj_f2b, h2,
                                     params["att2_w"], params["att2_u"],
                                     tm=tm_adj, tk=tk_adj)

    # Fused post-latent stage.
    comb, t12, t21, p1, p2, inner1, inner2 = latent_stage_forward(
        lat1, lat2, params["attc_w"], params["attc_u"],
        params["trans12"], params["trans21"],
        params["disc1"], params["disc2"],
        params["dec1_w"], params["dec2_w"], tm=tm_lat)

    # Decoders: adj_spatial @ (comb @ dec_w); inner products came fused + bf16.
    recon1 = pallas_matmul(adj_s1b, inner1, tm=tm_adj, tk=tk_adj)
    recon2 = pallas_matmul(adj_s2b, inner2, tm=tm_adj, tk=tk_adj)

    return {
        "emb_latent_omics1": lat1[:n],
        "emb_latent_omics2": lat2[:n],
        "emb_latent_translated_omics1_to_omics2": t12[:n],
        "emb_latent_translated_omics2_to_omics1": t21[:n],
        "emb_latent_omics1_discriminator": p1[:n],
        "emb_latent_omics2_discriminator": p2[:n],
        "emb_latent_combined": comb[:n],
        "emb_recon_omics1": recon1[:n],
        "emb_recon_omics2": recon2[:n],
    }


# ---------------------------------------------------------------------------
# Parameters, reference implementation, and test harness
# ---------------------------------------------------------------------------
def init_encoder_overall_params(key, din1, din2, dout1, dout2):
    keys = iter(jax.random.split(key, 40))

    def nrm(shape, scale=0.1):
        return jax.random.normal(next(keys), shape, jnp.float32) * scale

    def mlp_params(din, dout):
        # Weights stored (in, out): transpose of PyTorch nn.Linear's (out, in).
        return (nrm((din, 128)), nrm((1, 128)),
                nrm((128, 64)), nrm((1, 64)),
                nrm((64, dout)), nrm((1, dout)))

    return {
        "enc1_w": nrm((din1, dout1)),
        "enc2_w": nrm((din2, dout2)),
        "dec1_w": nrm((dout1, din1)),
        "dec2_w": nrm((dout2, din2)),
        "att1_w": nrm((dout1, dout1)), "att1_u": nrm((dout1, 1)),
        "att2_w": nrm((dout2, dout2)), "att2_u": nrm((dout2, 1)),
        "attc_w": nrm((dout1, dout2)), "attc_u": nrm((dout2, 1)),
        "trans12": mlp_params(dout1, dout2),
        "trans21": mlp_params(dout2, dout1),
        "disc1": mlp_params(dout1, 1),
        "disc2": mlp_params(dout2, 1),
    }


def _make_adj(key, n):
    a = (jax.random.uniform(key, (n, n)) < 0.05).astype(jnp.float32)
    a = jnp.maximum(a, jnp.eye(n, dtype=jnp.float32))
    deg = jnp.sum(a, axis=1, keepdims=True)
    return a / deg


def _reference_forward(params, f1, f2, adj_s1, adj_f1, adj_s2, adj_f2):
    hp = jax.lax.Precision.HIGHEST

    def mm(a, b):
        return jnp.matmul(a, b, precision=hp)

    def attention(e1, e2, w, u):
        emb = jnp.stack([e1, e2], axis=1)                    # (N, 2, D)
        v = jnp.tanh(mm(emb, w))                             # (N, 2, Do)
        vu = jnp.squeeze(mm(v, u), -1)                       # (N, 2)
        alpha = jax.nn.softmax(vu + 1e-6, axis=-1)
        comb = jnp.einsum("nmd,nm->nd", emb, alpha, precision=hp)
        return comb, alpha

    def mlp(x, pr):
        w1, b1, w2, b2, w3, b3 = pr
        h = jnp.maximum(mm(x, w1) + b1, 0.0)
        h = jnp.maximum(mm(h, w2) + b2, 0.0)
        return mm(h, w3) + b3

    h1 = mm(f1, params["enc1_w"])
    h2 = mm(f2, params["enc2_w"])
    e_sp1, e_ft1 = mm(adj_s1, h1), mm(adj_f1, h1)
    e_sp2, e_ft2 = mm(adj_s2, h2), mm(adj_f2, h2)
    lat1, _ = attention(e_sp1, e_ft1, params["att1_w"], params["att1_u"])
    lat2, _ = attention(e_sp2, e_ft2, params["att2_w"], params["att2_u"])
    t12 = mlp(lat1, params["trans12"])
    t21 = mlp(lat2, params["trans21"])
    p1 = jax.nn.sigmoid(mlp(lat1, params["disc1"]))
    p2 = jax.nn.sigmoid(mlp(lat2, params["disc2"]))
    comb, _ = attention(lat1, lat2, params["attc_w"], params["attc_u"])
    r1 = mm(adj_s1, mm(comb, params["dec1_w"]))
    r2 = mm(adj_s2, mm(comb, params["dec2_w"]))
    return {
        "emb_latent_omics1": lat1,
        "emb_latent_omics2": lat2,
        "emb_latent_translated_omics1_to_omics2": t12,
        "emb_latent_translated_omics2_to_omics1": t21,
        "emb_latent_omics1_discriminator": p1,
        "emb_latent_omics2_discriminator": p2,
        "emb_latent_combined": comb,
        "emb_recon_omics1": r1,
        "emb_recon_omics2": r2,
    }


if __name__ == "__main__":
    key = jax.random.PRNGKey(0)
    k_f1, k_f2, k_a1, k_a2, k_a3, k_a4, k_p = jax.random.split(key, 7)

    n_spot = 200                      # ragged vs. the tile sizes on purpose
    dim_in_omics1, dim_in_omics2 = 100, 130
    dim_out = 64                      # latent dims must match across omics
                                      # (required by the attention concat)

    feats1 = jax.random.normal(k_f1, (n_spot, dim_in_omics1), jnp.float32)
    feats2 = jax.random.normal(k_f2, (n_spot, dim_in_omics2), jnp.float32)
    adj_s1 = _make_adj(k_a1, n_spot)
    adj_f1 = _make_adj(k_a2, n_spot)
    adj_s2 = _make_adj(k_a3, n_spot)
    adj_f2 = _make_adj(k_a4, n_spot)

    params = init_encoder_overall_params(
        k_p, dim_in_omics1, dim_in_omics2, dim_out, dim_out)

    fwd = jax.jit(encoder_overall_forward)
    out = fwd(params, feats1, feats2, adj_s1, adj_f1, adj_s2, adj_f2)
    out = jax.block_until_ready(out)

    ref = _reference_forward(params, feats1, feats2, adj_s1, adj_f1,
                             adj_s2, adj_f2)
    for name, val in out.items():
        r = ref[name]
        assert val.shape == r.shape, (name, val.shape, r.shape)
        err = float(jnp.max(jnp.abs(val.astype(jnp.float32) - r)))
        assert err < 5e-2, (name, err)

    assert out["emb_latent_omics1_discriminator"].shape == (n_spot, 1)
    assert out["emb_recon_omics1"].shape == (n_spot, dim_in_omics1)
    assert out["emb_recon_omics2"].shape == (n_spot, dim_in_omics2)

    print("KERNEL_OK")
</pallas_src>

<mosaic_0001>
module attributes {stable_mosaic.version = 11 : i64} {
  func.func @_matmul_kernel_single(%arg0: i32, %arg1: i32, %arg2: memref<128x256xbf16, #tpu.memory_space<vmem>>, %arg3: memref<256x64xbf16, #tpu.memory_space<vmem>>, %arg4: memref<128x64xbf16, #tpu.memory_space<vmem>>) attributes {dimension_semantics = [#tpu.dimension_semantics<parallel>, #tpu.dimension_semantics<parallel>], iteration_bounds = array<i64: 2, 1>, scalar_prefetch = 0 : i64, scratch_operands = 0 : i64, tpu.core_type = #tpu.core_type<tc>, window_params = [{transform_indices = @transform_0, window_bounds = array<i64: 128, 256>}, {transform_indices = @transform_1, window_bounds = array<i64: 256, 64>}, {transform_indices = @transform_2, window_bounds = array<i64: 128, 64>}]} {
    %c0 = arith.constant 0 : index
    %c0_0 = arith.constant 0 : index
    %0 = vector.load %arg2[%c0, %c0_0] : memref<128x256xbf16, #tpu.memory_space<vmem>>, vector<128x256xbf16>
    %c0_1 = arith.constant 0 : index
    %c0_2 = arith.constant 0 : index
    %1 = vector.load %arg3[%c0_1, %c0_2] : memref<256x64xbf16, #tpu.memory_space<vmem>>, vector<256x64xbf16>
    %cst = arith.constant dense<0.000000e+00> : vector<128x64xf32>
    %2 = tpu.matmul %0, %1, %cst {dimension_numbers = #tpu.dot_dimension_numbers<[1], [0], [0], [1], [0, 0, 1, 1], [], []>} : vector<128x256xbf16>, vector<256x64xbf16>, vector<128x64xf32> -> vector<128x64xf32>
    %3 = arith.truncf %2 : vector<128x64xf32> to vector<128x64xbf16>
    %c0_3 = arith.constant 0 : index
    %c0_4 = arith.constant 0 : index
    %4 = vector.load %arg4[%c0_3, %c0_4] : memref<128x64xbf16, #tpu.memory_space<vmem>>, vector<128x64xbf16>
    tpu.vector_store %arg4[%c0_3, %c0_4], %3 {strides = array<i32>} : memref<128x64xbf16, #tpu.memory_space<vmem>>, vector<128x64xbf16>,
    return
  }
  func.func @transform_0(%arg0: i32, %arg1: i32) -> (i32, i32) {
    %c0_i32 = arith.constant 0 : i32
    %c0_i32_0 = arith.constant 0 : i32
    return %arg0, %c0_i32 : i32, i32
  }
  func.func @transform_1(%arg0: i32, %arg1: i32) -> (i32, i32) {
    %c0_i32 = arith.constant 0 : i32
    %c0_i32_0 = arith.constant 0 : i32
    return %c0_i32, %arg1 : i32, i32
  }
  func.func @transform_2(%arg0: i32, %arg1: i32) -> (i32, i32) {
    %c0_i32 = arith.constant 0 : i32
    return %arg0, %arg1 : i32, i32
  }
}

module attributes {stable_mosaic.version = 11 : i64} {
  func.func @_encoder_attention_kernel(%arg0: i32, %arg1: i32, %arg2: memref<128x256xbf16, #tpu.memory_space<vmem>>, %arg3: memref<128x256xbf16, #tpu.memory_space<vmem>>, %arg4: memref<256x64xbf16, #tpu.memory_space<vmem>>, %arg5: memref<64x64xf32, #tpu.memory_space<vmem>>, %arg6: memref<1x64xf32, #tpu.memory_space<vmem>>, %arg7: memref<128x64xf32, #tpu.memory_space<vmem>>, %arg8: memref<128x64xf32, #tpu.memory_space<vmem>>, %arg9: memref<128x64xf32, #tpu.memory_space<vmem>>) attributes {dimension_semantics = [#tpu.dimension_semantics<parallel>, #tpu.dimension_semantics<arbitrary>], iteration_bounds = array<i64: 2, 1>, scalar_prefetch = 0 : i64, scratch_operands = 2 : i64, tpu.core_type = #tpu.core_type<tc>, window_params = [{transform_indices = @transform_0, window_bounds = array<i64: 128, 256>}, {transform_indices = @transform_1, window_bounds = array<i64: 128, 256>}, {transform_indices = @transform_2, window_bounds = array<i64: 256, 64>}, {pipeline_mode = #tpu.pipeline_mode<synchronous>, transform_indices = @transform_3, window_bounds = array<i64: 64, 64>}, {pipeline_mode = #tpu.pipeline_mode<synchronous>, transform_indices = @transform_4, window_bounds = array<i64: 1, 64>}, {transform_indices = @transform_5, window_bounds = array<i64: 128, 64>}]} {
    %c0_i32 = arith.constant 0 : i32
    %0 = arith.cmpi eq, %arg1, %c0_i32 : i32
    %1 = arith.extui %0 : i1 to i32
    %c0_i32_0 = arith.constant 0 : i32
    %2 = arith.cmpi ne, %1, %c0_i32_0 : i32
    scf.if %2 {
      %cst_17 = arith.constant 0.000000e+00 : f32
      %17 = vector.broadcast %cst_17 : f32 to vector<128x64xf32>
      %c0_18 = arith.constant 0 : index
      %c0_19 = arith.constant 0 : index
      %18 = vector.load %arg8[%c0_18, %c0_19] : memref<128x64xf32, #tpu.memory_space<vmem>>, vector<128x64xf32>
      tpu.vector_store %arg8[%c0_18, %c0_19], %17 {strides = array<i32>} : memref<128x64xf32, #tpu.memory_space<vmem>>, vector<128x64xf32>,
      %cst_20 = arith.constant 0.000000e+00 : f32
      %19 = vector.broadcast %cst_20 : f32 to vector<128x64xf32>
      %c0_21 = arith.constant 0 : index
      %c0_22 = arith.constant 0 : index
      %20 = vector.load %arg9[%c0_21, %c0_22] : memref<128x64xf32, #tpu.memory_space<vmem>>, vector<128x64xf32>
      tpu.vector_store %arg9[%c0_21, %c0_22], %19 {strides = array<i32>} : memref<128x64xf32, #tpu.memory_space<vmem>>, vector<128x64xf32>,
    } else {
    }
    %c0 = arith.constant 0 : index
    %c0_1 = arith.constant 0 : index
    %3 = vector.load %arg4[%c0, %c0_1] : memref<256x64xbf16, #tpu.memory_space<vmem>>, vector<256x64xbf16>
    %c0_2 = arith.constant 0 : index
    %c0_3 = arith.constant 0 : index
    %4 = vector.load %arg8[%c0_2, %c0_3] : memref<128x64xf32, #tpu.memory_space<vmem>>, vector<128x64xf32>
    %c0_4 = arith.constant 0 : index
    %c0_5 = arith.constant 0 : index
    %5 = vector.load %arg2[%c0_4, %c0_5] : memref<128x256xbf16, #tpu.memory_space<vmem>>, vector<128x256xbf16>
    %cst = arith.constant dense<0.000000e+00> : vector<128x64xf32>
    %6 = tpu.matmul %5, %3, %cst {dimension_numbers = #tpu.dot_dimension_numbers<[1], [0], [0], [1], [0, 0, 1, 1], [], []>} : vector<128x256xbf16>, vector<256x64xbf16>, vector<128x64xf32> -> vector<128x64xf32>
    %7 = arith.addf %4, %6 : vector<128x64xf32>
    %c0_6 = arith.constant 0 : index
    %c0_7 = arith.constant 0 : index
    %8 = vector.load %arg8[%c0_6, %c0_7] : memref<128x64xf32, #tpu.memory_space<vmem>>, vector<128x64xf32>
    tpu.vector_store %arg8[%c0_6, %c0_7], %7 {strides = array<i32>} : memref<128x64xf32, #tpu.memory_space<vmem>>, vector<128x64xf32>,
    %c0_8 = arith.constant 0 : index
    %c0_9 = arith.constant 0 : index
    %9 = vector.load %arg9[%c0_8, %c0_9] : memref<128x64xf32, #tpu.memory_space<vmem>>, vector<128x64xf32>
    %c0_10 = arith.constant 0 : index
    %c0_11 = arith.constant 0 : index
    %10 = vector.load %arg3[%c0_10, %c0_11] : memref<128x256xbf16, #tpu.memory_space<vmem>>, vector<128x256xbf16>
    %cst_12 = arith.constant dense<0.000000e+00> : vector<128x64xf32>
    %11 = tpu.matmul %10, %3, %cst_12 {dimension_numbers = #tpu.dot_dimension_numbers<[1], [0], [0], [1], [0, 0, 1, 1], [], []>} : vector<128x256xbf16>, vector<256x64xbf16>, vector<128x64xf32> -> vector<128x64xf32>
    %12 = arith.addf %9, %11 : vector<128x64xf32>
    %c0_13 = arith.constant 0 : index
    %c0_14 = arith.constant 0 : index
    %13 = vector.load %arg9[%c0_13, %c0_14] : memref<128x64xf32, #tpu.memory_space<vmem>>, vector<128x64xf32>
    tpu.vector_store %arg9[%c0_13, %c0_14], %12 {strides = array<i32>} : memref<128x64xf32, #tpu.memory_space<vmem>>, vector<128x64xf32>,
    %c0_i32_15 = arith.constant 0 : i32
    %14 = arith.cmpi eq, %arg1, %c0_i32_15 : i32
    %15 = arith.extui %14 : i1 to i32
    %c0_i32_16 = arith.constant 0 : i32
    %16 = arith.cmpi ne, %15, %c0_i32_16 : i32
    scf.if %16 {
      %c0_17 = arith.constant 0 : index
      %c0_18 = arith.constant 0 : index
      %17 = vector.load %arg8[%c0_17, %c0_18] : memref<128x64xf32, #tpu.memory_space<vmem>>, vector<128x64xf32>
      %c0_19 = arith.constant 0 : index
      %c0_20 = arith.constant 0 : index
      %18 = vector.load %arg9[%c0_19, %c0_20] : memref<128x64xf32, #tpu.memory_space<vmem>>, vector<128x64xf32>
      %c0_21 = arith.constant 0 : index
      %c0_22 = arith.constant 0 : index
      %19 = vector.load %arg5[%c0_21, %c0_22] : memref<64x64xf32, #tpu.memory_space<vmem>>, vector<64x64xf32>
      %c0_23 = arith.constant 0 : index
      %c0_24 = arith.constant 0 : index
      %20 = vector.load %arg6[%c0_23, %c0_24] : memref<1x64xf32, #tpu.memory_space<vmem>>, vector<1x64xf32>
      %cst_25 = arith.constant dense<0.000000e+00> : vector<128x64xf32>
      %21 = tpu.matmul %17, %19, %cst_25 {dimension_numbers = #tpu.dot_dimension_numbers<[1], [0], [0], [1], [0, 0, 1, 1], [], []>} : vector<128x64xf32>, vector<64x64xf32>, vector<128x64xf32> -> vector<128x64xf32>
      %22 = math.tanh %21 : vector<128x64xf32>
      %cst_26 = arith.constant dense<0.000000e+00> : vector<128x64xf32>
      %23 = tpu.matmul %18, %19, %cst_26 {dimension_numbers = #tpu.dot_dimension_numbers<[1], [0], [0], [1], [0, 0, 1, 1], [], []>} : vector<128x64xf32>, vector<64x64xf32>, vector<128x64xf32> -> vector<128x64xf32>
      %24 = math.tanh %23 : vector<128x64xf32>
      %25 = vector.broadcast %20 : vector<1x64xf32> to vector<128x64xf32>
      %26 = arith.mulf %22, %25 : vector<128x64xf32>
      %cst_27 = arith.constant dense<0.000000e+00> : vector<128xf32>
      %27 = vector.multi_reduction <add>, %26, %cst_27 [1] : vector<128x64xf32> to vector<128xf32>
      %28 = vector.shape_cast %27 : vector<128xf32> to vector<128x1xf32>
      %cst_28 = arith.constant 9.99999997E-7 : f32
      %29 = vector.broadcast %cst_28 : f32 to vector<128x1xf32>
      %30 = arith.addf %28, %29 : vector<128x1xf32>
      %31 = vector.broadcast %20 : vector<1x64xf32> to vector<128x64xf32>
      %32 = arith.mulf %24, %31 : vector<128x64xf32>
      %cst_29 = arith.constant dense<0.000000e+00> : vector<128xf32>
      %33 = vector.multi_reduction <add>, %32, %cst_29 [1] : vector<128x64xf32> to vector<128xf32>
      %34 = vector.shape_cast %33 : vector<128xf32> to vector<128x1xf32>
      %cst_30 = arith.constant 9.99999997E-7 : f32
      %35 = vector.broadcast %cst_30 : f32 to vector<128x1xf32>
      %36 = arith.addf %34, %35 : vector<128x1xf32>
      %37 = arith.maximumf %30, %36 : vector<128x1xf32>
      %38 = arith.subf %30, %37 : vector<128x1xf32>
      %39 = math.exp %38 : vector<128x1xf32>
      %40 = arith.subf %36, %37 : vector<128x1xf32>
      %41 = math.exp %40 : vector<128x1xf32>
      %42 = arith.addf %39, %41 : vector<128x1xf32>
      %43 = tpu.reciprocal %42 {approx = true} : vector<128x1xf32> -> vector<128x1xf32>
      %44 = arith.mulf %39, %43 : vector<128x1xf32>
      %45 = vector.broadcast %44 : vector<128x1xf32> to vector<128x64xf32>
      %46 = arith.mulf %45, %17 : vector<128x64xf32>
      %47 = arith.mulf %41, %43 : vector<128x1xf32>
      %48 = vector.broadcast %47 : vector<128x1xf32> to vector<128x64xf32>
      %49 = arith.mulf %48, %18 : vector<128x64xf32>
      %50 = arith.addf %46, %49 : vector<128x64xf32>
      %c0_31 = arith.constant 0 : index
      %c0_32 = arith.constant 0 : index
      %51 = vector.load %arg7[%c0_31, %c0_32] : memref<128x64xf32, #tpu.memory_space<vmem>>, vector<128x64xf32>
      tpu.vector_store %arg7[%c0_31, %c0_32], %50 {strides = array<i32>} : memref<128x64xf32, #tpu.memory_space<vmem>>, vector<128x64xf32>,
    } else {
    }
    return
  }
  func.func @transform_0(%arg0: i32, %arg1: i32) -> (i32, i32) {
    %c0_i32 = arith.constant 0 : i32
    return %arg0, %arg1 : i32, i32
  }
  func.func @transform_1(%arg0: i32, %arg1: i32) -> (i32, i32) {
    %c0_i32 = arith.constant 0 : i32
    return %arg0, %arg1 : i32, i32
  }
  func.func @transform_2(%arg0: i32, %arg1: i32) -> (i32, i32) {
    %c0_i32 = arith.constant 0 : i32
    %c0_i32_0 = arith.constant 0 : i32
    return %arg1, %c0_i32 : i32, i32
  }
  func.func @transform_3(%arg0: i32, %arg1: i32) -> (i32, i32) {
    %c0_i32 = arith.constant 0 : i32
    %c0_i32_0 = arith.constant 0 : i32
    %c0_i32_1 = arith.constant 0 : i32
    return %c0_i32, %c0_i32_0 : i32, i32
  }
  func.func @transform_4(%arg0: i32, %arg1: i32) -> (i32, i32) {
    %c0_i32 = arith.constant 0 : i32
    %c0_i32_0 = arith.constant 0 : i32
    %c0_i32_1 = arith.constant 0 : i32
    return %c0_i32, %c0_i32_0 : i32, i32
  }
  func.func @transform_5(%arg0: i32, %arg1: i32) -> (i32, i32) {
    %c0_i32 = arith.constant 0 : i32
    %c0_i32_0 = arith.constant 0 : i32
    return %arg0, %c0_i32 : i32, i32
  }
}

module attributes {stable_mosaic.version = 11 : i64} {
  func.func @_matmul_kernel_single(%arg0: i32, %arg1: i32, %arg2: memref<128x128xbf16, #tpu.memory_space<vmem>>, %arg3: memref<128x64xbf16, #tpu.memory_space<vmem>>, %arg4: memref<128x64xbf16, #tpu.memory_space<vmem>>) attributes {dimension_semantics = [#tpu.dimension_semantics<parallel>, #tpu.dimension_semantics<parallel>], iteration_bounds = array<i64: 2, 1>, scalar_prefetch = 0 : i64, scratch_operands = 0 : i64, tpu.core_type = #tpu.core_type<tc>, window_params = [{transform_indices = @transform_0, window_bounds = array<i64: 128, 128>}, {transform_indices = @transform_1, window_bounds = array<i64: 128, 64>}, {transform_indices = @transform_2, window_bounds = array<i64: 128, 64>}]} {
    %c0 = arith.constant 0 : index
    %c0_0 = arith.constant 0 : index
    %0 = vector.load %arg2[%c0, %c0_0] : memref<128x128xbf16, #tpu.memory_space<vmem>>, vector<128x128xbf16>
    %c0_1 = arith.constant 0 : index
    %c0_2 = arith.constant 0 : index
    %1 = vector.load %arg3[%c0_1, %c0_2] : memref<128x64xbf16, #tpu.memory_space<vmem>>, vector<128x64xbf16>
    %cst = arith.constant dense<0.000000e+00> : vector<128x64xf32>
    %2 = tpu.matmul %0, %1, %cst {dimension_numbers = #tpu.dot_dimension_numbers<[1], [0], [0], [1], [0, 0, 1, 1], [], []>} : vector<128x128xbf16>, vector<128x64xbf16>, vector<128x64xf32> -> vector<128x64xf32>
    %3 = arith.truncf %2 : vector<128x64xf32> to vector<128x64xbf16>
    %c0_3 = arith.constant 0 : index
    %c0_4 = arith.constant 0 : index
    %4 = vector.load %arg4[%c0_3, %c0_4] : memref<128x64xbf16, #tpu.memory_space<vmem>>, vector<128x64xbf16>
    tpu.vector_store %arg4[%c0_3, %c0_4], %3 {strides = array<i32>} : memref<128x64xbf16, #tpu.memory_space<vmem>>, vector<128x64xbf16>,
    return
  }
  func.func @transform_0(%arg0: i32, %arg1: i32) -> (i32, i32) {
    %c0_i32 = arith.constant 0 : i32
    %c0_i32_0 = arith.constant 0 : i32
    return %arg0, %c0_i32 : i32, i32
  }
  func.func @transform_1(%arg0: i32, %arg1: i32) -> (i32, i32) {
    %c0_i32 = arith.constant 0 : i32
    %c0_i32_0 = arith.constant 0 : i32
    return %c0_i32, %arg1 : i32, i32
  }
  func.func @transform_2(%arg0: i32, %arg1: i32) -> (i32, i32) {
    %c0_i32 = arith.constant 0 : i32
    return %arg0, %arg1 : i32, i32
  }
}

module attributes {stable_mosaic.version = 11 : i64} {
  func.func @_latent_stage_kernel(%arg0: i32, %arg1: memref<128x64xf32, #tpu.memory_space<vmem>>, %arg2: memref<128x64xf32, #tpu.memory_space<vmem>>, %arg3: memref<64x64xf32, #tpu.memory_space<vmem>>, %arg4: memref<1x64xf32, #tpu.memory_space<vmem>>, %arg5: memref<64x128xf32, #tpu.memory_space<vmem>>, %arg6: memref<1x128xf32, #tpu.memory_space<vmem>>, %arg7: memref<128x64xf32, #tpu.memory_space<vmem>>, %arg8: memref<1x64xf32, #tpu.memory_space<vmem>>, %arg9: memref<64x64xf32, #tpu.memory_space<vmem>>, %arg10: memref<1x64xf32, #tpu.memory_space<vmem>>, %arg11: memref<64x128xf32, #tpu.memory_space<vmem>>, %arg12: memref<1x128xf32, #tpu.memory_space<vmem>>, %arg13: memref<128x64xf32, #tpu.memory_space<vmem>>, %arg14: memref<1x64xf32, #tpu.memory_space<vmem>>, %arg15: memref<64x64xf32, #tpu.memory_space<vmem>>, %arg16: memref<1x64xf32, #tpu.memory_space<vmem>>, %arg17: memref<64x128xf32, #tpu.memory_space<vmem>>, %arg18: memref<1x128xf32, #tpu.memory_space<vmem>>, %arg19: memref<128x64xf32, #tpu.memory_space<vmem>>, %arg20: memref<1x64xf32, #tpu.memory_space<vmem>>, %arg21: memref<1x64xf32, #tpu.memory_space<vmem>>, %arg22: memref<1x1xf32, #tpu.memory_space<vmem>>, %arg23: memref<64x128xf32, #tpu.memory_space<vmem>>, %arg24: memref<1x128xf32, #tpu.memory_space<vmem>>, %arg25: memref<128x64xf32, #tpu.memory_space<vmem>>, %arg26: memref<1x64xf32, #tpu.memory_space<vmem>>, %arg27: memref<1x64xf32, #tpu.memory_space<vmem>>, %arg28: memref<1x1xf32, #tpu.memory_space<vmem>>, %arg29: memref<64x100xf32, #tpu.memory_space<vmem>>, %arg30: memref<64x130xf32, #tpu.memory_space<vmem>>, %arg31: memref<128x64xf32, #tpu.memory_space<vmem>>, %arg32: memref<128x64xf32, #tpu.memory_space<vmem>>, %arg33: memref<128x64xf32, #tpu.memory_space<vmem>>, %arg34: memref<128x1xf32, #tpu.memory_space<vmem>>, %arg35: memref<128x1xf32, #tpu.memory_space<vmem>>, %arg36: memref<128x100xbf16, #tpu.memory_space<vmem>>, %arg37: memref<128x130xbf16, #tpu.memory_space<vmem>>) attributes {dimension_semantics = [#tpu.dimension_semantics<parallel>], iteration_bounds = array<i64: 2>, scalar_prefetch = 0 : i64, scratch_operands = 0 : i64, tpu.core_type = #tpu.core_type<tc>, window_params = [{transform_indices = @transform_0, window_bounds = array<i64: 128, 64>}, {transform_indices = @transform_1, window_bounds = array<i64: 128, 64>}, {pipeline_mode = #tpu.pipeline_mode<synchronous>, transform_indices = @transform_2, window_bounds = array<i64: 64, 64>}, {pipeline_mode = #tpu.pipeline_mode<synchronous>, transform_indices = @transform_3, window_bounds = array<i64: 1, 64>}, {pipeline_mode = #tpu.pipeline_mode<synchronous>, transform_indices = @transform_4, window_bounds = array<i64: 64, 128>}, {pipeline_mode = #tpu.pipeline_mode<synchronous>, transform_indices = @transform_5, window_bounds = array<i64: 1, 128>}, {pipeline_mode = #tpu.pipeline_mode<synchronous>, transform_indices = @transform_6, window_bounds = array<i64: 128, 64>}, {pipeline_mode = #tpu.pipeline_mode<synchronous>, transform_indices = @transform_7, window_bounds = array<i64: 1, 64>}, {pipeline_mode = #tpu.pipeline_mode<synchronous>, transform_indices = @transform_8, window_bounds = array<i64: 64, 64>}, {pipeline_mode = #tpu.pipeline_mode<synchronous>, transform_indices = @transform_9, window_bounds = array<i64: 1, 64>}, {pipeline_mode = #tpu.pipeline_mode<synchronous>, transform_indices = @transform_10, window_bounds = array<i64: 64, 128>}, {pipeline_mode = #tpu.pipeline_mode<synchronous>, transform_indices = @transform_11, window_bounds = array<i64: 1, 128>}, {pipeline_mode = #tpu.pipeline_mode<synchronous>, transform_indices = @transform_12, window_bounds = array<i64: 128, 64>}, {pipeline_mode = #tpu.pipeline_mode<synchronous>, transform_indices = @transform_13, window_bounds = array<i64: 1, 64>}, {pipeline_mode = #tpu.pipeline_mode<synchronous>, transform_indices = @transform_14, window_bounds = array<i64: 64, 64>}, {pipeline_mode = #tpu.pipeline_mode<synchronous>, transform_indices = @transform_15, window_bounds = array<i64: 1, 64>}, {pipeline_mode = #tpu.pipeline_mode<synchronous>, transform_indices = @transform_16, window_bounds = array<i64: 64, 128>}, {pipeline_mode = #tpu.pipeline_mode<synchronous>, transform_indices = @transform_17, window_bounds = array<i64: 1, 128>}, {pipeline_mode = #tpu.pipeline_mode<synchronous>, transform_indices = @transform_18, window_bounds = array<i64: 128, 64>}, {pipeline_mode = #tpu.pipeline_mode<synchronous>, transform_indices = @transform_19, window_bounds = array<i64: 1, 64>}, {pipeline_mode = #tpu.pipeline_mode<synchronous>, transform_indices = @transform_20, window_bounds = array<i64: 1, 64>}, {pipeline_mode = #tpu.pipeline_mode<synchronous>, transform_indices = @transform_21, window_bounds = array<i64: 1, 1>}, {pipeline_mode = #tpu.pipeline_mode<synchronous>, transform_indices = @transform_22, window_bounds = array<i64: 64, 128>}, {pipeline_mode = #tpu.pipeline_mode<synchronous>, transform_indices = @transform_23, window_bounds = array<i64: 1, 128>}, {pipeline_mode = #tpu.pipeline_mode<synchronous>, transform_indices = @transform_24, window_bounds = array<i64: 128, 64>}, {pipeline_mode = #tpu.pipeline_mode<synchronous>, transform_indices = @transform_25, window_bounds = array<i64: 1, 64>}, {pipeline_mode = #tpu.pipeline_mode<synchronous>, transform_indices = @transform_26, window_bounds = array<i64: 1, 64>}, {pipeline_mode = #tpu.pipeline_mode<synchronous>, transform_indices = @transform_27, window_bounds = array<i64: 1, 1>}, {pipeline_mode = #tpu.pipeline_mode<synchronous>, transform_indices = @transform_28, window_bounds = array<i64: 64, 100>}, {pipeline_mode = #tpu.pipeline_mode<synchronous>, transform_indices = @transform_29, window_bounds = array<i64: 64, 130>}, {transform_indices = @transform_30, window_bounds = array<i64: 128, 64>}, {transform_indices = @transform_31, window_bounds = array<i64: 128, 64>}, {transform_indices = @transform_32, window_bounds = array<i64: 128, 64>}, {transform_indices = @transform_33, window_bounds = array<i64: 128, 1>}, {transform_indices = @transform_34, window_bounds = array<i64: 128, 1>}, {transform_indices = @transform_35, window_bounds = array<i64: 128, 100>}, {transform_indices = @transform_36, window_bounds = array<i64: 128, 130>}]} {
    %c0 = arith.constant 0 : index
    %c0_0 = arith.constant 0 : index
    %0 = vector.load %arg1[%c0, %c0_0] : memref<128x64xf32, #tpu.memory_space<vmem>>, vector<128x64xf32>
    %c0_1 = arith.constant 0 : index
    %c0_2 = arith.constant 0 : index
    %1 = vector.load %arg2[%c0_1, %c0_2] : memref<128x64xf32, #tpu.memory_space<vmem>>, vector<128x64xf32>
    %c0_3 = arith.constant 0 : index
    %c0_4 = arith.constant 0 : index
    %2 = vector.load %arg3[%c0_3, %c0_4] : memref<64x64xf32, #tpu.memory_space<vmem>>, vector<64x64xf32>
    %c0_5 = arith.constant 0 : index
    %c0_6 = arith.constant 0 : index
    %3 = vector.load %arg4[%c0_5, %c0_6] : memref<1x64xf32, #tpu.memory_space<vmem>>, vector<1x64xf32>
    %cst = arith.constant dense<0.000000e+00> : vector<128x64xf32>
    %4 = tpu.matmul %0, %2, %cst {dimension_numbers = #tpu.dot_dimension_numbers<[1], [0], [0], [1], [0, 0, 1, 1], [], []>} : vector<128x64xf32>, vector<64x64xf32>, vector<128x64xf32> -> vector<128x64xf32>
    %5 = math.tanh %4 : vector<128x64xf32>
    %cst_7 = arith.constant dense<0.000000e+00> : vector<128x64xf32>
    %6 = tpu.matmul %1, %2, %cst_7 {dimension_numbers = #tpu.dot_dimension_numbers<[1], [0], [0], [1], [0, 0, 1, 1], [], []>} : vector<128x64xf32>, vector<64x64xf32>, vector<128x64xf32> -> vector<128x64xf32>
    %7 = math.tanh %6 : vector<128x64xf32>
    %8 = vector.broadcast %3 : vector<1x64xf32> to vector<128x64xf32>
    %9 = arith.mulf %5, %8 : vector<128x64xf32>
    %cst_8 = arith.constant dense<0.000000e+00> : vector<128xf32>
    %10 = vector.multi_reduction <add>, %9, %cst_8 [1] : vector<128x64xf32> to vector<128xf32>
    %11 = vector.shape_cast %10 : vector<128xf32> to vector<128x1xf32>
    %cst_9 = arith.constant 9.99999997E-7 : f32
    %12 = vector.broadcast %cst_9 : f32 to vector<128x1xf32>
    %13 = arith.addf %11, %12 : vector<128x1xf32>
    %14 = vector.broadcast %3 : vector<1x64xf32> to vector<128x64xf32>
    %15 = arith.mulf %7, %14 : vector<128x64xf32>
    %cst_10 = arith.constant dense<0.000000e+00> : vector<128xf32>
    %16 = vector.multi_reduction <add>, %15, %cst_10 [1] : vector<128x64xf32> to vector<128xf32>
    %17 = vector.shape_cast %16 : vector<128xf32> to vector<128x1xf32>
    %cst_11 = arith.constant 9.99999997E-7 : f32
    %18 = vector.broadcast %cst_11 : f32 to vector<128x1xf32>
    %19 = arith.addf %17, %18 : vector<128x1xf32>
    %20 = arith.maximumf %13, %19 : vector<128x1xf32>
    %21 = arith.subf %13, %20 : vector<128x1xf32>
    %22 = math.exp %21 : vector<128x1xf32>
    %23 = arith.subf %19, %20 : vector<128x1xf32>
    %24 = math.exp %23 : vector<128x1xf32>
    %25 = arith.addf %22, %24 : vector<128x1xf32>
    %26 = tpu.reciprocal %25 {approx = true} : vector<128x1xf32> -> vector<128x1xf32>
    %27 = arith.mulf %22, %26 : vector<128x1xf32>
    %28 = vector.broadcast %27 : vector<128x1xf32> to vector<128x64xf32>
    %29 = arith.mulf %28, %0 : vector<128x64xf32>
    %30 = arith.mulf %24, %26 : vector<128x1xf32>
    %31 = vector.broadcast %30 : vector<128x1xf32> to vector<128x64xf32>
    %32 = arith.mulf %31, %1 : vector<128x64xf32>
    %33 = arith.addf %29, %32 : vector<128x64xf32>
    %c0_12 = arith.constant 0 : index
    %c0_13 = arith.constant 0 : index
    %34 = vector.load %arg31[%c0_12, %c0_13] : memref<128x64xf32, #tpu.memory_space<vmem>>, vector<128x64xf32>
    tpu.vector_store %arg31[%c0_12, %c0_13], %33 {strides = array<i32>} : memref<128x64xf32, #tpu.memory_space<vmem>>, vector<128x64xf32>,
    %c0_14 = arith.constant 0 : index
    %c0_15 = arith.constant 0 : index
    %35 = vector.load %arg5[%c0_14, %c0_15] : memref<64x128xf32, #tpu.memory_space<vmem>>, vector<64x128xf32>
    %cst_16 = arith.constant dense<0.000000e+00> : vector<128x128xf32>
    %36 = tpu.matmul %0, %35, %cst_16 {dimension_numbers = #tpu.dot_dimension_numbers<[1], [0], [0], [1], [0, 0, 1, 1], [], []>} : vector<128x64xf32>, vector<64x128xf32>, vector<128x128xf32> -> vector<128x128xf32>
    %c0_17 = arith.constant 0 : index
    %c0_18 = arith.constant 0 : index
    %37 = vector.load %arg6[%c0_17, %c0_18] : memref<1x128xf32, #tpu.memory_space<vmem>>, vector<1x128xf32>
    %38 = vector.broadcast %37 : vector<1x128xf32> to vector<128x128xf32>
    %39 = arith.addf %36, %38 : vector<128x128xf32>
    %cst_19 = arith.constant 0.000000e+00 : f32
    %40 = vector.broadcast %cst_19 : f32 to vector<128x128xf32>
    %41 = arith.maximumf %39, %40 : vector<128x128xf32>
    %c0_20 = arith.constant 0 : index
    %c0_21 = arith.constant 0 : index
    %42 = vector.load %arg7[%c0_20, %c0_21] : memref<128x64xf32, #tpu.memory_space<vmem>>, vector<128x64xf32>
    %cst_22 = arith.constant dense<0.000000e+00> : vector<128x64xf32>
    %43 = tpu.matmul %41, %42, %cst_22 {dimension_numbers = #tpu.dot_dimension_numbers<[1], [0], [0], [1], [0, 0, 1, 1], [], []>} : vector<128x128xf32>, vector<128x64xf32>, vector<128x64xf32> -> vector<128x64xf32>
    %c0_23 = arith.constant 0 : index
    %c0_24 = arith.constant 0 : index
    %44 = vector.load %arg8[%c0_23, %c0_24] : memref<1x64xf32, #tpu.memory_space<vmem>>, vector<1x64xf32>
    %45 = vector.broadcast %44 : vector<1x64xf32> to vector<128x64xf32>
    %46 = arith.addf %43, %45 : vector<128x64xf32>
    %cst_25 = arith.constant 0.000000e+00 : f32
    %47 = vector.broadcast %cst_25 : f32 to vector<128x64xf32>
    %48 = arith.maximumf %46, %47 : vector<128x64xf32>
    %c0_26 = arith.constant 0 : index
    %c0_27 = arith.constant 0 : index
    %49 = vector.load %arg9[%c0_26, %c0_27] : memref<64x64xf32, #tpu.memory_space<vmem>>, vector<64x64xf32>
    %cst_28 = arith.constant dense<0.000000e+00> : vector<128x64xf32>
    %50 = tpu.matmul %48, %49, %cst_28 {dimension_numbers = #tpu.dot_dimension_numbers<[1], [0], [0], [1], [0, 0, 1, 1], [], []>} : vector<128x64xf32>, vector<64x64xf32>, vector<128x64xf32> -> vector<128x64xf32>
    %c0_29 = arith.constant 0 : index
    %c0_30 = arith.constant 0 : index
    %51 = vector.load %arg10[%c0_29, %c0_30] : memref<1x64xf32, #tpu.memory_space<vmem>>, vector<1x64xf32>
    %52 = vector.broadcast %51 : vector<1x64xf32> to vector<128x64xf32>
    %53 = arith.addf %50, %52 : vector<128x64xf32>
    %c0_31 = arith.constant 0 : index
    %c0_32 = arith.constant 0 : index
    %54 = vector.load %arg32[%c0_31, %c0_32] : memref<128x64xf32, #tpu.memory_space<vmem>>, vector<128x64xf32>
    tpu.vector_store %arg32[%c0_31, %c0_32], %53 {strides = array<i32>} : memref<128x64xf32, #tpu.memory_space<vmem>>, vector<128x64xf32>,
    %c0_33 = arith.constant 0 : index
    %c0_34 = arith.constant 0 : index
    %55 = vector.load %arg11[%c0_33, %c0_34] : memref<64x128xf32, #tpu.memory_space<vmem>>, vector<64x128xf32>
    %cst_35 = arith.constant dense<0.000000e+00> : vector<128x128xf32>
    %56 = tpu.matmul %1, %55, %cst_35 {dimension_numbers = #tpu.dot_dimension_numbers<[1], [0], [0], [1], [0, 0, 1, 1], [], []>} : vector<128x64xf32>, vector<64x128xf32>, vector<128x128xf32> -> vector<128x128xf32>
    %c0_36 = arith.constant 0 : index
    %c0_37 = arith.constant 0 : index
    %57 = vector.load %arg12[%c0_36, %c0_37] : memref<1x128xf32, #tpu.memory_space<vmem>>, vector<1x128xf32>
    %58 = vector.broadcast %57 : vector<1x128xf32> to vector<128x128xf32>
    %59 = arith.addf %56, %58 : vector<128x128xf32>
    %cst_38 = arith.constant 0.000000e+00 : f32
    %60 = vector.broadcast %cst_38 : f32 to vector<128x128xf32>
    %61 = arith.maximumf %59, %60 : vector<128x128xf32>
    %c0_39 = arith.constant 0 : index
    %c0_40 = arith.constant 0 : index
    %62 = vector.load %arg13[%c0_39, %c0_40] : memref<128x64xf32, #tpu.memory_space<vmem>>, vector<128x64xf32>
    %cst_41 = arith.constant dense<0.000000e+00> : vector<128x64xf32>
    %63 = tpu.matmul %61, %62, %cst_41 {dimension_numbers = #tpu.dot_dimension_numbers<[1], [0], [0], [1], [0, 0, 1, 1], [], []>} : vector<128x128xf32>, vector<128x64xf32>, vector<128x64xf32> -> vector<128x64xf32>
    %c0_42 = arith.constant 0 : index
    %c0_43 = arith.constant 0 : index
    %64 = vector.load %arg14[%c0_42, %c0_43] : memref<1x64xf32, #tpu.memory_space<vmem>>, vector<1x64xf32>
    %65 = vector.broadcast %64 : vector<1x64xf32> to vector<128x64xf32>
    %66 = arith.addf %63, %65 : vector<128x64xf32>
    %cst_44 = arith.constant 0.000000e+00 : f32
    %67 = vector.broadcast %cst_44 : f32 to vector<128x64xf32>
    %68 = arith.maximumf %66, %67 : vector<128x64xf32>
    %c0_45 = arith.constant 0 : index
    %c0_46 = arith.constant 0 : index
    %69 = vector.load %arg15[%c0_45, %c0_46] : memref<64x64xf32, #tpu.memory_space<vmem>>, vector<64x64xf32>
    %cst_47 = arith.constant dense<0.000000e+00> : vector<128x64xf32>
    %70 = tpu.matmul %68, %69, %cst_47 {dimension_numbers = #tpu.dot_dimension_numbers<[1], [0], [0], [1], [0, 0, 1, 1], [], []>} : vector<128x64xf32>, vector<64x64xf32>, vector<128x64xf32> -> vector<128x64xf32>
    %c0_48 = arith.constant 0 : index
    %c0_49 = arith.constant 0 : index
    %71 = vector.load %arg16[%c0_48, %c0_49] : memref<1x64xf32, #tpu.memory_space<vmem>>, vector<1x64xf32>
    %72 = vector.broadcast %71 : vector<1x64xf32> to vector<128x64xf32>
    %73 = arith.addf %70, %72 : vector<128x64xf32>
    %c0_50 = arith.constant 0 : index
    %c0_51 = arith.constant 0 : index
    %74 = vector.load %arg33[%c0_50, %c0_51] : memref<128x64xf32, #tpu.memory_space<vmem>>, vector<128x64xf32>
    tpu.vector_store %arg33[%c0_50, %c0_51], %73 {strides = array<i32>} : memref<128x64xf32, #tpu.memory_space<vmem>>, vector<128x64xf32>,
    %c0_52 = arith.constant 0 : index
    %c0_53 = arith.constant 0 : index
    %75 = vector.load %arg17[%c0_52, %c0_53] : memref<64x128xf32, #tpu.memory_space<vmem>>, vector<64x128xf32>
    %cst_54 = arith.constant dense<0.000000e+00> : vector<128x128xf32>
    %76 = tpu.matmul %0, %75, %cst_54 {dimension_numbers = #tpu.dot_dimension_numbers<[1], [0], [0], [1], [0, 0, 1, 1], [], []>} : vector<128x64xf32>, vector<64x128xf32>, vector<128x128xf32> -> vector<128x128xf32>
    %c0_55 = arith.constant 0 : index
    %c0_56 = arith.constant 0 : index
    %77 = vector.load %arg18[%c0_55, %c0_56] : memref<1x128xf32, #tpu.memory_space<vmem>>, vector<1x128xf32>
    %78 = vector.broadcast %77 : vector<1x128xf32> to vector<128x128xf32>
    %79 = arith.addf %76, %78 : vector<128x128xf32>
    %cst_57 = arith.constant 0.000000e+00 : f32
    %80 = vector.broadcast %cst_57 : f32 to vector<128x128xf32>
    %81 = arith.maximumf %79, %80 : vector<128x128xf32>
    %c0_58 = arith.constant 0 : index
    %c0_59 = arith.constant 0 : index
    %82 = vector.load %arg19[%c0_58, %c0_59] : memref<128x64xf32, #tpu.memory_space<vmem>>, vector<128x64xf32>
    %cst_60 = arith.constant dense<0.000000e+00> : vector<128x64xf32>
    %83 = tpu.matmul %81, %82, %cst_60 {dimension_numbers = #tpu.dot_dimension_numbers<[1], [0], [0], [1], [0, 0, 1, 1], [], []>} : vector<128x128xf32>, vector<128x64xf32>, vector<128x64xf32> -> vector<128x64xf32>
    %c0_61 = arith.constant 0 : index
    %c0_62 = arith.constant 0 : index
    %84 = vector.load %arg20[%c0_61, %c0_62] : memref<1x64xf32, #tpu.memory_space<vmem>>, vector<1x64xf32>
    %85 = vector.broadcast %84 : vector<1x64xf32> to vector<128x64xf32>
    %86 = arith.addf %83, %85 : vector<128x64xf32>
    %cst_63 = arith.constant 0.000000e+00 : f32
    %87 = vector.broadcast %cst_63 : f32 to vector<128x64xf32>
    %88 = arith.maximumf %86, %87 : vector<128x64xf32>
    %c0_64 = arith.constant 0 : index
    %c0_65 = arith.constant 0 : index
    %89 = vector.load %arg21[%c0_64, %c0_65] : memref<1x64xf32, #tpu.memory_space<vmem>>, vector<1x64xf32>
    %90 = vector.broadcast %89 : vector<1x64xf32> to vector<128x64xf32>
    %91 = arith.mulf %88, %90 : vector<128x64xf32>
    %cst_66 = arith.constant dense<0.000000e+00> : vector<128xf32>
    %92 = vector.multi_reduction <add>, %91, %cst_66 [1] : vector<128x64xf32> to vector<128xf32>
    %93 = vector.shape_cast %92 : vector<128xf32> to vector<128x1xf32>
    %c0_67 = arith.constant 0 : index
    %c0_68 = arith.constant 0 : index
    %94 = vector.load %arg22[%c0_67, %c0_68] : memref<1x1xf32, #tpu.memory_space<vmem>>, vector<1x1xf32>
    %95 = vector.broadcast %94 : vector<1x1xf32> to vector<128x1xf32>
    %96 = arith.addf %93, %95 : vector<128x1xf32>
    %97 = arith.negf %96 : vector<128x1xf32>
    %98 = math.exp %97 : vector<128x1xf32>
    %cst_69 = arith.constant 1.000000e+00 : f32
    %99 = vector.broadcast %cst_69 : f32 to vector<128x1xf32>
    %100 = arith.addf %99, %98 : vector<128x1xf32>
    %101 = arith.divf %99, %100 : vector<128x1xf32>
    %c0_70 = arith.constant 0 : index
    %c0_71 = arith.constant 0 : index
    %102 = vector.load %arg34[%c0_70, %c0_71] : memref<128x1xf32, #tpu.memory_space<vmem>>, vector<128x1xf32>
    tpu.vector_store %arg34[%c0_70, %c0_71], %101 {strides = array<i32>} : memref<128x1xf32, #tpu.memory_space<vmem>>, vector<128x1xf32>,
    %c0_72 = arith.constant 0 : index
    %c0_73 = arith.constant 0 : index
    %103 = vector.load %arg23[%c0_72, %c0_73] : memref<64x128xf32, #tpu.memory_space<vmem>>, vector<64x128xf32>
    %cst_74 = arith.constant dense<0.000000e+00> : vector<128x128xf32>
    %104 = tpu.matmul %1, %103, %cst_74 {dimension_numbers = #tpu.dot_dimension_numbers<[1], [0], [0], [1], [0, 0, 1, 1], [], []>} : vector<128x64xf32>, vector<64x128xf32>, vector<128x128xf32> -> vector<128x128xf32>
    %c0_75 = arith.constant 0 : index
    %c0_76 = arith.constant 0 : index
    %105 = vector.load %arg24[%c0_75, %c0_76] : memref<1x128xf32, #tpu.memory_space<vmem>>, vector<1x128xf32>
    %106 = vector.broadcast %105 : vector<1x128xf32> to vector<128x128xf32>
    %107 = arith.addf %104, %106 : vector<128x128xf32>
    %cst_77 = arith.constant 0.000000e+00 : f32
    %108 = vector.broadcast %cst_77 : f32 to vector<128x128xf32>
    %109 = arith.maximumf %107, %108 : vector<128x128xf32>
    %c0_78 = arith.constant 0 : index
    %c0_79 = arith.constant 0 : index
    %110 = vector.load %arg25[%c0_78, %c0_79] : memref<128x64xf32, #tpu.memory_space<vmem>>, vector<128x64xf32>
    %cst_80 = arith.constant dense<0.000000e+00> : vector<128x64xf32>
    %111 = tpu.matmul %109, %110, %cst_80 {dimension_numbers = #tpu.dot_dimension_numbers<[1], [0], [0], [1], [0, 0, 1, 1], [], []>} : vector<128x128xf32>, vector<128x64xf32>, vector<128x64xf32> -> vector<128x64xf32>
    %c0_81 = arith.constant 0 : index
    %c0_82 = arith.constant 0 : index
    %112 = vector.load %arg26[%c0_81, %c0_82] : memref<1x64xf32, #tpu.memory_space<vmem>>, vector<1x64xf32>
    %113 = vector.broadcast %112 : vector<1x64xf32> to vector<128x64xf32>
    %114 = arith.addf %111, %113 : vector<128x64xf32>
    %cst_83 = arith.constant 0.000000e+00 : f32
    %115 = vector.broadcast %cst_83 : f32 to vector<128x64xf32>
    %116 = arith.maximumf %114, %115 : vector<128x64xf32>
    %c0_84 = arith.constant 0 : index
    %c0_85 = arith.constant 0 : index
    %117 = vector.load %arg27[%c0_84, %c0_85] : memref<1x64xf32, #tpu.memory_space<vmem>>, vector<1x64xf32>
    %118 = vector.broadcast %117 : vector<1x64xf32> to vector<128x64xf32>
    %119 = arith.mulf %116, %118 : vector<128x64xf32>
    %cst_86 = arith.constant dense<0.000000e+00> : vector<128xf32>
    %120 = vector.multi_reduction <add>, %119, %cst_86 [1] : vector<128x64xf32> to vector<128xf32>
    %121 = vector.shape_cast %120 : vector<128xf32> to vector<128x1xf32>
    %c0_87 = arith.constant 0 : index
    %c0_88 = arith.constant 0 : index
    %122 = vector.load %arg28[%c0_87, %c0_88] : memref<1x1xf32, #tpu.memory_space<vmem>>, vector<1x1xf32>
    %123 = vector.broadcast %122 : vector<1x1xf32> to vector<128x1xf32>
    %124 = arith.addf %121, %123 : vector<128x1xf32>
    %125 = arith.negf %124 : vector<128x1xf32>
    %126 = math.exp %125 : vector<128x1xf32>
    %cst_89 = arith.constant 1.000000e+00 : f32
    %127 = vector.broadcast %cst_89 : f32 to vector<128x1xf32>
    %128 = arith.addf %127, %126 : vector<128x1xf32>
    %129 = arith.divf %127, %128 : vector<128x1xf32>
    %c0_90 = arith.constant 0 : index
    %c0_91 = arith.constant 0 : index
    %130 = vector.load %arg35[%c0_90, %c0_91] : memref<128x1xf32, #tpu.memory_space<vmem>>, vector<128x1xf32>
    tpu.vector_store %arg35[%c0_90, %c0_91], %129 {strides = array<i32>} : memref<128x1xf32, #tpu.memory_space<vmem>>, vector<128x1xf32>,
    %c0_92 = arith.constant 0 : index
    %c0_93 = arith.constant 0 : index
    %131 = vector.load %arg29[%c0_92, %c0_93] : memref<64x100xf32, #tpu.memory_space<vmem>>, vector<64x100xf32>
    %cst_94 = arith.constant dense<0.000000e+00> : vector<128x100xf32>
    %132 = tpu.matmul %33, %131, %cst_94 {dimension_numbers = #tpu.dot_dimension_numbers<[1], [0], [0], [1], [0, 0, 1, 1], [], []>} : vector<128x64xf32>, vector<64x100xf32>, vector<128x100xf32> -> vector<128x100xf32>
    %133 = arith.truncf %132 : vector<128x100xf32> to vector<128x100xbf16>
    %c0_95 = arith.constant 0 : index
    %c0_96 = arith.constant 0 : index
    %134 = vector.load %arg36[%c0_95, %c0_96] : memref<128x100xbf16, #tpu.memory_space<vmem>>, vector<128x100xbf16>
    tpu.vector_store %arg36[%c0_95, %c0_96], %133 {strides = array<i32>} : memref<128x100xbf16, #tpu.memory_space<vmem>>, vector<128x100xbf16>,
    %c0_97 = arith.constant 0 : index
    %c0_98 = arith.constant 0 : index
    %135 = vector.load %arg30[%c0_97, %c0_98] : memref<64x130xf32, #tpu.memory_space<vmem>>, vector<64x130xf32>
    %cst_99 = arith.constant dense<0.000000e+00> : vector<128x130xf32>
    %136 = tpu.matmul %33, %135, %cst_99 {dimension_numbers = #tpu.dot_dimension_numbers<[1], [0], [0], [1], [0, 0, 1, 1], [], []>} : vector<128x64xf32>, vector<64x130xf32>, vector<128x130xf32> -> vector<128x130xf32>
    %137 = arith.truncf %136 : vector<128x130xf32> to vector<128x130xbf16>
    %c0_100 = arith.constant 0 : index
    %c0_101 = arith.constant 0 : index
    %138 = vector.load %arg37[%c0_100, %c0_101] : memref<128x130xbf16, #tpu.memory_space<vmem>>, vector<128x130xbf16>
    tpu.vector_store %arg37[%c0_100, %c0_101], %137 {strides = array<i32>} : memref<128x130xbf16, #tpu.memory_space<vmem>>, vector<128x130xbf16>,
    return
  }
  func.func @transform_0(%arg0: i32) -> (i32, i32) {
    %c0_i32 = arith.constant 0 : i32
    %c0_i32_0 = arith.constant 0 : i32
    return %arg0, %c0_i32 : i32, i32
  }
  func.func @transform_1(%arg0: i32) -> (i32, i32) {
    %c0_i32 = arith.constant 0 : i32
    %c0_i32_0 = arith.constant 0 : i32
    return %arg0, %c0_i32 : i32, i32
  }
  func.func @transform_2(%arg0: i32) -> (i32, i32) {
    %c0_i32 = arith.constant 0 : i32
    %c0_i32_0 = arith.constant 0 : i32
    %c0_i32_1 = arith.constant 0 : i32
    return %c0_i32, %c0_i32_0 : i32, i32
  }
  func.func @transform_3(%arg0: i32) -> (i32, i32) {
    %c0_i32 = arith.constant 0 : i32
    %c0_i32_0 = arith.constant 0 : i32
    %c0_i32_1 = arith.constant 0 : i32
    return %c0_i32, %c0_i32_0 : i32, i32
  }
  func.func @transform_4(%arg0: i32) -> (i32, i32) {
    %c0_i32 = arith.constant 0 : i32
    %c0_i32_0 = arith.constant 0 : i32
    %c0_i32_1 = arith.constant 0 : i32
    return %c0_i32, %c0_i32_0 : i32, i32
  }
  func.func @transform_5(%arg0: i32) -> (i32, i32) {
    %c0_i32 = arith.constant 0 : i32
    %c0_i32_0 = arith.constant 0 : i32
    %c0_i32_1 = arith.constant 0 : i32
    return %c0_i32, %c0_i32_0 : i32, i32
  }
  func.func @transform_6(%arg0: i32) -> (i32, i32) {
    %c0_i32 = arith.constant 0 : i32
    %c0_i32_0 = arith.constant 0 : i32
    %c0_i32_1 = arith.constant 0 : i32
    return %c0_i32, %c0_i32_0 : i32, i32
  }
  func.func @transform_7(%arg0: i32) -> (i32, i32) {
    %c0_i32 = arith.constant 0 : i32
    %c0_i32_0 = arith.constant 0 : i32
    %c0_i32_1 = arith.constant 0 : i32
    return %c0_i32, %c0_i32_0 : i32, i32
  }
  func.func @transform_8(%arg0: i32) -> (i32, i32) {
    %c0_i32 = arith.constant 0 : i32
    %c0_i32_0 = arith.constant 0 : i32
    %c0_i32_1 = arith.constant 0 : i32
    return %c0_i32, %c0_i32_0 : i32, i32
  }
  func.func @transform_9(%arg0: i32) -> (i32, i32) {
    %c0_i32 = arith.constant 0 : i32
    %c0_i32_0 = arith.constant 0 : i32
    %c0_i32_1 = arith.constant 0 : i32
    return %c0_i32, %c0_i32_0 : i32, i32
  }
  func.func @transform_10(%arg0: i32) -> (i32, i32) {
    %c0_i32 = arith.constant 0 : i32
    %c0_i32_0 = arith.constant 0 : i32
    %c0_i32_1 = arith.constant 0 : i32
    return %c0_i32, %c0_i32_0 : i32, i32
  }
  func.func @transform_11(%arg0: i32) -> (i32, i32) {
    %c0_i32 = arith.constant 0 : i32
    %c0_i32_0 = arith.constant 0 : i32
    %c0_i32_1 = arith.constant 0 : i32
    return %c0_i32, %c0_i32_0 : i32, i32
  }
  func.func @transform_12(%arg0: i32) -> (i32, i32) {
    %c0_i32 = arith.constant 0 : i32
    %c0_i32_0 = arith.constant 0 : i32
    %c0_i32_1 = arith.constant 0 : i32
    return %c0_i32, %c0_i32_0 : i32, i32
  }
  func.func @transform_13(%arg0: i32) -> (i32, i32) {
    %c0_i32 = arith.constant 0 : i32
    %c0_i32_0 = arith.constant 0 : i32
    %c0_i32_1 = arith.constant 0 : i32
    return %c0_i32, %c0_i32_0 : i32, i32
  }
  func.func @transform_14(%arg0: i32) -> (i32, i32) {
    %c0_i32 = arith.constant 0 : i32
    %c0_i32_0 = arith.constant 0 : i32
    %c0_i32_1 = arith.constant 0 : i32
    return %c0_i32, %c0_i32_0 : i32, i32
  }
  func.func @transform_15(%arg0: i32) -> (i32, i32) {
    %c0_i32 = arith.constant 0 : i32
    %c0_i32_0 = arith.constant 0 : i32
    %c0_i32_1 = arith.constant 0 : i32
    return %c0_i32, %c0_i32_0 : i32, i32
  }
  func.func @transform_16(%arg0: i32) -> (i32, i32) {
    %c0_i32 = arith.constant 0 : i32
    %c0_i32_0 = arith.constant 0 : i32
    %c0_i32_1 = arith.constant 0 : i32
    return %c0_i32, %c0_i32_0 : i32, i32
  }
  func.func @transform_17(%arg0: i32) -> (i32, i32) {
    %c0_i32 = arith.constant 0 : i32
    %c0_i32_0 = arith.constant 0 : i32
    %c0_i32_1 = arith.constant 0 : i32
    return %c0_i32, %c0_i32_0 : i32, i32
  }
  func.func @transform_18(%arg0: i32) -> (i32, i32) {
    %c0_i32 = arith.constant 0 : i32
    %c0_i32_0 = arith.constant 0 : i32
    %c0_i32_1 = arith.constant 0 : i32
    return %c0_i32, %c0_i32_0 : i32, i32
  }
  func.func @transform_19(%arg0: i32) -> (i32, i32) {
    %c0_i32 = arith.constant 0 : i32
    %c0_i32_0 = arith.constant 0 : i32
    %c0_i32_1 = arith.constant 0 : i32
    return %c0_i32, %c0_i32_0 : i32, i32
  }
  func.func @transform_20(%arg0: i32) -> (i32, i32) {
    %c0_i32 = arith.constant 0 : i32
    %c0_i32_0 = arith.constant 0 : i32
    %c0_i32_1 = arith.constant 0 : i32
    return %c0_i32, %c0_i32_0 : i32, i32
  }
  func.func @transform_21(%arg0: i32) -> (i32, i32) {
    %c0_i32 = arith.constant 0 : i32
    %c0_i32_0 = arith.constant 0 : i32
    %c0_i32_1 = arith.constant 0 : i32
    return %c0_i32, %c0_i32_0 : i32, i32
  }
  func.func @transform_22(%arg0: i32) -> (i32, i32) {
    %c0_i32 = arith.constant 0 : i32
    %c0_i32_0 = arith.constant 0 : i32
    %c0_i32_1 = arith.constant 0 : i32
    return %c0_i32, %c0_i32_0 : i32, i32
  }
  func.func @transform_23(%arg0: i32) -> (i32, i32) {
    %c0_i32 = arith.constant 0 : i32
    %c0_i32_0 = arith.constant 0 : i32
    %c0_i32_1 = arith.constant 0 : i32
    return %c0_i32, %c0_i32_0 : i32, i32
  }
  func.func @transform_24(%arg0: i32) -> (i32, i32) {
    %c0_i32 = arith.constant 0 : i32
    %c0_i32_0 = arith.constant 0 : i32
    %c0_i32_1 = arith.constant 0 : i32
    return %c0_i32, %c0_i32_0 : i32, i32
  }
  func.func @transform_25(%arg0: i32) -> (i32, i32) {
    %c0_i32 = arith.constant 0 : i32
    %c0_i32_0 = arith.constant 0 : i32
    %c0_i32_1 = arith.constant 0 : i32
    return %c0_i32, %c0_i32_0 : i32, i32
  }
  func.func @transform_26(%arg0: i32) -> (i32, i32) {
    %c0_i32 = arith.constant 0 : i32
    %c0_i32_0 = arith.constant 0 : i32
    %c0_i32_1 = arith.constant 0 : i32
    return %c0_i32, %c0_i32_0 : i32, i32
  }
  func.func @transform_27(%arg0: i32) -> (i32, i32) {
    %c0_i32 = arith.constant 0 : i32
    %c0_i32_0 = arith.constant 0 : i32
    %c0_i32_1 = arith.constant 0 : i32
    return %c0_i32, %c0_i32_0 : i32, i32
  }
  func.func @transform_28(%arg0: i32) -> (i32, i32) {
    %c0_i32 = arith.constant 0 : i32
    %c0_i32_0 = arith.constant 0 : i32
    %c0_i32_1 = arith.constant 0 : i32
    return %c0_i32, %c0_i32_0 : i32, i32
  }
  func.func @transform_29(%arg0: i32) -> (i32, i32) {
    %c0_i32 = arith.constant 0 : i32
    %c0_i32_0 = arith.constant 0 : i32
    %c0_i32_1 = arith.constant 0 : i32
    return %c0_i32, %c0_i32_0 : i32, i32
  }
  func.func @transform_30(%arg0: i32) -> (i32, i32) {
    %c0_i32 = arith.constant 0 : i32
    %c0_i32_0 = arith.constant 0 : i32
    return %arg0, %c0_i32 : i32, i32
  }
  func.func @transform_31(%arg0: i32) -> (i32, i32) {
    %c0_i32 = arith.constant 0 : i32
    %c0_i32_0 = arith.constant 0 : i32
    return %arg0, %c0_i32 : i32, i32
  }
  func.func @transform_32(%arg0: i32) -> (i32, i32) {
    %c0_i32 = arith.constant 0 : i32
    %c0_i32_0 = arith.constant 0 : i32
    return %arg0, %c0_i32 : i32, i32
  }
  func.func @transform_33(%arg0: i32) -> (i32, i32) {
    %c0_i32 = arith.constant 0 : i32
    %c0_i32_0 = arith.constant 0 : i32
    return %arg0, %c0_i32 : i32, i32
  }
  func.func @transform_34(%arg0: i32) -> (i32, i32) {
    %c0_i32 = arith.constant 0 : i32
    %c0_i32_0 = arith.constant 0 : i32
    return %arg0, %c0_i32 : i32, i32
  }
  func.func @transform_35(%arg0: i32) -> (i32, i32) {
    %c0_i32 = arith.constant 0 : i32
    %c0_i32_0 = arith.constant 0 : i32
    return %arg0, %c0_i32 : i32, i32
  }
  func.func @transform_36(%arg0: i32) -> (i32, i32) {
    %c0_i32 = arith.constant 0 : i32
    %c0_i32_0 = arith.constant 0 : i32
    return %arg0, %c0_i32 : i32, i32
  }
}

module attributes {stable_mosaic.version = 11 : i64} {
  func.func @_matmul_kernel_single(%arg0: i32, %arg1: i32, %arg2: memref<128x256xbf16, #tpu.memory_space<vmem>>, %arg3: memref<256x130xbf16, #tpu.memory_space<vmem>>, %arg4: memref<128x130xf32, #tpu.memory_space<vmem>>) attributes {dimension_semantics = [#tpu.dimension_semantics<parallel>, #tpu.dimension_semantics<parallel>], iteration_bounds = array<i64: 2, 1>, scalar_prefetch = 0 : i64, scratch_operands = 0 : i64, tpu.core_type = #tpu.core_type<tc>, window_params = [{transform_indices = @transform_0, window_bounds = array<i64: 128, 256>}, {transform_indices = @transform_1, window_bounds = array<i64: 256, 130>}, {transform_indices = @transform_2, window_bounds = array<i64: 128, 130>}]} {
    %c0 = arith.constant 0 : index
    %c0_0 = arith.constant 0 : index
    %0 = vector.load %arg2[%c0, %c0_0] : memref<128x256xbf16, #tpu.memory_space<vmem>>, vector<128x256xbf16>
    %c0_1 = arith.constant 0 : index
    %c0_2 = arith.constant 0 : index
    %1 = vector.load %arg3[%c0_1, %c0_2] : memref<256x130xbf16, #tpu.memory_space<vmem>>, vector<256x130xbf16>
    %cst = arith.constant dense<0.000000e+00> : vector<128x130xf32>
    %2 = tpu.matmul %0, %1, %cst {dimension_numbers = #tpu.dot_dimension_numbers<[1], [0], [0], [1], [0, 0, 1, 1], [], []>} : vector<128x256xbf16>, vector<256x130xbf16>, vector<128x130xf32> -> vector<128x130xf32>
    %c0_3 = arith.constant 0 : index
    %c0_4 = arith.constant 0 : index
    %3 = vector.load %arg4[%c0_3, %c0_4] : memref<128x130xf32, #tpu.memory_space<vmem>>, vector<128x130xf32>
    tpu.vector_store %arg4[%c0_3, %c0_4], %2 {strides = array<i32>} : memref<128x130xf32, #tpu.memory_space<vmem>>, vector<128x130xf32>,
    return
  }
  func.func @transform_0(%arg0: i32, %arg1: i32) -> (i32, i32) {
    %c0_i32 = arith.constant 0 : i32
    %c0_i32_0 = arith.constant 0 : i32
    return %arg0, %c0_i32 : i32, i32
  }
  func.func @transform_1(%arg0: i32, %arg1: i32) -> (i32, i32) {
    %c0_i32 = arith.constant 0 : i32
    %c0_i32_0 = arith.constant 0 : i32
    return %c0_i32, %arg1 : i32, i32
  }
  func.func @transform_2(%arg0: i32, %arg1: i32) -> (i32, i32) {
    %c0_i32 = arith.constant 0 : i32
    return %arg0, %arg1 : i32, i32
  }
}

module attributes {stable_mosaic.version = 11 : i64} {
  func.func @_matmul_kernel_single(%arg0: i32, %arg1: i32, %arg2: memref<128x256xbf16, #tpu.memory_space<vmem>>, %arg3: memref<256x100xbf16, #tpu.memory_space<vmem>>, %arg4: memref<128x100xf32, #tpu.memory_space<vmem>>) attributes {dimension_semantics = [#tpu.dimension_semantics<parallel>, #tpu.dimension_semantics<parallel>], iteration_bounds = array<i64: 2, 1>, scalar_prefetch = 0 : i64, scratch_operands = 0 : i64, tpu.core_type = #tpu.core_type<tc>, window_params = [{transform_indices = @transform_0, window_bounds = array<i64: 128, 256>}, {transform_indices = @transform_1, window_bounds = array<i64: 256, 100>}, {transform_indices = @transform_2, window_bounds = array<i64: 128, 100>}]} {
    %c0 = arith.constant 0 : index
    %c0_0 = arith.constant 0 : index
    %0 = vector.load %arg2[%c0, %c0_0] : memref<128x256xbf16, #tpu.memory_space<vmem>>, vector<128x256xbf16>
    %c0_1 = arith.constant 0 : index
    %c0_2 = arith.constant 0 : index
    %1 = vector.load %arg3[%c0_1, %c0_2] : memref<256x100xbf16, #tpu.memory_space<vmem>>, vector<256x100xbf16>
    %cst = arith.constant dense<0.000000e+00> : vector<128x100xf32>
    %2 = tpu.matmul %0, %1, %cst {dimension_numbers = #tpu.dot_dimension_numbers<[1], [0], [0], [1], [0, 0, 1, 1], [], []>} : vector<128x256xbf16>, vector<256x100xbf16>, vector<128x100xf32> -> vector<128x100xf32>
    %c0_3 = arith.constant 0 : index
    %c0_4 = arith.constant 0 : index
    %3 = vector.load %arg4[%c0_3, %c0_4] : memref<128x100xf32, #tpu.memory_space<vmem>>, vector<128x100xf32>
    tpu.vector_store %arg4[%c0_3, %c0_4], %2 {strides = array<i32>} : memref<128x100xf32, #tpu.memory_space<vmem>>, vector<128x100xf32>,
    return
  }
  func.func @transform_0(%arg0: i32, %arg1: i32) -> (i32, i32) {
    %c0_i32 = arith.constant 0 : i32
    %c0_i32_0 = arith.constant 0 : i32
    return %arg0, %c0_i32 : i32, i32
  }
  func.func @transform_1(%arg0: i32, %arg1: i32) -> (i32, i32) {
    %c0_i32 = arith.constant 0 : i32
    %c0_i32_0 = arith.constant 0 : i32
    return %c0_i32, %arg1 : i32, i32
  }
  func.func @transform_2(%arg0: i32, %arg1: i32) -> (i32, i32) {
    %c0_i32 = arith.constant 0 : i32
    return %arg0, %arg1 : i32, i32
  }
}

</mosaic_0001>

<bundles_post_ra>
// kernel: encoder_overall_forward.7
= control target key start
LH: loop header
LB: loop body
LE: loop exit
PB: predicated region body
PF: predicated region fallthrough
CT: control target
= control target key end

     0   :  { %s784_s9 = smov 0   ;;  %s786_s10 = smov 0   ;;  %s892_s0 = inlined_call_operand.vmem [shape: bf16[256,128], index: 0, kind: input, shape index: {}]   ;;  %s893_s1 = inlined_call_operand.vmem [shape: bf16[128,64], index: 1, kind: input, shape index: {}]   ;;  %s894_s2 = inlined_call_operand.vmem [shape: bf16[256,64], index: 2, kind: output, shape index: {}]  }
   0x1   :  { %s788_s11 = smov 0  }
   0x2 LB: > { %s24_s12 = sadd.s32 1, %s763_s10  ;;  %p586_p0 = scmp.ge.s32.totalorder %s767_s11, 1  ;;  %s767_s11 = sphi %s788_s11, %s12_s11   ;;  %s763_s10 = sphi %s786_s10, %s896_s10   ;;  %s759_s9 = sphi %s784_s9, %s895_s9  }
   0x3   : > { %p26_p1 = scmp.ge.s32.totalorder %s24_s12, 2  ;;  %p136_p2 = scmp.lt.s32.totalorder %s767_s11, 3 }
   0x5   : > { %s898_s12 = smov (%p26_p1, %s24_s12), 0  ;;  %p137_p3 = pnand %p586_p0, %p136_p2 }
   0x6   : > { %v729_v0 = vld [vmem:[%s893_s1] sm:$0xff] (!%p137_p3)   ;;  %s587_s15 = sshll.u32 (!%p137_p3), %s759_s9, 4  ;;  %v730_v1 = vld [vmem:[%s893_s1 + $0x8] sm:$0xff] (!%p137_p3)   ;;  %v731_v2 = vld [vmem:[%s893_s1 + $0x10] sm:$0xff] (!%p137_p3)   ;;  %vm474_vm0 = vcmask (!%p137_p3), 519168  }
   0x7   : > { %140 = sbr.rel (%p137_p3) target bundleno = 265 (0x109), region = 28  ;;  %p166_p4 = scmp.lt.s32.totalorder (!%p137_p3), %s587_s15, 31  ;;  %657 = vmatprep.subr.bf16.mxu0 (!%p137_p3), %v729_v0  ;;  %689 = vmatprep.subr.bf16.mxu1 (!%p137_p3), %v729_v0  ;;  %v732_v3 = vld [vmem:[%s893_s1 + $0x18] sm:$0xff] (!%p137_p3)   ;;  %v733_v6 = vld [vmem:[%s893_s1 + $0x20] sm:$0xff] (!%p137_p3)   ;;  %v734_v7 = vld [vmem:[%s893_s1 + $0x28] sm:$0xff] (!%p137_p3)  }
   0x8   : > { %658 = vmatpush3.bf16.msra.mxu0 (!%p137_p3), %v729_v0  ;;  %697 = vmatpush3.bf16.msra.mxu1 (!%p137_p3), %v729_v0  ;;  %v735_v8 = vld [vmem:[%s893_s1 + $0x30] sm:$0xff] (!%p137_p3)   ;;  %v736_v9 = vld [vmem:[%s893_s1 + $0x38] sm:$0xff] (!%p137_p3)  }
   0x9   : > { %659 = vmatprep.subr.bf16.mxu0 (!%p137_p3), %v730_v1  ;;  %690 = vmatprep.subr.bf16.mxu1 (!%p137_p3), %v730_v1 }
   0xc   : > { %660 = vmatpush3.bf16.msra.mxu0 (!%p137_p3), %v730_v1  ;;  %698 = vmatpush3.bf16.msra.mxu1 (!%p137_p3), %v730_v1 }
   0xd   : > { %661 = vmatprep.subr.bf16.mxu0 (!%p137_p3), %v731_v2  ;;  %691 = vmatprep.subr.bf16.mxu1 (!%p137_p3), %v731_v2 }
   0xe   : > { %s900_s15 = smov (!%p166_p4, %s587_s15), 31 }
   0xf   : > { %s588_s20 = sshll.u32 %s900_s15, 2 }
  0x10   : > { %s819_s23 = scalar_lea.vmem %s892_s0, %s588_s20  ;;  %662 = vmatpush3.bf16.msra.mxu0 %v731_v2  ;;  %699 = vmatpush3.bf16.msra.mxu1 %v731_v2  ;;  %s849_s8 = scalar_lea.vmem %s894_s2, %s588_s20 }
  0x11   : > { %v737_v4 = vld [vmem:[%s819_s23] sm:$0xff]   ;;  %663 = vmatprep.subr.bf16.mxu0 %v732_v3  ;;  %692 = vmatprep.subr.bf16.mxu1 %v732_v3  ;;  %v739_v10 = vld [vmem:[%s819_s23 + $0x8] sm:$0xff]   ;;  %v741_v12 = vld [vmem:[%s819_s23 + $0x10] sm:$0xff]  }
  0x12   : > { %v738_v5 = vld [vmem:[%s819_s23 + $0x20] sm:$0xff]   ;;  %673 = vmatprep.mubr.bf16.mxu0 %v737_v4  ;;  %v740_v11 = vld [vmem:[%s819_s23 + $0x28] sm:$0xff]   ;;  %v742_v13 = vld [vmem:[%s819_s23 + $0x30] sm:$0xff]  }
  0x13   : > { %681 = vmatprep.mubr.bf16.mxu1 %v738_v5  ;;  %v743_v14 = vld [vmem:[%s819_s23 + $0x18] sm:$0xff]  }
  0x14   : > { %664 = vmatpush3.bf16.msra.mxu0 %v732_v3  ;;  %700 = vmatpush3.bf16.msra.mxu1 %v732_v3  ;;  %v744_v15 = vld [vmem:[%s819_s23 + $0x38] sm:$0xff]  }
  0x15   : > { %665 = vmatprep.subr.bf16.mxu0 %v733_v6  ;;  %693 = vmatprep.subr.bf16.mxu1 %v733_v6 }
  0x18   : > { %666 = vmatpush3.bf16.msra.mxu0 %v733_v6  ;;  %701 = vmatpush3.bf16.msra.mxu1 %v733_v6 }
  0x19   : > { %667 = vmatprep.subr.bf16.mxu0 %v734_v7  ;;  %694 = vmatprep.subr.bf16.mxu1 %v734_v7 }
  0x1c   : > { %668 = vmatpush3.bf16.msra.mxu0 %v734_v7  ;;  %702 = vmatpush3.bf16.msra.mxu1 %v734_v7 }
  0x1d   : > { %669 = vmatprep.subr.bf16.mxu0 %v735_v8  ;;  %695 = vmatprep.subr.bf16.mxu1 %v735_v8 }
  0x20   : > { %670 = vmatpush3.bf16.msra.mxu0 %v735_v8  ;;  %703 = vmatpush3.bf16.msra.mxu1 %v735_v8 }
  0x21   : > { %671 = vmatprep.subr.bf16.mxu0 %v736_v9  ;;  %696 = vmatprep.subr.bf16.mxu1 %v736_v9 }
  0x24   : > { %672 = vmatpush3.bf16.msra.mxu0 %v736_v9  ;;  %704 = vmatpush3.bf16.msra.mxu1 %v736_v9 }
  0x27   : > { %674 = vmatmul.mubr.bf16.vlgmr.msra.gmra.mrb[0].mxu0 %v739_v10  ;;  %682 = vmatmul.mubr.bf16.vlgmr.msra.gmra.mrb[0].mxu1 %v740_v11 }
  0x28   : > { %677 = vmatprep.mubr.bf16.mxu0 %v741_v12  ;;  %685 = vmatprep.mubr.bf16.mxu1 %v742_v13 }
  0x2f   : > { %678 = vmatmul.mubr.bf16.gmra.mrb[4].mxu0 %v743_v14  ;;  %686 = vmatmul.mubr.bf16.gmra.mrb[4].mxu1 %v744_v15 }
  0xfa   : > { %v675_v16 = vpop.f32.mrb[0].mxu0  ;;  %v683_v17 = vpop.f32.mrb[0].mxu1 }
  0xfb   : > { %v627_v18 = vpack.c.bf16 %v675_v16, %v675_v16  ;;  %v635_v19 = vpack.c.bf16 %v683_v17, %v683_v17  ;;  %v347_v20 = vpop.f32.mrb[1].mxu0  ;;  %v379_v21 = vpop.f32.mrb[1].mxu1 }
  0xfc   : > { %v625_v22 = vpack.c.bf16 %v347_v20, %v347_v20  ;;  %v633_v23 = vpack.c.bf16 %v379_v21, %v379_v21  ;;  %v676_v24 = vpop.f32.mrb[2].mxu0  ;;  %v684_v25 = vpop.f32.mrb[2].mxu1 }
  0xfd   : > { %477 = vst.msk [vmem:[%s849_s8 + $0x8] sm:$0xf] %vm474_vm0, %v627_v18  ;;  %485 = vst.msk [vmem:[%s849_s8 + $0x28] sm:$0xf] %vm474_vm0, %v635_v19  ;;  %v628_v26 = vpack.c.bf16 %v676_v24, %v676_v24  ;;  %v636_v27 = vpack.c.bf16 %v684_v25, %v684_v25  ;;  %v350_v28 = vpop.f32.mrb[3].mxu0  ;;  %v382_v29 = vpop.f32.mrb[3].mxu1 }
  0xfe   : > { %475 = vst.msk [vmem:[%s849_s8] sm:$0xf] %vm474_vm0, %v625_v22  ;;  %483 = vst.msk [vmem:[%s849_s8 + $0x20] sm:$0xf] %vm474_vm0, %v633_v23  ;;  %v626_v30 = vpack.c.bf16 %v350_v28, %v350_v28  ;;  %v634_v31 = vpack.c.bf16 %v382_v29, %v382_v29 }
  0xff   : > { %478 = vst.msk [vmem:[%s849_s8 + $0xc] sm:$0xf] %vm474_vm0, %v628_v26  ;;  %486 = vst.msk [vmem:[%s849_s8 + $0x2c] sm:$0xf] %vm474_vm0, %v636_v27 }
 0x100   : > { %476 = vst.msk [vmem:[%s849_s8 + $0x4] sm:$0xf] %vm474_vm0, %v626_v30  ;;  %484 = vst.msk [vmem:[%s849_s8 + $0x24] sm:$0xf] %vm474_vm0, %v634_v31 }
 0x102   : > { %v679_v32 = vpop.f32.mrb[4].mxu0  ;;  %v687_v33 = vpop.f32.mrb[4].mxu1 }
 0x103   : > { %v631_v34 = vpack.c.bf16 %v679_v32, %v679_v32  ;;  %v639_v35 = vpack.c.bf16 %v687_v33, %v687_v33  ;;  %v363_v36 = vpop.f32.mrb[5].mxu0  ;;  %v395_v37 = vpop.f32.mrb[5].mxu1 }
 0x104   : > { %v629_v38 = vpack.c.bf16 %v363_v36, %v363_v36  ;;  %v637_v39 = vpack.c.bf16 %v395_v37, %v395_v37  ;;  %v680_v40 = vpop.f32.mrb[6].mxu0  ;;  %v688_v41 = vpop.f32.mrb[6].mxu1 }
 0x105   : > { %481 = vst.msk [vmem:[%s849_s8 + $0x18] sm:$0xf] %vm474_vm0, %v631_v34  ;;  %489 = vst.msk [vmem:[%s849_s8 + $0x38] sm:$0xf] %vm474_vm0, %v639_v35  ;;  %v632_v42 = vpack.c.bf16 %v680_v40, %v680_v40  ;;  %v640_v43 = vpack.c.bf16 %v688_v41, %v688_v41  ;;  %v366_v44 = vpop.f32.mrb[7].mxu0  ;;  %v398_v45 = vpop.f32.mrb[7].mxu1 }
 0x106   : > { %479 = vst.msk [vmem:[%s849_s8 + $0x10] sm:$0xf] %vm474_vm0, %v629_v38  ;;  %487 = vst.msk [vmem:[%s849_s8 + $0x30] sm:$0xf] %vm474_vm0, %v637_v39  ;;  %v630_v46 = vpack.c.bf16 %v366_v44, %v366_v44  ;;  %v638_v47 = vpack.c.bf16 %v398_v45, %v398_v45 }
 0x107   : > { %482 = vst.msk [vmem:[%s849_s8 + $0x1c] sm:$0xf] %vm474_vm0, %v632_v42  ;;  %490 = vst.msk [vmem:[%s849_s8 + $0x3c] sm:$0xf] %vm474_vm0, %v640_v43 }
 0x108   : > { %480 = vst.msk [vmem:[%s849_s8 + $0x14] sm:$0xf] %vm474_vm0, %v630_v46  ;;  %488 = vst.msk [vmem:[%s849_s8 + $0x34] sm:$0xf] %vm474_vm0, %v638_v47 }
 0x109 PF: > { %s12_s11 = sadd.s32 1, %s767_s11   ;;  %s895_s9 = smov %s763_s10 }
 0x10a   : > { %p9_p5 = scmp.ge.s32.totalorder %s12_s11, 4   ;;  %s896_s10 = smov %s898_s12 }
 0x10c   :  { %11 = sbr.rel (!%p9_p5) target bundleno = 2 (0x2), region = 61 }

// kernel: encoder_overall_forward.8
= control target key start
LH: loop header
LB: loop body
LE: loop exit
PB: predicated region body
PF: predicated region fallthrough
CT: control target
= control target key end

     0   :  { %s941_s9 = smov 0   ;;  %s943_s10 = smov 0   ;;  %s1078_s0 = inlined_call_operand.vmem [shape: bf16[256,256], index: 0, kind: input, shape index: {}]   ;;  %s1079_s1 = inlined_call_operand.vmem [shape: bf16[256,64], index: 1, kind: input, shape index: {}]   ;;  %s1080_s2 = inlined_call_operand.vmem [shape: bf16[256,64], index: 2, kind: output, shape index: {}]  }
   0x1   :  { %s945_s11 = smov 0  }
   0x2 LB: > { %s24_s12 = sadd.s32 1, %s920_s10  ;;  %p685_p0 = scmp.ge.s32.totalorder %s924_s11, 1  ;;  %s924_s11 = sphi %s945_s11, %s12_s11   ;;  %s920_s10 = sphi %s943_s10, %s1082_s10   ;;  %s916_s9 = sphi %s941_s9, %s1081_s9  }
   0x3   : > { %p26_p1 = scmp.ge.s32.totalorder %s24_s12, 2  ;;  %p137_p2 = scmp.lt.s32.totalorder %s924_s11, 3 }
   0x5   : > { %s1084_s12 = smov (%p26_p1, %s24_s12), 0  ;;  %p138_p3 = pnand %p685_p0, %p137_p2 }
   0x6   : > { %v862_v0 = vld [vmem:[%s1079_s1 + $0x40] sm:$0xff] (!%p138_p3)   ;;  %s686_s15 = sshll.u32 (!%p138_p3), %s916_s9, 4  ;;  %v864_v2 = vld [vmem:[%s1079_s1 + $0x48] sm:$0xff] (!%p138_p3)   ;;  %v866_v4 = vld [vmem:[%s1079_s1 + $0x50] sm:$0xff] (!%p138_p3)   ;;  %vm573_vm0 = vcmask (!%p138_p3), 519168  }
   0x7   : > { %141 = sbr.rel (%p138_p3) target bundleno = 283 (0x11b), region = 28  ;;  %v863_v1 = vld [vmem:[%s1079_s1] sm:$0xff] (!%p138_p3)   ;;  %758 = vmatprep.subr.bf16.mxu0 (!%p138_p3), %v862_v0  ;;  %822 = vmatprep.subr.bf16.mxu1 (!%p138_p3), %v862_v0  ;;  %v865_v3 = vld [vmem:[%s1079_s1 + $0x8] sm:$0xff] (!%p138_p3)   ;;  %p168_p4 = scmp.lt.s32.totalorder (!%p138_p3), %s686_s15, 31  ;;  %v867_v5 = vld [vmem:[%s1079_s1 + $0x10] sm:$0xff] (!%p138_p3)  }
   0x8   : > { %759 = vmatpush3.bf16.msra.mxu0 (!%p138_p3), %v863_v1  ;;  %830 = vmatpush3.bf16.msra.mxu1 (!%p138_p3), %v863_v1  ;;  %v868_v6 = vld [vmem:[%s1079_s1 + $0x58] sm:$0xff] (!%p138_p3)   ;;  %v870_v8 = vld [vmem:[%s1079_s1 + $0x60] sm:$0xff] (!%p138_p3)   ;;  %v872_v10 = vld [vmem:[%s1079_s1 + $0x68] sm:$0xff] (!%p138_p3)  }
   0x9   : > { %760 = vmatprep.subr.bf16.mxu0 (!%p138_p3), %v864_v2  ;;  %823 = vmatprep.subr.bf16.mxu1 (!%p138_p3), %v864_v2  ;;  %v869_v7 = vld [vmem:[%s1079_s1 + $0x18] sm:$0xff] (!%p138_p3)   ;;  %v871_v9 = vld [vmem:[%s1079_s1 + $0x20] sm:$0xff] (!%p138_p3)   ;;  %v873_v13 = vld [vmem:[%s1079_s1 + $0x28] sm:$0xff] (!%p138_p3)  }
   0xa   : > { %v874_v14 = vld [vmem:[%s1079_s1 + $0x70] sm:$0xff] (!%p138_p3)   ;;  %v876_v16 = vld [vmem:[%s1079_s1 + $0x78] sm:$0xff] (!%p138_p3)  }
   0xb   : > { %v875_v15 = vld [vmem:[%s1079_s1 + $0x30] sm:$0xff] (!%p138_p3)   ;;  %v877_v17 = vld [vmem:[%s1079_s1 + $0x38] sm:$0xff] (!%p138_p3)  }
   0xc   : > { %761 = vmatpush3.bf16.msra.mxu0 (!%p138_p3), %v865_v3  ;;  %831 = vmatpush3.bf16.msra.mxu1 (!%p138_p3), %v865_v3 }
   0xd   : > { %762 = vmatprep.subr.bf16.mxu0 (!%p138_p3), %v866_v4  ;;  %824 = vmatprep.subr.bf16.mxu1 (!%p138_p3), %v866_v4 }
   0xe   : > { %s1086_s15 = smov (!%p168_p4, %s686_s15), 31 }
   0xf   : > { %s741_s30 = sshll.u32 %s1086_s15, 3  ;;  %s690_s26 = sshll.u32 %s1086_s15, 2 }
  0x10   : > { %763 = vmatpush3.bf16.msra.mxu0 %v867_v5  ;;  %832 = vmatpush3.bf16.msra.mxu1 %v867_v5  ;;  %s992_s7 = scalar_lea.vmem %s1078_s0, %s741_s30  ;;  %s1035_s29 = scalar_lea.vmem %s1080_s2, %s690_s26 }
  0x11   : > { %764 = vmatprep.subr.bf16.mxu0 %v868_v6  ;;  %825 = vmatprep.subr.bf16.mxu1 %v868_v6  ;;  %v880_v11 = vld [vmem:[%s992_s7 + $0x4] ss:$8 sps:$4 sm:$0xff]   ;;  %v878_v18 = vld [vmem:[%s992_s7] ss:$8 sps:$4 sm:$0xff]   ;;  %v884_v20 = vld [vmem:[%s992_s7 + $0x14] ss:$8 sps:$4 sm:$0xff]  }
  0x12   : > { %v883_v12 = vld [vmem:[%s992_s7 + $0x44] ss:$8 sps:$4 sm:$0xff]   ;;  %444 = vmatprep.mubr.bf16.mxu0 %v880_v11  ;;  %v881_v19 = vld [vmem:[%s992_s7 + $0x40] ss:$8 sps:$4 sm:$0xff]   ;;  %v886_v21 = vld [vmem:[%s992_s7 + $0x54] ss:$8 sps:$4 sm:$0xff]  }
  0x13   : > { %476 = vmatprep.mubr.bf16.mxu1 %v883_v12  ;;  %v888_v22 = vld [vmem:[%s992_s7 + $0x10] ss:$8 sps:$4 sm:$0xff]   ;;  %v890_v24 = vld [vmem:[%s992_s7 + $0x24] ss:$8 sps:$4 sm:$0xff]   ;;  %v894_v26 = vld [vmem:[%s992_s7 + $0x20] ss:$8 sps:$4 sm:$0xff]  }
  0x14   : > { %765 = vmatpush3.bf16.msra.mxu0 %v869_v7  ;;  %833 = vmatpush3.bf16.msra.mxu1 %v869_v7  ;;  %v889_v23 = vld [vmem:[%s992_s7 + $0x50] ss:$8 sps:$4 sm:$0xff]   ;;  %v892_v25 = vld [vmem:[%s992_s7 + $0x64] ss:$8 sps:$4 sm:$0xff]   ;;  %v895_v27 = vld [vmem:[%s992_s7 + $0x60] ss:$8 sps:$4 sm:$0xff]  }
  0x15   : > { %766 = vmatprep.subr.bf16.mxu0 %v870_v8  ;;  %826 = vmatprep.subr.bf16.mxu1 %v870_v8  ;;  %v896_v28 = vld [vmem:[%s992_s7 + $0x34] ss:$8 sps:$4 sm:$0xff]   ;;  %v900_v30 = vld [vmem:[%s992_s7 + $0x30] ss:$8 sps:$4 sm:$0xff]  }
  0x16   : > { %v898_v29 = vld [vmem:[%s992_s7 + $0x74] ss:$8 sps:$4 sm:$0xff]   ;;  %v901_v31 = vld [vmem:[%s992_s7 + $0x70] ss:$8 sps:$4 sm:$0xff]  }
  0x18   : > { %767 = vmatpush3.bf16.msra.mxu0 %v871_v9  ;;  %834 = vmatpush3.bf16.msra.mxu1 %v871_v9 }
  0x19   : > { %768 = vmatprep.subr.bf16.mxu0 %v872_v10  ;;  %827 = vmatprep.subr.bf16.mxu1 %v872_v10 }
  0x1c   : > { %769 = vmatpush3.bf16.msra.mxu0 %v873_v13  ;;  %835 = vmatpush3.bf16.msra.mxu1 %v873_v13 }
  0x1d   : > { %770 = vmatprep.subr.bf16.mxu0 %v874_v14  ;;  %828 = vmatprep.subr.bf16.mxu1 %v874_v14 }
  0x20   : > { %771 = vmatpush3.bf16.msra.mxu0 %v875_v15  ;;  %836 = vmatpush3.bf16.msra.mxu1 %v875_v15 }
  0x21   : > { %772 = vmatprep.subr.bf16.mxu0 %v876_v16  ;;  %829 = vmatprep.subr.bf16.mxu1 %v876_v16 }
  0x24   : > { %773 = vmatpush3.bf16.msra.mxu0 %v877_v17  ;;  %837 = vmatpush3.bf16.msra.mxu1 %v877_v17 }
  0x27   : > { %445 = vmatmul.mubr.bf16.vlgmr.msra.gmra.mrb[0].mxu0 %v878_v18  ;;  %477 = vmatmul.mubr.bf16.vlgmr.msra.gmra.mrb[0].mxu1 %v881_v19 }
  0x28   : > { %452 = vmatprep.mubr.bf16.mxu0 %v884_v20  ;;  %484 = vmatprep.mubr.bf16.mxu1 %v886_v21 }
  0x2f   : > { %453 = vmatmul.mubr.bf16.gmra.mrb[4].mxu0 %v888_v22  ;;  %485 = vmatmul.mubr.bf16.gmra.mrb[4].mxu1 %v889_v23 }
  0x30   : > { %460 = vmatprep.mubr.bf16.mxu0 %v890_v24  ;;  %492 = vmatprep.mubr.bf16.mxu1 %v892_v25 }
  0x37   : > { %461 = vmatmul.mubr.bf16.gmra.mrb[8].mxu0 %v894_v26  ;;  %493 = vmatmul.mubr.bf16.gmra.mrb[8].mxu1 %v895_v27 }
  0x38   : > { %468 = vmatprep.mubr.bf16.mxu0 %v896_v28  ;;  %500 = vmatprep.mubr.bf16.mxu1 %v898_v29 }
  0x3f   : > { %469 = vmatmul.mubr.bf16.gmra.mrb[12].mxu0 %v900_v30  ;;  %501 = vmatmul.mubr.bf16.gmra.mrb[12].mxu1 %v901_v31 }
  0xfa   : > { %v774_v32 = vpop.f32.mrb[0].mxu0  ;;  %v798_v33 = vpop.f32.mrb[0].mxu1 }
  0xfb   : > { %v775_v34 = vpop.f32.mrb[1].mxu0  ;;  %v799_v35 = vpop.f32.mrb[1].mxu1 }
  0xfc   : > { %v776_v36 = vadd.f32 %v775_v34, %v774_v32  ;;  %v800_v37 = vadd.f32 %v799_v35, %v798_v33  ;;  %v777_v38 = vpop.f32.mrb[2].mxu0  ;;  %v801_v39 = vpop.f32.mrb[2].mxu1 }
  0xfd   : > { %v778_v40 = vpop.f32.mrb[3].mxu0  ;;  %v802_v41 = vpop.f32.mrb[3].mxu1 }
  0xfe   : > { %v742_v42 = vpack.c.bf16 %v776_v36, %v776_v36  ;;  %v750_v43 = vpack.c.bf16 %v800_v37, %v800_v37  ;;  %v779_v44 = vadd.f32 %v778_v40, %v777_v38  ;;  %v803_v45 = vadd.f32 %v802_v41, %v801_v39 }
 0x100   : > { %574 = vst.msk [vmem:[%s1035_s29] sm:$0xf] %vm573_vm0, %v742_v42  ;;  %582 = vst.msk [vmem:[%s1035_s29 + $0x20] sm:$0xf] %vm573_vm0, %v750_v43  ;;  %v743_v46 = vpack.c.bf16 %v779_v44, %v779_v44  ;;  %v751_v47 = vpack.c.bf16 %v803_v45, %v803_v45 }
 0x102   : > { %575 = vst.msk [vmem:[%s1035_s29 + $0x4] sm:$0xf] %vm573_vm0, %v743_v46  ;;  %583 = vst.msk [vmem:[%s1035_s29 + $0x24] sm:$0xf] %vm573_vm0, %v751_v47  ;;  %v780_v48 = vpop.f32.mrb[4].mxu0  ;;  %v804_v49 = vpop.f32.mrb[4].mxu1 }
 0x103   : > { %v781_v50 = vpop.f32.mrb[5].mxu0  ;;  %v805_v51 = vpop.f32.mrb[5].mxu1 }
 0x104   : > { %v782_v52 = vadd.f32 %v781_v50, %v780_v48  ;;  %v806_v53 = vadd.f32 %v805_v51, %v804_v49  ;;  %v783_v54 = vpop.f32.mrb[6].mxu0  ;;  %v807_v55 = vpop.f32.mrb[6].mxu1 }
 0x105   : > { %v784_v56 = vpop.f32.mrb[7].mxu0  ;;  %v808_v57 = vpop.f32.mrb[7].mxu1 }
 0x106   : > { %v744_v58 = vpack.c.bf16 %v782_v52, %v782_v52  ;;  %v752_v59 = vpack.c.bf16 %v806_v53, %v806_v53  ;;  %v785_v60 = vadd.f32 %v784_v56, %v783_v54  ;;  %v809_v61 = vadd.f32 %v808_v57, %v807_v55 }
 0x108   : > { %576 = vst.msk [vmem:[%s1035_s29 + $0x8] sm:$0xf] %vm573_vm0, %v744_v58  ;;  %584 = vst.msk [vmem:[%s1035_s29 + $0x28] sm:$0xf] %vm573_vm0, %v752_v59  ;;  %v745_v62 = vpack.c.bf16 %v785_v60, %v785_v60  ;;  %v753_v63 = vpack.c.bf16 %v809_v61, %v809_v61 }
 0x10a   : > { %577 = vst.msk [vmem:[%s1035_s29 + $0xc] sm:$0xf] %vm573_vm0, %v745_v62  ;;  %585 = vst.msk [vmem:[%s1035_s29 + $0x2c] sm:$0xf] %vm573_vm0, %v753_v63  ;;  %v786_v0 = vpop.f32.mrb[8].mxu0  ;;  %v810_v1 = vpop.f32.mrb[8].mxu1 }
 0x10b   : > { %v787_v2 = vpop.f32.mrb[9].mxu0  ;;  %v811_v3 = vpop.f32.mrb[9].mxu1 }
 0x10c   : > { %v788_v4 = vadd.f32 %v787_v2, %v786_v0  ;;  %v812_v5 = vadd.f32 %v811_v3, %v810_v1  ;;  %v789_v6 = vpop.f32.mrb[10].mxu0  ;;  %v813_v7 = vpop.f32.mrb[10].mxu1 }
 0x10d   : > { %v790_v8 = vpop.f32.mrb[11].mxu0  ;;  %v814_v9 = vpop.f32.mrb[11].mxu1 }
 0x10e   : > { %v746_v10 = vpack.c.bf16 %v788_v4, %v788_v4  ;;  %v754_v11 = vpack.c.bf16 %v812_v5, %v812_v5  ;;  %v791_v12 = vadd.f32 %v790_v8, %v789_v6  ;;  %v815_v13 = vadd.f32 %v814_v9, %v813_v7 }
 0x110   : > { %578 = vst.msk [vmem:[%s1035_s29 + $0x10] sm:$0xf] %vm573_vm0, %v746_v10  ;;  %586 = vst.msk [vmem:[%s1035_s29 + $0x30] sm:$0xf] %vm573_vm0, %v754_v11  ;;  %v747_v14 = vpack.c.bf16 %v791_v12, %v791_v12  ;;  %v755_v15 = vpack.c.bf16 %v815_v13, %v815_v13 }
 0x112   : > { %579 = vst.msk [vmem:[%s1035_s29 + $0x14] sm:$0xf] %vm573_vm0, %v747_v14  ;;  %587 = vst.msk [vmem:[%s1035_s29 + $0x34] sm:$0xf] %vm573_vm0, %v755_v15  ;;  %v792_v16 = vpop.f32.mrb[12].mxu0  ;;  %v816_v17 = vpop.f32.mrb[12].mxu1 }
 0x113   : > { %v793_v18 = vpop.f32.mrb[13].mxu0  ;;  %v817_v19 = vpop.f32.mrb[13].mxu1 }
 0x114   : > { %v794_v20 = vadd.f32 %v793_v18, %v792_v16  ;;  %v818_v21 = vadd.f32 %v817_v19, %v816_v17  ;;  %v795_v22 = vpop.f32.mrb[14].mxu0  ;;  %v819_v23 = vpop.f32.mrb[14].mxu1 }
 0x115   : > { %v796_v24 = vpop.f32.mrb[15].mxu0  ;;  %v820_v25 = vpop.f32.mrb[15].mxu1 }
 0x116   : > { %v748_v26 = vpack.c.bf16 %v794_v20, %v794_v20  ;;  %v756_v27 = vpack.c.bf16 %v818_v21, %v818_v21  ;;  %v797_v28 = vadd.f32 %v796_v24, %v795_v22  ;;  %v821_v29 = vadd.f32 %v820_v25, %v819_v23 }
 0x118   : > { %580 = vst.msk [vmem:[%s1035_s29 + $0x18] sm:$0xf] %vm573_vm0, %v748_v26  ;;  %588 = vst.msk [vmem:[%s1035_s29 + $0x38] sm:$0xf] %vm573_vm0, %v756_v27  ;;  %v749_v30 = vpack.c.bf16 %v797_v28, %v797_v28  ;;  %v757_v31 = vpack.c.bf16 %v821_v29, %v821_v29 }
 0x11a   : > { %581 = vst.msk [vmem:[%s1035_s29 + $0x1c] sm:$0xf] %vm573_vm0, %v749_v30  ;;  %589 = vst.msk [vmem:[%s1035_s29 + $0x3c] sm:$0xf] %vm573_vm0, %v757_v31 }
 0x11b PF: > { %s12_s11 = sadd.s32 1, %s924_s11   ;;  %s1081_s9 = smov %s920_s10 }
 0x11c   : > { %p9_p5 = scmp.ge.s32.totalorder %s12_s11, 4   ;;  %s1082_s10 = smov %s1084_s12 }
 0x11e   :  { %11 = sbr.rel (!%p9_p5) target bundleno = 2 (0x2), region = 61 }

// kernel: encoder_overall_forward.10
= control target key start
LH: loop header
LB: loop body
LE: loop exit
PB: predicated region body
PF: predicated region fallthrough
CT: control target
= control target key end

     0   :  { %s2664_s18 = smov 0   ;;  %s2666_s19 = smov 0   ;;  %s3096_s0 = inlined_call_operand.vmem [shape: bf16[256,256], index: 0, kind: input, shape index: {}]   ;;  %s3097_s1 = inlined_call_operand.vmem [shape: bf16[256,256], index: 1, kind: input, shape index: {}]   ;;  %s3098_s2 = inlined_call_operand.vmem [shape: bf16[256,64], index: 2, kind: input, shape index: {}]   ;;  %s3099_s3 = inlined_call_operand.vmem [shape: f32[64,64], index: 3, kind: input, shape index: {}]   ;;  %s3100_s4 = inlined_call_operand.vmem [shape: f32[1,64], index: 4, kind: input, shape index: {}]   ;;  %s3101_s5 = inlined_call_operand.vmem [shape: f32[256,64], index: 5, kind: output, shape index: {}]  }
   0x1   :  { %s2668_s20 = smov 0  }
   0x2 LB: > { %s27_s21 = sadd.s32 1, %s2627_s19  ;;  %p1948_p0 = scmp.ge.s32.totalorder %s2631_s20, 1  ;;  %s2631_s20 = sphi %s2668_s20, %s15_s20   ;;  %s2627_s19 = sphi %s2666_s19, %s3103_s19   ;;  %s2623_s18 = sphi %s2664_s18, %s3102_s18  }
   0x3   : > { %p29_p1 = scmp.ge.s32.totalorder %s27_s21, 2  ;;  %p238_p2 = scmp.lt.s32.totalorder %s2631_s20, 3 }
   0x5   : > { %s3105_s21 = smov (%p29_p1, %s27_s21), 0  ;;  %p239_p3 = pnand %p1948_p0, %p238_p2 }
   0x6   : > { %v2355_v0 = vld [vmem:[%s3098_s2 + $0x40] sm:$0xff] (!%p239_p3)   ;;  %s1949_s24 = sshll.u32 (!%p239_p3), %s2623_s18, 4  ;;  %v2357_v2 = vld [vmem:[%s3098_s2 + $0x48] sm:$0xff] (!%p239_p3)   ;;  %v2359_v4 = vld [vmem:[%s3098_s2 + $0x50] sm:$0xff] (!%p239_p3)   ;;  %vm327_vm0 = vcmask (!%p239_p3), 523264   ;;  %v2633_v57 = vmov (!%p239_p3), 0.0  }
   0x7   : > { %242 = sbr.rel (%p239_p3) target bundleno = 739 (0x2e3), region = 40  ;;  %v2356_v1 = vld [vmem:[%s3098_s2] sm:$0xff] (!%p239_p3)   ;;  %2042 = vmatprep.subr.bf16.mxu0 (!%p239_p3), %v2355_v0  ;;  %2106 = vmatprep.subr.bf16.mxu1 (!%p239_p3), %v2355_v0  ;;  %v2358_v3 = vld [vmem:[%s3098_s2 + $0x8] sm:$0xff] (!%p239_p3)   ;;  %p288_p4 = scmp.lt.s32.totalorder (!%p239_p3), %s1949_s24, 31  ;;  %v2360_v5 = vld [vmem:[%s3098_s2 + $0x10] sm:$0xff] (!%p239_p3)   ;;  %328 = vst.msk [vmem:[#allocation2] sm:$0xff] (!%p239_p3), %vm327_vm0, %v2633_v57 }
   0x8   : > { %2043 = vmatpush3.bf16.msra.mxu0 (!%p239_p3), %v2356_v1  ;;  %2107 = vmatpush3.bf16.msra.mxu1 (!%p239_p3), %v2356_v1  ;;  %v2361_v6 = vld [vmem:[%s3098_s2 + $0x58] sm:$0xff] (!%p239_p3)   ;;  %v2363_v8 = vld [vmem:[%s3098_s2 + $0x60] sm:$0xff] (!%p239_p3)   ;;  %v2365_v10 = vld [vmem:[%s3098_s2 + $0x68] sm:$0xff] (!%p239_p3)   ;;  %329 = vst.msk [vmem:[#allocation2 + $0x8] sm:$0xff] (!%p239_p3), %vm327_vm0, %v2633_v57 }
   0x9   : > { %2044 = vmatprep.subr.bf16.mxu0 (!%p239_p3), %v2357_v2  ;;  %2108 = vmatprep.subr.bf16.mxu1 (!%p239_p3), %v2357_v2  ;;  %v2362_v7 = vld [vmem:[%s3098_s2 + $0x18] sm:$0xff] (!%p239_p3)   ;;  %v2364_v9 = vld [vmem:[%s3098_s2 + $0x20] sm:$0xff] (!%p239_p3)   ;;  %v2366_v13 = vld [vmem:[%s3098_s2 + $0x28] sm:$0xff] (!%p239_p3)   ;;  %330 = vst.msk [vmem:[#allocation2 + $0x10] sm:$0xff] (!%p239_p3), %vm327_vm0, %v2633_v57 }
   0xa   : > { %v2367_v14 = vld [vmem:[%s3098_s2 + $0x70] sm:$0xff] (!%p239_p3)   ;;  %v2369_v16 = vld [vmem:[%s3098_s2 + $0x78] sm:$0xff] (!%p239_p3)   ;;  %v1006_v24 = vld [vmem:[%s3099_s3] sm:$0xff] (!%p239_p3)  ;;  %331 = vst.msk [vmem:[#allocation2 + $0x18] sm:$0xff] (!%p239_p3), %vm327_vm0, %v2633_v57 }
   0xb   : > { %v2368_v15 = vld [vmem:[%s3098_s2 + $0x30] sm:$0xff] (!%p239_p3)   ;;  %v2370_v17 = vld [vmem:[%s3098_s2 + $0x38] sm:$0xff] (!%p239_p3)   ;;  %v1007_v25 = vld [vmem:[%s3099_s3 + $0x8] sm:$0xff] (!%p239_p3)  ;;  %332 = vst.msk [vmem:[#allocation2 + $0x20] sm:$0xff] (!%p239_p3), %vm327_vm0, %v2633_v57 }
   0xc   : > { %2045 = vmatpush3.bf16.msra.mxu0 (!%p239_p3), %v2358_v3  ;;  %2109 = vmatpush3.bf16.msra.mxu1 (!%p239_p3), %v2358_v3  ;;  %v2298_v27 = vpack.c.bf16 (!%p239_p3), %v1007_v25, %v1006_v24  ;;  %v1008_v28 = vld [vmem:[%s3099_s3 + $0x10] sm:$0xff] (!%p239_p3)  ;;  %v1009_v29 = vld [vmem:[%s3099_s3 + $0x18] sm:$0xff] (!%p239_p3)  ;;  %v1010_v31 = vld [vmem:[%s3099_s3 + $0x20] sm:$0xff] (!%p239_p3)  ;;  %333 = vst.msk [vmem:[#allocation2 + $0x28] sm:$0xff] (!%p239_p3), %vm327_vm0, %v2633_v57 }
   0xd   : > { %2046 = vmatprep.subr.bf16.mxu0 (!%p239_p3), %v2359_v4  ;;  %2110 = vmatprep.subr.bf16.mxu1 (!%p239_p3), %v2359_v4  ;;  %v1011_v32 = vld [vmem:[%s3099_s3 + $0x28] sm:$0xff] (!%p239_p3)  ;;  %v2302_v33 = vpack.c.bf16 (!%p239_p3), %v1009_v29, %v1008_v28  ;;  %334 = vst.msk [vmem:[#allocation2 + $0x30] sm:$0xff] (!%p239_p3), %vm327_vm0, %v2633_v57  ;;  %335 = vst.msk [vmem:[#allocation2 + $0x38] sm:$0xff] (!%p239_p3), %vm327_vm0, %v2633_v57  ;;  %v1012_v58 = vld [vmem:[%s3099_s3 + $0x30] sm:$0xff] (!%p239_p3) }
   0xe   : > { %s3107_s24 = smov (!%p288_p4, %s1949_s24), 31  ;;  %v2306_v34 = vpack.c.bf16 %v1011_v32, %v1010_v31  ;;  %336 = vst.msk [vmem:[#allocation2 + $0x40] sm:$0xff] %vm327_vm0, %v2633_v57  ;;  %337 = vst.msk [vmem:[#allocation2 + $0x48] sm:$0xff] %vm327_vm0, %v2633_v57  ;;  %v1013_v59 = vld [vmem:[%s3099_s3 + $0x38] sm:$0xff]  ;;  %v392_v63 = vld [vmem:[#allocation2] sm:$0xff] }
   0xf   : > { %s2706_s14 = sshll.u32 %s3107_s24, 3  ;;  %338 = vst.msk [vmem:[#allocation2 + $0x50] sm:$0xff] %vm327_vm0, %v2633_v57  ;;  %339 = vst.msk [vmem:[#allocation2 + $0x58] sm:$0xff] %vm327_vm0, %v2633_v57  ;;  %v2310_v60 = vpack.c.bf16 %v1013_v59, %v1012_v58 }
  0x10   : > { %2047 = vmatpush3.bf16.msra.mxu0 %v2360_v5  ;;  %2111 = vmatpush3.bf16.msra.mxu1 %v2360_v5  ;;  %s2715_s22 = scalar_lea.vmem %s3096_s0, %s2706_s14  ;;  %s2724_s27 = scalar_lea.vmem %s3097_s1, %s2706_s14  ;;  %340 = vst.msk [vmem:[#allocation2 + $0x60] sm:$0xff] %vm327_vm0, %v2633_v57  ;;  %341 = vst.msk [vmem:[#allocation2 + $0x68] sm:$0xff] %vm327_vm0, %v2633_v57 }
  0x11   : > { %2048 = vmatprep.subr.bf16.mxu0 %v2361_v6  ;;  %2112 = vmatprep.subr.bf16.mxu1 %v2361_v6  ;;  %v2373_v11 = vld [vmem:[%s2715_s22 + $0x4] ss:$8 sps:$4 sm:$0xff]   ;;  %v2371_v18 = vld [vmem:[%s2715_s22] ss:$8 sps:$4 sm:$0xff]   ;;  %v2377_v20 = vld [vmem:[%s2715_s22 + $0x14] ss:$8 sps:$4 sm:$0xff]   ;;  %s2995_s15 = scalar_lea.vmem %s3101_s5, %s2706_s14 }
  0x12   : > { %v2376_v12 = vld [vmem:[%s2724_s27 + $0x4] ss:$8 sps:$4 sm:$0xff]   ;;  %632 = vmatprep.mubr.bf16.mxu0 %v2373_v11  ;;  %v2374_v19 = vld [vmem:[%s2724_s27] ss:$8 sps:$4 sm:$0xff]   ;;  %v2379_v21 = vld [vmem:[%s2724_s27 + $0x14] ss:$8 sps:$4 sm:$0xff]  }
  0x13   : > { %874 = vmatprep.mubr.bf16.mxu1 %v2376_v12  ;;  %v2381_v22 = vld [vmem:[%s2715_s22 + $0x10] ss:$8 sps:$4 sm:$0xff]   ;;  %v2383_v26 = vld [vmem:[%s2715_s22 + $0x24] ss:$8 sps:$4 sm:$0xff]   ;;  %v2385_v35 = vld [vmem:[%s2715_s22 + $0x20] ss:$8 sps:$4 sm:$0xff]  }
  0x14   : > { %2049 = vmatpush3.bf16.msra.mxu0 %v2362_v7  ;;  %2113 = vmatpush3.bf16.msra.mxu1 %v2362_v7  ;;  %v2382_v23 = vld [vmem:[%s2724_s27 + $0x10] ss:$8 sps:$4 sm:$0xff]   ;;  %v2386_v30 = vld [vmem:[%s2724_s27 + $0x24] ss:$8 sps:$4 sm:$0xff]   ;;  %v2388_v36 = vld [vmem:[%s2724_s27 + $0x20] ss:$8 sps:$4 sm:$0xff]  }
  0x15   : > { %2050 = vmatprep.subr.bf16.mxu0 %v2363_v8  ;;  %2114 = vmatprep.subr.bf16.mxu1 %v2363_v8  ;;  %v2389_v37 = vld [vmem:[%s2715_s22 + $0x34] ss:$8 sps:$4 sm:$0xff]   ;;  %v2391_v39 = vld [vmem:[%s2715_s22 + $0x30] ss:$8 sps:$4 sm:$0xff]   ;;  %v2395_v41 = vld [vmem:[%s2715_s22 + $0x44] ss:$8 sps:$4 sm:$0xff]  }
  0x16   : > { %v2392_v38 = vld [vmem:[%s2724_s27 + $0x34] ss:$8 sps:$4 sm:$0xff]   ;;  %v2394_v40 = vld [vmem:[%s2724_s27 + $0x30] ss:$8 sps:$4 sm:$0xff]   ;;  %v2398_v42 = vld [vmem:[%s2724_s27 + $0x44] ss:$8 sps:$4 sm:$0xff]  }
  0x17   : > { %v2397_v43 = vld [vmem:[%s2715_s22 + $0x40] ss:$8 sps:$4 sm:$0xff]   ;;  %v2401_v45 = vld [vmem:[%s2715_s22 + $0x54] ss:$8 sps:$4 sm:$0xff]   ;;  %v2403_v47 = vld [vmem:[%s2715_s22 + $0x50] ss:$8 sps:$4 sm:$0xff]  }
  0x18   : > { %2051 = vmatpush3.bf16.msra.mxu0 %v2364_v9  ;;  %2115 = vmatpush3.bf16.msra.mxu1 %v2364_v9  ;;  %v2400_v44 = vld [vmem:[%s2724_s27 + $0x40] ss:$8 sps:$4 sm:$0xff]   ;;  %v2404_v46 = vld [vmem:[%s2724_s27 + $0x54] ss:$8 sps:$4 sm:$0xff]   ;;  %v2406_v48 = vld [vmem:[%s2724_s27 + $0x50] ss:$8 sps:$4 sm:$0xff]  }
  0x19   : > { %2052 = vmatprep.subr.bf16.mxu0 %v2365_v10  ;;  %2116 = vmatprep.subr.bf16.mxu1 %v2365_v10  ;;  %v2407_v49 = vld [vmem:[%s2715_s22 + $0x64] ss:$8 sps:$4 sm:$0xff]   ;;  %v2409_v51 = vld [vmem:[%s2715_s22 + $0x60] ss:$8 sps:$4 sm:$0xff]   ;;  %v2413_v53 = vld [vmem:[%s2715_s22 + $0x74] ss:$8 sps:$4 sm:$0xff]  }
  0x1a   : > { %v2410_v50 = vld [vmem:[%s2724_s27 + $0x64] ss:$8 sps:$4 sm:$0xff]   ;;  %v2412_v52 = vld [vmem:[%s2724_s27 + $0x60] ss:$8 sps:$4 sm:$0xff]   ;;  %v2416_v54 = vld [vmem:[%s2724_s27 + $0x74] ss:$8 sps:$4 sm:$0xff]  }
  0x1b   : > { %v2415_v55 = vld [vmem:[%s2715_s22 + $0x70] ss:$8 sps:$4 sm:$0xff]   ;;  %342 = vst.msk [vmem:[#allocation2 + $0x70] sm:$0xff] %vm327_vm0, %v2633_v57  ;;  %343 = vst.msk [vmem:[#allocation2 + $0x78] sm:$0xff] %vm327_vm0, %v2633_v57  ;;  %v393_v7 = vld [vmem:[#allocation2 + $0x8] sm:$0xff] }
  0x1c   : > { %2053 = vmatpush3.bf16.msra.mxu0 %v2366_v13  ;;  %2117 = vmatpush3.bf16.msra.mxu1 %v2366_v13  ;;  %v2418_v56 = vld [vmem:[%s2724_s27 + $0x70] ss:$8 sps:$4 sm:$0xff]   ;;  %344 = vst.msk [vmem:[#allocation3] sm:$0xff] %vm327_vm0, %v2633_v57  ;;  %345 = vst.msk [vmem:[#allocation3 + $0x8] sm:$0xff] %vm327_vm0, %v2633_v57 }
  0x1d   : > { %2054 = vmatprep.subr.bf16.mxu0 %v2367_v14  ;;  %2118 = vmatprep.subr.bf16.mxu1 %v2367_v14  ;;  %346 = vst.msk [vmem:[#allocation3 + $0x10] sm:$0xff] %vm327_vm0, %v2633_v57  ;;  %347 = vst.msk [vmem:[#allocation3 + $0x18] sm:$0xff] %vm327_vm0, %v2633_v57 }
  0x1e   : > { %348 = vst.msk [vmem:[#allocation3 + $0x20] sm:$0xff] %vm327_vm0, %v2633_v57  ;;  %349 = vst.msk [vmem:[#allocation3 + $0x28] sm:$0xff] %vm327_vm0, %v2633_v57 }
  0x1f   : > { %350 = vst.msk [vmem:[#allocation3 + $0x30] sm:$0xff] %vm327_vm0, %v2633_v57  ;;  %351 = vst.msk [vmem:[#allocation3 + $0x38] sm:$0xff] %vm327_vm0, %v2633_v57 }
  0x20   : > { %2055 = vmatpush3.bf16.msra.mxu0 %v2368_v15  ;;  %2119 = vmatpush3.bf16.msra.mxu1 %v2368_v15  ;;  %352 = vst.msk [vmem:[#allocation3 + $0x40] sm:$0xff] %vm327_vm0, %v2633_v57  ;;  %353 = vst.msk [vmem:[#allocation3 + $0x48] sm:$0xff] %vm327_vm0, %v2633_v57 }
  0x21   : > { %2056 = vmatprep.subr.bf16.mxu0 %v2369_v16  ;;  %2120 = vmatprep.subr.bf16.mxu1 %v2369_v16  ;;  %354 = vst.msk [vmem:[#allocation3 + $0x50] sm:$0xff] %vm327_vm0, %v2633_v57  ;;  %355 = vst.msk [vmem:[#allocation3 + $0x58] sm:$0xff] %vm327_vm0, %v2633_v57 }
  0x22   : > { %356 = vst.msk [vmem:[#allocation3 + $0x60] sm:$0xff] %vm327_vm0, %v2633_v57  ;;  %357 = vst.msk [vmem:[#allocation3 + $0x68] sm:$0xff] %vm327_vm0, %v2633_v57 }
  0x23   : > { %358 = vst.msk [vmem:[#allocation3 + $0x70] sm:$0xff] %vm327_vm0, %v2633_v57  ;;  %359 = vst.msk [vmem:[#allocation3 + $0x78] sm:$0xff] %vm327_vm0, %v2633_v57  ;;  %v730_v1 = vld [vmem:[#allocation3] sm:$0xff]  ;;  %v731_v9 = vld [vmem:[#allocation3 + $0x8] sm:$0xff] }
  0x24   : > { %2057 = vmatpush3.bf16.msra.mxu0 %v2370_v17  ;;  %2121 = vmatpush3.bf16.msra.mxu1 %v2370_v17  ;;  %v733_v29 = vld [vmem:[#allocation3 + $0x18] sm:$0xff] }
  0x25   : > { %2299 = vmatprep.subr.bf16.mxu0 %v2298_v27  ;;  %2315 = vmatprep.subr.bf16.mxu1 %v2298_v27 }
  0x27   : > { %633 = vmatmul.mubr.bf16.vlgmr.msra.gmra.mrb[0].mxu0 %v2371_v18  ;;  %875 = vmatmul.mubr.bf16.vlgmr.msra.gmra.mrb[0].mxu1 %v2374_v19  ;;  %v394_v19 = vld [vmem:[#allocation2 + $0x10] sm:$0xff] }
  0x28   : > { %640 = vmatprep.mubr.bf16.mxu0 %v2377_v20  ;;  %882 = vmatprep.mubr.bf16.mxu1 %v2379_v21  ;;  %v732_v21 = vld [vmem:[#allocation3 + $0x10] sm:$0xff] }
  0x29   : > { %2301 = vmatpush3.bf16.msra.mxu0 %v2298_v27  ;;  %2317 = vmatpush3.bf16.msra.mxu1 %v2298_v27  ;;  %v395_v27 = vld [vmem:[#allocation2 + $0x18] sm:$0xff] }
  0x2a   : > { %2303 = vmatprep.subr.bf16.mxu0 %v2302_v33  ;;  %2319 = vmatprep.subr.bf16.mxu1 %v2302_v33 }
  0x2d   : > { %2305 = vmatpush3.bf16.msra.mxu0 %v2302_v33  ;;  %2321 = vmatpush3.bf16.msra.mxu1 %v2302_v33 }
  0x2e   : > { %2307 = vmatprep.subr.bf16.mxu0 %v2306_v34  ;;  %2323 = vmatprep.subr.bf16.mxu1 %v2306_v34 }
  0x2f   : > { %641 = vmatmul.mubr.bf16.gmra.mrb[4].mxu0 %v2381_v22  ;;  %883 = vmatmul.mubr.bf16.gmra.mrb[4].mxu1 %v2382_v23 }
  0x30   : > { %648 = vmatprep.mubr.bf16.mxu0 %v2383_v26  ;;  %890 = vmatprep.mubr.bf16.mxu1 %v2386_v30 }
  0x31   : > { %2309 = vmatpush3.bf16.msra.mxu0 %v2306_v34  ;;  %2325 = vmatpush3.bf16.msra.mxu1 %v2306_v34 }
  0x32   : > { %2311 = vmatprep.subr.bf16.mxu0 %v2310_v60  ;;  %2327 = vmatprep.subr.bf16.mxu1 %v2310_v60 }
  0x35   : > { %2313 = vmatpush3.bf16.msra.mxu0 %v2310_v60  ;;  %2329 = vmatpush3.bf16.msra.mxu1 %v2310_v60 }
  0x37   : > { %649 = vmatmul.mubr.bf16.gmra.mrb[8].mxu0 %v2385_v35  ;;  %891 = vmatmul.mubr.bf16.gmra.mrb[8].mxu1 %v2388_v36 }
  0x38   : > { %656 = vmatprep.mubr.bf16.mxu0 %v2389_v37  ;;  %898 = vmatprep.mubr.bf16.mxu1 %v2392_v38 }
  0x3f   : > { %657 = vmatmul.mubr.bf16.gmra.mrb[12].mxu0 %v2391_v39  ;;  %899 = vmatmul.mubr.bf16.gmra.mrb[12].mxu1 %v2394_v40 }
  0x40   : > { %664 = vmatprep.mubr.bf16.mxu0 %v2395_v41  ;;  %906 = vmatprep.mubr.bf16.mxu1 %v2398_v42 }
  0x47   : > { %665 = vmatmul.mubr.bf16.gmra.mrb[16].mxu0 %v2397_v43  ;;  %907 = vmatmul.mubr.bf16.gmra.mrb[16].mxu1 %v2400_v44  ;;  %v396_v43 = vld [vmem:[#allocation2 + $0x20] sm:$0xff] }
  0x48   : > { %672 = vmatprep.mubr.bf16.mxu0 %v2401_v45  ;;  %914 = vmatprep.mubr.bf16.mxu1 %v2404_v46  ;;  %v734_v45 = vld [vmem:[#allocation3 + $0x20] sm:$0xff] }
  0x4f   : > { %673 = vmatmul.mubr.bf16.gmra.mrb[20].mxu0 %v2403_v47  ;;  %915 = vmatmul.mubr.bf16.gmra.mrb[20].mxu1 %v2406_v48 }
  0x50   : > { %680 = vmatprep.mubr.bf16.mxu0 %v2407_v49  ;;  %922 = vmatprep.mubr.bf16.mxu1 %v2410_v50 }
  0x57   : > { %681 = vmatmul.mubr.bf16.gmra.mrb[24].mxu0 %v2409_v51  ;;  %923 = vmatmul.mubr.bf16.gmra.mrb[24].mxu1 %v2412_v52  ;;  %v397_v51 = vld [vmem:[#allocation2 + $0x28] sm:$0xff] }
  0x58   : > { %688 = vmatprep.mubr.bf16.mxu0 %v2413_v53  ;;  %930 = vmatprep.mubr.bf16.mxu1 %v2416_v54  ;;  %v735_v53 = vld [vmem:[#allocation3 + $0x28] sm:$0xff] }
  0x5f   : > { %689 = vmatmul.mubr.bf16.gmra.mrb[28].mxu0 %v2415_v55  ;;  %931 = vmatmul.mubr.bf16.gmra.mrb[28].mxu1 %v2418_v56 }
  0xfa   : > { %v2058_v61 = vpop.f32.mrb[0].mxu0  ;;  %v2122_v62 = vpop.f32.mrb[0].mxu1 }
  0xfb   : > { %v2059_v0 = vpop.f32.mrb[1].mxu0  ;;  %v2123_v2 = vpop.f32.mrb[1].mxu1 }
  0xfc   : > { %v2060_v3 = vadd.f32 %v2059_v0, %v2058_v61  ;;  %v2124_v4 = vadd.f32 %v2123_v2, %v2122_v62  ;;  %v2061_v5 = vpop.f32.mrb[2].mxu0  ;;  %v2125_v6 = vpop.f32.mrb[2].mxu1 }
  0xfd   : > { %v2062_v8 = vpop.f32.mrb[3].mxu0  ;;  %v2126_v10 = vpop.f32.mrb[3].mxu1 }
  0xfe   : > { %v697_v11 = vadd.f32 %v2060_v3, %v392_v63  ;;  %v939_v12 = vadd.f32 %v2124_v4, %v730_v1  ;;  %v2063_v13 = vadd.f32 %v2062_v8, %v2061_v5  ;;  %v2127_v14 = vadd.f32 %v2126_v10, %v2125_v6  ;;  %v398_v3 = vld [vmem:[#allocation2 + $0x30] sm:$0xff] }
  0xff   : > { %v736_v5 = vld [vmem:[#allocation3 + $0x30] sm:$0xff] }
 0x100   : > { %714 = vst.msk [vmem:[#allocation2] sm:$0xff] %vm327_vm0, %v697_v11  ;;  %955 = vst.msk [vmem:[#allocation3] sm:$0xff] %vm327_vm0, %v939_v12  ;;  %v698_v15 = vadd.f32 %v2063_v13, %v393_v7  ;;  %v940_v16 = vadd.f32 %v2127_v14, %v731_v9  ;;  %v399_v11 = vld [vmem:[#allocation2 + $0x38] sm:$0xff] }
 0x101   : > { %v737_v13 = vld [vmem:[#allocation3 + $0x38] sm:$0xff] }
 0x102   : > { %715 = vst.msk [vmem:[#allocation2 + $0x8] sm:$0xff] %vm327_vm0, %v698_v15  ;;  %956 = vst.msk [vmem:[#allocation3 + $0x8] sm:$0xff] %vm327_vm0, %v940_v16  ;;  %v2064_v17 = vpop.f32.mrb[4].mxu0  ;;  %v2128_v18 = vpop.f32.mrb[4].mxu1 }
 0x103   : > { %v2065_v20 = vpop.f32.mrb[5].mxu0  ;;  %v2129_v22 = vpop.f32.mrb[5].mxu1 }
 0x104   : > { %v2066_v23 = vadd.f32 %v2065_v20, %v2064_v17  ;;  %v2130_v24 = vadd.f32 %v2129_v22, %v2128_v18  ;;  %v2067_v25 = vpop.f32.mrb[6].mxu0  ;;  %v2131_v26 = vpop.f32.mrb[6].mxu1 }
 0x105   : > { %v2068_v28 = vpop.f32.mrb[7].mxu0  ;;  %v2132_v30 = vpop.f32.mrb[7].mxu1 }
 0x106   : > { %v699_v31 = vadd.f32 %v2066_v23, %v394_v19  ;;  %v941_v32 = vadd.f32 %v2130_v24, %v732_v21  ;;  %v2069_v33 = vadd.f32 %v2068_v28, %v2067_v25  ;;  %v2133_v34 = vadd.f32 %v2132_v30, %v2131_v26 }
 0x107   : > { %v974_v35 = vld [vmem:[#allocation2] sm:$0xff] }
 0x108   : > { %v990_v36 = vld [vmem:[#allocation3] sm:$0xff]  ;;  %716 = vst.msk [vmem:[#allocation2 + $0x10] sm:$0xff] %vm327_vm0, %v699_v31  ;;  %957 = vst.msk [vmem:[#allocation3 + $0x10] sm:$0xff] %vm327_vm0, %v941_v32  ;;  %v700_v37 = vadd.f32 %v2069_v33, %v395_v27  ;;  %v942_v38 = vadd.f32 %v2133_v34, %v733_v29  ;;  %2234 = vmatprep.mubr.msk.f32.mxu0 %vm327_vm0, %v974_v35  ;;  %v401_v35 = vld [vmem:[#allocation2 + $0x48] sm:$0xff] }
 0x109   : > { %2274 = vmatprep.mubr.msk.f32.mxu1 %vm327_vm0, %v990_v36  ;;  %v2840_v39 = vld [vmem:[#allocation2 + $0x8] sm:$0xff]  ;;  %v400_v27 = vld [vmem:[#allocation2 + $0x40] sm:$0xff] }
 0x10a   : > { %v2842_v40 = vld [vmem:[#allocation3 + $0x8] sm:$0xff]  ;;  %717 = vst.msk [vmem:[#allocation2 + $0x18] sm:$0xff] %vm327_vm0, %v700_v37  ;;  %958 = vst.msk [vmem:[#allocation3 + $0x18] sm:$0xff] %vm327_vm0, %v942_v38  ;;  %v2070_v41 = vpop.f32.mrb[8].mxu0  ;;  %2235 = vmatmul.mubr.msk.f32.vlgmr.msra.gmra.mrb[32].mxu0 %vm327_vm0, %v2840_v39  ;;  %v2134_v42 = vpop.f32.mrb[8].mxu1  ;;  %v738_v29 = vld [vmem:[#allocation3 + $0x40] sm:$0xff] }
 0x10b   : > { %2275 = vmatmul.mubr.msk.f32.vlgmr.msra.gmra.mrb[32].mxu1 %vm327_vm0, %v2842_v40  ;;  %v2071_v44 = vpop.f32.mrb[9].mxu0  ;;  %v2135_v46 = vpop.f32.mrb[9].mxu1  ;;  %v739_v37 = vld [vmem:[#allocation3 + $0x48] sm:$0xff] }
 0x10c   : > { %v2072_v47 = vadd.f32 %v2071_v44, %v2070_v41  ;;  %v2073_v48 = vpop.f32.mrb[10].mxu0  ;;  %v2136_v49 = vadd.f32 %v2135_v46, %v2134_v42  ;;  %v2137_v50 = vpop.f32.mrb[10].mxu1 }
 0x10d   : > { %v2074_v52 = vpop.f32.mrb[11].mxu0  ;;  %v2138_v54 = vpop.f32.mrb[11].mxu1 }
 0x10e   : > { %v701_v55 = vadd.f32 %v2072_v47, %v396_v43  ;;  %v2075_v56 = vadd.f32 %v2074_v52, %v2073_v48  ;;  %v943_v57 = vadd.f32 %v2136_v49, %v734_v45  ;;  %v2139_v58 = vadd.f32 %v2138_v54, %v2137_v50 }
 0x10f   : > { %v976_v59 = vld [vmem:[#allocation2 + $0x10] sm:$0xff] }
 0x110   : > { %v992_v60 = vld [vmem:[#allocation3 + $0x10] sm:$0xff]  ;;  %718 = vst.msk [vmem:[#allocation2 + $0x20] sm:$0xff] %vm327_vm0, %v701_v55  ;;  %v702_v61 = vadd.f32 %v2075_v56, %v397_v51  ;;  %959 = vst.msk [vmem:[#allocation3 + $0x20] sm:$0xff] %vm327_vm0, %v943_v57  ;;  %v944_v62 = vadd.f32 %v2139_v58, %v735_v53  ;;  %2237 = vmatprep.mubr.msk.f32.mxu0 %vm327_vm0, %v976_v59 }
 0x111   : > { %2277 = vmatprep.mubr.msk.f32.mxu1 %vm327_vm0, %v992_v60  ;;  %v977_v63 = vld [vmem:[#allocation2 + $0x18] sm:$0xff]  ;;  %v402_v53 = vld [vmem:[#allocation2 + $0x50] sm:$0xff] }
 0x112   : > { %v993_v0 = vld [vmem:[#allocation3 + $0x18] sm:$0xff]  ;;  %719 = vst.msk [vmem:[#allocation2 + $0x28] sm:$0xff] %vm327_vm0, %v702_v61  ;;  %960 = vst.msk [vmem:[#allocation3 + $0x28] sm:$0xff] %vm327_vm0, %v944_v62  ;;  %v2076_v1 = vpop.f32.mrb[12].mxu0  ;;  %2238 = vmatmul.mubr.msk.f32.gmra.mrb[34].mxu0 %vm327_vm0, %v977_v63  ;;  %v2140_v2 = vpop.f32.mrb[12].mxu1  ;;  %v740_v55 = vld [vmem:[#allocation3 + $0x50] sm:$0xff] }
 0x113   : > { %2278 = vmatmul.mubr.msk.f32.gmra.mrb[34].mxu1 %vm327_vm0, %v993_v0  ;;  %v2077_v4 = vpop.f32.mrb[13].mxu0  ;;  %v2141_v6 = vpop.f32.mrb[13].mxu1  ;;  %v403_v61 = vld [vmem:[#allocation2 + $0x58] sm:$0xff] }
 0x114   : > { %v2078_v7 = vadd.f32 %v2077_v4, %v2076_v1  ;;  %v2079_v8 = vpop.f32.mrb[14].mxu0  ;;  %v2142_v9 = vadd.f32 %v2141_v6, %v2140_v2  ;;  %v2143_v10 = vpop.f32.mrb[14].mxu1  ;;  %v741_v63 = vld [vmem:[#allocation3 + $0x58] sm:$0xff] }
 0x115   : > { %v2080_v12 = vpop.f32.mrb[15].mxu0  ;;  %v2144_v14 = vpop.f32.mrb[15].mxu1 }
 0x116   : > { %v703_v15 = vadd.f32 %v2078_v7, %v398_v3  ;;  %v2081_v16 = vadd.f32 %v2080_v12, %v2079_v8  ;;  %v945_v17 = vadd.f32 %v2142_v9, %v736_v5  ;;  %v2145_v18 = vadd.f32 %v2144_v14, %v2143_v10 }
 0x117   : > { %v978_v19 = vld [vmem:[#allocation2 + $0x20] sm:$0xff] }
 0x118   : > { %v994_v20 = vld [vmem:[#allocation3 + $0x20] sm:$0xff]  ;;  %720 = vst.msk [vmem:[#allocation2 + $0x30] sm:$0xff] %vm327_vm0, %v703_v15  ;;  %v704_v21 = vadd.f32 %v2081_v16, %v399_v11  ;;  %961 = vst.msk [vmem:[#allocation3 + $0x30] sm:$0xff] %vm327_vm0, %v945_v17  ;;  %v946_v22 = vadd.f32 %v2145_v18, %v737_v13  ;;  %2240 = vmatprep.mubr.msk.f32.mxu0 %vm327_vm0, %v978_v19 }
 0x119   : > { %2280 = vmatprep.mubr.msk.f32.mxu1 %vm327_vm0, %v994_v20  ;;  %v979_v23 = vld [vmem:[#allocation2 + $0x28] sm:$0xff]  ;;  %v404_v13 = vld [vmem:[#allocation2 + $0x60] sm:$0xff] }
 0x11a   : > { %v995_v24 = vld [vmem:[#allocation3 + $0x28] sm:$0xff]  ;;  %721 = vst.msk [vmem:[#allocation2 + $0x38] sm:$0xff] %vm327_vm0, %v704_v21  ;;  %962 = vst.msk [vmem:[#allocation3 + $0x38] sm:$0xff] %vm327_vm0, %v946_v22  ;;  %v2082_v25 = vpop.f32.mrb[16].mxu0  ;;  %2241 = vmatmul.mubr.msk.f32.gmra.mrb[36].mxu0 %vm327_vm0, %v979_v23  ;;  %v2146_v26 = vpop.f32.mrb[16].mxu1  ;;  %v742_v15 = vld [vmem:[#allocation3 + $0x60] sm:$0xff] }
 0x11b   : > { %2281 = vmatmul.mubr.msk.f32.gmra.mrb[36].mxu1 %vm327_vm0, %v995_v24  ;;  %v2083_v28 = vpop.f32.mrb[17].mxu0  ;;  %v2147_v30 = vpop.f32.mrb[17].mxu1  ;;  %v405_v21 = vld [vmem:[#allocation2 + $0x68] sm:$0xff] }
 0x11c   : > { %v2084_v31 = vadd.f32 %v2083_v28, %v2082_v25  ;;  %v2085_v32 = vpop.f32.mrb[18].mxu0  ;;  %v2148_v33 = vadd.f32 %v2147_v30, %v2146_v26  ;;  %v2149_v34 = vpop.f32.mrb[18].mxu1  ;;  %v743_v23 = vld [vmem:[#allocation3 + $0x68] sm:$0xff] }
 0x11d   : > { %v2086_v36 = vpop.f32.mrb[19].mxu0  ;;  %v2150_v38 = vpop.f32.mrb[19].mxu1 }
 0x11e   : > { %v705_v41 = vadd.f32 %v2084_v31, %v400_v27  ;;  %v2087_v42 = vadd.f32 %v2086_v36, %v2085_v32  ;;  %v947_v43 = vadd.f32 %v2148_v33, %v738_v29  ;;  %v2151_v44 = vadd.f32 %v2150_v38, %v2149_v34 }
 0x11f   : > { %v980_v45 = vld [vmem:[#allocation2 + $0x30] sm:$0xff] }
 0x120   : > { %v996_v46 = vld [vmem:[#allocation3 + $0x30] sm:$0xff]  ;;  %722 = vst.msk [vmem:[#allocation2 + $0x40] sm:$0xff] %vm327_vm0, %v705_v41  ;;  %v706_v47 = vadd.f32 %v2087_v42, %v401_v35  ;;  %963 = vst.msk [vmem:[#allocation3 + $0x40] sm:$0xff] %vm327_vm0, %v947_v43  ;;  %v948_v48 = vadd.f32 %v2151_v44, %v739_v37  ;;  %2243 = vmatprep.mubr.msk.f32.mxu0 %vm327_vm0, %v980_v45 }
 0x121   : > { %2283 = vmatprep.mubr.msk.f32.mxu1 %vm327_vm0, %v996_v46  ;;  %v981_v49 = vld [vmem:[#allocation2 + $0x38] sm:$0xff]  ;;  %v406_v37 = vld [vmem:[#allocation2 + $0x70] sm:$0xff] }
 0x122   : > { %v997_v50 = vld [vmem:[#allocation3 + $0x38] sm:$0xff]  ;;  %723 = vst.msk [vmem:[#allocation2 + $0x48] sm:$0xff] %vm327_vm0, %v706_v47  ;;  %964 = vst.msk [vmem:[#allocation3 + $0x48] sm:$0xff] %vm327_vm0, %v948_v48  ;;  %v2088_v51 = vpop.f32.mrb[20].mxu0  ;;  %2244 = vmatmul.mubr.msk.f32.gmra.mrb[38].mxu0 %vm327_vm0, %v981_v49  ;;  %v2152_v52 = vpop.f32.mrb[20].mxu1  ;;  %v744_v41 = vld [vmem:[#allocation3 + $0x70] sm:$0xff] }
 0x123   : > { %2284 = vmatmul.mubr.msk.f32.gmra.mrb[38].mxu1 %vm327_vm0, %v997_v50  ;;  %v2089_v54 = vpop.f32.mrb[21].mxu0  ;;  %v2153_v56 = vpop.f32.mrb[21].mxu1  ;;  %v407_v47 = vld [vmem:[#allocation2 + $0x78] sm:$0xff] }
 0x124   : > { %v2090_v57 = vadd.f32 %v2089_v54, %v2088_v51  ;;  %v2091_v58 = vpop.f32.mrb[22].mxu0  ;;  %v2154_v59 = vadd.f32 %v2153_v56, %v2152_v52  ;;  %v2155_v60 = vpop.f32.mrb[22].mxu1  ;;  %v745_v49 = vld [vmem:[#allocation3 + $0x78] sm:$0xff] }
 0x125   : > { %v2092_v62 = vpop.f32.mrb[23].mxu0  ;;  %v2156_v0 = vpop.f32.mrb[23].mxu1 }
 0x126   : > { %v707_v1 = vadd.f32 %v2090_v57, %v402_v53  ;;  %v2093_v2 = vadd.f32 %v2092_v62, %v2091_v58  ;;  %v949_v3 = vadd.f32 %v2154_v59, %v740_v55  ;;  %v2157_v4 = vadd.f32 %v2156_v0, %v2155_v60 }
 0x127   : > { %v982_v5 = vld [vmem:[#allocation2 + $0x40] sm:$0xff] }
 0x128   : > { %v998_v6 = vld [vmem:[#allocation3 + $0x40] sm:$0xff]  ;;  %724 = vst.msk [vmem:[#allocation2 + $0x50] sm:$0xff] %vm327_vm0, %v707_v1  ;;  %v708_v7 = vadd.f32 %v2093_v2, %v403_v61  ;;  %965 = vst.msk [vmem:[#allocation3 + $0x50] sm:$0xff] %vm327_vm0, %v949_v3  ;;  %v950_v8 = vadd.f32 %v2157_v4, %v741_v63  ;;  %2246 = vmatprep.mubr.msk.f32.mxu0 %vm327_vm0, %v982_v5 }
 0x129   : > { %2286 = vmatprep.mubr.msk.f32.mxu1 %vm327_vm0, %v998_v6  ;;  %v983_v9 = vld [vmem:[#allocation2 + $0x48] sm:$0xff] }
 0x12a   : > { %v999_v10 = vld [vmem:[#allocation3 + $0x48] sm:$0xff]  ;;  %725 = vst.msk [vmem:[#allocation2 + $0x58] sm:$0xff] %vm327_vm0, %v708_v7  ;;  %966 = vst.msk [vmem:[#allocation3 + $0x58] sm:$0xff] %vm327_vm0, %v950_v8  ;;  %v2094_v11 = vpop.f32.mrb[24].mxu0  ;;  %2247 = vmatmul.mubr.msk.f32.gmra.mrb[40].mxu0 %vm327_vm0, %v983_v9  ;;  %v2158_v12 = vpop.f32.mrb[24].mxu1 }
 0x12b   : > { %2287 = vmatmul.mubr.msk.f32.gmra.mrb[40].mxu1 %vm327_vm0, %v999_v10  ;;  %v2095_v14 = vpop.f32.mrb[25].mxu0  ;;  %v2159_v16 = vpop.f32.mrb[25].mxu1  ;;  %v2905_v9 = vld [vmem:[%s3100_s4] ss:$0 sm:$0xff] }
 0x12c   : > { %v2096_v17 = vadd.f32 %v2095_v14, %v2094_v11  ;;  %v2097_v18 = vpop.f32.mrb[26].mxu0  ;;  %v2160_v19 = vadd.f32 %v2159_v16, %v2158_v12  ;;  %v2161_v20 = vpop.f32.mrb[26].mxu1 }
 0x12d   : > { %v2098_v22 = vpop.f32.mrb[27].mxu0  ;;  %v2162_v24 = vpop.f32.mrb[27].mxu1 }
 0x12e   : > { %v709_v25 = vadd.f32 %v2096_v17, %v404_v13  ;;  %v2099_v26 = vadd.f32 %v2098_v22, %v2097_v18  ;;  %v951_v27 = vadd.f32 %v2160_v19, %v742_v15  ;;  %v2163_v28 = vadd.f32 %v2162_v24, %v2161_v20 }
 0x12f   : > { %v984_v29 = vld [vmem:[#allocation2 + $0x50] sm:$0xff] }
 0x130   : > { %v1000_v30 = vld [vmem:[#allocation3 + $0x50] sm:$0xff]  ;;  %726 = vst.msk [vmem:[#allocation2 + $0x60] sm:$0xff] %vm327_vm0, %v709_v25  ;;  %v710_v31 = vadd.f32 %v2099_v26, %v405_v21  ;;  %967 = vst.msk [vmem:[#allocation3 + $0x60] sm:$0xff] %vm327_vm0, %v951_v27  ;;  %v952_v32 = vadd.f32 %v2163_v28, %v743_v23  ;;  %2249 = vmatprep.mubr.msk.f32.mxu0 %vm327_vm0, %v984_v29 }
 0x131   : > { %2289 = vmatprep.mubr.msk.f32.mxu1 %vm327_vm0, %v1000_v30  ;;  %v985_v33 = vld [vmem:[#allocation2 + $0x58] sm:$0xff] }
 0x132   : > { %v1001_v34 = vld [vmem:[#allocation3 + $0x58] sm:$0xff]  ;;  %727 = vst.msk [vmem:[#allocation2 + $0x68] sm:$0xff] %vm327_vm0, %v710_v31  ;;  %968 = vst.msk [vmem:[#allocation3 + $0x68] sm:$0xff] %vm327_vm0, %v952_v32  ;;  %v2100_v35 = vpop.f32.mrb[28].mxu0  ;;  %2250 = vmatmul.mubr.msk.f32.gmra.mrb[42].mxu0 %vm327_vm0, %v985_v33  ;;  %v2164_v36 = vpop.f32.mrb[28].mxu1 }
 0x133   : > { %2290 = vmatmul.mubr.msk.f32.gmra.mrb[42].mxu1 %vm327_vm0, %v1001_v34  ;;  %v2101_v38 = vpop.f32.mrb[29].mxu0  ;;  %v2165_v42 = vpop.f32.mrb[29].mxu1 }
 0x134   : > { %v2102_v43 = vadd.f32 %v2101_v38, %v2100_v35  ;;  %v2103_v44 = vpop.f32.mrb[30].mxu0  ;;  %v2166_v45 = vadd.f32 %v2165_v42, %v2164_v36  ;;  %v2167_v46 = vpop.f32.mrb[30].mxu1 }
 0x135   : > { %v2104_v48 = vpop.f32.mrb[31].mxu0  ;;  %v2168_v50 = vpop.f32.mrb[31].mxu1 }
 0x136   : > { %v711_v51 = vadd.f32 %v2102_v43, %v406_v37  ;;  %v2105_v52 = vadd.f32 %v2104_v48, %v2103_v44  ;;  %v953_v53 = vadd.f32 %v2166_v45, %v744_v41  ;;  %v2169_v54 = vadd.f32 %v2168_v50, %v2167_v46 }
 0x137   : > { %v986_v55 = vld [vmem:[#allocation2 + $0x60] sm:$0xff] }
 0x138   : > { %v1002_v56 = vld [vmem:[#allocation3 + $0x60] sm:$0xff]  ;;  %728 = vst.msk [vmem:[#allocation2 + $0x70] sm:$0xff] %vm327_vm0, %v711_v51  ;;  %v712_v57 = vadd.f32 %v2105_v52, %v407_v47  ;;  %969 = vst.msk [vmem:[#allocation3 + $0x70] sm:$0xff] %vm327_vm0, %v953_v53  ;;  %v954_v58 = vadd.f32 %v2169_v54, %v745_v49  ;;  %2252 = vmatprep.mubr.msk.f32.mxu0 %vm327_vm0, %v986_v55 }
 0x139   : > { %2292 = vmatprep.mubr.msk.f32.mxu1 %vm327_vm0, %v1002_v56  ;;  %v987_v59 = vld [vmem:[#allocation2 + $0x68] sm:$0xff] }
 0x13a   : > { %v1003_v60 = vld [vmem:[#allocation3 + $0x68] sm:$0xff]  ;;  %729 = vst.msk [vmem:[#allocation2 + $0x78] sm:$0xff] %vm327_vm0, %v712_v57  ;;  %970 = vst.msk [vmem:[#allocation3 + $0x78] sm:$0xff] %vm327_vm0, %v954_v58  ;;  %2253 = vmatmul.mubr.msk.f32.gmra.mrb[44].mxu0 %vm327_vm0, %v987_v59 }
 0x13b   : > { %2293 = vmatmul.mubr.msk.f32.gmra.mrb[44].mxu1 %vm327_vm0, %v1003_v60 }
 0x13f   : > { %v988_v61 = vld [vmem:[#allocation2 + $0x70] sm:$0xff] }
 0x140   : > { %v1004_v62 = vld [vmem:[#allocation3 + $0x70] sm:$0xff]  ;;  %2255 = vmatprep.mubr.msk.f32.mxu0 %vm327_vm0, %v988_v61 }
 0x141   : > { %2295 = vmatprep.mubr.msk.f32.mxu1 %vm327_vm0, %v1004_v62  ;;  %v989_v63 = vld [vmem:[#allocation2 + $0x78] sm:$0xff] }
 0x142   : > { %v1005_v0 = vld [vmem:[#allocation3 + $0x78] sm:$0xff]  ;;  %2256 = vmatmul.mubr.msk.f32.gmra.mrb[46].mxu0 %vm327_vm0, %v989_v63 }
 0x143   : > { %2296 = vmatmul.mubr.msk.f32.gmra.mrb[46].mxu1 %vm327_vm0, %v1005_v0 }
 0x1dd   : > { %v2236_v1 = vpop.f32.mrb[32].mxu0 }
 0x1de   : > { %v2276_v2 = vpop.f32.mrb[32].mxu1  ;;  %2419 = vtanh.f32 %v2236_v1  ;;  %v1129_v3 = vpop.f32.mrb[33].mxu0 }
 0x1df   : > { %v1338_v4 = vpop.f32.mrb[33].mxu1  ;;  %2421 = vtanh.f32 %v2276_v2 }
 0x1e0   : > { %2423 = vtanh.f32 %v1129_v3 }
 0x1e1   : > { %2425 = vtanh.f32 %v1338_v4 }
 0x1e5   : > { %v2239_v5 = vpop.f32.mrb[34].mxu0 }
 0x1e6   : > { %v2279_v6 = vpop.f32.mrb[34].mxu1  ;;  %2427 = vtanh.f32 %v2239_v5  ;;  %v1139_v7 = vpop.f32.mrb[35].mxu0 }
 0x1e7   : > { %v1348_v8 = vpop.f32.mrb[35].mxu1  ;;  %2429 = vtanh.f32 %v2279_v6 }
 0x1e8   : > { %v2420_v10 = vpop.eup %2419  ;;  %2431 = vtanh.f32 %v1348_v8 }
 0x1e9   : > { %v2422_v11 = vpop.eup %2421  ;;  %v1440_v12 = vmul.f32 %v2420_v10, %v2905_v9  ;;  %2433 = vtanh.f32 %v1139_v7 }
 0x1ea   : > { %v2424_v13 = vpop.eup %2423  ;;  %v1520_v14 = vmul.f32 %v2422_v11, %v2905_v9 }
 0x1eb   : > { %v1458_v15 = vsel %vm327_vm0, %v1440_v12, 0.0  ;;  %v1439_v16 = vmul.f32 %v2424_v13, %v2905_v9  ;;  %v2426_v17 = vpop.eup %2425 }
 0x1ec   : > { %v1538_v18 = vsel %vm327_vm0, %v1520_v14, 0.0  ;;  %1459 = vadd.xlane.f32.xlu0 %v1458_v15  ;;  %v1519_v24 = vmul.f32 %v2426_v17, %v2905_v9 }
 0x1ed   : > { %1539 = vadd.xlane.f32.xlu1 %v1538_v18  ;;  %v2242_v19 = vpop.f32.mrb[36].mxu0  ;;  %v1455_v23 = vsel %vm327_vm0, %v1439_v16, 0.0 }
 0x1ee   : > { %v2282_v20 = vpop.f32.mrb[36].mxu1  ;;  %2435 = vtanh.f32 %v2242_v19  ;;  %v1149_v21 = vpop.f32.mrb[37].mxu0  ;;  %v1535_v29 = vsel %vm327_vm0, %v1519_v24, 0.0 }
 0x1ef   : > { %v1358_v22 = vpop.f32.mrb[37].mxu1  ;;  %2437 = vtanh.f32 %v1149_v21 }
 0x1f0   : > { %v2428_v25 = vpop.eup %2427  ;;  %1456 = vadd.xlane.f32.xlu0 %v1455_v23  ;;  %2439 = vtanh.f32 %v1358_v22 }
 0x1f1   : > { %v2430_v26 = vpop.eup %2429  ;;  %v1442_v27 = vmul.f32 %v2428_v25, %v2905_v9  ;;  %2441 = vtanh.f32 %v2282_v20 }
 0x1f2   : > { %v2432_v28 = vpop.eup %2431  ;;  %v1522_v31 = vmul.f32 %v2430_v26, %v2905_v9 }
 0x1f3   : > { %v1464_v30 = vsel %vm327_vm0, %v1442_v27, 0.0  ;;  %v2434_v32 = vpop.eup %2433  ;;  %v1521_v33 = vmul.f32 %v2432_v28, %v2905_v9 }
 0x1f4   : > { %1536 = vadd.xlane.f32.xlu0 %v1535_v29  ;;  %1465 = vadd.xlane.f32.xlu1 %v1464_v30  ;;  %v1544_v41 = vsel %vm327_vm0, %v1522_v31, 0.0  ;;  %v1441_v42 = vmul.f32 %v2434_v32, %v2905_v9 }
 0x1f5   : > { %v2245_v34 = vpop.f32.mrb[38].mxu0  ;;  %v1541_v38 = vsel %vm327_vm0, %v1521_v33, 0.0 }
 0x1f6   : > { %v2285_v35 = vpop.f32.mrb[38].mxu1  ;;  %2443 = vtanh.f32 %v2245_v34  ;;  %v1159_v36 = vpop.f32.mrb[39].mxu0  ;;  %v1461_v47 = vsel %vm327_vm0, %v1441_v42, 0.0 }
 0x1f7   : > { %v1368_v37 = vpop.f32.mrb[39].mxu1  ;;  %2445 = vtanh.f32 %v1159_v36 }
 0x1f8   : > { %v2436_v43 = vpop.eup %2435  ;;  %1542 = vadd.xlane.f32.xlu0 %v1541_v38  ;;  %1545 = vadd.xlane.f32.xlu1 %v1544_v41  ;;  %2447 = vtanh.f32 %v1368_v37 }
 0x1f9   : > { %v2438_v44 = vpop.eup %2437  ;;  %2449 = vtanh.f32 %v2285_v35  ;;  %v1444_v48 = vmul.f32 %v2436_v43, %v2905_v9 }
 0x1fa   : > { %v1443_v45 = vmul.f32 %v2438_v44, %v2905_v9  ;;  %v2440_v46 = vpop.eup %2439 }
 0x1fb   : > { %v2442_v49 = vpop.eup %2441  ;;  %v1523_v51 = vmul.f32 %v2440_v46, %v2905_v9  ;;  %v1470_v57 = vsel %vm327_vm0, %v1444_v48, 0.0 }
 0x1fc   : > { %1462 = vadd.xlane.f32.xlu1 %v1461_v47  ;;  %v1467_v50 = vsel %vm327_vm0, %v1443_v45, 0.0  ;;  %v1524_v58 = vmul.f32 %v2442_v49, %v2905_v9 }
 0x1fd   : > { %1468 = vadd.xlane.f32.xlu0 %v1467_v50  ;;  %v2248_v52 = vpop.f32.mrb[40].mxu0  ;;  %v1547_v56 = vsel %vm327_vm0, %v1523_v51, 0.0 }
 0x1fe   : > { %v2288_v53 = vpop.f32.mrb[40].mxu1  ;;  %2451 = vtanh.f32 %v2248_v52  ;;  %v1169_v54 = vpop.f32.mrb[41].mxu0  ;;  %v1550_v63 = vsel %vm327_vm0, %v1524_v58, 0.0 }
 0x1ff   : > { %v1378_v55 = vpop.f32.mrb[41].mxu1  ;;  %2453 = vtanh.f32 %v1169_v54 }
 0x200   : > { %v2444_v59 = vpop.eup %2443  ;;  %1471 = vadd.xlane.f32.xlu1 %v1470_v57  ;;  %2455 = vtanh.f32 %v1378_v55 }
 0x201   : > { %v2446_v60 = vpop.eup %2445  ;;  %1548 = vadd.xlane.f32.xlu0 %v1547_v56  ;;  %2457 = vtanh.f32 %v2288_v53  ;;  %v1446_v0 = vmul.f32 %v2444_v59, %v2905_v9 }
 0x202   : > { %v1445_v61 = vmul.f32 %v2446_v60, %v2905_v9  ;;  %v2448_v62 = vpop.eup %2447 }
 0x203   : > { %v2450_v1 = vpop.eup %2449  ;;  %v1525_v3 = vmul.f32 %v2448_v62, %v2905_v9  ;;  %v1476_v10 = vsel %vm327_vm0, %v1446_v0, 0.0 }
 0x204   : > { %1551 = vadd.xlane.f32.xlu1 %v1550_v63  ;;  %v1473_v2 = vsel %vm327_vm0, %v1445_v61, 0.0  ;;  %v1526_v11 = vmul.f32 %v2450_v1, %v2905_v9 }
 0x205   : > { %1474 = vadd.xlane.f32.xlu0 %v1473_v2  ;;  %v2251_v4 = vpop.f32.mrb[42].mxu0  ;;  %v1553_v8 = vsel %vm327_vm0, %v1525_v3, 0.0 }
 0x206   : > { %v2291_v5 = vpop.f32.mrb[42].mxu1  ;;  %2459 = vtanh.f32 %v2251_v4  ;;  %v1179_v6 = vpop.f32.mrb[43].mxu0  ;;  %v1556_v16 = vsel %vm327_vm0, %v1526_v11, 0.0 }
 0x207   : > { %v1388_v7 = vpop.f32.mrb[43].mxu1  ;;  %2461 = vtanh.f32 %v1179_v6 }
 0x208   : > { %v2452_v12 = vpop.eup %2451  ;;  %1477 = vadd.xlane.f32.xlu1 %v1476_v10  ;;  %2463 = vtanh.f32 %v1388_v7 }
 0x209   : > { %v2454_v13 = vpop.eup %2453  ;;  %1554 = vadd.xlane.f32.xlu0 %v1553_v8  ;;  %2465 = vtanh.f32 %v2291_v5  ;;  %v1448_v17 = vmul.f32 %v2452_v12, %v2905_v9 }
 0x20a   : > { %v1447_v14 = vmul.f32 %v2454_v13, %v2905_v9  ;;  %v2456_v15 = vpop.eup %2455 }
 0x20b   : > { %v2458_v18 = vpop.eup %2457  ;;  %v1527_v20 = vmul.f32 %v2456_v15, %v2905_v9  ;;  %v1482_v26 = vsel %vm327_vm0, %v1448_v17, 0.0 }
 0x20c   : > { %1557 = vadd.xlane.f32.xlu1 %v1556_v16  ;;  %v1479_v19 = vsel %vm327_vm0, %v1447_v14, 0.0  ;;  %v1528_v27 = vmul.f32 %v2458_v18, %v2905_v9 }
 0x20d   : > { %1480 = vadd.xlane.f32.xlu0 %v1479_v19  ;;  %v2254_v21 = vpop.f32.mrb[44].mxu0  ;;  %v1559_v25 = vsel %vm327_vm0, %v1527_v20, 0.0 }
 0x20e   : > { %v2294_v22 = vpop.f32.mrb[44].mxu1  ;;  %2467 = vtanh.f32 %v2254_v21  ;;  %v1189_v23 = vpop.f32.mrb[45].mxu0  ;;  %v1562_v32 = vsel %vm327_vm0, %v1528_v27, 0.0 }
 0x20f   : > { %v1398_v24 = vpop.f32.mrb[45].mxu1  ;;  %2469 = vtanh.f32 %v1189_v23 }
 0x210   : > { %v2460_v28 = vpop.eup %2459  ;;  %1483 = vadd.xlane.f32.xlu1 %v1482_v26  ;;  %2471 = vtanh.f32 %v1398_v24 }
 0x211   : > { %v2462_v29 = vpop.eup %2461  ;;  %1560 = vadd.xlane.f32.xlu0 %v1559_v25  ;;  %2473 = vtanh.f32 %v2294_v22  ;;  %v1450_v33 = vmul.f32 %v2460_v28, %v2905_v9 }
 0x212   : > { %v1449_v30 = vmul.f32 %v2462_v29, %v2905_v9  ;;  %v2464_v31 = vpop.eup %2463 }
 0x213   : > { %v2466_v34 = vpop.eup %2465  ;;  %v1529_v36 = vmul.f32 %v2464_v31, %v2905_v9  ;;  %v1488_v44 = vsel %vm327_vm0, %v1450_v33, 0.0 }
 0x214   : > { %1563 = vadd.xlane.f32.xlu1 %v1562_v32  ;;  %v1485_v35 = vsel %vm327_vm0, %v1449_v30, 0.0  ;;  %v1530_v45 = vmul.f32 %v2466_v34, %v2905_v9 }
 0x215   : > { %1486 = vadd.xlane.f32.xlu0 %v1485_v35  ;;  %v2257_v37 = vpop.f32.mrb[46].mxu0  ;;  %v1565_v43 = vsel %vm327_vm0, %v1529_v36, 0.0 }
 0x216   : > { %v2297_v38 = vpop.f32.mrb[46].mxu1  ;;  %2475 = vtanh.f32 %v2257_v37  ;;  %v1199_v41 = vpop.f32.mrb[47].mxu0  ;;  %v1568_v50 = vsel %vm327_vm0, %v1530_v45, 0.0 }
 0x217   : > { %v1408_v42 = vpop.f32.mrb[47].mxu1  ;;  %2477 = vtanh.f32 %v1199_v41 }
 0x218   : > { %v2468_v46 = vpop.eup %2467  ;;  %2479 = vtanh.f32 %v2297_v38  ;;  %1489 = vadd.xlane.f32.xlu1 %v1488_v44 }
 0x219   : > { %v2470_v47 = vpop.eup %2469  ;;  %2481 = vtanh.f32 %v1408_v42  ;;  %1566 = vadd.xlane.f32.xlu0 %v1565_v43  ;;  %v1452_v51 = vmul.f32 %v2468_v46, %v2905_v9 }
 0x21a   : > { %v1451_v48 = vmul.f32 %v2470_v47, %v2905_v9  ;;  %v2472_v49 = vpop.eup %2471 }
 0x21b   : > { %v2474_v52 = vpop.eup %2473  ;;  %v1531_v54 = vmul.f32 %v2472_v49, %v2905_v9  ;;  %v1494_v56 = vsel %vm327_vm0, %v1452_v51, 0.0 }
 0x21c   : > { %1569 = vadd.xlane.f32.xlu1 %v1568_v50  ;;  %v1491_v53 = vsel %vm327_vm0, %v1451_v48, 0.0  ;;  %v1532_v57 = vmul.f32 %v2474_v52, %v2905_v9 }
 0x21d   : > { %1492 = vadd.xlane.f32.xlu0 %v1491_v53  ;;  %v1571_v55 = vsel %vm327_vm0, %v1531_v54, 0.0 }
 0x21e   : > { %v1574_v63 = vsel %vm327_vm0, %v1532_v57, 0.0 }
 0x220   : > { %v2476_v58 = vpop.eup %2475  ;;  %1495 = vadd.xlane.f32.xlu1 %v1494_v56 }
 0x221   : > { %v2478_v59 = vpop.eup %2477  ;;  %1572 = vadd.xlane.f32.xlu0 %v1571_v55  ;;  %v1454_v0 = vmul.f32 %v2476_v58, %v2905_v9 }
 0x222   : > { %v2480_v60 = vpop.eup %2479  ;;  %v1453_v61 = vmul.f32 %v2478_v59, %v2905_v9 }
 0x223   : > { %v2482_v62 = vpop.eup %2481  ;;  %v1534_v1 = vmul.f32 %v2480_v60, %v2905_v9  ;;  %v1500_v5 = vsel %vm327_vm0, %v1454_v0, 0.0 }
 0x224   : > { %1575 = vadd.xlane.f32.xlu1 %v1574_v63  ;;  %v1497_v2 = vsel %vm327_vm0, %v1453_v61, 0.0  ;;  %v1533_v3 = vmul.f32 %v2482_v62, %v2905_v9 }
 0x225   : > { %1498 = vadd.xlane.f32.xlu0 %v1497_v2  ;;  %v1580_v6 = vsel %vm327_vm0, %v1534_v1, 0.0 }
 0x226   : > { %v1577_v4 = vsel %vm327_vm0, %v1533_v3, 0.0 }
 0x228   : > { %1501 = vadd.xlane.f32.xlu1 %v1500_v5 }
 0x229   : > { %1578 = vadd.xlane.f32.xlu0 %v1577_v4 }
 0x22c   : > { %1581 = vadd.xlane.f32.xlu1 %v1580_v6 }
 0x279   : > { %v1460_v7 = vpop.xlane.xlu0 %1459 }
 0x27a   : > { %v1540_v8 = vpop.xlane.xlu1 %1539  ;;  %v1504_v10 = vadd.f32 1e-06, %v1460_v7 }
 0x27b   : > { %v1584_v11 = vadd.f32 1e-06, %v1540_v8 }
 0x27d   : > { %v1600_v12 = vmax.f32 %v1504_v10, %v1584_v11  ;;  %v1457_v13 = vpop.xlane.xlu0 %1456 }
 0x27e   : > { %v1503_v19 = vadd.f32 1e-06, %v1457_v13 }
 0x27f   : > { %v1616_v14 = vsub.f32 %v1504_v10, %v1600_v12  ;;  %v1664_v15 = vsub.f32 %v1584_v11, %v1600_v12 }
 0x281   : > { %v1633_v16 = vmul.f32 1.442695, %v1616_v14  ;;  %v1681_v9 = vmul.f32 1.442695, %v1664_v15  ;;  %v1537_v17 = vpop.xlane.xlu0 %1536  ;;  %v1466_v18 = vpop.xlane.xlu1 %1465 }
 0x282   : > { %v1583_v20 = vadd.f32 1e-06, %v1537_v17  ;;  %v1506_v26 = vadd.f32 1e-06, %v1466_v18 }
 0x283   : > { %2483 = vpow2.f32 %v1633_v16 }
 0x284   : > { %2485 = vpow2.f32 %v1681_v9  ;;  %v1599_v21 = vmax.f32 %v1503_v19, %v1583_v20 }
 0x285   : > { %v1543_v22 = vpop.xlane.xlu0 %1542  ;;  %v1546_v23 = vpop.xlane.xlu1 %1545 }
 0x286   : > { %v1615_v24 = vsub.f32 %v1503_v19, %v1599_v21  ;;  %v1663_v25 = vsub.f32 %v1583_v20, %v1599_v21  ;;  %v1586_v27 = vadd.f32 1e-06, %v1546_v23  ;;  %v1585_v31 = vadd.f32 1e-06, %v1543_v22 }
 0x288   : > { %v1631_v28 = vmul.f32 1.442695, %v1615_v24  ;;  %v1679_v29 = vmul.f32 1.442695, %v1663_v25  ;;  %v1602_v30 = vmax.f32 %v1506_v26, %v1586_v27 }
 0x289   : > { %v1463_v32 = vpop.xlane.xlu1 %1462 }
 0x28a   : > { %2487 = vpow2.f32 %v1631_v28  ;;  %v1618_v33 = vsub.f32 %v1506_v26, %v1602_v30  ;;  %v1666_v34 = vsub.f32 %v1586_v27, %v1602_v30  ;;  %v1505_v35 = vadd.f32 1e-06, %v1463_v32  ;;  %v1469_v36 = vpop.xlane.xlu0 %1468 }
 0x28b   : > { %2489 = vpow2.f32 %v1679_v29  ;;  %v1507_v49 = vadd.f32 1e-06, %v1469_v36 }
 0x28c   : > { %v1637_v37 = vmul.f32 1.442695, %v1618_v33  ;;  %v1685_v38 = vmul.f32 1.442695, %v1666_v34  ;;  %v1601_v41 = vmax.f32 %v1505_v35, %v1585_v31 }
 0x28d   : > { %v2484_v42 = vpop.eup %2483  ;;  %v1472_v43 = vpop.xlane.xlu1 %1471 }
 0x28e   : > { %v2486_v44 = vpop.eup %2485  ;;  %2491 = vpow2.f32 %v1637_v37  ;;  %v1617_v45 = vsub.f32 %v1505_v35, %v1601_v41  ;;  %v1665_v46 = vsub.f32 %v1585_v31, %v1601_v41  ;;  %v1549_v47 = vpop.xlane.xlu0 %1548  ;;  %v1508_v55 = vadd.f32 1e-06, %v1472_v43 }
 0x28f   : > { %v1712_v48 = vadd.f32 %v2486_v44, %v2484_v42  ;;  %2493 = vpow2.f32 %v1685_v38  ;;  %v1587_v50 = vadd.f32 1e-06, %v1549_v47 }
 0x290   : > { %v1635_v51 = vmul.f32 1.442695, %v1617_v45  ;;  %v1683_v52 = vmul.f32 1.442695, %v1665_v46 }
 0x291   : > { %2495 = vrcp.f32 %v1712_v48  ;;  %v1603_v53 = vmax.f32 %v1507_v49, %v1587_v50  ;;  %v1552_v54 = vpop.xlane.xlu1 %1551 }
 0x292   : > { %2497 = vpow2.f32 %v1635_v51  ;;  %v1588_v56 = vadd.f32 1e-06, %v1552_v54  ;;  %v1475_v57 = vpop.xlane.xlu0 %1474 }
 0x293   : > { %2499 = vpow2.f32 %v1683_v52  ;;  %v1619_v58 = vsub.f32 %v1507_v49, %v1603_v53  ;;  %v1667_v59 = vsub.f32 %v1587_v50, %v1603_v53  ;;  %v1509_v6 = vadd.f32 1e-06, %v1475_v57 }
 0x294   : > { %v2971_v60 = vpop.eup %2487  ;;  %v1604_v61 = vmax.f32 %v1508_v55, %v1588_v56 }
 0x295   : > { %v2973_v62 = vpop.eup %2489  ;;  %v1639_v63 = vmul.f32 1.442695, %v1619_v58  ;;  %v1687_v0 = vmul.f32 1.442695, %v1667_v59  ;;  %v1478_v1 = vpop.xlane.xlu1 %1477  ;;  %v2580_v58 = vld [vmem:[#allocation3] sm:$0xff] }
 0x296   : > { %v1711_v2 = vadd.f32 %v2973_v62, %v2971_v60  ;;  %v1620_v3 = vsub.f32 %v1508_v55, %v1604_v61  ;;  %v1668_v4 = vsub.f32 %v1588_v56, %v1604_v61  ;;  %v1555_v5 = vpop.xlane.xlu0 %1554  ;;  %v1510_v16 = vadd.f32 1e-06, %v1478_v1  ;;  %v2579_v56 = vld [vmem:[#allocation2] sm:$0xff] }
 0x297   : > { %2501 = vpow2.f32 %v1639_v63  ;;  %v1589_v7 = vadd.f32 1e-06, %v1555_v5 }
 0x298   : > { %v2977_v8 = vpop.eup %2491  ;;  %2503 = vrcp.f32 %v1711_v2  ;;  %v1641_v10 = vmul.f32 1.442695, %v1620_v3  ;;  %v1689_v11 = vmul.f32 1.442695, %v1668_v4 }
 0x299   : > { %v2979_v12 = vpop.eup %2493  ;;  %2505 = vpow2.f32 %v1687_v0  ;;  %v1605_v13 = vmax.f32 %v1509_v6, %v1589_v7  ;;  %v1558_v14 = vpop.xlane.xlu1 %1557 }
 0x29a   : > { %v1714_v15 = vadd.f32 %v2979_v12, %v2977_v8  ;;  %2507 = vpow2.f32 %v1641_v10  ;;  %v1590_v9 = vadd.f32 1e-06, %v1558_v14  ;;  %v1481_v17 = vpop.xlane.xlu0 %1480 }
 0x29b   : > { %v2496_v18 = vpop.eup %2495  ;;  %2509 = vpow2.f32 %v1689_v11  ;;  %v1621_v19 = vsub.f32 %v1509_v6, %v1605_v13  ;;  %v1669_v20 = vsub.f32 %v1589_v7, %v1605_v13  ;;  %v1511_v35 = vadd.f32 1e-06, %v1481_v17  ;;  %v2581_v13 = vld [vmem:[#allocation2 + $0x18] sm:$0xff] }
 0x29c   : > { %v2983_v21 = vpop.eup %2497  ;;  %v1744_v22 = vmul.f32 %v2496_v18, %v2484_v42  ;;  %v1776_v23 = vmul.f32 %v2496_v18, %v2486_v44  ;;  %2511 = vrcp.f32 %v1714_v15  ;;  %v1606_v24 = vmax.f32 %v1510_v16, %v1590_v9  ;;  %v2582_v15 = vld [vmem:[#allocation3 + $0x18] sm:$0xff] }
 0x29d   : > { %v2985_v25 = vpop.eup %2499  ;;  %v1643_v26 = vmul.f32 1.442695, %v1621_v19  ;;  %v1691_v27 = vmul.f32 1.442695, %v1669_v20  ;;  %v1484_v28 = vpop.xlane.xlu1 %1483 }
 0x29e   : > { %v1760_v29 = vmul.f32 %v1744_v22, %v2840_v39  ;;  %v1792_v30 = vmul.f32 %v1776_v23, %v2842_v40  ;;  %v1713_v31 = vadd.f32 %v2985_v25, %v2983_v21  ;;  %v1622_v32 = vsub.f32 %v1510_v16, %v1606_v24  ;;  %v1561_v33 = vpop.xlane.xlu0 %1560 }
 0x29f   : > { %2513 = vpow2.f32 %v1643_v26  ;;  %v1670_v34 = vsub.f32 %v1590_v9, %v1606_v24  ;;  %v1591_v36 = vadd.f32 1e-06, %v1561_v33  ;;  %v1512_v44 = vadd.f32 1e-06, %v1484_v28 }
 0x2a0   : > { %v1808_v37 = vadd.f32 %v1792_v30, %v1760_v29  ;;  %2515 = vrcp.f32 %v1713_v31  ;;  %v1645_v39 = vmul.f32 1.442695, %v1622_v32  ;;  %v2583_v32 = vld [vmem:[#allocation2 + $0x10] sm:$0xff] }
 0x2a1   : > { %v2997_v38 = vpop.eup %2501  ;;  %2517 = vpow2.f32 %v1691_v27  ;;  %v1693_v40 = vmul.f32 1.442695, %v1670_v34  ;;  %v1607_v41 = vmax.f32 %v1511_v35, %v1591_v36  ;;  %v1564_v42 = vpop.xlane.xlu1 %1563  ;;  %v2584_v34 = vld [vmem:[#allocation3 + $0x10] sm:$0xff] }
 0x2a2   : > { %v2504_v43 = vpop.eup %2503  ;;  %1824 = vst.msk [vmem:[%s2995_s15 + $0x8] sm:$0xff] %vm327_vm0, %v1808_v37  ;;  %2519 = vpow2.f32 %v1645_v39  ;;  %v1592_v45 = vadd.f32 1e-06, %v1564_v42  ;;  %v1487_v46 = vpop.xlane.xlu0 %1486 }
 0x2a3   : > { %v3001_v47 = vpop.eup %2505  ;;  %v1743_v48 = vmul.f32 %v2504_v43, %v2971_v60  ;;  %v1775_v49 = vmul.f32 %v2504_v43, %v2973_v62  ;;  %2521 = vpow2.f32 %v1693_v40  ;;  %v1623_v50 = vsub.f32 %v1511_v35, %v1607_v41 }
 0x2a4   : > { %v3005_v51 = vpop.eup %2507  ;;  %v1715_v52 = vadd.f32 %v3001_v47, %v2997_v38  ;;  %v1671_v53 = vsub.f32 %v1591_v36, %v1607_v41  ;;  %v1608_v54 = vmax.f32 %v1512_v44, %v1592_v45  ;;  %v1513_v10 = vadd.f32 1e-06, %v1487_v46 }
 0x2a5   : > { %v3009_v55 = vpop.eup %2509  ;;  %v1759_v57 = vmul.f32 %v2579_v56, %v1743_v48  ;;  %v1791_v59 = vmul.f32 %v2580_v58, %v1775_v49  ;;  %v1647_v61 = vmul.f32 1.442695, %v1623_v50  ;;  %v1490_v63 = vpop.xlane.xlu1 %1489 }
 0x2a6   : > { %v2512_v60 = vpop.eup %2511  ;;  %2523 = vrcp.f32 %v1715_v52  ;;  %v1716_v62 = vadd.f32 %v3009_v55, %v3005_v51  ;;  %v1695_v0 = vmul.f32 1.442695, %v1671_v53  ;;  %v1624_v1 = vsub.f32 %v1512_v44, %v1608_v54  ;;  %v1567_v2 = vpop.xlane.xlu0 %1566 }
 0x2a7   : > { %v1807_v3 = vadd.f32 %v1791_v59, %v1759_v57  ;;  %v1746_v4 = vmul.f32 %v2512_v60, %v2977_v8  ;;  %v1778_v5 = vmul.f32 %v2512_v60, %v2979_v12  ;;  %2525 = vpow2.f32 %v1647_v61 }
 0x2a8   : > { %2527 = vrcp.f32 %v1716_v62  ;;  %v1649_v6 = vmul.f32 1.442695, %v1624_v1  ;;  %v1672_v7 = vsub.f32 %v1592_v45, %v1608_v54  ;;  %v1593_v9 = vadd.f32 1e-06, %v1567_v2  ;;  %v2585_v62 = vld [vmem:[#allocation2 + $0x20] sm:$0xff] }
 0x2a9   : > { %v3015_v11 = vpop.eup %2513  ;;  %1823 = vst.msk [vmem:[%s2995_s15] sm:$0xff] %vm327_vm0, %v1807_v3  ;;  %v1762_v14 = vmul.f32 %v2581_v13, %v1746_v4  ;;  %v1794_v16 = vmul.f32 %v2582_v15, %v1778_v5  ;;  %2529 = vpow2.f32 %v1695_v0  ;;  %v1570_v17 = vpop.xlane.xlu1 %1569  ;;  %v1514_v12 = vadd.f32 1e-06, %v1490_v63  ;;  %v2586_v1 = vld [vmem:[#allocation3 + $0x20] sm:$0xff] }
 0x2aa   : > { %v2516_v18 = vpop.eup %2515  ;;  %2531 = vpow2.f32 %v1649_v6  ;;  %v1697_v8 = vmul.f32 1.442695, %v1672_v7  ;;  %v1594_v19 = vadd.f32 1e-06, %v1570_v17  ;;  %v1493_v20 = vpop.xlane.xlu0 %1492  ;;  %v1609_v27 = vmax.f32 %v1513_v10, %v1593_v9 }
 0x2ab   : > { %v3019_v22 = vpop.eup %2517  ;;  %v1810_v23 = vadd.f32 %v1794_v16, %v1762_v14  ;;  %v1745_v24 = vmul.f32 %v2516_v18, %v2983_v21  ;;  %v1777_v26 = vmul.f32 %v2516_v18, %v2985_v25  ;;  %v1515_v48 = vadd.f32 1e-06, %v1493_v20  ;;  %v2588_v14 = vld [vmem:[#allocation3 + $0x28] sm:$0xff] }
 0x2ac   : > { %v3023_v28 = vpop.eup %2519  ;;  %v1717_v29 = vadd.f32 %v3019_v22, %v3015_v11  ;;  %2533 = vpow2.f32 %v1697_v8  ;;  %v1610_v30 = vmax.f32 %v1514_v12, %v1594_v19  ;;  %v1625_v36 = vsub.f32 %v1513_v10, %v1609_v27  ;;  %v2587_v10 = vld [vmem:[#allocation2 + $0x28] sm:$0xff] }
 0x2ad   : > { %v3027_v31 = vpop.eup %2521  ;;  %1826 = vst.msk [vmem:[%s2995_s15 + $0x18] sm:$0xff] %vm327_vm0, %v1810_v23  ;;  %v1761_v33 = vmul.f32 %v2583_v32, %v1745_v24  ;;  %v1793_v35 = vmul.f32 %v2584_v34, %v1777_v26  ;;  %v1673_v21 = vsub.f32 %v1593_v9, %v1609_v27  ;;  %v1496_v25 = vpop.xlane.xlu1 %1495 }
 0x2ae   : > { %2535 = vrcp.f32 %v1717_v29  ;;  %v1718_v37 = vadd.f32 %v3027_v31, %v3023_v28  ;;  %v1626_v39 = vsub.f32 %v1514_v12, %v1610_v30  ;;  %v1674_v40 = vsub.f32 %v1594_v19, %v1610_v30  ;;  %v1573_v41 = vpop.xlane.xlu0 %1572 }
 0x2af   : > { %v1809_v42 = vadd.f32 %v1793_v35, %v1761_v33  ;;  %v1651_v43 = vmul.f32 1.442695, %v1625_v36  ;;  %v1699_v44 = vmul.f32 1.442695, %v1673_v21  ;;  %v1595_v49 = vadd.f32 1e-06, %v1573_v41 }
 0x2b0   : > { %v2524_v45 = vpop.eup %2523  ;;  %2537 = vrcp.f32 %v1718_v37  ;;  %v1653_v46 = vmul.f32 1.442695, %v1626_v39  ;;  %v1701_v54 = vmul.f32 1.442695, %v1674_v40  ;;  %v1516_v58 = vadd.f32 1e-06, %v1496_v25 }
 0x2b1   : > { %v3033_v50 = vpop.eup %2525  ;;  %1825 = vst.msk [vmem:[%s2995_s15 + $0x10] sm:$0xff] %vm327_vm0, %v1809_v42  ;;  %v1747_v52 = vmul.f32 %v2524_v45, %v2997_v38  ;;  %v1779_v53 = vmul.f32 %v2524_v45, %v3001_v47  ;;  %2539 = vpow2.f32 %v1651_v43  ;;  %v1576_v56 = vpop.xlane.xlu1 %1575  ;;  %v1611_v59 = vmax.f32 %v1515_v48, %v1595_v49  ;;  %v2589_v25 = vld [vmem:[#allocation2 + $0x30] sm:$0xff] }
 0x2b2   : > { %v2528_v57 = vpop.eup %2527  ;;  %2541 = vpow2.f32 %v1699_v44  ;;  %v1596_v61 = vadd.f32 1e-06, %v1576_v56  ;;  %v1499_v63 = vpop.xlane.xlu0 %1498  ;;  %v2590_v39 = vld [vmem:[#allocation3 + $0x30] sm:$0xff] }
 0x2b3   : > { %v3039_v60 = vpop.eup %2529  ;;  %v1763_v0 = vmul.f32 %v2585_v62, %v1747_v52  ;;  %v1795_v2 = vmul.f32 %v2586_v1, %v1779_v53  ;;  %v1748_v3 = vmul.f32 %v2528_v57, %v3005_v51  ;;  %v1780_v38 = vmul.f32 %v2528_v57, %v3009_v55 }
 0x2b4   : > { %v3043_v47 = vpop.eup %2531  ;;  %v1719_v4 = vadd.f32 %v3039_v60, %v3033_v50  ;;  %2543 = vpow2.f32 %v1653_v46  ;;  %v1627_v5 = vsub.f32 %v1515_v48, %v1611_v59  ;;  %v1675_v6 = vsub.f32 %v1595_v49, %v1611_v59  ;;  %v2591_v46 = vld [vmem:[#allocation2 + $0x38] sm:$0xff] }
 0x2b5   : > { %v1811_v7 = vadd.f32 %v1795_v2, %v1763_v0  ;;  %v1764_v13 = vmul.f32 %v2587_v10, %v1748_v3  ;;  %v1796_v15 = vmul.f32 %v2588_v14, %v1780_v38  ;;  %2545 = vpow2.f32 %v1701_v54  ;;  %v1502_v16 = vpop.xlane.xlu1 %1501  ;;  %v2592_v49 = vld [vmem:[#allocation3 + $0x38] sm:$0xff] }
 0x2b6   : > { %v3047_v51 = vpop.eup %2533  ;;  %2547 = vrcp.f32 %v1719_v4  ;;  %v1655_v55 = vmul.f32 1.442695, %v1627_v5  ;;  %v1703_v9 = vmul.f32 1.442695, %v1675_v6  ;;  %v1612_v17 = vmax.f32 %v1516_v58, %v1596_v61  ;;  %v1579_v18 = vpop.xlane.xlu0 %1578  ;;  %v2593_v5 = vld [vmem:[#allocation2 + $0x40] sm:$0xff] }
 0x2b7   : > { %1827 = vst.msk [vmem:[%s2995_s15 + $0x20] sm:$0xff] %vm327_vm0, %v1811_v7  ;;  %v1812_v8 = vadd.f32 %v1796_v15, %v1764_v13  ;;  %v1720_v12 = vadd.f32 %v3047_v51, %v3043_v47  ;;  %v1517_v19 = vadd.f32 1e-06, %v1499_v63  ;;  %v1597_v26 = vadd.f32 1e-06, %v1579_v18  ;;  %v2594_v7 = vld [vmem:[#allocation3 + $0x40] sm:$0xff] }
 0x2b8   : > { %v2536_v20 = vpop.eup %2535  ;;  %2549 = vpow2.f32 %v1655_v55  ;;  %v1628_v23 = vsub.f32 %v1516_v58, %v1612_v17  ;;  %v1676_v24 = vsub.f32 %v1596_v61, %v1612_v17  ;;  %v1518_v30 = vadd.f32 1e-06, %v1502_v16  ;;  %v2595_v55 = vld [vmem:[#allocation2 + $0x48] sm:$0xff] }
 0x2b9   : > { %1828 = vst.msk [vmem:[%s2995_s15 + $0x28] sm:$0xff] %vm327_vm0, %v1812_v8  ;;  %v1749_v27 = vmul.f32 %v2536_v20, %v3015_v11  ;;  %v1781_v29 = vmul.f32 %v2536_v20, %v3019_v22  ;;  %2551 = vrcp.f32 %v1720_v12  ;;  %v1582_v32 = vpop.xlane.xlu1 %1581  ;;  %v1613_v36 = vmax.f32 %v1517_v19, %v1597_v26  ;;  %v2596_v17 = vld [vmem:[#allocation3 + $0x48] sm:$0xff] }
 0x2ba   : > { %v2538_v33 = vpop.eup %2537  ;;  %2553 = vpow2.f32 %v1703_v9  ;;  %v1657_v34 = vmul.f32 1.442695, %v1628_v23  ;;  %v1705_v35 = vmul.f32 1.442695, %v1676_v24  ;;  %v1598_v44 = vadd.f32 1e-06, %v1582_v32 }
 0x2bb   : > { %v3057_v21 = vpop.eup %2539  ;;  %v1765_v37 = vmul.f32 %v2589_v25, %v1749_v27  ;;  %v1797_v40 = vmul.f32 %v2590_v39, %v1781_v29  ;;  %v1750_v41 = vmul.f32 %v2538_v33, %v3023_v28  ;;  %v1782_v11 = vmul.f32 %v2538_v33, %v3027_v31  ;;  %v2597_v27 = vld [vmem:[#allocation2 + $0x50] sm:$0xff]  ;;  %v2599_v39 = vld [vmem:[#allocation2 + $0x58] sm:$0xff] }
 0x2bc   : > { %v2542_v42 = vpop.eup %2541  ;;  %2555 = vpow2.f32 %v1657_v34  ;;  %v1629_v22 = vsub.f32 %v1517_v19, %v1613_v36  ;;  %v1677_v43 = vsub.f32 %v1597_v26, %v1613_v36  ;;  %v1614_v57 = vmax.f32 %v1518_v30, %v1598_v44 }
 0x2bd   : > { %v1813_v45 = vadd.f32 %v1797_v40, %v1765_v37  ;;  %v1766_v48 = vmul.f32 %v2591_v46, %v1750_v41  ;;  %v1798_v52 = vmul.f32 %v2592_v49, %v1782_v11  ;;  %v1721_v53 = vadd.f32 %v2542_v42, %v3057_v21 }
 0x2be   : > { %v2544_v54 = vpop.eup %2543  ;;  %2557 = vpow2.f32 %v1705_v35  ;;  %v1659_v56 = vmul.f32 1.442695, %v1629_v22  ;;  %v1707_v28 = vmul.f32 1.442695, %v1677_v43  ;;  %v1630_v63 = vsub.f32 %v1518_v30, %v1614_v57  ;;  %v2598_v30 = vld [vmem:[#allocation3 + $0x50] sm:$0xff] }
 0x2bf   : > { %v2546_v31 = vpop.eup %2545  ;;  %1829 = vst.msk [vmem:[%s2995_s15 + $0x30] sm:$0xff] %vm327_vm0, %v1813_v45  ;;  %v1814_v58 = vadd.f32 %v1798_v52, %v1766_v48  ;;  %2559 = vrcp.f32 %v1721_v53  ;;  %v1678_v62 = vsub.f32 %v1598_v44, %v1614_v57  ;;  %v2601_v45 = vld [vmem:[#allocation2 + $0x60] sm:$0xff]  ;;  %v2603_v57 = vld [vmem:[#allocation2 + $0x68] sm:$0xff] }
 0x2c0   : > { %v2548_v59 = vpop.eup %2547  ;;  %v1722_v61 = vadd.f32 %v2546_v31, %v2544_v54  ;;  %2561 = vpow2.f32 %v1659_v56  ;;  %v1661_v3 = vmul.f32 1.442695, %v1630_v63  ;;  %v2602_v48 = vld [vmem:[#allocation3 + $0x60] sm:$0xff] }
 0x2c1   : > { %1830 = vst.msk [vmem:[%s2995_s15 + $0x38] sm:$0xff] %vm327_vm0, %v1814_v58  ;;  %v1751_v0 = vmul.f32 %v2548_v59, %v3033_v50  ;;  %v1783_v1 = vmul.f32 %v2548_v59, %v3039_v60  ;;  %2563 = vpow2.f32 %v1707_v28  ;;  %v1709_v38 = vmul.f32 1.442695, %v1678_v62  ;;  %v2604_v58 = vld [vmem:[#allocation3 + $0x68] sm:$0xff] }
 0x2c2   : > { %v2550_v2 = vpop.eup %2549  ;;  %2565 = vrcp.f32 %v1722_v61 }
 0x2c3   : > { %v2552_v4 = vpop.eup %2551  ;;  %v1767_v6 = vmul.f32 %v2593_v5, %v1751_v0  ;;  %v1799_v10 = vmul.f32 %v2594_v7, %v1783_v1  ;;  %2567 = vpow2.f32 %v1661_v3  ;;  %v2605_v0 = vld [vmem:[#allocation2 + $0x70] sm:$0xff]  ;;  %v2607_v7 = vld [vmem:[#allocation2 + $0x78] sm:$0xff] }
 0x2c4   : > { %v2554_v13 = vpop.eup %2553  ;;  %v1752_v14 = vmul.f32 %v2552_v4, %v3043_v47  ;;  %v1784_v15 = vmul.f32 %v2552_v4, %v3047_v51  ;;  %2569 = vpow2.f32 %v1709_v38 }
 0x2c5   : > { %v1815_v50 = vadd.f32 %v1799_v10, %v1767_v6  ;;  %v1723_v60 = vadd.f32 %v2554_v13, %v2550_v2 }
 0x2c6   : > { %v2556_v16 = vpop.eup %2555  ;;  %v1768_v9 = vmul.f32 %v2595_v55, %v1752_v14  ;;  %v1800_v18 = vmul.f32 %v2596_v17, %v1784_v15 }
 0x2c7   : > { %1831 = vst.msk [vmem:[%s2995_s15 + $0x40] sm:$0xff] %vm327_vm0, %v1815_v50  ;;  %2571 = vrcp.f32 %v1723_v60 }
 0x2c8   : > { %v2558_v8 = vpop.eup %2557  ;;  %v1816_v12 = vadd.f32 %v1800_v18, %v1768_v9 }
 0x2c9   : > { %v2560_v19 = vpop.eup %2559  ;;  %v1724_v20 = vadd.f32 %v2558_v8, %v2556_v16 }
 0x2ca   : > { %v2562_v47 = vpop.eup %2561  ;;  %1832 = vst.msk [vmem:[%s2995_s15 + $0x48] sm:$0xff] %vm327_vm0, %v1816_v12  ;;  %v1753_v51 = vmul.f32 %v2560_v19, %v3057_v21  ;;  %v1785_v23 = vmul.f32 %v2560_v19, %v2542_v42  ;;  %v2600_v21 = vld [vmem:[#allocation3 + $0x58] sm:$0xff] }
 0x2cb   : > { %v2564_v24 = vpop.eup %2563  ;;  %2573 = vrcp.f32 %v1724_v20 }
 0x2cc   : > { %v2566_v26 = vpop.eup %2565  ;;  %v1769_v29 = vmul.f32 %v2597_v27, %v1753_v51  ;;  %v1801_v32 = vmul.f32 %v2598_v30, %v1785_v23  ;;  %v1725_v33 = vadd.f32 %v2564_v24, %v2562_v47 }
 0x2cd   : > { %v1754_v34 = vmul.f32 %v2566_v26, %v2544_v54  ;;  %v1786_v35 = vmul.f32 %v2566_v26, %v2546_v31  ;;  %v2568_v36 = vpop.eup %2567 }
 0x2ce   : > { %v1817_v25 = vadd.f32 %v1801_v32, %v1769_v29  ;;  %2575 = vrcp.f32 %v1725_v33  ;;  %v2570_v37 = vpop.eup %2569 }
 0x2cf   : > { %v1770_v40 = vmul.f32 %v2599_v39, %v1754_v34  ;;  %v1802_v41 = vmul.f32 %v2600_v21, %v1786_v35  ;;  %v1726_v11 = vadd.f32 %v2570_v37, %v2568_v36 }
 0x2d0   : > { %1833 = vst.msk [vmem:[%s2995_s15 + $0x50] sm:$0xff] %vm327_vm0, %v1817_v25 }
 0x2d1   : > { %v2572_v42 = vpop.eup %2571  ;;  %v1818_v22 = vadd.f32 %v1802_v41, %v1770_v40  ;;  %2577 = vrcp.f32 %v1726_v11 }
 0x2d2   : > { %v1755_v43 = vmul.f32 %v2572_v42, %v2550_v2  ;;  %v1787_v44 = vmul.f32 %v2572_v42, %v2554_v13  ;;  %v2606_v2 = vld [vmem:[#allocation3 + $0x70] sm:$0xff]  ;;  %v2608_v13 = vld [vmem:[#allocation3 + $0x78] sm:$0xff] }
 0x2d3   : > { %1834 = vst.msk [vmem:[%s2995_s15 + $0x58] sm:$0xff] %vm327_vm0, %v1818_v22 }
 0x2d4   : > { %v1771_v46 = vmul.f32 %v2601_v45, %v1755_v43  ;;  %v1803_v49 = vmul.f32 %v2602_v48, %v1787_v44 }
 0x2d5   : > { %v2574_v52 = vpop.eup %2573 }
 0x2d6   : > { %v1819_v53 = vadd.f32 %v1803_v49, %v1771_v46  ;;  %v1756_v54 = vmul.f32 %v2574_v52, %v2556_v16  ;;  %v1788_v56 = vmul.f32 %v2574_v52, %v2558_v8 }
 0x2d8   : > { %v2576_v28 = vpop.eup %2575  ;;  %1835 = vst.msk [vmem:[%s2995_s15 + $0x60] sm:$0xff] %vm327_vm0, %v1819_v53  ;;  %v1772_v31 = vmul.f32 %v2603_v57, %v1756_v54  ;;  %v1804_v59 = vmul.f32 %v2604_v58, %v1788_v56 }
 0x2d9   : > { %v1757_v61 = vmul.f32 %v2576_v28, %v2562_v47  ;;  %v1789_v63 = vmul.f32 %v2576_v28, %v2564_v24 }
 0x2da   : > { %v1820_v62 = vadd.f32 %v1804_v59, %v1772_v31 }
 0x2db   : > { %v1773_v1 = vmul.f32 %v2605_v0, %v1757_v61  ;;  %v1805_v3 = vmul.f32 %v2606_v2, %v1789_v63  ;;  %v2578_v38 = vpop.eup %2577 }
 0x2dc   : > { %1836 = vst.msk [vmem:[%s2995_s15 + $0x68] sm:$0xff] %vm327_vm0, %v1820_v62  ;;  %v1758_v5 = vmul.f32 %v2578_v38, %v2568_v36  ;;  %v1790_v6 = vmul.f32 %v2578_v38, %v2570_v37 }
 0x2dd   : > { %v1821_v4 = vadd.f32 %v1805_v3, %v1773_v1 }
 0x2de   : > { %v1774_v10 = vmul.f32 %v2607_v7, %v1758_v5  ;;  %v1806_v14 = vmul.f32 %v2608_v13, %v1790_v6 }
 0x2df   : > { %1837 = vst.msk [vmem:[%s2995_s15 + $0x70] sm:$0xff] %vm327_vm0, %v1821_v4 }
 0x2e0   : > { %v1822_v15 = vadd.f32 %v1806_v14, %v1774_v10 }
 0x2e2   : > { %1838 = vst.msk [vmem:[%s2995_s15 + $0x78] sm:$0xff] %vm327_vm0, %v1822_v15 }
 0x2e3 PF: > { %s15_s20 = sadd.s32 1, %s2631_s20   ;;  %s3102_s18 = smov %s2627_s19 }
 0x2e4   : > { %p12_p5 = scmp.ge.s32.totalorder %s15_s20, 4   ;;  %s3103_s19 = smov %s3105_s21 }
 0x2e6   :  { %14 = sbr.rel (!%p12_p5) target bundleno = 2 (0x2), region = 84 }

// kernel: encoder_overall_forward.13
= control target key start
LH: loop header
LB: loop body
LE: loop exit
PB: predicated region body
PF: predicated region fallthrough
CT: control target
= control target key end

     0   :  { %s961_s9 = smov 0   ;;  %s963_s10 = smov 0   ;;  %s1165_s0 = inlined_call_operand.vmem [shape: bf16[256,256], index: 0, kind: input, shape index: {}]   ;;  %s1166_s1 = inlined_call_operand.vmem [shape: bf16[256,130], index: 1, kind: input, shape index: {}]   ;;  %s1167_s2 = inlined_call_operand.vmem [shape: f32[256,130], index: 2, kind: output, shape index: {}]  }
   0x1   :  { %s965_s11 = smov 0  }
   0x2 LB: > { %s24_s12 = sadd.s32 1, %s940_s10  ;;  %p735_p0 = scmp.ge.s32.totalorder %s944_s11, 1  ;;  %s944_s11 = sphi %s965_s11, %s12_s11   ;;  %s940_s10 = sphi %s963_s10, %s1169_s10   ;;  %s936_s9 = sphi %s961_s9, %s1168_s9  }
   0x3   : > { %p26_p1 = scmp.ge.s32.totalorder %s24_s12, 2  ;;  %p139_p2 = scmp.lt.s32.totalorder %s944_s11, 3 }
   0x5   : > { %s1171_s12 = smov (%p26_p1, %s24_s12), 0  ;;  %p140_p3 = pnand %p735_p0, %p139_p2 }
   0x6   : > { %v850_v0 = vld [vmem:[%s1166_s1 + $0x4] ss:$8 sps:$4 sm:$0xff] (!%p140_p3)   ;;  %v852_v1 = vld [vmem:[%s1166_s1] ss:$8 sps:$4 sm:$0xff] (!%p140_p3)   ;;  %v853_v2 = vld [vmem:[%s1166_s1 + $0x14] ss:$8 sps:$4 sm:$0xff] (!%p140_p3)  }
   0x7   : > { %143 = sbr.rel (%p140_p3) target bundleno = 311 (0x137), region = 28  ;;  %485 = vmatprep.subr.bf16.mxu0 (!%p140_p3), %v850_v0  ;;  %794 = vmatprep.subr.bf16.mxu1 (!%p140_p3), %v850_v0  ;;  %v855_v3 = vld [vmem:[%s1166_s1 + $0x10] ss:$8 sps:$4 sm:$0xff] (!%p140_p3)   ;;  %v856_v4 = vld [vmem:[%s1166_s1 + $0x24] ss:$8 sps:$4 sm:$0xff] (!%p140_p3)   ;;  %s736_s23 = sshll.u32 (!%p140_p3), %s936_s9, 4 }
   0x8   : > { %486 = vmatpush1.bf16.msra.mxu0 (!%p140_p3), %v852_v1  ;;  %810 = vmatpush1.bf16.msra.mxu1 (!%p140_p3), %v852_v1  ;;  %v858_v5 = vld [vmem:[%s1166_s1 + $0x20] ss:$8 sps:$4 sm:$0xff] (!%p140_p3)   ;;  %v859_v6 = vld [vmem:[%s1166_s1 + $0x34] ss:$8 sps:$4 sm:$0xff] (!%p140_p3)   ;;  %p173_p4 = scmp.lt.s32.totalorder (!%p140_p3), %s736_s23, 31  ;;  %vm599_vm0 = vcmask (!%p140_p3), 15360  }
   0x9   : > { %487 = vmatprep.subr.bf16.mxu0 (!%p140_p3), %v853_v2  ;;  %795 = vmatprep.subr.bf16.mxu1 (!%p140_p3), %v853_v2  ;;  %v861_v7 = vld [vmem:[%s1166_s1 + $0x30] ss:$8 sps:$4 sm:$0xff] (!%p140_p3)   ;;  %v862_v8 = vld [vmem:[%s1166_s1 + $0x44] ss:$8 sps:$4 sm:$0xff] (!%p140_p3)   ;;  %v864_v9 = vld [vmem:[%s1166_s1 + $0x40] ss:$8 sps:$4 sm:$0xff] (!%p140_p3)  }
   0xa   : > { %v865_v10 = vld [vmem:[%s1166_s1 + $0x54] ss:$8 sps:$4 sm:$0xff] (!%p140_p3)   ;;  %v867_v11 = vld [vmem:[%s1166_s1 + $0x50] ss:$8 sps:$4 sm:$0xff] (!%p140_p3)   ;;  %v868_v12 = vld [vmem:[%s1166_s1 + $0x64] ss:$8 sps:$4 sm:$0xff] (!%p140_p3)  }
   0xb   : > { %v870_v14 = vld [vmem:[%s1166_s1 + $0x60] ss:$8 sps:$4 sm:$0xff] (!%p140_p3)   ;;  %v871_v16 = vld [vmem:[%s1166_s1 + $0x74] ss:$8 sps:$4 sm:$0xff] (!%p140_p3)   ;;  %v873_v17 = vld [vmem:[%s1166_s1 + $0x70] ss:$8 sps:$4 sm:$0xff] (!%p140_p3)  }
   0xc   : > { %488 = vmatpush1.bf16.msra.mxu0 (!%p140_p3), %v855_v3  ;;  %811 = vmatpush1.bf16.msra.mxu1 (!%p140_p3), %v855_v3  ;;  %v874_v18 = vld [vmem:[%s1166_s1 + $0x84] ss:$8 sps:$4 sm:$0xff] (!%p140_p3)   ;;  %v876_v19 = vld [vmem:[%s1166_s1 + $0x80] ss:$8 sps:$4 sm:$0xff] (!%p140_p3)   ;;  %v877_v20 = vld [vmem:[%s1166_s1 + $0x94] ss:$8 sps:$4 sm:$0xff] (!%p140_p3)  }
   0xd   : > { %489 = vmatprep.subr.bf16.mxu0 (!%p140_p3), %v856_v4  ;;  %796 = vmatprep.subr.bf16.mxu1 (!%p140_p3), %v856_v4  ;;  %v879_v21 = vld [vmem:[%s1166_s1 + $0x90] ss:$8 sps:$4 sm:$0xff] (!%p140_p3)   ;;  %v880_v22 = vld [vmem:[%s1166_s1 + $0xa4] ss:$8 sps:$4 sm:$0xff] (!%p140_p3)   ;;  %v882_v23 = vld [vmem:[%s1166_s1 + $0xa0] ss:$8 sps:$4 sm:$0xff] (!%p140_p3)  }
   0xe   : > { %s1173_s23 = smov (!%p173_p4, %s736_s23), 31  ;;  %v883_v24 = vld [vmem:[%s1166_s1 + $0xb4] ss:$8 sps:$4 sm:$0xff]   ;;  %v885_v25 = vld [vmem:[%s1166_s1 + $0xb0] ss:$8 sps:$4 sm:$0xff]  }
   0xf   : > { %s792_s8 = sshll.u32 %s1173_s23, 3  ;;  %v886_v26 = vld [vmem:[%s1166_s1 + $0xc4] ss:$8 sps:$4 sm:$0xff]   ;;  %v888_v27 = vld [vmem:[%s1166_s1 + $0xc0] ss:$8 sps:$4 sm:$0xff]   ;;  %s793_s7 = sshll.u32 %s1173_s23, 4 }
  0x10   : > { %490 = vmatpush1.bf16.msra.mxu0 %v858_v5  ;;  %812 = vmatpush1.bf16.msra.mxu1 %v858_v5  ;;  %s1024_s16 = scalar_lea.vmem %s1165_s0, %s792_s8  ;;  %v889_v28 = vld [vmem:[%s1166_s1 + $0xd4] ss:$8 sps:$4 sm:$0xff]   ;;  %v891_v29 = vld [vmem:[%s1166_s1 + $0xd0] ss:$8 sps:$4 sm:$0xff]   ;;  %v892_v30 = vld [vmem:[%s1166_s1 + $0xe4] ss:$8 sps:$4 sm:$0xff]   ;;  %s1106_s13 = scalar_lea.vmem %s1167_s2, %s793_s7 }
  0x11   : > { %491 = vmatprep.subr.bf16.mxu0 %v859_v6  ;;  %797 = vmatprep.subr.bf16.mxu1 %v859_v6  ;;  %v900_v13 = vld [vmem:[%s1024_s16 + $0x4] ss:$8 sps:$4 sm:$0xff]   ;;  %v894_v31 = vld [vmem:[%s1166_s1 + $0xe0] ss:$8 sps:$4 sm:$0xff]   ;;  %v895_v32 = vld [vmem:[%s1166_s1 + $0xf4] ss:$8 sps:$4 sm:$0xff]  }
  0x12   : > { %v903_v15 = vld [vmem:[%s1024_s16 + $0x44] ss:$8 sps:$4 sm:$0xff]   ;;  %517 = vmatprep.mubr.bf16.mxu0 %v900_v13  ;;  %v897_v33 = vld [vmem:[%s1166_s1 + $0xf0] ss:$8 sps:$4 sm:$0xff]   ;;  %v898_v34 = vld [vmem:[%s1024_s16] ss:$8 sps:$4 sm:$0xff]  }
  0x13   : > { %557 = vmatprep.mubr.bf16.mxu1 %v903_v15  ;;  %v901_v35 = vld [vmem:[%s1024_s16 + $0x40] ss:$8 sps:$4 sm:$0xff]   ;;  %v904_v36 = vld [vmem:[%s1024_s16 + $0x14] ss:$8 sps:$4 sm:$0xff]   ;;  %v908_v38 = vld [vmem:[%s1024_s16 + $0x10] ss:$8 sps:$4 sm:$0xff]  }
  0x14   : > { %492 = vmatpush1.bf16.msra.mxu0 %v861_v7  ;;  %813 = vmatpush1.bf16.msra.mxu1 %v861_v7  ;;  %v906_v37 = vld [vmem:[%s1024_s16 + $0x54] ss:$8 sps:$4 sm:$0xff]   ;;  %v909_v39 = vld [vmem:[%s1024_s16 + $0x50] ss:$8 sps:$4 sm:$0xff]   ;;  %v910_v40 = vld [vmem:[%s1024_s16 + $0x24] ss:$8 sps:$4 sm:$0xff]  }
  0x15   : > { %493 = vmatprep.subr.bf16.mxu0 %v862_v8  ;;  %798 = vmatprep.subr.bf16.mxu1 %v862_v8  ;;  %v912_v41 = vld [vmem:[%s1024_s16 + $0x64] ss:$8 sps:$4 sm:$0xff]   ;;  %v914_v42 = vld [vmem:[%s1024_s16 + $0x20] ss:$8 sps:$4 sm:$0xff]   ;;  %v916_v44 = vld [vmem:[%s1024_s16 + $0x34] ss:$8 sps:$4 sm:$0xff]  }
  0x16   : > { %v915_v43 = vld [vmem:[%s1024_s16 + $0x60] ss:$8 sps:$4 sm:$0xff]   ;;  %v918_v45 = vld [vmem:[%s1024_s16 + $0x74] ss:$8 sps:$4 sm:$0xff]   ;;  %v920_v46 = vld [vmem:[%s1024_s16 + $0x30] ss:$8 sps:$4 sm:$0xff]  }
  0x17   : > { %v921_v47 = vld [vmem:[%s1024_s16 + $0x70] ss:$8 sps:$4 sm:$0xff]  }
  0x18   : > { %494 = vmatpush1.bf16.msra.mxu0 %v864_v9  ;;  %814 = vmatpush1.bf16.msra.mxu1 %v864_v9 }
  0x19   : > { %495 = vmatprep.subr.bf16.mxu0 %v865_v10  ;;  %799 = vmatprep.subr.bf16.mxu1 %v865_v10 }
  0x1c   : > { %496 = vmatpush1.bf16.msra.mxu0 %v867_v11  ;;  %815 = vmatpush1.bf16.msra.mxu1 %v867_v11 }
  0x1d   : > { %497 = vmatprep.subr.bf16.mxu0 %v868_v12  ;;  %800 = vmatprep.subr.bf16.mxu1 %v868_v12 }
  0x20   : > { %498 = vmatpush1.bf16.msra.mxu0 %v870_v14  ;;  %816 = vmatpush1.bf16.msra.mxu1 %v870_v14 }
  0x21   : > { %499 = vmatprep.subr.bf16.mxu0 %v871_v16  ;;  %801 = vmatprep.subr.bf16.mxu1 %v871_v16 }
  0x24   : > { %500 = vmatpush1.bf16.msra.mxu0 %v873_v17  ;;  %817 = vmatpush1.bf16.msra.mxu1 %v873_v17 }
  0x25   : > { %501 = vmatprep.subr.bf16.mxu0 %v874_v18  ;;  %802 = vmatprep.subr.bf16.mxu1 %v874_v18 }
  0x28   : > { %502 = vmatpush1.bf16.msra.mxu0 %v876_v19  ;;  %818 = vmatpush1.bf16.msra.mxu1 %v876_v19 }
  0x29   : > { %503 = vmatprep.subr.bf16.mxu0 %v877_v20  ;;  %803 = vmatprep.subr.bf16.mxu1 %v877_v20 }
  0x2c   : > { %504 = vmatpush1.bf16.msra.mxu0 %v879_v21  ;;  %819 = vmatpush1.bf16.msra.mxu1 %v879_v21 }
  0x2d   : > { %505 = vmatprep.subr.bf16.mxu0 %v880_v22  ;;  %804 = vmatprep.subr.bf16.mxu1 %v880_v22 }
  0x30   : > { %506 = vmatpush1.bf16.msra.mxu0 %v882_v23  ;;  %820 = vmatpush1.bf16.msra.mxu1 %v882_v23 }
  0x31   : > { %507 = vmatprep.subr.bf16.mxu0 %v883_v24  ;;  %805 = vmatprep.subr.bf16.mxu1 %v883_v24 }
  0x34   : > { %508 = vmatpush1.bf16.msra.mxu0 %v885_v25  ;;  %821 = vmatpush1.bf16.msra.mxu1 %v885_v25 }
  0x35   : > { %509 = vmatprep.subr.bf16.mxu0 %v886_v26  ;;  %806 = vmatprep.subr.bf16.mxu1 %v886_v26 }
  0x38   : > { %510 = vmatpush1.bf16.msra.mxu0 %v888_v27  ;;  %822 = vmatpush1.bf16.msra.mxu1 %v888_v27 }
  0x39   : > { %511 = vmatprep.subr.bf16.mxu0 %v889_v28  ;;  %807 = vmatprep.subr.bf16.mxu1 %v889_v28 }
  0x3c   : > { %512 = vmatpush1.bf16.msra.mxu0 %v891_v29  ;;  %823 = vmatpush1.bf16.msra.mxu1 %v891_v29 }
  0x3d   : > { %513 = vmatprep.subr.bf16.mxu0 %v892_v30  ;;  %808 = vmatprep.subr.bf16.mxu1 %v892_v30 }
  0x40   : > { %514 = vmatpush1.bf16.msra.mxu0 %v894_v31  ;;  %824 = vmatpush1.bf16.msra.mxu1 %v894_v31 }
  0x41   : > { %515 = vmatprep.subr.bf16.mxu0 %v895_v32  ;;  %809 = vmatprep.subr.bf16.mxu1 %v895_v32 }
  0x44   : > { %516 = vmatpush1.bf16.msra.mxu0 %v897_v33  ;;  %825 = vmatpush1.bf16.msra.mxu1 %v897_v33 }
  0x47   : > { %518 = vmatmul.mubr.bf16.vlgmr.msra.gmra.mrb[0].mxu0 %v898_v34  ;;  %558 = vmatmul.mubr.bf16.vlgmr.msra.gmra.mrb[0].mxu1 %v901_v35 }
  0x48   : > { %527 = vmatprep.mubr.bf16.mxu0 %v904_v36  ;;  %567 = vmatprep.mubr.bf16.mxu1 %v906_v37 }
  0x4f   : > { %528 = vmatmul.mubr.bf16.gmra.mrb[4].mxu0 %v908_v38  ;;  %568 = vmatmul.mubr.bf16.gmra.mrb[4].mxu1 %v909_v39 }
  0x50   : > { %537 = vmatprep.mubr.bf16.mxu0 %v910_v40  ;;  %577 = vmatprep.mubr.bf16.mxu1 %v912_v41 }
  0x57   : > { %538 = vmatmul.mubr.bf16.gmra.mrb[8].mxu0 %v914_v42  ;;  %578 = vmatmul.mubr.bf16.gmra.mrb[8].mxu1 %v915_v43 }
  0x58   : > { %547 = vmatprep.mubr.bf16.mxu0 %v916_v44  ;;  %587 = vmatprep.mubr.bf16.mxu1 %v918_v45 }
  0x5f   : > { %548 = vmatmul.mubr.bf16.gmra.mrb[12].mxu0 %v920_v46  ;;  %588 = vmatmul.mubr.bf16.gmra.mrb[12].mxu1 %v921_v47 }
 0x11a   : > { %v519_v48 = vpop.f32.mrb[0].mxu0  ;;  %v559_v49 = vpop.f32.mrb[0].mxu1 }
 0x11b   : > { %598 = vst [vmem:[%s1106_s13] sm:$0xff] %v519_v48  ;;  %615 = vst [vmem:[%s1106_s13 + $0x80] sm:$0xff] %v559_v49  ;;  %v521_v50 = vpop.f32.mrb[1].mxu0  ;;  %v561_v51 = vpop.f32.mrb[1].mxu1 }
 0x11c   : > { %600 = vst.msk [vmem:[%s1106_s13 + $0x8] sm:$0xff] %vm599_vm0, %v521_v50  ;;  %616 = vst.msk [vmem:[%s1106_s13 + $0x88] sm:$0xff] %vm599_vm0, %v561_v51  ;;  %v523_v52 = vpop.f32.mrb[2].mxu0  ;;  %v563_v53 = vpop.f32.mrb[2].mxu1 }
 0x11d   : > { %601 = vst [vmem:[%s1106_s13 + $0x10] sm:$0xff] %v523_v52  ;;  %617 = vst [vmem:[%s1106_s13 + $0x90] sm:$0xff] %v563_v53  ;;  %v525_v54 = vpop.f32.mrb[3].mxu0  ;;  %v565_v55 = vpop.f32.mrb[3].mxu1 }
 0x11e   : > { %602 = vst.msk [vmem:[%s1106_s13 + $0x18] sm:$0xff] %vm599_vm0, %v525_v54  ;;  %618 = vst.msk [vmem:[%s1106_s13 + $0x98] sm:$0xff] %vm599_vm0, %v565_v55 }
 0x122   : > { %v529_v56 = vpop.f32.mrb[4].mxu0  ;;  %v569_v57 = vpop.f32.mrb[4].mxu1 }
 0x123   : > { %603 = vst [vmem:[%s1106_s13 + $0x20] sm:$0xff] %v529_v56  ;;  %619 = vst [vmem:[%s1106_s13 + $0xa0] sm:$0xff] %v569_v57  ;;  %v531_v58 = vpop.f32.mrb[5].mxu0  ;;  %v571_v59 = vpop.f32.mrb[5].mxu1 }
 0x124   : > { %604 = vst.msk [vmem:[%s1106_s13 + $0x28] sm:$0xff] %vm599_vm0, %v531_v58  ;;  %620 = vst.msk [vmem:[%s1106_s13 + $0xa8] sm:$0xff] %vm599_vm0, %v571_v59  ;;  %v533_v60 = vpop.f32.mrb[6].mxu0  ;;  %v573_v61 = vpop.f32.mrb[6].mxu1 }
 0x125   : > { %605 = vst [vmem:[%s1106_s13 + $0x30] sm:$0xff] %v533_v60  ;;  %621 = vst [vmem:[%s1106_s13 + $0xb0] sm:$0xff] %v573_v61  ;;  %v535_v62 = vpop.f32.mrb[7].mxu0  ;;  %v575_v63 = vpop.f32.mrb[7].mxu1 }
 0x126   : > { %606 = vst.msk [vmem:[%s1106_s13 + $0x38] sm:$0xff] %vm599_vm0, %v535_v62  ;;  %622 = vst.msk [vmem:[%s1106_s13 + $0xb8] sm:$0xff] %vm599_vm0, %v575_v63 }
 0x12a   : > { %v539_v0 = vpop.f32.mrb[8].mxu0  ;;  %v579_v1 = vpop.f32.mrb[8].mxu1 }
 0x12b   : > { %607 = vst [vmem:[%s1106_s13 + $0x40] sm:$0xff] %v539_v0  ;;  %623 = vst [vmem:[%s1106_s13 + $0xc0] sm:$0xff] %v579_v1  ;;  %v541_v2 = vpop.f32.mrb[9].mxu0  ;;  %v581_v3 = vpop.f32.mrb[9].mxu1 }
 0x12c   : > { %608 = vst.msk [vmem:[%s1106_s13 + $0x48] sm:$0xff] %vm599_vm0, %v541_v2  ;;  %624 = vst.msk [vmem:[%s1106_s13 + $0xc8] sm:$0xff] %vm599_vm0, %v581_v3  ;;  %v543_v4 = vpop.f32.mrb[10].mxu0  ;;  %v583_v5 = vpop.f32.mrb[10].mxu1 }
 0x12d   : > { %609 = vst [vmem:[%s1106_s13 + $0x50] sm:$0xff] %v543_v4  ;;  %625 = vst [vmem:[%s1106_s13 + $0xd0] sm:$0xff] %v583_v5  ;;  %v545_v6 = vpop.f32.mrb[11].mxu0  ;;  %v585_v7 = vpop.f32.mrb[11].mxu1 }
 0x12e   : > { %610 = vst.msk [vmem:[%s1106_s13 + $0x58] sm:$0xff] %vm599_vm0, %v545_v6  ;;  %626 = vst.msk [vmem:[%s1106_s13 + $0xd8] sm:$0xff] %vm599_vm0, %v585_v7 }
 0x132   : > { %v549_v8 = vpop.f32.mrb[12].mxu0  ;;  %v589_v9 = vpop.f32.mrb[12].mxu1 }
 0x133   : > { %611 = vst [vmem:[%s1106_s13 + $0x60] sm:$0xff] %v549_v8  ;;  %627 = vst [vmem:[%s1106_s13 + $0xe0] sm:$0xff] %v589_v9  ;;  %v551_v10 = vpop.f32.mrb[13].mxu0  ;;  %v591_v11 = vpop.f32.mrb[13].mxu1 }
 0x134   : > { %612 = vst.msk [vmem:[%s1106_s13 + $0x68] sm:$0xff] %vm599_vm0, %v551_v10  ;;  %628 = vst.msk [vmem:[%s1106_s13 + $0xe8] sm:$0xff] %vm599_vm0, %v591_v11  ;;  %v553_v12 = vpop.f32.mrb[14].mxu0  ;;  %v593_v13 = vpop.f32.mrb[14].mxu1 }
 0x135   : > { %613 = vst [vmem:[%s1106_s13 + $0x70] sm:$0xff] %v553_v12  ;;  %629 = vst [vmem:[%s1106_s13 + $0xf0] sm:$0xff] %v593_v13  ;;  %v555_v14 = vpop.f32.mrb[15].mxu0  ;;  %v595_v15 = vpop.f32.mrb[15].mxu1 }
 0x136   : > { %614 = vst.msk [vmem:[%s1106_s13 + $0x78] sm:$0xff] %vm599_vm0, %v555_v14  ;;  %630 = vst.msk [vmem:[%s1106_s13 + $0xf8] sm:$0xff] %vm599_vm0, %v595_v15 }
 0x137 PF: > { %s12_s11 = sadd.s32 1, %s944_s11   ;;  %s1168_s9 = smov %s940_s10 }
 0x138   : > { %p9_p5 = scmp.ge.s32.totalorder %s12_s11, 4   ;;  %s1169_s10 = smov %s1171_s12 }
 0x13a   :  { %11 = sbr.rel (!%p9_p5) target bundleno = 2 (0x2), region = 61 }

// kernel: encoder_overall_forward.12
= control target key start
LH: loop header
LB: loop body
LE: loop exit
PB: predicated region body
PF: predicated region fallthrough
CT: control target
= control target key end

     0   :  { %s845_s9 = smov 0   ;;  %s847_s10 = smov 0   ;;  %s985_s0 = inlined_call_operand.vmem [shape: bf16[256,256], index: 0, kind: input, shape index: {}]   ;;  %s986_s1 = inlined_call_operand.vmem [shape: bf16[256,100], index: 1, kind: input, shape index: {}]   ;;  %s987_s2 = inlined_call_operand.vmem [shape: f32[256,100], index: 2, kind: output, shape index: {}]  }
   0x1   :  { %s849_s11 = smov 0  }
   0x2 LB: > { %s24_s12 = sadd.s32 1, %s824_s10  ;;  %p621_p0 = scmp.ge.s32.totalorder %s828_s11, 1  ;;  %s828_s11 = sphi %s849_s11, %s12_s11   ;;  %s824_s10 = sphi %s847_s10, %s989_s10   ;;  %s820_s9 = sphi %s845_s9, %s988_s9  }
   0x3   : > { %p26_p1 = scmp.ge.s32.totalorder %s24_s12, 2  ;;  %p137_p2 = scmp.lt.s32.totalorder %s828_s11, 3 }
   0x5   : > { %s991_s12 = smov (%p26_p1, %s24_s12), 0  ;;  %p138_p3 = pnand %p621_p0, %p137_p2 }
   0x6   : > { %v766_v0 = vld [vmem:[%s986_s1 + $0x40] sm:$0xff] (!%p138_p3)   ;;  %s622_s15 = sshll.u32 (!%p138_p3), %s820_s9, 4  ;;  %v768_v2 = vld [vmem:[%s986_s1 + $0x48] sm:$0xff] (!%p138_p3)   ;;  %v770_v4 = vld [vmem:[%s986_s1 + $0x50] sm:$0xff] (!%p138_p3)   ;;  %vm509_vm0 = vcmask (!%p138_p3), 818176  }
   0x7   : > { %141 = sbr.rel (%p138_p3) target bundleno = 281 (0x119), region = 28  ;;  %v767_v1 = vld [vmem:[%s986_s1] sm:$0xff] (!%p138_p3)   ;;  %662 = vmatprep.subr.bf16.mxu0 (!%p138_p3), %v766_v0  ;;  %726 = vmatprep.subr.bf16.mxu1 (!%p138_p3), %v766_v0  ;;  %v769_v3 = vld [vmem:[%s986_s1 + $0x8] sm:$0xff] (!%p138_p3)   ;;  %p168_p4 = scmp.lt.s32.totalorder (!%p138_p3), %s622_s15, 31  ;;  %v771_v5 = vld [vmem:[%s986_s1 + $0x10] sm:$0xff] (!%p138_p3)  }
   0x8   : > { %663 = vmatpush3.bf16.msra.mxu0 (!%p138_p3), %v767_v1  ;;  %734 = vmatpush3.bf16.msra.mxu1 (!%p138_p3), %v767_v1  ;;  %v772_v6 = vld [vmem:[%s986_s1 + $0x58] sm:$0xff] (!%p138_p3)   ;;  %v774_v8 = vld [vmem:[%s986_s1 + $0x60] sm:$0xff] (!%p138_p3)   ;;  %v776_v10 = vld [vmem:[%s986_s1 + $0x68] sm:$0xff] (!%p138_p3)  }
   0x9   : > { %664 = vmatprep.subr.bf16.mxu0 (!%p138_p3), %v768_v2  ;;  %727 = vmatprep.subr.bf16.mxu1 (!%p138_p3), %v768_v2  ;;  %v773_v7 = vld [vmem:[%s986_s1 + $0x18] sm:$0xff] (!%p138_p3)   ;;  %v775_v9 = vld [vmem:[%s986_s1 + $0x20] sm:$0xff] (!%p138_p3)   ;;  %v777_v13 = vld [vmem:[%s986_s1 + $0x28] sm:$0xff] (!%p138_p3)  }
   0xa   : > { %v778_v14 = vld [vmem:[%s986_s1 + $0x70] sm:$0xff] (!%p138_p3)   ;;  %v780_v16 = vld [vmem:[%s986_s1 + $0x78] sm:$0xff] (!%p138_p3)  }
   0xb   : > { %v779_v15 = vld [vmem:[%s986_s1 + $0x30] sm:$0xff] (!%p138_p3)   ;;  %v781_v17 = vld [vmem:[%s986_s1 + $0x38] sm:$0xff] (!%p138_p3)  }
   0xc   : > { %665 = vmatpush3.bf16.msra.mxu0 (!%p138_p3), %v769_v3  ;;  %735 = vmatpush3.bf16.msra.mxu1 (!%p138_p3), %v769_v3 }
   0xd   : > { %666 = vmatprep.subr.bf16.mxu0 (!%p138_p3), %v770_v4  ;;  %728 = vmatprep.subr.bf16.mxu1 (!%p138_p3), %v770_v4 }
   0xe   : > { %s993_s15 = smov (!%p168_p4, %s622_s15), 31 }
   0xf   : > { %s661_s30 = sshll.u32 %s993_s15, 3 }
  0x10   : > { %667 = vmatpush3.bf16.msra.mxu0 %v771_v5  ;;  %736 = vmatpush3.bf16.msra.mxu1 %v771_v5  ;;  %s898_s7 = scalar_lea.vmem %s985_s0, %s661_s30  ;;  %s942_s28 = scalar_lea.vmem %s987_s2, %s661_s30 }
  0x11   : > { %668 = vmatprep.subr.bf16.mxu0 %v772_v6  ;;  %729 = vmatprep.subr.bf16.mxu1 %v772_v6  ;;  %v784_v11 = vld [vmem:[%s898_s7 + $0x4] ss:$8 sps:$4 sm:$0xff]   ;;  %v782_v18 = vld [vmem:[%s898_s7] ss:$8 sps:$4 sm:$0xff]   ;;  %v788_v20 = vld [vmem:[%s898_s7 + $0x14] ss:$8 sps:$4 sm:$0xff]  }
  0x12   : > { %v787_v12 = vld [vmem:[%s898_s7 + $0x44] ss:$8 sps:$4 sm:$0xff]   ;;  %444 = vmatprep.mubr.bf16.mxu0 %v784_v11  ;;  %v785_v19 = vld [vmem:[%s898_s7 + $0x40] ss:$8 sps:$4 sm:$0xff]   ;;  %v790_v21 = vld [vmem:[%s898_s7 + $0x54] ss:$8 sps:$4 sm:$0xff]  }
  0x13   : > { %476 = vmatprep.mubr.bf16.mxu1 %v787_v12  ;;  %v792_v22 = vld [vmem:[%s898_s7 + $0x10] ss:$8 sps:$4 sm:$0xff]   ;;  %v794_v24 = vld [vmem:[%s898_s7 + $0x24] ss:$8 sps:$4 sm:$0xff]   ;;  %v798_v26 = vld [vmem:[%s898_s7 + $0x20] ss:$8 sps:$4 sm:$0xff]  }
  0x14   : > { %669 = vmatpush3.bf16.msra.mxu0 %v773_v7  ;;  %737 = vmatpush3.bf16.msra.mxu1 %v773_v7  ;;  %v793_v23 = vld [vmem:[%s898_s7 + $0x50] ss:$8 sps:$4 sm:$0xff]   ;;  %v796_v25 = vld [vmem:[%s898_s7 + $0x64] ss:$8 sps:$4 sm:$0xff]   ;;  %v799_v27 = vld [vmem:[%s898_s7 + $0x60] ss:$8 sps:$4 sm:$0xff]  }
  0x15   : > { %670 = vmatprep.subr.bf16.mxu0 %v774_v8  ;;  %730 = vmatprep.subr.bf16.mxu1 %v774_v8  ;;  %v800_v28 = vld [vmem:[%s898_s7 + $0x34] ss:$8 sps:$4 sm:$0xff]   ;;  %v804_v30 = vld [vmem:[%s898_s7 + $0x30] ss:$8 sps:$4 sm:$0xff]  }
  0x16   : > { %v802_v29 = vld [vmem:[%s898_s7 + $0x74] ss:$8 sps:$4 sm:$0xff]   ;;  %v805_v31 = vld [vmem:[%s898_s7 + $0x70] ss:$8 sps:$4 sm:$0xff]  }
  0x18   : > { %671 = vmatpush3.bf16.msra.mxu0 %v775_v9  ;;  %738 = vmatpush3.bf16.msra.mxu1 %v775_v9 }
  0x19   : > { %672 = vmatprep.subr.bf16.mxu0 %v776_v10  ;;  %731 = vmatprep.subr.bf16.mxu1 %v776_v10 }
  0x1c   : > { %673 = vmatpush3.bf16.msra.mxu0 %v777_v13  ;;  %739 = vmatpush3.bf16.msra.mxu1 %v777_v13 }
  0x1d   : > { %674 = vmatprep.subr.bf16.mxu0 %v778_v14  ;;  %732 = vmatprep.subr.bf16.mxu1 %v778_v14 }
  0x20   : > { %675 = vmatpush3.bf16.msra.mxu0 %v779_v15  ;;  %740 = vmatpush3.bf16.msra.mxu1 %v779_v15 }
  0x21   : > { %676 = vmatprep.subr.bf16.mxu0 %v780_v16  ;;  %733 = vmatprep.subr.bf16.mxu1 %v780_v16 }
  0x24   : > { %677 = vmatpush3.bf16.msra.mxu0 %v781_v17  ;;  %741 = vmatpush3.bf16.msra.mxu1 %v781_v17 }
  0x27   : > { %445 = vmatmul.mubr.bf16.vlgmr.msra.gmra.mrb[0].mxu0 %v782_v18  ;;  %477 = vmatmul.mubr.bf16.vlgmr.msra.gmra.mrb[0].mxu1 %v785_v19 }
  0x28   : > { %452 = vmatprep.mubr.bf16.mxu0 %v788_v20  ;;  %484 = vmatprep.mubr.bf16.mxu1 %v790_v21 }
  0x2f   : > { %453 = vmatmul.mubr.bf16.gmra.mrb[4].mxu0 %v792_v22  ;;  %485 = vmatmul.mubr.bf16.gmra.mrb[4].mxu1 %v793_v23 }
  0x30   : > { %460 = vmatprep.mubr.bf16.mxu0 %v794_v24  ;;  %492 = vmatprep.mubr.bf16.mxu1 %v796_v25 }
  0x37   : > { %461 = vmatmul.mubr.bf16.gmra.mrb[8].mxu0 %v798_v26  ;;  %493 = vmatmul.mubr.bf16.gmra.mrb[8].mxu1 %v799_v27 }
  0x38   : > { %468 = vmatprep.mubr.bf16.mxu0 %v800_v28  ;;  %500 = vmatprep.mubr.bf16.mxu1 %v802_v29 }
  0x3f   : > { %469 = vmatmul.mubr.bf16.gmra.mrb[12].mxu0 %v804_v30  ;;  %501 = vmatmul.mubr.bf16.gmra.mrb[12].mxu1 %v805_v31 }
  0xfa   : > { %v678_v32 = vpop.f32.mrb[0].mxu0  ;;  %v702_v33 = vpop.f32.mrb[0].mxu1 }
  0xfb   : > { %v679_v34 = vpop.f32.mrb[1].mxu0  ;;  %v703_v35 = vpop.f32.mrb[1].mxu1 }
  0xfc   : > { %v680_v36 = vadd.f32 %v679_v34, %v678_v32  ;;  %v704_v37 = vadd.f32 %v703_v35, %v702_v33  ;;  %v681_v38 = vpop.f32.mrb[2].mxu0  ;;  %v705_v39 = vpop.f32.mrb[2].mxu1 }
  0xfd   : > { %v682_v40 = vpop.f32.mrb[3].mxu0  ;;  %v706_v41 = vpop.f32.mrb[3].mxu1 }
  0xfe   : > { %510 = vst.msk [vmem:[%s942_s28] sm:$0xff] %vm509_vm0, %v680_v36  ;;  %518 = vst.msk [vmem:[%s942_s28 + $0x40] sm:$0xff] %vm509_vm0, %v704_v37  ;;  %v683_v42 = vadd.f32 %v682_v40, %v681_v38  ;;  %v707_v43 = vadd.f32 %v706_v41, %v705_v39 }
 0x100   : > { %511 = vst.msk [vmem:[%s942_s28 + $0x8] sm:$0xff] %vm509_vm0, %v683_v42  ;;  %519 = vst.msk [vmem:[%s942_s28 + $0x48] sm:$0xff] %vm509_vm0, %v707_v43 }
 0x102   : > { %v684_v44 = vpop.f32.mrb[4].mxu0  ;;  %v708_v45 = vpop.f32.mrb[4].mxu1 }
 0x103   : > { %v685_v46 = vpop.f32.mrb[5].mxu0  ;;  %v709_v47 = vpop.f32.mrb[5].mxu1 }
 0x104   : > { %v686_v48 = vadd.f32 %v685_v46, %v684_v44  ;;  %v710_v49 = vadd.f32 %v709_v47, %v708_v45  ;;  %v687_v50 = vpop.f32.mrb[6].mxu0  ;;  %v711_v51 = vpop.f32.mrb[6].mxu1 }
 0x105   : > { %v688_v52 = vpop.f32.mrb[7].mxu0  ;;  %v712_v53 = vpop.f32.mrb[7].mxu1 }
 0x106   : > { %512 = vst.msk [vmem:[%s942_s28 + $0x10] sm:$0xff] %vm509_vm0, %v686_v48  ;;  %520 = vst.msk [vmem:[%s942_s28 + $0x50] sm:$0xff] %vm509_vm0, %v710_v49  ;;  %v689_v54 = vadd.f32 %v688_v52, %v687_v50  ;;  %v713_v55 = vadd.f32 %v712_v53, %v711_v51 }
 0x108   : > { %513 = vst.msk [vmem:[%s942_s28 + $0x18] sm:$0xff] %vm509_vm0, %v689_v54  ;;  %521 = vst.msk [vmem:[%s942_s28 + $0x58] sm:$0xff] %vm509_vm0, %v713_v55 }
 0x10a   : > { %v690_v56 = vpop.f32.mrb[8].mxu0  ;;  %v714_v57 = vpop.f32.mrb[8].mxu1 }
 0x10b   : > { %v691_v58 = vpop.f32.mrb[9].mxu0  ;;  %v715_v59 = vpop.f32.mrb[9].mxu1 }
 0x10c   : > { %v692_v60 = vadd.f32 %v691_v58, %v690_v56  ;;  %v716_v61 = vadd.f32 %v715_v59, %v714_v57  ;;  %v693_v62 = vpop.f32.mrb[10].mxu0  ;;  %v717_v63 = vpop.f32.mrb[10].mxu1 }
 0x10d   : > { %v694_v0 = vpop.f32.mrb[11].mxu0  ;;  %v718_v1 = vpop.f32.mrb[11].mxu1 }
 0x10e   : > { %514 = vst.msk [vmem:[%s942_s28 + $0x20] sm:$0xff] %vm509_vm0, %v692_v60  ;;  %522 = vst.msk [vmem:[%s942_s28 + $0x60] sm:$0xff] %vm509_vm0, %v716_v61  ;;  %v695_v2 = vadd.f32 %v694_v0, %v693_v62  ;;  %v719_v3 = vadd.f32 %v718_v1, %v717_v63 }
 0x110   : > { %515 = vst.msk [vmem:[%s942_s28 + $0x28] sm:$0xff] %vm509_vm0, %v695_v2  ;;  %523 = vst.msk [vmem:[%s942_s28 + $0x68] sm:$0xff] %vm509_vm0, %v719_v3 }
 0x112   : > { %v696_v4 = vpop.f32.mrb[12].mxu0  ;;  %v720_v5 = vpop.f32.mrb[12].mxu1 }
 0x113   : > { %v697_v6 = vpop.f32.mrb[13].mxu0  ;;  %v721_v7 = vpop.f32.mrb[13].mxu1 }
 0x114   : > { %v698_v8 = vadd.f32 %v697_v6, %v696_v4  ;;  %v722_v9 = vadd.f32 %v721_v7, %v720_v5  ;;  %v699_v10 = vpop.f32.mrb[14].mxu0  ;;  %v723_v11 = vpop.f32.mrb[14].mxu1 }
 0x115   : > { %v700_v12 = vpop.f32.mrb[15].mxu0  ;;  %v724_v13 = vpop.f32.mrb[15].mxu1 }
 0x116   : > { %516 = vst.msk [vmem:[%s942_s28 + $0x30] sm:$0xff] %vm509_vm0, %v698_v8  ;;  %524 = vst.msk [vmem:[%s942_s28 + $0x70] sm:$0xff] %vm509_vm0, %v722_v9  ;;  %v701_v14 = vadd.f32 %v700_v12, %v699_v10  ;;  %v725_v15 = vadd.f32 %v724_v13, %v723_v11 }
 0x118   : > { %517 = vst.msk [vmem:[%s942_s28 + $0x38] sm:$0xff] %vm509_vm0, %v701_v14  ;;  %525 = vst.msk [vmem:[%s942_s28 + $0x78] sm:$0xff] %vm509_vm0, %v725_v15 }
 0x119 PF: > { %s12_s11 = sadd.s32 1, %s828_s11   ;;  %s988_s9 = smov %s824_s10 }
 0x11a   : > { %p9_p5 = scmp.ge.s32.totalorder %s12_s11, 4   ;;  %s989_s10 = smov %s991_s12 }
 0x11c   :  { %11 = sbr.rel (!%p9_p5) target bundleno = 2 (0x2), region = 61 }

// kernel: encoder_overall_forward.11
= control target key start
LH: loop header
LB: loop body
LE: loop exit
PB: predicated region body
PF: predicated region fallthrough
CT: control target
= control target key end

     0   :  { %s7163_s6 = smov 1   ;;  %s7164_s10 = smov 2   ;;  %s8822_s0 = inlined_call_operand.smem [shape: u32[37], index: -1, kind: input, shape index: {}] }
   0x1   :  { %s7208_s5 = sld [smem:[%s8822_s0]]   ;;  %s7165_s14 = smov 3  }
   0x2   :  { %s7213_s9 = sld [smem:[%s8822_s0 + %s7163_s6]]   ;;  %s7166_s18 = smov 4  }
   0x3   :  { %s7218_s13 = sld [smem:[%s8822_s0 + %s7164_s10]]   ;;  %s7167_s22 = smov 5  }
   0x4   :  { %s7223_s17 = sld [smem:[%s8822_s0 + %s7165_s14]]   ;;  %s7168_s26 = smov 6  }
   0x5   :  { %s7228_s21 = sld [smem:[%s8822_s0 + %s7166_s18]]   ;;  %s7169_s30 = smov 7  }
   0x6   :  { %s7233_s25 = sld [smem:[%s8822_s0 + %s7167_s22]]   ;;  %s7170_s4 = smov 8  }
   0x7   :  { %s7238_s29 = sld [smem:[%s8822_s0 + %s7168_s26]]   ;;  %s7171_s10 = smov 9  }
   0x8   :  { %s7243_s3 = sld [smem:[%s8822_s0 + %s7169_s30]]   ;;  %s7172_s15 = smov 10  }
   0x9   :  { %s7248_s8 = sld [smem:[%s8822_s0 + %s7170_s4]]   ;;  %s7173_s20 = smov 11  }
   0xa   :  { %s7253_s14 = sld [smem:[%s8822_s0 + %s7171_s10]]   ;;  %s7174_s26 = smov 12  }
   0xb   :  { %s7258_s19 = sld [smem:[%s8822_s0 + %s7172_s15]]   ;;  %s7175_s1 = smov 13  }
   0xc   :  { %s7263_s24 = sld [smem:[%s8822_s0 + %s7173_s20]]   ;;  %s7176_s7 = smov 14  }
   0xd   :  { %s7268_s30 = sld [smem:[%s8822_s0 + %s7174_s26]]   ;;  %s7177_s15 = smov 15  }
   0xe   :  { %s7273_s6 = sld [smem:[%s8822_s0 + %s7175_s1]]   ;;  %s7178_s22 = smov 16  }
   0xf   :  { %s7278_s12 = sld [smem:[%s8822_s0 + %s7176_s7]]   ;;  %s7179_s28 = smov 17  }
  0x10   :  { %8837 = sst [smem:[#allocation4_spill]] %s7253_s14  ;;  %s7180_s7 = smov 18  }
  0x11   :  { %s7283_s20 = sld [smem:[%s8822_s0 + %s7177_s15]]   ;;  %s7181_s15 = smov 19  }
  0x12   :  { %s7288_s27 = sld [smem:[%s8822_s0 + %s7178_s22]]   ;;  %s7182_s22 = smov 20  }
  0x13   :  { %s7293_s4 = sld [smem:[%s8822_s0 + %s7179_s28]]   ;;  %s7183_s28 = smov 21  }
  0x14   :  { %8838 = sst [smem:[#allocation5_spill]] %s7273_s6  ;;  %s7184_s10 = smov 22  }
  0x15   :  { %8839 = sst [smem:[#allocation6_spill]] %s7278_s12  ;;  %s7185_s16 = smov 23  }
  0x16   :  { %s7298_s6 = sld [smem:[%s8822_s0 + %s7180_s7]]   ;;  %s7186_s23 = smov 24  }
  0x17   :  { %8840 = sst [smem:[#allocation7_spill]] %s7283_s20  ;;  %s7187_s1 = smov 25  }
  0x18   :  { %s7303_s20 = sld [smem:[%s8822_s0 + %s7181_s15]]   ;;  %s7192_s7 = smov 31  }
  0x19   :  { %8841 = sst [smem:[#allocation8_spill]] %s7293_s4 }
  0x1a   :  { %s7308_s14 = sld [smem:[%s8822_s0 + %s7182_s22]]  }
  0x1b   :  { %s5244_s4 = sld [smem:[%s8822_s0 + %s7183_s28]]  }
  0x1c   :  { %8842 = sst [smem:[#allocation9_spill]] %s7298_s6 }
  0x1d   :  { %s7316_s6 = sld [smem:[%s8822_s0 + %s7184_s10]]   ;;  %s7188_s10 = smov 26  }
  0x1e   :  { %8843 = sst [smem:[#allocation10_spill]] %s7303_s20 }
  0x1f   :  { %s7321_s20 = sld [smem:[%s8822_s0 + %s7185_s16]]   ;;  %s7189_s16 = smov 28  }
  0x20   :  { %8844 = sst [smem:[#allocation11_spill]] %s7308_s14 }
  0x21   :  { %s7326_s14 = sld [smem:[%s8822_s0 + %s7186_s23]]   ;;  %v79_v0 = vstv %s5244_s4  ;;  %s7190_s23 = smov 29  }
  0x22   :  { %s7331_s12 = sld [smem:[%s8822_s0 + %s7187_s1]]   ;;  %80 = vst [vmem:[#allocation2] sm:$0x1] %v79_v0  ;;  %s7191_s1 = smov 30  }
  0x23   :  { %8845 = sst [smem:[#allocation12_spill]] %s7316_s6  ;;  %s7193_s4 = smov 32  }
  0x24   :  { %s7336_s6 = sld [smem:[%s8822_s0 + %s7188_s10]]  }
  0x25   :  { %8846 = sst [smem:[#allocation13_spill]] %s7321_s20 }
  0x26   :  { %s7341_s20 = sld [smem:[%s8822_s0 + %s7189_s16]]  }
  0x27   :  { %8847 = sst [smem:[#allocation14_spill]] %s7326_s14 }
  0x28   :  { %8848 = sst [smem:[#allocation15_spill]] %s7331_s12  ;;  %s7195_s12 = smov 34  }
  0x29   :  { %s7346_s28 = sld [smem:[%s8822_s0 + %s7190_s23]]   ;;  %s7194_s23 = smov 33  }
  0x2a   :  { %8849 = sst [smem:[#allocation16_spill]] %s7336_s6  ;;  %s7196_s6 = smov 35  }
  0x2b   :  { %s7351_s10 = sld [smem:[%s8822_s0 + %s7191_s1]]  }
  0x2c   :  { %8850 = sst [smem:[#allocation17_spill]] %s7341_s20 }
  0x2d   :  { %s7356_s16 = sld [smem:[%s8822_s0 + %s7192_s7]]  }
  0x2e   :  { %s7361_s22 = sld [smem:[%s8822_s0 + %s7193_s4]]   ;;  %s7197_s4 = smov 36  }
  0x2f   :  { %8851 = sst [smem:[#allocation18_spill]] %s7346_s28  ;;  %s7198_s28 = smov 27  }
  0x30   :  { %s7366_s14 = sld [smem:[%s8822_s0 + %s7194_s23]]  }
  0x31   :  { %s7371_s20 = sld [smem:[%s8822_s0 + %s7195_s12]]   ;;  %s7386_s12 = smov 0  }
  0x33   :  { %8852 = sst [smem:[#allocation19_spill]] %s7356_s16 }
  0x34   :  { %8853 = sst [smem:[#allocation20_spill]] %s7361_s22 }
  0x35   :  { %s7376_s16 = sld [smem:[%s8822_s0 + %s7196_s6]]  }
  0x36   :  { %8854 = sst [smem:[#allocation21_spill]] %s7366_s14 }
  0x37   :  { %s7381_s22 = sld [smem:[%s8822_s0 + %s7197_s4]]  }
  0x38   :  { %s5250_s14 = sld [smem:[%s8822_s0 + %s7198_s28]]  }
  0x3e   :  { %v81_v1 = vstv %s5250_s14 }
  0x3f   :  { %82 = vst [vmem:[#allocation3] sm:$0x1] %v81_v1 }
  0x40 LB: > { %s5260_s1 = sadd.s32 4294967295, %s7161_s12   ;;  %p5264_p0 = scmp.ge.s32.totalorder %s7161_s12, 1  ;;  %s7161_s12 = sphi %s7386_s12, %s88_s12  }
  0x41   : > { %p1028_p1 = scmp.lt.s32.totalorder %s7161_s12, 3 }
  0x43   : > { %p1029_p2 = pnand %p5264_p0, %p1028_p1 }
  0x45   : > { %1032 = sbr.rel (%p1029_p2) target bundleno = 1299 (0x513), region = 140 }
  0x4c   : > { %v1241_v2 = vld [vmem:[%s7218_s13] sm:$0xff]  ;;  %v1242_v3 = vld [vmem:[%s7218_s13 + $0x8] sm:$0xff]  ;;  %v1243_v4 = vld [vmem:[%s7218_s13 + $0x10] sm:$0xff]  ;;  %s5265_s0 = sshll.u32 %s5260_s1, 4  ;;  %vm1250_vm0 = vcmask 523264   ;;  %s8859_s11 = sld [smem:[#allocation12_spill]] }
  0x4d   : > { %v6486_v5 = vpack.c.bf16 %v1242_v3, %v1241_v2  ;;  %v1244_v6 = vld [vmem:[%s7218_s13 + $0x18] sm:$0xff]  ;;  %p1155_p3 = scmp.lt.s32.totalorder %s5265_s0, 31  ;;  %v1245_v8 = vld [vmem:[%s7218_s13 + $0x20] sm:$0xff]  ;;  %v1246_v9 = vld [vmem:[%s7218_s13 + $0x28] sm:$0xff]  ;;  %s8860_s4 = sld [smem:[#allocation17_spill]]  ;;  %vm4641_vm1 = vcmask 814080  }
  0x4e   : > { %v6490_v7 = vpack.c.bf16 %v1244_v6, %v1243_v4  ;;  %v6494_v10 = vpack.c.bf16 %v1246_v9, %v1245_v8  ;;  %v1247_v11 = vld [vmem:[%s7218_s13 + $0x30] sm:$0xff]  ;;  %v1248_v12 = vld [vmem:[%s7218_s13 + $0x38] sm:$0xff]  ;;  %v2075_v16 = vld [vmem:[%s7228_s21] sm:$0xff]  ;;  %s8861_s15 = sld [smem:[#allocation6_spill]]  ;;  %s8862_s18 = sld [smem:[#allocation9_spill]]  ;;  %vm4931_vm2 = vcmask 1043456  }
  0x4f   : > { %6487 = vmatprep.subr.bf16.mxu0 %v6486_v5  ;;  %6503 = vmatprep.subr.bf16.mxu1 %v6486_v5  ;;  %s8884_s0 = smov (!%p1155_p3, %s5265_s0), 31  ;;  %v6498_v15 = vpack.c.bf16 %v1248_v12, %v1247_v11  ;;  %v2076_v17 = vld [vmem:[%s7228_s21 + $0x8] sm:$0xff]  ;;  %v2077_v19 = vld [vmem:[%s7228_s21 + $0x10] sm:$0xff]  ;;  %v2078_v20 = vld [vmem:[%s7228_s21 + $0x18] sm:$0xff]  ;;  %s8863_s28 = sld [smem:[#allocation4_spill]]  ;;  %vm4932_vm3 = vcmask 15364  }
  0x50   : > { %6489 = vmatpush3.bf16.msra.mxu0 %v6486_v5  ;;  %6505 = vmatpush3.bf16.msra.mxu1 %v6486_v5  ;;  %s7403_s14 = sshll.u32 %s8884_s0, 3  ;;  %v6518_v18 = vpack.c.bf16 %v2076_v17, %v2075_v16  ;;  %v6522_v24 = vpack.c.bf16 %v2078_v20, %v2077_v19  ;;  %v2079_v26 = vld [vmem:[%s7228_s21 + $0x20] sm:$0xff]  ;;  %v2080_v27 = vld [vmem:[%s7228_s21 + $0x28] sm:$0xff]  ;;  %v2081_v33 = vld [vmem:[%s7228_s21 + $0x30] sm:$0xff]  ;;  %s8864_s23 = sld [smem:[#allocation19_spill]]  ;;  %vm3793_vm5 = vcmask 7168  }
  0x51   : > { %6491 = vmatprep.subr.bf16.mxu0 %v6490_v7  ;;  %6507 = vmatprep.subr.bf16.mxu1 %v6490_v7  ;;  %s7409_s2 = scalar_lea.vmem %s7208_s5, %s7403_s14  ;;  %s7413_s6 = scalar_lea.vmem %s7213_s9, %s7403_s14  ;;  %v6526_v31 = vpack.c.bf16 %v2080_v27, %v2079_v26  ;;  %v2082_v34 = vld [vmem:[%s7228_s21 + $0x38] sm:$0xff]  ;;  %v2251_v58 = vld [vmem:[%s7238_s29] sm:$0xff]  ;;  %v2252_v59 = vld [vmem:[%s7238_s29 + $0x8] sm:$0xff] }
  0x52   : > { %v7416_v13 = vld [vmem:[%s7409_s2] sm:$0xff]  ;;  %v7430_v21 = vld [vmem:[%s7409_s2 + $0x8] sm:$0xff]  ;;  %v7436_v23 = vld [vmem:[%s7409_s2 + $0x10] sm:$0xff]  ;;  %v6530_v38 = vpack.c.bf16 %v2082_v34, %v2081_v33  ;;  %v6534_v60 = vpack.c.bf16 %v2252_v59, %v2251_v58  ;;  %s7804_s7 = scalar_lea.vmem %s7351_s10, %s7403_s14  ;;  %s8869_s1 = sld [smem:[#allocation5_spill]] }
  0x53   : > { %v7419_v14 = vld [vmem:[%s7413_s6] sm:$0xff]  ;;  %5918 = vmatprep.mubr.msk.f32.mxu0 %vm1250_vm0, %v7416_v13  ;;  %v7433_v22 = vld [vmem:[%s7413_s6 + $0x8] sm:$0xff]  ;;  %v7439_v25 = vld [vmem:[%s7413_s6 + $0x10] sm:$0xff] }
  0x54   : > { %6493 = vmatpush3.bf16.msra.mxu0 %v6490_v7  ;;  %6509 = vmatpush3.bf16.msra.mxu1 %v6490_v7  ;;  %v7450_v28 = vld [vmem:[%s7409_s2 + $0x18] sm:$0xff]  ;;  %v7456_v30 = vld [vmem:[%s7409_s2 + $0x20] sm:$0xff]  ;;  %v1214_v35 = vld [vmem:[%s7409_s2 + $0x28] sm:$0xff] }
  0x55   : > { %6495 = vmatprep.subr.bf16.mxu0 %v6494_v10  ;;  %6511 = vmatprep.subr.bf16.mxu1 %v6494_v10  ;;  %v7453_v29 = vld [vmem:[%s7413_s6 + $0x18] sm:$0xff]  ;;  %v7461_v32 = vld [vmem:[%s7413_s6 + $0x20] sm:$0xff]  ;;  %v7473_v36 = vld [vmem:[%s7413_s6 + $0x28] sm:$0xff] }
  0x56   : > { %5958 = vmatprep.mubr.msk.f32.mxu1 %vm1250_vm0, %v7419_v14  ;;  %v1215_v37 = vld [vmem:[%s7409_s2 + $0x30] sm:$0xff]  ;;  %v1216_v40 = vld [vmem:[%s7409_s2 + $0x38] sm:$0xff]  ;;  %v1217_v42 = vld [vmem:[%s7409_s2 + $0x40] sm:$0xff]  ;;  %s8272_s26 = scalar_lea.vmem %s8864_s23, %s7403_s14  ;;  %s5280_s23 = sshll.u32 %s8884_s0, 2 }
  0x57   : > { %v7479_v39 = vld [vmem:[%s7413_s6 + $0x30] sm:$0xff]  ;;  %v7487_v41 = vld [vmem:[%s7413_s6 + $0x38] sm:$0xff]  ;;  %v7493_v43 = vld [vmem:[%s7413_s6 + $0x40] sm:$0xff]  ;;  %s8874_s0 = sld [smem:[#allocation7_spill]] }
  0x58   : > { %6497 = vmatpush3.bf16.msra.mxu0 %v6494_v10  ;;  %6513 = vmatpush3.bf16.msra.mxu1 %v6494_v10  ;;  %v1218_v44 = vld [vmem:[%s7409_s2 + $0x48] sm:$0xff]  ;;  %v1219_v46 = vld [vmem:[%s7409_s2 + $0x50] sm:$0xff]  ;;  %v1220_v48 = vld [vmem:[%s7409_s2 + $0x58] sm:$0xff] }
  0x59   : > { %6499 = vmatprep.subr.bf16.mxu0 %v6498_v15  ;;  %6515 = vmatprep.subr.bf16.mxu1 %v6498_v15  ;;  %v7501_v45 = vld [vmem:[%s7413_s6 + $0x48] sm:$0xff]  ;;  %v7507_v47 = vld [vmem:[%s7413_s6 + $0x50] sm:$0xff]  ;;  %v7517_v49 = vld [vmem:[%s7413_s6 + $0x58] sm:$0xff] }
  0x5a   : > { %v1221_v50 = vld [vmem:[%s7409_s2 + $0x60] sm:$0xff]  ;;  %v1222_v52 = vld [vmem:[%s7409_s2 + $0x68] sm:$0xff]  ;;  %v1223_v54 = vld [vmem:[%s7409_s2 + $0x70] sm:$0xff] }
  0x5b   : > { %v7521_v51 = vld [vmem:[%s7413_s6 + $0x60] sm:$0xff]  ;;  %v7531_v53 = vld [vmem:[%s7413_s6 + $0x68] sm:$0xff]  ;;  %v7535_v55 = vld [vmem:[%s7413_s6 + $0x70] sm:$0xff] }
  0x5c   : > { %6501 = vmatpush3.bf16.msra.mxu0 %v6498_v15  ;;  %6517 = vmatpush3.bf16.msra.mxu1 %v6498_v15  ;;  %v1224_v56 = vld [vmem:[%s7409_s2 + $0x78] sm:$0xff]  ;;  %v2253_v61 = vld [vmem:[%s7238_s29 + $0x10] sm:$0xff]  ;;  %v2255_v0 = vld [vmem:[%s7238_s29 + $0x20] sm:$0xff] }
  0x5d   : > { %6519 = vmatprep.subr.bf16.mxu0 %v6518_v18  ;;  %v7545_v57 = vld [vmem:[%s7413_s6 + $0x78] sm:$0xff]  ;;  %6774 = vmatprep.subr.bf16.mxu1 %v6534_v60  ;;  %v2256_v1 = vld [vmem:[%s7238_s29 + $0x28] sm:$0xff]  ;;  %v2257_v3 = vld [vmem:[%s7238_s29 + $0x30] sm:$0xff] }
  0x5e   : > { %v2254_v62 = vld [vmem:[%s7238_s29 + $0x18] sm:$0xff]  ;;  %v6542_v2 = vpack.c.bf16 %v2256_v1, %v2255_v0  ;;  %v2259_v6 = vld [vmem:[%s7238_s29 + $0x40] sm:$0xff]  ;;  %v2260_v7 = vld [vmem:[%s7238_s29 + $0x48] sm:$0xff] }
  0x5f   : > { %5919 = vmatmul.mubr.msk.f32.vlgmr.msra.gmra.mrb[0].mxu0 %vm1250_vm0, %v7430_v21  ;;  %5959 = vmatmul.mubr.msk.f32.vlgmr.msra.gmra.mrb[0].mxu1 %vm1250_vm0, %v7433_v22  ;;  %v6538_v63 = vpack.c.bf16 %v2254_v62, %v2253_v61  ;;  %v2258_v4 = vld [vmem:[%s7238_s29 + $0x38] sm:$0xff]  ;;  %v6550_v8 = vpack.c.bf16 %v2260_v7, %v2259_v6  ;;  %v2261_v9 = vld [vmem:[%s7238_s29 + $0x50] sm:$0xff]  ;;  %v2263_v12 = vld [vmem:[%s7238_s29 + $0x60] sm:$0xff] }
  0x60   : > { %6521 = vmatpush3.bf16.msra.mxu0 %v6518_v18  ;;  %5921 = vmatprep.mubr.msk.f32.mxu0 %vm1250_vm0, %v7436_v23  ;;  %v6546_v5 = vpack.c.bf16 %v2258_v4, %v2257_v3  ;;  %v2262_v10 = vld [vmem:[%s7238_s29 + $0x58] sm:$0xff]  ;;  %v2265_v16 = vld [vmem:[%s7238_s29 + $0x70] sm:$0xff]  ;;  %v2659_v19 = vld [vmem:[%s7258_s19] sm:$0xff] }
  0x61   : > { %5961 = vmatprep.mubr.msk.f32.mxu1 %vm1250_vm0, %v7439_v25  ;;  %6523 = vmatprep.subr.bf16.mxu0 %v6522_v24  ;;  %v6554_v11 = vpack.c.bf16 %v2262_v10, %v2261_v9  ;;  %v2266_v17 = vld [vmem:[%s7238_s29 + $0x78] sm:$0xff]  ;;  %v2660_v20 = vld [vmem:[%s7258_s19 + $0x8] sm:$0xff]  ;;  %vm8655_vm4 = vmor %vm4932_vm3, %vm4931_vm2 }
  0x62   : > { %6782 = vmatpush3.bf16.msra.mxu1 %v6534_v60  ;;  %v6562_v18 = vpack.c.bf16 %v2266_v17, %v2265_v16 }
  0x63   : > { %5922 = vmatmul.mubr.msk.f32.gmra.mrb[2].mxu0 %vm1250_vm0, %v7450_v28  ;;  %5962 = vmatmul.mubr.msk.f32.gmra.mrb[2].mxu1 %vm1250_vm0, %v7453_v29 }
  0x64   : > { %5924 = vmatprep.mubr.msk.f32.mxu0 %vm1250_vm0, %v7456_v30  ;;  %6525 = vmatpush3.bf16.msra.mxu0 %v6522_v24 }
  0x65   : > { %5964 = vmatprep.mubr.msk.f32.mxu1 %vm1250_vm0, %v7461_v32  ;;  %6527 = vmatprep.subr.bf16.mxu0 %v6526_v31 }
  0x66   : > { %6775 = vmatprep.subr.bf16.mxu1 %v6538_v63 }
  0x67   : > { %5925 = vmatmul.mubr.msk.f32.gmra.mrb[4].mxu0 %vm1250_vm0, %v1214_v35  ;;  %5965 = vmatmul.mubr.msk.f32.gmra.mrb[4].mxu1 %vm1250_vm0, %v7473_v36 }
  0x68   : > { %5927 = vmatprep.mubr.msk.f32.mxu0 %vm1250_vm0, %v1215_v37  ;;  %6529 = vmatpush3.bf16.msra.mxu0 %v6526_v31 }
  0x69   : > { %5967 = vmatprep.mubr.msk.f32.mxu1 %vm1250_vm0, %v7479_v39  ;;  %6531 = vmatprep.subr.bf16.mxu0 %v6530_v38 }
  0x6a   : > { %6783 = vmatpush3.bf16.msra.mxu1 %v6538_v63 }
  0x6b   : > { %5928 = vmatmul.mubr.msk.f32.gmra.mrb[6].mxu0 %vm1250_vm0, %v1216_v40  ;;  %5968 = vmatmul.mubr.msk.f32.gmra.mrb[6].mxu1 %vm1250_vm0, %v7487_v41 }
  0x6c   : > { %5930 = vmatprep.mubr.msk.f32.mxu0 %vm1250_vm0, %v1217_v42  ;;  %6533 = vmatpush3.bf16.msra.mxu0 %v6530_v38  ;;  %v7593_v38 = vld [vmem:[%s7223_s17] ss:$0 sm:$0xff] }
  0x6d   : > { %5970 = vmatprep.mubr.msk.f32.mxu1 %vm1250_vm0, %v7493_v43  ;;  %6535 = vmatprep.subr.bf16.mxu0 %v6534_v60 }
  0x6e   : > { %6776 = vmatprep.subr.bf16.mxu1 %v6542_v2 }
  0x6f   : > { %5931 = vmatmul.mubr.msk.f32.gmra.mrb[8].mxu0 %vm1250_vm0, %v1218_v44  ;;  %5971 = vmatmul.mubr.msk.f32.gmra.mrb[8].mxu1 %vm1250_vm0, %v7501_v45 }
  0x70   : > { %5933 = vmatprep.mubr.msk.f32.mxu0 %vm1250_vm0, %v1219_v46  ;;  %5973 = vmatprep.mubr.msk.f32.mxu1 %vm1250_vm0, %v7507_v47 }
  0x71   : > { %6784 = vmatpush3.bf16.msra.mxu1 %v6542_v2 }
  0x72   : > { %6777 = vmatprep.subr.bf16.mxu1 %v6546_v5 }
  0x73   : > { %5934 = vmatmul.mubr.msk.f32.gmra.mrb[10].mxu0 %vm1250_vm0, %v1220_v48  ;;  %5974 = vmatmul.mubr.msk.f32.gmra.mrb[10].mxu1 %vm1250_vm0, %v7517_v49 }
  0x74   : > { %5936 = vmatprep.mubr.msk.f32.mxu0 %vm1250_vm0, %v1221_v50  ;;  %5976 = vmatprep.mubr.msk.f32.mxu1 %vm1250_vm0, %v7521_v51 }
  0x75   : > { %6785 = vmatpush3.bf16.msra.mxu1 %v6546_v5 }
  0x76   : > { %6778 = vmatprep.subr.bf16.mxu1 %v6550_v8 }
  0x77   : > { %5937 = vmatmul.mubr.msk.f32.gmra.mrb[12].mxu0 %vm1250_vm0, %v1222_v52  ;;  %5977 = vmatmul.mubr.msk.f32.gmra.mrb[12].mxu1 %vm1250_vm0, %v7531_v53 }
  0x78   : > { %5939 = vmatprep.mubr.msk.f32.mxu0 %vm1250_vm0, %v1223_v54  ;;  %5979 = vmatprep.mubr.msk.f32.mxu1 %vm1250_vm0, %v7535_v55 }
  0x79   : > { %6786 = vmatpush3.bf16.msra.mxu1 %v6550_v8 }
  0x7a   : > { %6779 = vmatprep.subr.bf16.mxu1 %v6554_v11 }
  0x7b   : > { %5940 = vmatmul.mubr.msk.f32.gmra.mrb[14].mxu0 %vm1250_vm0, %v1224_v56  ;;  %5980 = vmatmul.mubr.msk.f32.gmra.mrb[14].mxu1 %vm1250_vm0, %v7545_v57 }
  0x7c   : > { %5998 = vmatprep.mubr.msk.f32.mxu0 %vm1250_vm0, %v7416_v13  ;;  %v2264_v13 = vld [vmem:[%s7238_s29 + $0x68] sm:$0xff] }
  0x7d   : > { %6787 = vmatpush3.bf16.msra.mxu1 %v6554_v11  ;;  %v6558_v15 = vpack.c.bf16 %v2264_v13, %v2263_v12 }
  0x7f   : > { %5999 = vmatmul.mubr.msk.f32.vlgmr.msra.gmra.mrb[16].mxu0 %vm1250_vm0, %v7430_v21  ;;  %6780 = vmatprep.subr.bf16.mxu1 %v6558_v15  ;;  %v7589_v21 = vpack.c.bf16 %v2660_v20, %v2659_v19 }
  0x80   : > { %6001 = vmatprep.mubr.msk.f32.mxu0 %vm1250_vm0, %v7436_v23  ;;  %6537 = vmatpush3.bf16.msra.mxu0 %v6534_v60 }
  0x81   : > { %6539 = vmatprep.subr.bf16.mxu0 %v6538_v63  ;;  %6788 = vmatpush3.bf16.msra.mxu1 %v6558_v15 }
  0x82   : > { %6781 = vmatprep.subr.bf16.mxu1 %v6562_v18 }
  0x83   : > { %6002 = vmatmul.mubr.msk.f32.gmra.mrb[18].mxu0 %vm1250_vm0, %v7450_v28 }
  0x84   : > { %6004 = vmatprep.mubr.msk.f32.mxu0 %vm1250_vm0, %v7456_v30  ;;  %6541 = vmatpush3.bf16.msra.mxu0 %v6538_v63 }
  0x85   : > { %6543 = vmatprep.subr.bf16.mxu0 %v6542_v2  ;;  %6789 = vmatpush3.bf16.msra.mxu1 %v6562_v18 }
  0x86   : > { %6583 = vmatprep.subr.bf16.mxu1 %v7589_v21 }
  0x87   : > { %6005 = vmatmul.mubr.msk.f32.gmra.mrb[20].mxu0 %vm1250_vm0, %v1214_v35 }
  0x88   : > { %6007 = vmatprep.mubr.msk.f32.mxu0 %vm1250_vm0, %v1215_v37  ;;  %6545 = vmatpush3.bf16.msra.mxu0 %v6542_v2 }
  0x89   : > { %6547 = vmatprep.subr.bf16.mxu0 %v6546_v5 }
  0x8b   : > { %6008 = vmatmul.mubr.msk.f32.gmra.mrb[22].mxu0 %vm1250_vm0, %v1216_v40 }
  0x8c   : > { %6010 = vmatprep.mubr.msk.f32.mxu0 %vm1250_vm0, %v1217_v42  ;;  %6549 = vmatpush3.bf16.msra.mxu0 %v6546_v5 }
  0x8d   : > { %6551 = vmatprep.subr.bf16.mxu0 %v6550_v8 }
  0x8f   : > { %6011 = vmatmul.mubr.msk.f32.gmra.mrb[24].mxu0 %vm1250_vm0, %v1218_v44 }
  0x90   : > { %6013 = vmatprep.mubr.msk.f32.mxu0 %vm1250_vm0, %v1219_v46  ;;  %6553 = vmatpush3.bf16.msra.mxu0 %v6550_v8 }
  0x91   : > { %6555 = vmatprep.subr.bf16.mxu0 %v6554_v11 }
  0x93   : > { %6014 = vmatmul.mubr.msk.f32.gmra.mrb[26].mxu0 %vm1250_vm0, %v1220_v48 }
  0x94   : > { %6016 = vmatprep.mubr.msk.f32.mxu0 %vm1250_vm0, %v1221_v50  ;;  %6557 = vmatpush3.bf16.msra.mxu0 %v6554_v11 }
  0x95   : > { %6559 = vmatprep.subr.bf16.mxu0 %v6558_v15 }
  0x97   : > { %6017 = vmatmul.mubr.msk.f32.gmra.mrb[28].mxu0 %vm1250_vm0, %v1222_v52 }
  0x98   : > { %6019 = vmatprep.mubr.msk.f32.mxu0 %vm1250_vm0, %v1223_v54  ;;  %6561 = vmatpush3.bf16.msra.mxu0 %v6558_v15 }
  0x99   : > { %6563 = vmatprep.subr.bf16.mxu0 %v6562_v18 }
  0x9b   : > { %6020 = vmatmul.mubr.msk.f32.gmra.mrb[30].mxu0 %vm1250_vm0, %v1224_v56 }
  0x9c   : > { %6565 = vmatpush3.bf16.msra.mxu0 %v6562_v18 }
 0x132   : > { %v5920_v23 = vpop.f32.mrb[0].mxu0  ;;  %v5960_v24 = vpop.f32.mrb[0].mxu1 }
 0x133   : > { %6835 = vtanh.f32 %v5920_v23  ;;  %v1365_v26 = vpop.f32.mrb[1].mxu0  ;;  %v1574_v27 = vpop.f32.mrb[1].mxu1 }
 0x134   : > { %6837 = vtanh.f32 %v1365_v26 }
 0x135   : > { %6839 = vtanh.f32 %v5960_v24 }
 0x136   : > { %v5923_v28 = vpop.f32.mrb[2].mxu0  ;;  %6841 = vtanh.f32 %v1574_v27  ;;  %v5963_v30 = vpop.f32.mrb[2].mxu1 }
 0x137   : > { %v1375_v31 = vpop.f32.mrb[3].mxu0  ;;  %v1584_v33 = vpop.f32.mrb[3].mxu1 }
 0x138   : > { %6843 = vtanh.f32 %v1375_v31 }
 0x139   : > { %6845 = vtanh.f32 %v5963_v30 }
 0x13a   : > { %v5926_v34 = vpop.f32.mrb[4].mxu0  ;;  %6847 = vtanh.f32 %v1584_v33  ;;  %v5966_v35 = vpop.f32.mrb[4].mxu1 }
 0x13b   : > { %v1385_v37 = vpop.f32.mrb[5].mxu0  ;;  %v1594_v40 = vpop.f32.mrb[5].mxu1  ;;  %6849 = vtanh.f32 %v5923_v28 }
 0x13c   : > { %6851 = vtanh.f32 %v1594_v40 }
 0x13d   : > { %v6836_v42 = vpop.eup %6835  ;;  %6853 = vtanh.f32 %v1385_v37 }
 0x13e   : > { %v6838_v44 = vpop.eup %6837  ;;  %v5929_v46 = vpop.f32.mrb[6].mxu0  ;;  %v1676_v48 = vmul.f32 %v6836_v42, %v7593_v38  ;;  %6855 = vtanh.f32 %v5966_v35 }
 0x13f   : > { %v5969_v50 = vpop.f32.mrb[6].mxu1  ;;  %v6840_v52 = vpop.eup %6839  ;;  %v1675_v56 = vmul.f32 %v6838_v44, %v7593_v38  ;;  %6857 = vtanh.f32 %v5926_v34 }
 0x140   : > { %v1395_v54 = vpop.f32.mrb[7].mxu0  ;;  %v1604_v58 = vpop.f32.mrb[7].mxu1  ;;  %v1694_v60 = vsel %vm1250_vm0, %v1676_v48, 0.0  ;;  %v1756_v61 = vmul.f32 %v6840_v52, %v7593_v38 }
 0x141   : > { %v6842_v59 = vpop.eup %6841  ;;  %1695 = vadd.xlane.f32.xlu1 %v1694_v60  ;;  %v1691_v62 = vsel %vm1250_vm0, %v1675_v56, 0.0  ;;  %6859 = vtanh.f32 %v1604_v58  ;;  %v7638_v56 = vld [vmem:[%s7233_s25] ss:$0 sm:$0xff] }
 0x142   : > { %v1755_v63 = vmul.f32 %v6842_v59, %v7593_v38  ;;  %v6844_v0 = vpop.eup %6843  ;;  %1692 = vadd.xlane.f32.xlu0 %v1691_v62  ;;  %v7601_v1 = vpop.f32.mrb[8].mxu0  ;;  %v1774_v2 = vsel %vm1250_vm0, %v1756_v61, 0.0  ;;  %6861 = vtanh.f32 %v1395_v54 }
 0x143   : > { %v5972_v3 = vpop.f32.mrb[8].mxu1  ;;  %v6846_v4 = vpop.eup %6845  ;;  %v1677_v10 = vmul.f32 %v6844_v0, %v7593_v38  ;;  %6863 = vtanh.f32 %v5969_v50 }
 0x144   : > { %v1405_v5 = vpop.f32.mrb[9].mxu0  ;;  %v1771_v6 = vsel %vm1250_vm0, %v1755_v63, 0.0  ;;  %v1614_v7 = vpop.f32.mrb[9].mxu1  ;;  %v1758_v13 = vmul.f32 %v6846_v4, %v7593_v38  ;;  %6865 = vtanh.f32 %v5929_v46 }
 0x145   : > { %v6848_v8 = vpop.eup %6847  ;;  %1775 = vadd.xlane.f32.xlu1 %v1774_v2  ;;  %v1697_v20 = vsel %vm1250_vm0, %v1677_v10, 0.0  ;;  %6867 = vtanh.f32 %v1614_v7 }
 0x146   : > { %v1757_v9 = vmul.f32 %v6848_v8, %v7593_v38  ;;  %v6850_v11 = vpop.eup %6849  ;;  %1772 = vadd.xlane.f32.xlu0 %v1771_v6  ;;  %v7607_v12 = vpop.f32.mrb[10].mxu0  ;;  %v1780_v27 = vsel %vm1250_vm0, %v1758_v13, 0.0  ;;  %6869 = vtanh.f32 %v1405_v5 }
 0x147   : > { %v7610_v15 = vpop.f32.mrb[10].mxu1  ;;  %v1415_v16 = vpop.f32.mrb[11].mxu0  ;;  %v1678_v23 = vmul.f32 %v6850_v11, %v7593_v38  ;;  %6871 = vtanh.f32 %v5972_v3 }
 0x148   : > { %v1777_v17 = vsel %vm1250_vm0, %v1757_v9, 0.0  ;;  %v1624_v18 = vpop.f32.mrb[11].mxu1  ;;  %v6852_v19 = vpop.eup %6851  ;;  %6873 = vtanh.f32 %v7601_v1 }
 0x149   : > { %1778 = vadd.xlane.f32.xlu1 %v1777_v17  ;;  %v6854_v24 = vpop.eup %6853  ;;  %v1759_v28 = vmul.f32 %v6852_v19, %v7593_v38  ;;  %v1700_v35 = vsel %vm1250_vm0, %v1678_v23, 0.0  ;;  %6875 = vtanh.f32 %v1624_v18 }
 0x14a   : > { %1698 = vadd.xlane.f32.xlu0 %v1697_v20  ;;  %v7615_v26 = vpop.f32.mrb[12].mxu0  ;;  %v7619_v30 = vpop.f32.mrb[12].mxu1  ;;  %v1679_v37 = vmul.f32 %v6854_v24, %v7593_v38  ;;  %6877 = vtanh.f32 %v1415_v16 }
 0x14b   : > { %v6856_v31 = vpop.eup %6855  ;;  %v7621_v33 = vpop.f32.mrb[13].mxu0  ;;  %v1783_v44 = vsel %vm1250_vm0, %v1759_v28, 0.0  ;;  %6879 = vtanh.f32 %v7610_v15 }
 0x14c   : > { %v7623_v34 = vpop.f32.mrb[13].mxu1  ;;  %v6858_v40 = vpop.eup %6857  ;;  %v1760_v48 = vmul.f32 %v6856_v31, %v7593_v38  ;;  %v1703_v58 = vsel %vm1250_vm0, %v1679_v37, 0.0  ;;  %6881 = vtanh.f32 %v7607_v12 }
 0x14d   : > { %1781 = vadd.xlane.f32.xlu1 %v1780_v27  ;;  %v6860_v52 = vpop.eup %6859  ;;  %v1680_v59 = vmul.f32 %v6858_v40, %v7593_v38  ;;  %6883 = vtanh.f32 %v7623_v34 }
 0x14e   : > { %1701 = vadd.xlane.f32.xlu0 %v1700_v35  ;;  %v7627_v42 = vpop.f32.mrb[14].mxu0  ;;  %v7631_v50 = vpop.f32.mrb[14].mxu1  ;;  %v1786_v62 = vsel %vm1250_vm0, %v1760_v48, 0.0  ;;  %v1761_v63 = vmul.f32 %v6860_v52, %v7593_v38  ;;  %6885 = vtanh.f32 %v7621_v33 }
 0x14f   : > { %v7633_v54 = vpop.f32.mrb[15].mxu0  ;;  %v7635_v46 = vpop.f32.mrb[15].mxu1  ;;  %v1706_v5 = vsel %vm1250_vm0, %v1680_v59, 0.0  ;;  %6887 = vtanh.f32 %v7619_v30 }
 0x150   : > { %v6862_v60 = vpop.eup %6861  ;;  %v1789_v10 = vsel %vm1250_vm0, %v1761_v63, 0.0  ;;  %6889 = vtanh.f32 %v7615_v26 }
 0x151   : > { %1784 = vadd.xlane.f32.xlu1 %v1783_v44  ;;  %v6864_v0 = vpop.eup %6863  ;;  %v1681_v6 = vmul.f32 %v6862_v60, %v7593_v38  ;;  %6891 = vtanh.f32 %v7635_v46  ;;  %v2663_v46 = vld [vmem:[%s7258_s19 + $0x20] sm:$0xff] }
 0x152   : > { %1704 = vadd.xlane.f32.xlu0 %v1703_v58  ;;  %v6000_v61 = vpop.f32.mrb[16].mxu0  ;;  %v6866_v7 = vpop.eup %6865  ;;  %v1762_v11 = vmul.f32 %v6864_v0, %v7593_v38  ;;  %6893 = vtanh.f32 %v7633_v54 }
 0x153   : > { %v2162_v2 = vadd.f32 %v6000_v61, %v7638_v56  ;;  %v2156_v4 = vpop.f32.mrb[17].mxu0  ;;  %v6868_v13 = vpop.eup %6867  ;;  %v1709_v18 = vsel %vm1250_vm0, %v1681_v6, 0.0  ;;  %v1682_v23 = vmul.f32 %v6866_v7, %v7593_v38  ;;  %6895 = vtanh.f32 %v7631_v50 }
 0x154   : > { %v2157_v3 = vadd.f32 %v7638_v56, %v2156_v4  ;;  %v6870_v24 = vpop.eup %6869  ;;  %v1792_v31 = vsel %vm1250_vm0, %v1762_v11, 0.0  ;;  %v1763_v35 = vmul.f32 %v6868_v13, %v7593_v38  ;;  %6897 = vtanh.f32 %v7627_v42 }
 0x155   : > { %1787 = vadd.xlane.f32.xlu1 %v1786_v62  ;;  %v2236_v17 = vmax.f32 %v2162_v2, 0.0  ;;  %v6872_v16 = vpop.eup %6871  ;;  %v1712_v48 = vsel %vm1250_vm0, %v1682_v23, 0.0  ;;  %v1683_v52 = vmul.f32 %v6870_v24, %v7593_v38 }
 0x156   : > { %v2235_v8 = vmax.f32 %v2157_v3, 0.0  ;;  %1707 = vadd.xlane.f32.xlu0 %v1706_v5  ;;  %v6003_v9 = vpop.f32.mrb[18].mxu0  ;;  %v6874_v58 = vpop.eup %6873  ;;  %v1795_v61 = vsel %vm1250_vm0, %v1763_v35, 0.0  ;;  %v1764_v62 = vmul.f32 %v6872_v16, %v7593_v38 }
 0x157   : > { %v2172_v1 = vadd.f32 %v6003_v9, %v7638_v56  ;;  %v2166_v19 = vpop.f32.mrb[19].mxu0  ;;  %v6876_v12 = vpop.eup %6875  ;;  %v1715_v34 = vsel %vm1250_vm0, %v1683_v52, 0.0  ;;  %v1684_v3 = vmul.f32 %v6874_v58, %v7593_v38 }
 0x158   : > { %v2167_v20 = vadd.f32 %v7638_v56, %v2166_v19  ;;  %6054 = vmatprep.mubr.f32.mxu0 %v2235_v8  ;;  %v6878_v5 = vpop.eup %6877  ;;  %v1798_v8 = vsel %vm1250_vm0, %v1764_v62, 0.0  ;;  %v1765_v33 = vmul.f32 %v6876_v12, %v7593_v38 }
 0x159   : > { %6055 = vmatmul.mubr.f32.vlgmr.msra.gmra.mrb[32].mxu0 %v2236_v17  ;;  %1790 = vadd.xlane.f32.xlu1 %v1789_v10  ;;  %v2238_v37 = vmax.f32 %v2172_v1, 0.0  ;;  %v6880_v9 = vpop.eup %6879  ;;  %v2661_v17 = vld [vmem:[%s7258_s19 + $0x10] sm:$0xff]  ;;  %v2662_v1 = vld [vmem:[%s7258_s19 + $0x18] sm:$0xff]  ;;  %v1718_v19 = vsel %vm1250_vm0, %v1684_v3, 0.0 }
 0x15a   : > { %v2237_v27 = vmax.f32 %v2167_v20, 0.0  ;;  %1710 = vadd.xlane.f32.xlu0 %v1709_v18  ;;  %v6006_v28 = vpop.f32.mrb[20].mxu0  ;;  %v1685_v20 = vmul.f32 %v6878_v5, %v7593_v38  ;;  %v6882_v18 = vpop.eup %6881  ;;  %v1801_v26 = vsel %vm1250_vm0, %v1765_v33, 0.0 }
 0x15b   : > { %v2182_v40 = vadd.f32 %v6006_v28, %v7638_v56  ;;  %v2176_v44 = vpop.f32.mrb[21].mxu0  ;;  %v6884_v28 = vpop.eup %6883 }
 0x15c   : > { %v2177_v15 = vadd.f32 %v7638_v56, %v2176_v44  ;;  %6057 = vmatprep.mubr.f32.mxu0 %v2237_v27  ;;  %v1766_v27 = vmul.f32 %v6880_v9, %v7593_v38  ;;  %v2664_v44 = vld [vmem:[%s7258_s19 + $0x28] sm:$0xff]  ;;  %v6886_v52 = vpop.eup %6885 }
 0x15d   : > { %6058 = vmatmul.mubr.f32.gmra.mrb[34].mxu0 %v2238_v37  ;;  %1793 = vadd.xlane.f32.xlu1 %v1792_v31  ;;  %v2240_v63 = vmax.f32 %v2182_v40, 0.0  ;;  %v6586_v37 = vpack.c.bf16 %v2662_v1, %v2661_v17 }
 0x15e   : > { %v2239_v59 = vmax.f32 %v2177_v15, 0.0  ;;  %1713 = vadd.xlane.f32.xlu0 %v1712_v48  ;;  %v6009_v60 = vpop.f32.mrb[22].mxu0  ;;  %v1721_v15 = vsel %vm1250_vm0, %v1685_v20, 0.0  ;;  %v1686_v48 = vmul.f32 %v6882_v18, %v7593_v38  ;;  %v1804_v54 = vsel %vm1250_vm0, %v1766_v27, 0.0 }
 0x15f   : > { %v2192_v0 = vadd.f32 %v6009_v60, %v7638_v56  ;;  %v2186_v2 = vpop.f32.mrb[23].mxu0  ;;  %v1767_v60 = vmul.f32 %v6884_v28, %v7593_v38 }
 0x160   : > { %v2187_v4 = vadd.f32 %v7638_v56, %v2186_v2  ;;  %6060 = vmatprep.mubr.f32.mxu0 %v2239_v59  ;;  %v2665_v2 = vld [vmem:[%s7258_s19 + $0x30] sm:$0xff] }
 0x161   : > { %6061 = vmatmul.mubr.f32.gmra.mrb[36].mxu0 %v2240_v63  ;;  %1796 = vadd.xlane.f32.xlu1 %v1795_v61  ;;  %v2242_v10 = vmax.f32 %v2192_v0, 0.0  ;;  %v6888_v61 = vpop.eup %6887  ;;  %v6590_v63 = vpack.c.bf16 %v2664_v44, %v2663_v46 }
 0x162   : > { %v2241_v6 = vmax.f32 %v2187_v4, 0.0  ;;  %1716 = vadd.xlane.f32.xlu0 %v1715_v34  ;;  %v6012_v7 = vpop.f32.mrb[24].mxu0  ;;  %v2666_v4 = vld [vmem:[%s7258_s19 + $0x38] sm:$0xff]  ;;  %v1687_v34 = vmul.f32 %v6886_v52, %v7593_v38  ;;  %v6890_v3 = vpop.eup %6889  ;;  %v1768_v42 = vmul.f32 %v6888_v61, %v7593_v38 }
 0x163   : > { %v2202_v11 = vadd.f32 %v6012_v7, %v7638_v56  ;;  %v2196_v30 = vpop.f32.mrb[25].mxu0  ;;  %v1807_v7 = vsel %vm1250_vm0, %v1767_v60, 0.0  ;;  %v1688_v17 = vmul.f32 %v6890_v3, %v7593_v38 }
 0x164   : > { %v2197_v13 = vadd.f32 %v7638_v56, %v2196_v30  ;;  %6063 = vmatprep.mubr.f32.mxu0 %v2241_v6  ;;  %v1810_v20 = vsel %vm1250_vm0, %v1768_v42, 0.0 }
 0x165   : > { %6064 = vmatmul.mubr.f32.gmra.mrb[38].mxu0 %v2242_v10  ;;  %1799 = vadd.xlane.f32.xlu1 %v1798_v8  ;;  %v2244_v31 = vmax.f32 %v2202_v11, 0.0  ;;  %v6892_v8 = vpop.eup %6891  ;;  %v6594_v11 = vpack.c.bf16 %v2666_v4, %v2665_v2 }
 0x166   : > { %v2243_v23 = vmax.f32 %v2197_v13, 0.0  ;;  %1719 = vadd.xlane.f32.xlu0 %v1718_v19  ;;  %v6015_v24 = vpop.f32.mrb[26].mxu0  ;;  %v1727_v13 = vsel %vm1250_vm0, %v1687_v34, 0.0  ;;  %v6894_v1 = vpop.eup %6893  ;;  %v1769_v18 = vmul.f32 %v6892_v8, %v7593_v38 }
 0x167   : > { %v2212_v35 = vadd.f32 %v6015_v24, %v7638_v56  ;;  %v2206_v16 = vpop.f32.mrb[27].mxu0 }
 0x168   : > { %v2207_v40 = vadd.f32 %v7638_v56, %v2206_v16  ;;  %6066 = vmatprep.mubr.f32.mxu1 %v2243_v23  ;;  %v6896_v23 = vpop.eup %6895  ;;  %v1813_v28 = vsel %vm1250_vm0, %v1769_v18, 0.0 }
 0x169   : > { %6067 = vmatmul.mubr.f32.vlgmr.msra.gmra.mrb[16].mxu1 %v2244_v31  ;;  %1802 = vadd.xlane.f32.xlu1 %v1801_v26  ;;  %v2246_v62 = vmax.f32 %v2212_v35, 0.0  ;;  %v1689_v26 = vmul.f32 %v6894_v1, %v7593_v38  ;;  %v6898_v27 = vpop.eup %6897  ;;  %v1770_v31 = vmul.f32 %v6896_v23, %v7593_v38 }
 0x16a   : > { %v2245_v58 = vmax.f32 %v2207_v40, 0.0  ;;  %1722 = vadd.xlane.f32.xlu0 %v1721_v15  ;;  %v6018_v59 = vpop.f32.mrb[28].mxu0  ;;  %6585 = vmatpush3.bf16.msra.mxu1 %v7589_v21  ;;  %v1724_v21 = vsel %vm1250_vm0, %v1686_v48, 0.0  ;;  %v1690_v16 = vmul.f32 %v6898_v27, %v7593_v38 }
 0x16b   : > { %v2222_v50 = vadd.f32 %v6018_v59, %v7638_v56  ;;  %v2216_v12 = vpop.f32.mrb[29].mxu0  ;;  %6587 = vmatprep.subr.bf16.mxu1 %v6586_v37  ;;  %v1733_v35 = vsel %vm1250_vm0, %v1689_v26, 0.0 }
 0x16c   : > { %v2217_v0 = vadd.f32 %v7638_v56, %v2216_v12  ;;  %6069 = vmatprep.mubr.f32.mxu1 %v2245_v58 }
 0x16d   : > { %6070 = vmatmul.mubr.f32.gmra.mrb[18].mxu1 %v2246_v62  ;;  %1805 = vadd.xlane.f32.xlu1 %v1804_v54  ;;  %v2248_v33 = vmax.f32 %v2222_v50, 0.0 }
 0x16e   : > { %v2247_v5 = vmax.f32 %v2217_v0, 0.0  ;;  %1725 = vadd.xlane.f32.xlu0 %v1724_v21  ;;  %v6021_v6 = vpop.f32.mrb[30].mxu0  ;;  %6589 = vmatpush3.bf16.msra.mxu1 %v6586_v37  ;;  %v1816_v37 = vsel %vm1250_vm0, %v1770_v31, 0.0 }
 0x16f   : > { %v2232_v9 = vadd.f32 %v6021_v6, %v7638_v56  ;;  %v2226_v10 = vpop.f32.mrb[31].mxu0  ;;  %6591 = vmatprep.subr.bf16.mxu1 %v6590_v63 }
 0x170   : > { %v2227_v30 = vadd.f32 %v7638_v56, %v2226_v10  ;;  %6072 = vmatprep.mubr.f32.mxu1 %v2247_v5  ;;  %v1730_v56 = vsel %vm1250_vm0, %v1688_v17, 0.0 }
 0x171   : > { %6073 = vmatmul.mubr.f32.gmra.mrb[20].mxu1 %v2248_v33  ;;  %1808 = vadd.xlane.f32.xlu1 %v1807_v7  ;;  %v2250_v24 = vmax.f32 %v2232_v9, 0.0 }
 0x172   : > { %v2249_v19 = vmax.f32 %v2227_v30, 0.0  ;;  %1728 = vadd.xlane.f32.xlu0 %v1727_v13  ;;  %6593 = vmatpush3.bf16.msra.mxu1 %v6590_v63 }
 0x173   : > { %6595 = vmatprep.subr.bf16.mxu1 %v6594_v11 }
 0x174   : > { %6075 = vmatprep.mubr.f32.mxu1 %v2249_v19 }
 0x175   : > { %6076 = vmatmul.mubr.f32.gmra.mrb[22].mxu1 %v2250_v24  ;;  %1811 = vadd.xlane.f32.xlu1 %v1810_v20 }
 0x176   : > { %1731 = vadd.xlane.f32.xlu0 %v1730_v56  ;;  %6597 = vmatpush3.bf16.msra.mxu1 %v6594_v11 }
 0x177   : > { %6134 = vmatprep.mubr.msk.f32.mxu1 %vm1250_vm0, %v7419_v14  ;;  %v1736_v14 = vsel %vm1250_vm0, %v1690_v16, 0.0 }
 0x179   : > { %6135 = vmatmul.mubr.msk.f32.vlgmr.msra.gmra.mrb[24].mxu1 %vm1250_vm0, %v7433_v22  ;;  %1814 = vadd.xlane.f32.xlu1 %v1813_v28  ;;  %v2435_v22 = vld [vmem:[%s7248_s8] sm:$0xff] }
 0x17a   : > { %1734 = vadd.xlane.f32.xlu0 %v1733_v35  ;;  %6137 = vmatprep.mubr.msk.f32.mxu1 %vm1250_vm0, %v7439_v25  ;;  %v2436_v25 = vld [vmem:[%s7248_s8 + $0x8] sm:$0xff] }
 0x17d   : > { %6138 = vmatmul.mubr.msk.f32.gmra.mrb[26].mxu1 %vm1250_vm0, %v7453_v29  ;;  %1817 = vadd.xlane.f32.xlu1 %v1816_v37  ;;  %v6566_v29 = vpack.c.bf16 %v2436_v25, %v2435_v22 }
 0x17e   : > { %1737 = vadd.xlane.f32.xlu0 %v1736_v14  ;;  %6140 = vmatprep.mubr.msk.f32.mxu1 %vm1250_vm0, %v7461_v32  ;;  %v2437_v32 = vld [vmem:[%s7248_s8 + $0x10] sm:$0xff] }
 0x17f   : > { %6567 = vmatprep.subr.bf16.mxu0 %v6566_v29 }
 0x180   : > { %6569 = vmatpush3.bf16.msra.mxu0 %v6566_v29 }
 0x181   : > { %6141 = vmatmul.mubr.msk.f32.gmra.mrb[28].mxu1 %vm1250_vm0, %v7473_v36  ;;  %v2438_v36 = vld [vmem:[%s7248_s8 + $0x18] sm:$0xff] }
 0x182   : > { %6143 = vmatprep.mubr.msk.f32.mxu1 %vm1250_vm0, %v7479_v39  ;;  %v6570_v39 = vpack.c.bf16 %v2438_v36, %v2437_v32 }
 0x184   : > { %6571 = vmatprep.subr.bf16.mxu0 %v6570_v39 }
 0x185   : > { %6144 = vmatmul.mubr.msk.f32.gmra.mrb[30].mxu1 %vm1250_vm0, %v7487_v41  ;;  %v2439_v41 = vld [vmem:[%s7248_s8 + $0x20] sm:$0xff]  ;;  %6573 = vmatpush3.bf16.msra.mxu0 %v6570_v39 }
 0x186   : > { %6146 = vmatprep.mubr.msk.f32.mxu1 %vm1250_vm0, %v7493_v43  ;;  %v2440_v43 = vld [vmem:[%s7248_s8 + $0x28] sm:$0xff] }
 0x189   : > { %6147 = vmatmul.mubr.msk.f32.gmra.mrb[32].mxu1 %vm1250_vm0, %v7501_v45  ;;  %v6574_v45 = vpack.c.bf16 %v2440_v43, %v2439_v41 }
 0x18a   : > { %6149 = vmatprep.mubr.msk.f32.mxu1 %vm1250_vm0, %v7507_v47  ;;  %v2441_v47 = vld [vmem:[%s7248_s8 + $0x30] sm:$0xff] }
 0x18b   : > { %6575 = vmatprep.subr.bf16.mxu0 %v6574_v45 }
 0x18c   : > { %6577 = vmatpush3.bf16.msra.mxu0 %v6574_v45 }
 0x18d   : > { %6150 = vmatmul.mubr.msk.f32.gmra.mrb[34].mxu1 %vm1250_vm0, %v7517_v49  ;;  %v2442_v49 = vld [vmem:[%s7248_s8 + $0x38] sm:$0xff] }
 0x18e   : > { %6152 = vmatprep.mubr.msk.f32.mxu1 %vm1250_vm0, %v7521_v51  ;;  %v6578_v51 = vpack.c.bf16 %v2442_v49, %v2441_v47 }
 0x190   : > { %6579 = vmatprep.subr.bf16.mxu0 %v6578_v51 }
 0x191   : > { %6153 = vmatmul.mubr.msk.f32.gmra.mrb[36].mxu1 %vm1250_vm0, %v7531_v53  ;;  %6581 = vmatpush3.bf16.msra.mxu0 %v6578_v51  ;;  %v2835_v53 = vld [vmem:[%s7268_s30] sm:$0xff] }
 0x192   : > { %6155 = vmatprep.mubr.msk.f32.mxu1 %vm1250_vm0, %v7535_v55  ;;  %v2836_v55 = vld [vmem:[%s7268_s30 + $0x8] sm:$0xff] }
 0x195   : > { %6156 = vmatmul.mubr.msk.f32.gmra.mrb[38].mxu1 %vm1250_vm0, %v7545_v57  ;;  %v7760_v57 = vpack.c.bf16 %v2836_v55, %v2835_v53 }
 0x197   : > { %6599 = vmatprep.subr.bf16.mxu0 %v7760_v57 }
 0x1ce   : > { %v1696_v38 = vpop.xlane.xlu1 %1695 }
 0x1cf   : > { %v1693_v40 = vpop.xlane.xlu0 %1692  ;;  %v1740_v44 = vadd.f32 1e-06, %v1696_v38 }
 0x1d0   : > { %v1739_v52 = vadd.f32 1e-06, %v1693_v40 }
 0x1d2   : > { %v1776_v46 = vpop.xlane.xlu1 %1775 }
 0x1d3   : > { %v1820_v15 = vadd.f32 1e-06, %v1776_v46  ;;  %v1773_v48 = vpop.xlane.xlu0 %1772 }
 0x1d4   : > { %v1819_v58 = vadd.f32 1e-06, %v1773_v48 }
 0x1d5   : > { %v1836_v59 = vmax.f32 %v1740_v44, %v1820_v15 }
 0x1d6   : > { %v1835_v54 = vmax.f32 %v1739_v52, %v1819_v58  ;;  %v1779_v60 = vpop.xlane.xlu1 %1778 }
 0x1d7   : > { %v1852_v61 = vsub.f32 %v1740_v44, %v1836_v59  ;;  %v1900_v62 = vsub.f32 %v1820_v15, %v1836_v59  ;;  %v1821_v50 = vadd.f32 1e-06, %v1779_v60  ;;  %v1699_v12 = vpop.xlane.xlu0 %1698 }
 0x1d8   : > { %v1851_v63 = vsub.f32 %v1739_v52, %v1835_v54  ;;  %v1899_v0 = vsub.f32 %v1819_v58, %v1835_v54  ;;  %v1741_v2 = vadd.f32 1e-06, %v1699_v12 }
 0x1d9   : > { %v1869_v4 = vmul.f32 1.442695, %v1852_v61  ;;  %v1917_v21 = vmul.f32 1.442695, %v1900_v62 }
 0x1da   : > { %v1867_v34 = vmul.f32 1.442695, %v1851_v63  ;;  %v1915_v3 = vmul.f32 1.442695, %v1899_v0  ;;  %v1837_v5 = vmax.f32 %v1741_v2, %v1821_v50  ;;  %v1782_v6 = vpop.xlane.xlu1 %1781 }
 0x1db   : > { %6899 = vpow2.f32 %v1869_v4  ;;  %v1822_v7 = vadd.f32 1e-06, %v1782_v6  ;;  %v1702_v42 = vpop.xlane.xlu0 %1701 }
 0x1dc   : > { %6901 = vpow2.f32 %v1917_v21  ;;  %v1853_v8 = vsub.f32 %v1741_v2, %v1837_v5  ;;  %v1901_v33 = vsub.f32 %v1821_v50, %v1837_v5  ;;  %v1742_v9 = vadd.f32 1e-06, %v1702_v42 }
 0x1dd   : > { %6903 = vpow2.f32 %v1867_v34 }
 0x1de   : > { %6905 = vpow2.f32 %v1915_v3  ;;  %v1871_v10 = vmul.f32 1.442695, %v1853_v8  ;;  %v1919_v11 = vmul.f32 1.442695, %v1901_v33  ;;  %v1838_v30 = vmax.f32 %v1742_v9, %v1822_v7  ;;  %v1785_v13 = vpop.xlane.xlu1 %1784 }
 0x1df   : > { %v1823_v17 = vadd.f32 1e-06, %v1785_v13  ;;  %v1705_v1 = vpop.xlane.xlu0 %1704 }
 0x1e0   : > { %6907 = vpow2.f32 %v1871_v10  ;;  %v1854_v19 = vsub.f32 %v1742_v9, %v1838_v30  ;;  %v1902_v20 = vsub.f32 %v1822_v7, %v1838_v30  ;;  %v1743_v18 = vadd.f32 1e-06, %v1705_v1 }
 0x1e1   : > { %6909 = vpow2.f32 %v1919_v11 }
 0x1e2   : > { %v1873_v23 = vmul.f32 1.442695, %v1854_v19  ;;  %v1921_v24 = vmul.f32 1.442695, %v1902_v20  ;;  %v1839_v56 = vmax.f32 %v1743_v18, %v1823_v17  ;;  %v1788_v26 = vpop.xlane.xlu1 %1787 }
 0x1e3   : > { %v1824_v27 = vadd.f32 1e-06, %v1788_v26  ;;  %v1708_v28 = vpop.xlane.xlu0 %1707 }
 0x1e4   : > { %6911 = vpow2.f32 %v1873_v23  ;;  %v1855_v31 = vsub.f32 %v1743_v18, %v1839_v56  ;;  %v1903_v35 = vsub.f32 %v1823_v17, %v1839_v56  ;;  %v1744_v16 = vadd.f32 1e-06, %v1708_v28  ;;  %v7790_v56 = vld [vmem:[%s7409_s2 + $0x8] sm:$0xff] }
 0x1e5   : > { %v6900_v37 = vpop.eup %6899  ;;  %6913 = vpow2.f32 %v1921_v24 }
 0x1e6   : > { %v6902_v14 = vpop.eup %6901  ;;  %v1875_v22 = vmul.f32 1.442695, %v1855_v31  ;;  %v1923_v25 = vmul.f32 1.442695, %v1903_v35  ;;  %v1840_v29 = vmax.f32 %v1744_v16, %v1824_v27  ;;  %v1791_v32 = vpop.xlane.xlu1 %1790 }
 0x1e7   : > { %v7763_v36 = vpop.eup %6903  ;;  %v1948_v39 = vadd.f32 %v6902_v14, %v6900_v37  ;;  %v1825_v41 = vadd.f32 1e-06, %v1791_v32  ;;  %v1711_v43 = vpop.xlane.xlu0 %1710 }
 0x1e8   : > { %v7765_v45 = vpop.eup %6905  ;;  %6915 = vpow2.f32 %v1875_v22  ;;  %v1856_v47 = vsub.f32 %v1744_v16, %v1840_v29  ;;  %v1904_v49 = vsub.f32 %v1824_v27, %v1840_v29  ;;  %v1745_v51 = vadd.f32 1e-06, %v1711_v43  ;;  %v7794_v27 = vld [vmem:[%s7413_s6 + $0x8] sm:$0xff] }
 0x1e9   : > { %6917 = vrcp.f32 %v1948_v39  ;;  %v1947_v53 = vadd.f32 %v7765_v45, %v7763_v36 }
 0x1ea   : > { %v7769_v55 = vpop.eup %6907  ;;  %6919 = vpow2.f32 %v1923_v25  ;;  %v1877_v38 = vmul.f32 1.442695, %v1856_v47  ;;  %v1925_v40 = vmul.f32 1.442695, %v1904_v49  ;;  %v1841_v46 = vmax.f32 %v1745_v51, %v1825_v41  ;;  %v1794_v44 = vpop.xlane.xlu1 %1793 }
 0x1eb   : > { %v7771_v15 = vpop.eup %6909  ;;  %6921 = vrcp.f32 %v1947_v53  ;;  %v1826_v48 = vadd.f32 1e-06, %v1794_v44  ;;  %v1714_v52 = vpop.xlane.xlu0 %1713 }
 0x1ec   : > { %v1949_v58 = vadd.f32 %v7771_v15, %v7769_v55  ;;  %6923 = vpow2.f32 %v1877_v38  ;;  %v1857_v59 = vsub.f32 %v1745_v51, %v1841_v46  ;;  %v1905_v54 = vsub.f32 %v1825_v41, %v1841_v46 }
 0x1ed   : > { %6925 = vpow2.f32 %v1925_v40  ;;  %v1746_v60 = vadd.f32 1e-06, %v1714_v52  ;;  %v7810_v40 = vld [vmem:[%s7409_s2] sm:$0xff] }
 0x1ee   : > { %v7775_v61 = vpop.eup %6911  ;;  %v1879_v62 = vmul.f32 1.442695, %v1857_v59  ;;  %v1927_v50 = vmul.f32 1.442695, %v1905_v54  ;;  %v1797_v12 = vpop.xlane.xlu1 %1796  ;;  %6927 = vrcp.f32 %v1949_v58  ;;  %v7818_v54 = vld [vmem:[%s7413_s6] sm:$0xff] }
 0x1ef   : > { %v7777_v63 = vpop.eup %6913  ;;  %v1842_v0 = vmax.f32 %v1746_v60, %v1826_v48  ;;  %v1827_v2 = vadd.f32 1e-06, %v1797_v12  ;;  %v1717_v4 = vpop.xlane.xlu0 %1716 }
 0x1f0   : > { %v1950_v21 = vadd.f32 %v7777_v63, %v7775_v61  ;;  %6929 = vpow2.f32 %v1879_v62  ;;  %v1747_v34 = vadd.f32 1e-06, %v1717_v4 }
 0x1f1   : > { %6931 = vpow2.f32 %v1927_v50  ;;  %v1858_v3 = vsub.f32 %v1746_v60, %v1842_v0  ;;  %v1906_v5 = vsub.f32 %v1826_v48, %v1842_v0 }
 0x1f2   : > { %v7781_v6 = vpop.eup %6915  ;;  %v1843_v7 = vmax.f32 %v1747_v34, %v1827_v2  ;;  %v1800_v42 = vpop.xlane.xlu1 %1799  ;;  %6933 = vrcp.f32 %v1950_v21 }
 0x1f3   : > { %v6918_v8 = vpop.eup %6917  ;;  %v1881_v33 = vmul.f32 1.442695, %v1858_v3  ;;  %v1929_v9 = vmul.f32 1.442695, %v1906_v5  ;;  %v1828_v10 = vadd.f32 1e-06, %v1800_v42  ;;  %v1720_v11 = vpop.xlane.xlu0 %1719 }
 0x1f4   : > { %v7783_v30 = vpop.eup %6919  ;;  %v1980_v13 = vmul.f32 %v6918_v8, %v6900_v37  ;;  %v2012_v17 = vmul.f32 %v6918_v8, %v6902_v14  ;;  %v1859_v1 = vsub.f32 %v1747_v34, %v1843_v7  ;;  %v1907_v19 = vsub.f32 %v1827_v2, %v1843_v7 }
 0x1f5   : > { %v6922_v20 = vpop.eup %6921  ;;  %v1951_v18 = vadd.f32 %v7783_v30, %v7781_v6  ;;  %6935 = vpow2.f32 %v1881_v33  ;;  %v1748_v23 = vadd.f32 1e-06, %v1720_v11  ;;  %v7835_v33 = vld [vmem:[%s7409_s2 + $0x10] sm:$0xff] }
 0x1f6   : > { %v7787_v24 = vpop.eup %6923  ;;  %v1996_v26 = vmul.f32 %v7790_v56, %v1980_v13  ;;  %v2028_v28 = vmul.f32 %v7794_v27, %v2012_v17  ;;  %6937 = vpow2.f32 %v1929_v9  ;;  %v1883_v31 = vmul.f32 1.442695, %v1859_v1  ;;  %v1803_v35 = vpop.xlane.xlu1 %1802 }
 0x1f7   : > { %v7797_v16 = vpop.eup %6925  ;;  %6939 = vrcp.f32 %v1951_v18  ;;  %v1931_v37 = vmul.f32 1.442695, %v1907_v19  ;;  %v1844_v14 = vmax.f32 %v1748_v23, %v1828_v10  ;;  %v1829_v22 = vadd.f32 1e-06, %v1803_v35  ;;  %v1723_v25 = vpop.xlane.xlu0 %1722 }
 0x1f8   : > { %v1952_v29 = vadd.f32 %v7797_v16, %v7787_v24  ;;  %6941 = vpow2.f32 %v1883_v31  ;;  %v1749_v32 = vadd.f32 1e-06, %v1723_v25  ;;  %v1979_v39 = vmul.f32 %v6922_v20, %v7763_v36  ;;  %v6928_v41 = vpop.eup %6927 }
 0x1f9   : > { %6943 = vpow2.f32 %v1931_v37  ;;  %v1860_v43 = vsub.f32 %v1748_v23, %v1844_v14  ;;  %v1908_v47 = vsub.f32 %v1828_v10, %v1844_v14  ;;  %v2011_v49 = vmul.f32 %v6922_v20, %v7765_v45  ;;  %v7844_v20 = vld [vmem:[%s7413_s6 + $0x10] sm:$0xff] }
 0x1fa   : > { %v7807_v51 = vpop.eup %6929  ;;  %6945 = vrcp.f32 %v1952_v29  ;;  %v1845_v53 = vmax.f32 %v1749_v32, %v1829_v22  ;;  %v1806_v38 = vpop.xlane.xlu1 %1805  ;;  %v1995_v46 = vmul.f32 %v7810_v40, %v1979_v39  ;;  %v7813_v36 = vadd.f32 %v2028_v28, %v1996_v26 }
 0x1fb   : > { %v7815_v44 = vpop.eup %6931  ;;  %v1885_v48 = vmul.f32 1.442695, %v1860_v43  ;;  %v1933_v52 = vmul.f32 1.442695, %v1908_v47  ;;  %v1830_v58 = vadd.f32 1e-06, %v1806_v38  ;;  %v1726_v59 = vpop.xlane.xlu0 %1725  ;;  %v2027_v45 = vmul.f32 %v7818_v54, %v2011_v49 }
 0x1fc   : > { %v1953_v60 = vadd.f32 %v7815_v44, %v7807_v51  ;;  %v1861_v62 = vsub.f32 %v1749_v32, %v1845_v53  ;;  %v1909_v50 = vsub.f32 %v1829_v22, %v1845_v53  ;;  %v1750_v12 = vadd.f32 1e-06, %v1726_v59  ;;  %2060 = vst.msk [vmem:[%s7804_s7 + $0x8] sm:$0xff] %vm1250_vm0, %v7813_v36  ;;  %v6934_v0 = vpop.eup %6933  ;;  %v7856_v32 = vld [vmem:[%s7409_s2 + $0x18] sm:$0xff] }
 0x1fd   : > { %6947 = vpow2.f32 %v1885_v48  ;;  %v7826_v2 = vadd.f32 %v2027_v45, %v1995_v46  ;;  %v1981_v4 = vmul.f32 %v6928_v41, %v7769_v55  ;;  %v2013_v55 = vmul.f32 %v6928_v41, %v7771_v15  ;;  %v7865_v49 = vld [vmem:[%s7413_s6 + $0x18] sm:$0xff] }
 0x1fe   : > { %6949 = vrcp.f32 %v1953_v60  ;;  %v1887_v21 = vmul.f32 1.442695, %v1861_v62  ;;  %v1935_v34 = vmul.f32 1.442695, %v1909_v50  ;;  %v1846_v3 = vmax.f32 %v1750_v12, %v1830_v58  ;;  %v1809_v5 = vpop.xlane.xlu1 %1808 }
 0x1ff   : > { %v7829_v7 = vpop.eup %6935  ;;  %6951 = vpow2.f32 %v1933_v52  ;;  %v1831_v42 = vadd.f32 1e-06, %v1809_v5  ;;  %v1729_v8 = vpop.xlane.xlu0 %1728  ;;  %2059 = vst.msk [vmem:[%s7804_s7] sm:$0xff] %vm1250_vm0, %v7826_v2  ;;  %v1997_v9 = vmul.f32 %v7835_v33, %v1981_v4  ;;  %v2029_v18 = vmul.f32 %v7844_v20, %v2013_v55  ;;  %v7875_v4 = vld [vmem:[%s7409_s2 + $0x20] sm:$0xff] }
 0x200   : > { %v7839_v10 = vpop.eup %6937  ;;  %6953 = vpow2.f32 %v1887_v21  ;;  %v1862_v11 = vsub.f32 %v1750_v12, %v1846_v3  ;;  %v1910_v13 = vsub.f32 %v1830_v58, %v1846_v3  ;;  %v1751_v17 = vadd.f32 1e-06, %v1729_v8 }
 0x201   : > { %v6940_v1 = vpop.eup %6939  ;;  %v1954_v19 = vadd.f32 %v7839_v10, %v7829_v7  ;;  %6955 = vpow2.f32 %v1935_v34  ;;  %v1982_v23 = vmul.f32 %v6934_v0, %v7775_v61  ;;  %v2014_v37 = vmul.f32 %v6934_v0, %v7777_v63 }
 0x202   : > { %v7848_v26 = vpop.eup %6941  ;;  %v1889_v15 = vmul.f32 1.442695, %v1862_v11  ;;  %v1937_v28 = vmul.f32 1.442695, %v1910_v13  ;;  %v1847_v31 = vmax.f32 %v1751_v17, %v1831_v42  ;;  %v1812_v35 = vpop.xlane.xlu1 %1811  ;;  %v7853_v29 = vadd.f32 %v2029_v18, %v1997_v9 }
 0x203   : > { %v7851_v14 = vpop.eup %6943  ;;  %6957 = vrcp.f32 %v1954_v19  ;;  %v1832_v22 = vadd.f32 1e-06, %v1812_v35  ;;  %v1732_v25 = vpop.xlane.xlu0 %1731  ;;  %v1998_v61 = vmul.f32 %v7856_v32, %v1982_v23  ;;  %v2030_v53 = vmul.f32 %v7865_v49, %v2014_v37 }
 0x204   : > { %v6946_v39 = vpop.eup %6945  ;;  %v1955_v41 = vadd.f32 %v7851_v14, %v7848_v26  ;;  %6959 = vpow2.f32 %v1889_v15  ;;  %v1863_v43 = vsub.f32 %v1751_v17, %v1847_v31  ;;  %v1911_v47 = vsub.f32 %v1831_v42, %v1847_v31  ;;  %2061 = vst.msk [vmem:[%s7804_s7 + $0x10] sm:$0xff] %vm1250_vm0, %v7853_v29  ;;  %v7885_v42 = vld [vmem:[%s7413_s6 + $0x20] sm:$0xff] }
 0x205   : > { %6961 = vpow2.f32 %v1937_v28  ;;  %v1752_v63 = vadd.f32 1e-06, %v1732_v25  ;;  %v1983_v52 = vmul.f32 %v6940_v1, %v7781_v6  ;;  %v7871_v62 = vadd.f32 %v2030_v53, %v1998_v61 }
 0x206   : > { %6963 = vrcp.f32 %v1955_v41  ;;  %v1891_v38 = vmul.f32 1.442695, %v1863_v43  ;;  %v1939_v46 = vmul.f32 1.442695, %v1911_v47  ;;  %v1815_v48 = vpop.xlane.xlu1 %1814  ;;  %v2015_v50 = vmul.f32 %v6940_v1, %v7783_v30 }
 0x207   : > { %v7869_v58 = vpop.eup %6947  ;;  %v1848_v59 = vmax.f32 %v1752_v63, %v1832_v22  ;;  %v1833_v45 = vadd.f32 1e-06, %v1815_v48  ;;  %v1735_v60 = vpop.xlane.xlu0 %1734  ;;  %v1999_v21 = vmul.f32 %v7875_v4, %v1983_v52  ;;  %v1984_v6 = vmul.f32 %v6946_v39, %v7787_v24  ;;  %2062 = vst.msk [vmem:[%s7804_s7 + $0x18] sm:$0xff] %vm1250_vm0, %v7871_v62  ;;  %v7893_v24 = vld [vmem:[%s7409_s2 + $0x28] sm:$0xff] }
 0x208   : > { %v6950_v12 = vpop.eup %6949  ;;  %6965 = vpow2.f32 %v1891_v38  ;;  %v1753_v0 = vadd.f32 1e-06, %v1735_v60  ;;  %v2031_v30 = vmul.f32 %v7885_v42, %v2015_v50  ;;  %v2016_v17 = vmul.f32 %v6946_v39, %v7797_v16  ;;  %v7907_v16 = vld [vmem:[%s7413_s6 + $0x28] sm:$0xff] }
 0x209   : > { %v7879_v34 = vpop.eup %6951  ;;  %6967 = vpow2.f32 %v1939_v46  ;;  %v1864_v3 = vsub.f32 %v1752_v63, %v1848_v59  ;;  %v1912_v5 = vsub.f32 %v1832_v22, %v1848_v59  ;;  %v2000_v13 = vmul.f32 %v7893_v24, %v1984_v6  ;;  %v7921_v59 = vld [vmem:[%s7409_s2 + $0x30] sm:$0xff] }
 0x20a   : > { %v7888_v8 = vpop.eup %6953  ;;  %v1956_v9 = vadd.f32 %v7879_v34, %v7869_v58  ;;  %v1849_v55 = vmax.f32 %v1753_v0, %v1833_v45  ;;  %v1818_v11 = vpop.xlane.xlu1 %1817  ;;  %v7899_v28 = vadd.f32 %v2031_v30, %v1999_v21  ;;  %v2032_v61 = vmul.f32 %v7907_v16, %v2016_v17  ;;  %v7935_v21 = vld [vmem:[%s7409_s2 + $0x38] sm:$0xff] }
 0x20b   : > { %v7897_v1 = vpop.eup %6955  ;;  %v1893_v19 = vmul.f32 1.442695, %v1864_v3  ;;  %v1941_v18 = vmul.f32 1.442695, %v1912_v5  ;;  %v1834_v23 = vadd.f32 1e-06, %v1818_v11  ;;  %v1738_v15 = vpop.xlane.xlu0 %1737  ;;  %v1985_v47 = vmul.f32 %v6950_v12, %v7807_v51 }
 0x20c   : > { %6969 = vrcp.f32 %v1956_v9  ;;  %v1957_v31 = vadd.f32 %v7897_v1, %v7888_v8  ;;  %v1865_v35 = vsub.f32 %v1753_v0, %v1849_v55  ;;  %v1913_v37 = vsub.f32 %v1833_v45, %v1849_v55  ;;  %2063 = vst.msk [vmem:[%s7804_s7 + $0x20] sm:$0xff] %vm1250_vm0, %v7899_v28  ;;  %v7929_v0 = vld [vmem:[%s7413_s6 + $0x30] sm:$0xff]  ;;  %v7945_v17 = vld [vmem:[%s7413_s6 + $0x38] sm:$0xff] }
 0x20d   : > { %v6958_v22 = vpop.eup %6957  ;;  %6971 = vpow2.f32 %v1893_v19  ;;  %v1754_v25 = vadd.f32 1e-06, %v1738_v15  ;;  %v7915_v38 = vadd.f32 %v2032_v61, %v2000_v13  ;;  %v2017_v46 = vmul.f32 %v6950_v12, %v7815_v44 }
 0x20e   : > { %v7910_v39 = vpop.eup %6959  ;;  %6973 = vrcp.f32 %v1957_v31  ;;  %v1895_v41 = vmul.f32 1.442695, %v1865_v35  ;;  %v1943_v43 = vmul.f32 1.442695, %v1913_v37  ;;  %v2001_v45 = vmul.f32 %v7921_v59, %v1985_v47  ;;  %v7976_v47 = vld [vmem:[%s7413_s6 + $0x48] sm:$0xff] }
 0x20f   : > { %v7913_v63 = vpop.eup %6961  ;;  %6975 = vpow2.f32 %v1941_v18  ;;  %v1850_v53 = vmax.f32 %v1754_v25, %v1834_v23  ;;  %v1986_v51 = vmul.f32 %v6958_v22, %v7829_v7  ;;  %2064 = vst.msk [vmem:[%s7804_s7 + $0x28] sm:$0xff] %vm1250_vm0, %v7915_v38  ;;  %v2033_v44 = vmul.f32 %v7929_v0, %v2017_v46  ;;  %v7949_v18 = vld [vmem:[%s7409_s2 + $0x40] sm:$0xff] }
 0x210   : > { %v6964_v48 = vpop.eup %6963  ;;  %v1958_v52 = vadd.f32 %v7913_v63, %v7910_v39  ;;  %6977 = vpow2.f32 %v1895_v41  ;;  %v2018_v6 = vmul.f32 %v6958_v22, %v7839_v10  ;;  %v7972_v41 = vld [vmem:[%s7409_s2 + $0x48] sm:$0xff] }
 0x211   : > { %6979 = vpow2.f32 %v1943_v43  ;;  %v1866_v60 = vsub.f32 %v1754_v25, %v1850_v53  ;;  %v1914_v50 = vsub.f32 %v1834_v23, %v1850_v53  ;;  %v2002_v7 = vmul.f32 %v7935_v21, %v1986_v51  ;;  %v7984_v51 = vld [vmem:[%s7409_s2 + $0x50] sm:$0xff] }
 0x212   : > { %v7932_v12 = vpop.eup %6965  ;;  %6981 = vrcp.f32 %v1958_v52  ;;  %v1987_v3 = vmul.f32 %v6964_v48, %v7848_v26  ;;  %v7940_v55 = vadd.f32 %v2033_v44, %v2001_v45  ;;  %v2019_v11 = vmul.f32 %v6964_v48, %v7851_v14  ;;  %v7956_v26 = vld [vmem:[%s7413_s6 + $0x40] sm:$0xff] }
 0x213   : > { %v6968_v5 = vpop.eup %6967  ;;  %v1897_v30 = vmul.f32 1.442695, %v1866_v60  ;;  %v1945_v9 = vmul.f32 1.442695, %v1914_v50  ;;  %v2034_v19 = vmul.f32 %v7945_v17, %v2018_v6  ;;  %v7988_v50 = vld [vmem:[%s7413_s6 + $0x50] sm:$0xff] }
 0x214   : > { %v1959_v13 = vadd.f32 %v6968_v5, %v7932_v12  ;;  %v2003_v10 = vmul.f32 %v7949_v18, %v1987_v3  ;;  %2065 = vst.msk [vmem:[%s7804_s7 + $0x30] sm:$0xff] %vm1250_vm0, %v7940_v55  ;;  %v2035_v14 = vmul.f32 %v7956_v26, %v2019_v11 }
 0x215   : > { %6983 = vpow2.f32 %v1897_v30  ;;  %v7959_v15 = vadd.f32 %v2034_v19, %v2002_v7 }
 0x216   : > { %v6970_v23 = vpop.eup %6969  ;;  %6985 = vrcp.f32 %v1959_v13  ;;  %v7961_v35 = vadd.f32 %v2035_v14, %v2003_v10  ;;  %v8006_v13 = vld [vmem:[%s7413_s6 + $0x58] sm:$0xff] }
 0x217   : > { %v6972_v31 = vpop.eup %6971  ;;  %6987 = vpow2.f32 %v1945_v9  ;;  %v1988_v37 = vmul.f32 %v6970_v23, %v7869_v58  ;;  %v2020_v22 = vmul.f32 %v6970_v23, %v7879_v34  ;;  %2066 = vst.msk [vmem:[%s7804_s7 + $0x38] sm:$0xff] %vm1250_vm0, %v7959_v15  ;;  %v8002_v9 = vld [vmem:[%s7409_s2 + $0x58] sm:$0xff] }
 0x218   : > { %v6974_v25 = vpop.eup %6973  ;;  %2067 = vst.msk [vmem:[%s7804_s7 + $0x40] sm:$0xff] %vm1250_vm0, %v7961_v35 }
 0x219   : > { %v6976_v61 = vpop.eup %6975  ;;  %v2004_v43 = vmul.f32 %v7972_v41, %v1988_v37  ;;  %v2036_v58 = vmul.f32 %v7976_v47, %v2020_v22  ;;  %v1989_v34 = vmul.f32 %v6974_v25, %v7888_v8  ;;  %v2021_v53 = vmul.f32 %v6974_v25, %v7897_v1  ;;  %v8016_v22 = vld [vmem:[%s7409_s2 + $0x60] sm:$0xff] }
 0x21a   : > { %v6978_v46 = vpop.eup %6977  ;;  %v1960_v48 = vadd.f32 %v6976_v61, %v6972_v31 }
 0x21b   : > { %v6980_v52 = vpop.eup %6979  ;;  %v7981_v45 = vadd.f32 %v2036_v58, %v2004_v43  ;;  %v2005_v60 = vmul.f32 %v7984_v51, %v1989_v34  ;;  %v2037_v44 = vmul.f32 %v7988_v50, %v2021_v53  ;;  %v8020_v43 = vld [vmem:[%s7413_s6 + $0x60] sm:$0xff] }
 0x21c   : > { %v6982_v7 = vpop.eup %6981  ;;  %6989 = vrcp.f32 %v1960_v48  ;;  %v1961_v8 = vadd.f32 %v6980_v52, %v6978_v46 }
 0x21d   : > { %2068 = vst.msk [vmem:[%s7804_s7 + $0x48] sm:$0xff] %vm1250_vm0, %v7981_v45  ;;  %v7994_v1 = vadd.f32 %v2037_v44, %v2005_v60  ;;  %v1990_v6 = vmul.f32 %v6982_v7, %v7910_v39  ;;  %v2022_v3 = vmul.f32 %v6982_v7, %v7913_v63  ;;  %v8029_v60 = vld [vmem:[%s7409_s2 + $0x68] sm:$0xff] }
 0x21e   : > { %6991 = vrcp.f32 %v1961_v8  ;;  %v8033_v7 = vld [vmem:[%s7413_s6 + $0x68] sm:$0xff] }
 0x21f   : > { %v6984_v30 = vpop.eup %6983  ;;  %2069 = vst.msk [vmem:[%s7804_s7 + $0x50] sm:$0xff] %vm1250_vm0, %v7994_v1  ;;  %v2006_v11 = vmul.f32 %v8002_v9, %v1990_v6  ;;  %v2038_v19 = vmul.f32 %v8006_v13, %v2022_v3 }
 0x220   : > { %v6986_v10 = vpop.eup %6985 }
 0x221   : > { %v6988_v39 = vpop.eup %6987  ;;  %v8009_v14 = vadd.f32 %v2038_v19, %v2006_v11  ;;  %v1991_v63 = vmul.f32 %v6986_v10, %v7932_v12  ;;  %v2023_v23 = vmul.f32 %v6986_v10, %v6968_v5  ;;  %v8037_v11 = vld [vmem:[%s7243_s3] ss:$0 sm:$0xff]  ;;  %v8046_v10 = vld [vmem:[%s7413_s6 + $0x70] sm:$0xff] }
 0x222   : > { %v1962_v37 = vadd.f32 %v6988_v39, %v6984_v30 }
 0x223   : > { %2070 = vst.msk [vmem:[%s7804_s7 + $0x58] sm:$0xff] %vm1250_vm0, %v8009_v14  ;;  %v2007_v25 = vmul.f32 %v8016_v22, %v1991_v63  ;;  %v2039_v58 = vmul.f32 %v8020_v43, %v2023_v23 }
 0x224   : > { %6993 = vrcp.f32 %v1962_v37 }
 0x225   : > { %v8023_v34 = vadd.f32 %v2039_v58, %v2007_v25 }
 0x226   : > { %v6990_v12 = vpop.eup %6989 }
 0x227   : > { %8855 = vst [vmem:[#allocation22_spill] sm:$0xff] %v8023_v34  ;;  %2071 = vst.msk [vmem:[%s7804_s7 + $0x60] sm:$0xff] %vm1250_vm0, %v8023_v34  ;;  %v1992_v5 = vmul.f32 %v6990_v12, %v6972_v31  ;;  %v2024_v53 = vmul.f32 %v6990_v12, %v6976_v61  ;;  %v8042_v31 = vld [vmem:[%s7409_s2 + $0x70] sm:$0xff] }
 0x228   : > { %v6992_v48 = vpop.eup %6991 }
 0x229   : > { %v2008_v44 = vmul.f32 %v8029_v60, %v1992_v5  ;;  %v2040_v8 = vmul.f32 %v8033_v7, %v2024_v53  ;;  %v1993_v6 = vmul.f32 %v6992_v48, %v6978_v46  ;;  %v2025_v3 = vmul.f32 %v6992_v48, %v6980_v52  ;;  %v2837_v46 = vld [vmem:[%s7268_s30 + $0x10] sm:$0xff]  ;;  %v2838_v52 = vld [vmem:[%s7268_s30 + $0x18] sm:$0xff] }
 0x22b   : > { %v8039_v19 = vadd.f32 %v2040_v8, %v2008_v44  ;;  %v2009_v61 = vmul.f32 %v8042_v31, %v1993_v6  ;;  %v2041_v63 = vmul.f32 %v8046_v10, %v2025_v3  ;;  %v6602_v6 = vpack.c.bf16 %v2838_v52, %v2837_v46 }
 0x22c   : > { %v6056_v23 = vpop.f32.mrb[32].mxu0 }
 0x22d   : > { %8856 = vst [vmem:[#allocation23_spill] sm:$0xff] %v8039_v19  ;;  %v2346_v37 = vadd.f32 %v6056_v23, %v8037_v11  ;;  %v2340_v25 = vpop.f32.mrb[33].mxu0  ;;  %2072 = vst.msk [vmem:[%s7804_s7 + $0x68] sm:$0xff] %vm1250_vm0, %v8039_v19  ;;  %v8055_v58 = vadd.f32 %v2041_v63, %v2009_v61  ;;  %v8063_v19 = vld [vmem:[%s7409_s2 + $0x78] sm:$0xff]  ;;  %s8870_s2 = sld [smem:[#allocation8_spill]] }
 0x22e   : > { %v6994_v12 = vpop.eup %6993  ;;  %v2341_v5 = vadd.f32 %v8037_v11, %v2340_v25  ;;  %v8067_v63 = vld [vmem:[%s7413_s6 + $0x78] sm:$0xff]  ;;  %s8871_s6 = sld [smem:[#allocation14_spill]] }
 0x22f   : > { %8857 = vst [vmem:[#allocation24_spill] sm:$0xff] %v8055_v58  ;;  %2073 = vst.msk [vmem:[%s7804_s7 + $0x70] sm:$0xff] %vm1250_vm0, %v8055_v58  ;;  %v1994_v53 = vmul.f32 %v6994_v12, %v6984_v30  ;;  %v2026_v48 = vmul.f32 %v6994_v12, %v6988_v39  ;;  %v2420_v3 = vmax.f32 %v2346_v37, 0.0  ;;  %v2839_v30 = vld [vmem:[%s7268_s30 + $0x20] sm:$0xff]  ;;  %v2840_v39 = vld [vmem:[%s7268_s30 + $0x28] sm:$0xff] }
 0x230   : > { %v2419_v44 = vmax.f32 %v2341_v5, 0.0  ;;  %v6059_v8 = vpop.f32.mrb[34].mxu0 }
 0x231   : > { %v2356_v23 = vadd.f32 %v6059_v8, %v8037_v11  ;;  %v2350_v34 = vpop.f32.mrb[35].mxu0  ;;  %v2010_v61 = vmul.f32 %v8063_v19, %v1994_v53  ;;  %v2042_v25 = vmul.f32 %v8067_v63, %v2026_v48 }
 0x232   : > { %v2351_v58 = vadd.f32 %v8037_v11, %v2350_v34  ;;  %6094 = vmatprep.mubr.msk.f32.mxu0 %vm1250_vm0, %v2419_v44  ;;  %v6606_v34 = vpack.c.bf16 %v2840_v39, %v2839_v30  ;;  %v2841_v44 = vld [vmem:[%s7268_s30 + $0x30] sm:$0xff]  ;;  %v2843_v39 = vld [vmem:[%s7268_s30 + $0x40] sm:$0xff] }
 0x233   : > { %6095 = vmatmul.mubr.msk.f32.vlgmr.msra.gmra.mrb[40].mxu0 %vm1250_vm0, %v2420_v3  ;;  %v8075_v37 = vadd.f32 %v2042_v25, %v2010_v61  ;;  %v2422_v12 = vmax.f32 %v2356_v23, 0.0 }
 0x234   : > { %v2421_v46 = vmax.f32 %v2351_v58, 0.0  ;;  %v6062_v52 = vpop.f32.mrb[36].mxu0  ;;  %6601 = vmatpush3.bf16.msra.mxu0 %v7760_v57  ;;  %v2842_v58 = vld [vmem:[%s7268_s30 + $0x38] sm:$0xff] }
 0x235   : > { %8858 = vst [vmem:[#allocation25_spill] sm:$0xff] %v8075_v37  ;;  %v2366_v5 = vadd.f32 %v6062_v52, %v8037_v11  ;;  %v2360_v53 = vpop.f32.mrb[37].mxu0  ;;  %6603 = vmatprep.subr.bf16.mxu0 %v6602_v6  ;;  %2074 = vst.msk [vmem:[%s7804_s7 + $0x78] sm:$0xff] %vm1250_vm0, %v8075_v37  ;;  %v6610_v25 = vpack.c.bf16 %v2842_v58, %v2841_v44  ;;  %v2845_v58 = vld [vmem:[%s7268_s30 + $0x50] sm:$0xff]  ;;  %s8872_s7 = sld [smem:[#allocation13_spill]] }
 0x236   : > { %v2361_v48 = vadd.f32 %v8037_v11, %v2360_v53  ;;  %6097 = vmatprep.mubr.msk.f32.mxu0 %vm1250_vm0, %v2421_v46  ;;  %v2844_v46 = vld [vmem:[%s7268_s30 + $0x48] sm:$0xff] }
 0x237   : > { %6098 = vmatmul.mubr.msk.f32.gmra.mrb[42].mxu0 %vm1250_vm0, %v2422_v12  ;;  %v2424_v3 = vmax.f32 %v2366_v5, 0.0 }
 0x238   : > { %v2423_v57 = vmax.f32 %v2361_v48, 0.0  ;;  %v6065_v8 = vpop.f32.mrb[38].mxu0  ;;  %6605 = vmatpush3.bf16.msra.mxu0 %v6602_v6  ;;  %v6614_v48 = vpack.c.bf16 %v2844_v46, %v2843_v39  ;;  %v2847_v46 = vld [vmem:[%s7268_s30 + $0x60] sm:$0xff] }
 0x239   : > { %v2376_v23 = vadd.f32 %v6065_v8, %v8037_v11  ;;  %v2370_v61 = vpop.f32.mrb[39].mxu0  ;;  %6607 = vmatprep.subr.bf16.mxu0 %v6606_v34 }
 0x23a   : > { %v2371_v30 = vadd.f32 %v8037_v11, %v2370_v61  ;;  %6100 = vmatprep.mubr.msk.f32.mxu0 %vm1250_vm0, %v2423_v57  ;;  %v2846_v57 = vld [vmem:[%s7268_s30 + $0x58] sm:$0xff] }
 0x23b   : > { %6101 = vmatmul.mubr.msk.f32.gmra.mrb[44].mxu0 %vm1250_vm0, %v2424_v3  ;;  %v2426_v6 = vmax.f32 %v2376_v23, 0.0 }
 0x23c   : > { %v2425_v52 = vmax.f32 %v2371_v30, 0.0  ;;  %v6068_v12 = vpop.f32.mrb[16].mxu1  ;;  %6609 = vmatpush3.bf16.msra.mxu0 %v6606_v34  ;;  %v6618_v30 = vpack.c.bf16 %v2846_v57, %v2845_v58  ;;  %v2849_v57 = vld [vmem:[%s7268_s30 + $0x70] sm:$0xff] }
 0x23d   : > { %v2386_v5 = vadd.f32 %v6068_v12, %v8037_v11  ;;  %v2380_v53 = vpop.f32.mrb[17].mxu1  ;;  %6611 = vmatprep.subr.bf16.mxu0 %v6610_v25 }
 0x23e   : > { %v2381_v44 = vadd.f32 %v8037_v11, %v2380_v53  ;;  %6103 = vmatprep.mubr.msk.f32.mxu0 %vm1250_vm0, %v2425_v52  ;;  %v2848_v52 = vld [vmem:[%s7268_s30 + $0x68] sm:$0xff] }
 0x23f   : > { %6104 = vmatmul.mubr.msk.f32.gmra.mrb[46].mxu0 %vm1250_vm0, %v2426_v6  ;;  %v2428_v34 = vmax.f32 %v2386_v5, 0.0 }
 0x240   : > { %v2427_v8 = vmax.f32 %v2381_v44, 0.0  ;;  %v6071_v3 = vpop.f32.mrb[18].mxu1  ;;  %6613 = vmatpush3.bf16.msra.mxu0 %v6610_v25  ;;  %v6622_v44 = vpack.c.bf16 %v2848_v52, %v2847_v46  ;;  %v8115_v52 = vld [vmem:[%s7263_s24] ss:$0 sm:$0xff] }
 0x241   : > { %v2396_v23 = vadd.f32 %v6071_v3, %v8037_v11  ;;  %v2390_v61 = vpop.f32.mrb[19].mxu1  ;;  %6615 = vmatprep.subr.bf16.mxu0 %v6614_v48 }
 0x242   : > { %v2391_v39 = vadd.f32 %v8037_v11, %v2390_v61  ;;  %6106 = vmatprep.mubr.msk.f32.mxu0 %vm1250_vm0, %v2427_v8  ;;  %v2850_v8 = vld [vmem:[%s7268_s30 + $0x78] sm:$0xff] }
 0x243   : > { %6107 = vmatmul.mubr.msk.f32.gmra.mrb[48].mxu0 %vm1250_vm0, %v2428_v34  ;;  %v2430_v25 = vmax.f32 %v2396_v23, 0.0 }
 0x244   : > { %v2429_v12 = vmax.f32 %v2391_v39, 0.0  ;;  %v6074_v6 = vpop.f32.mrb[20].mxu1  ;;  %6617 = vmatpush3.bf16.msra.mxu0 %v6614_v48  ;;  %v6626_v39 = vpack.c.bf16 %v2850_v8, %v2849_v57  ;;  %v3245_v8 = vld [vmem:[%s7288_s27 + $0x10] sm:$0xff] }
 0x245   : > { %v2406_v5 = vadd.f32 %v6074_v6, %v8037_v11  ;;  %v2400_v53 = vpop.f32.mrb[21].mxu1  ;;  %6619 = vmatprep.subr.bf16.mxu0 %v6618_v30  ;;  %v3244_v6 = vld [vmem:[%s7288_s27 + $0x8] sm:$0xff] }
 0x246   : > { %v2401_v58 = vadd.f32 %v8037_v11, %v2400_v53  ;;  %6109 = vmatprep.mubr.msk.f32.mxu0 %vm1250_vm0, %v2429_v12  ;;  %v3243_v12 = vld [vmem:[%s7288_s27] sm:$0xff] }
 0x247   : > { %6110 = vmatmul.mubr.msk.f32.gmra.mrb[50].mxu0 %vm1250_vm0, %v2430_v25  ;;  %v2432_v48 = vmax.f32 %v2406_v5, 0.0  ;;  %v6646_v57 = vpack.c.bf16 %v3244_v6, %v3243_v12  ;;  %v3247_v6 = vld [vmem:[%s7288_s27 + $0x20] sm:$0xff] }
 0x248   : > { %v2431_v3 = vmax.f32 %v2401_v58, 0.0  ;;  %v6077_v34 = vpop.f32.mrb[22].mxu1  ;;  %6621 = vmatpush3.bf16.msra.mxu0 %v6618_v30 }
 0x249   : > { %v2416_v23 = vadd.f32 %v6077_v34, %v8037_v11  ;;  %v2410_v61 = vpop.f32.mrb[23].mxu1  ;;  %6623 = vmatprep.subr.bf16.mxu0 %v6622_v44 }
 0x24a   : > { %v2411_v46 = vadd.f32 %v8037_v11, %v2410_v61  ;;  %6112 = vmatprep.mubr.msk.f32.mxu0 %vm1250_vm0, %v2431_v3  ;;  %v3246_v3 = vld [vmem:[%s7288_s27 + $0x18] sm:$0xff] }
 0x24b   : > { %6113 = vmatmul.mubr.msk.f32.gmra.mrb[52].mxu0 %vm1250_vm0, %v2432_v48  ;;  %v2434_v5 = vmax.f32 %v2416_v23, 0.0 }
 0x24c   : > { %v2433_v25 = vmax.f32 %v2411_v46, 0.0  ;;  %v6136_v30 = vpop.f32.mrb[24].mxu1  ;;  %6625 = vmatpush3.bf16.msra.mxu0 %v6622_v44  ;;  %v6650_v46 = vpack.c.bf16 %v3246_v3, %v3245_v8  ;;  %v3249_v3 = vld [vmem:[%s7288_s27 + $0x30] sm:$0xff] }
 0x24d   : > { %v2746_v53 = vadd.f32 %v6136_v30, %v8115_v52  ;;  %v2740_v58 = vpop.f32.mrb[25].mxu1  ;;  %6627 = vmatprep.subr.bf16.mxu0 %v6626_v39 }
 0x24e   : > { %v2741_v11 = vadd.f32 %v8115_v52, %v2740_v58  ;;  %6115 = vmatprep.mubr.msk.f32.mxu0 %vm1250_vm0, %v2433_v25  ;;  %v3248_v25 = vld [vmem:[%s7288_s27 + $0x28] sm:$0xff] }
 0x24f   : > { %6116 = vmatmul.mubr.msk.f32.gmra.mrb[54].mxu0 %vm1250_vm0, %v2434_v5  ;;  %v2820_v44 = vmax.f32 %v2746_v53, 0.0 }
 0x250   : > { %v2819_v34 = vmax.f32 %v2741_v11, 0.0  ;;  %v6139_v48 = vpop.f32.mrb[26].mxu1  ;;  %6629 = vmatpush3.bf16.msra.mxu0 %v6626_v39  ;;  %v6654_v11 = vpack.c.bf16 %v3248_v25, %v3247_v6  ;;  %v3810_v6 = vld [vmem:[%s8859_s11] sm:$0xff]  ;;  %v3811_v25 = vld [vmem:[%s8859_s11 + $0x8] sm:$0xff] }
 0x251   : > { %v2756_v23 = vadd.f32 %v6139_v48, %v8115_v52  ;;  %v2750_v61 = vpop.f32.mrb[27].mxu1  ;;  %6647 = vmatprep.subr.bf16.mxu0 %v6646_v57  ;;  %v3250_v48 = vld [vmem:[%s7288_s27 + $0x38] sm:$0xff] }
 0x252   : > { %v2751_v12 = vadd.f32 %v8115_v52, %v2750_v61  ;;  %6190 = vmatprep.mubr.f32.mxu0 %v2819_v34 }
 0x253   : > { %6191 = vmatmul.mubr.f32.vlgmr.msra.gmra.mrb[56].mxu0 %v2820_v44  ;;  %v2822_v5 = vmax.f32 %v2756_v23, 0.0 }
 0x254   : > { %v2821_v30 = vmax.f32 %v2751_v12, 0.0  ;;  %v6142_v58 = vpop.f32.mrb[28].mxu1  ;;  %6649 = vmatpush3.bf16.msra.mxu0 %v6646_v57  ;;  %v6658_v12 = vpack.c.bf16 %v3250_v48, %v3249_v3 }
 0x255   : > { %v2766_v39 = vadd.f32 %v6142_v58, %v8115_v52  ;;  %v2760_v53 = vpop.f32.mrb[29].mxu1  ;;  %6651 = vmatprep.subr.bf16.mxu0 %v6650_v46 }
 0x256   : > { %v2761_v8 = vadd.f32 %v8115_v52, %v2760_v53  ;;  %6193 = vmatprep.mubr.f32.mxu0 %v2821_v30 }
 0x257   : > { %6194 = vmatmul.mubr.f32.gmra.mrb[58].mxu0 %v2822_v5  ;;  %v2824_v44 = vmax.f32 %v2766_v39, 0.0 }
 0x258   : > { %v2823_v34 = vmax.f32 %v2761_v8, 0.0  ;;  %v6145_v61 = vpop.f32.mrb[30].mxu1  ;;  %6653 = vmatpush3.bf16.msra.mxu0 %v6650_v46  ;;  %v6694_v46 = vpack.c.bf16 %v3811_v25, %v3810_v6 }
 0x259   : > { %v2776_v57 = vadd.f32 %v6145_v61, %v8115_v52  ;;  %v2770_v23 = vpop.f32.mrb[31].mxu1  ;;  %6655 = vmatprep.subr.bf16.mxu0 %v6654_v11 }
 0x25a   : > { %v2771_v58 = vadd.f32 %v8115_v52, %v2770_v23  ;;  %6196 = vmatprep.mubr.f32.mxu0 %v2823_v34 }
 0x25b   : > { %6197 = vmatmul.mubr.f32.gmra.mrb[60].mxu0 %v2824_v44  ;;  %v2826_v37 = vmax.f32 %v2776_v57, 0.0 }
 0x25c   : > { %v2825_v53 = vmax.f32 %v2771_v58, 0.0  ;;  %v6148_v30 = vpop.f32.mrb[32].mxu1  ;;  %6657 = vmatpush3.bf16.msra.mxu0 %v6654_v11 }
 0x25d   : > { %v2786_v5 = vadd.f32 %v6148_v30, %v8115_v52  ;;  %v2780_v8 = vpop.f32.mrb[33].mxu1  ;;  %6659 = vmatprep.subr.bf16.mxu0 %v6658_v12 }
 0x25e   : > { %v2781_v39 = vadd.f32 %v8115_v52, %v2780_v8  ;;  %6199 = vmatprep.mubr.f32.mxu0 %v2825_v53 }
 0x25f   : > { %6200 = vmatmul.mubr.f32.gmra.mrb[62].mxu0 %v2826_v37  ;;  %v2828_v34 = vmax.f32 %v2786_v5, 0.0 }
 0x260   : > { %v2827_v3 = vmax.f32 %v2781_v39, 0.0  ;;  %v6151_v48 = vpop.f32.mrb[34].mxu1  ;;  %6661 = vmatpush3.bf16.msra.mxu0 %v6658_v12 }
 0x261   : > { %v2796_v61 = vadd.f32 %v6151_v48, %v8115_v52  ;;  %v2790_v44 = vpop.f32.mrb[35].mxu1  ;;  %6695 = vmatprep.subr.bf16.mxu0 %v6694_v46 }
 0x262   : > { %v2791_v11 = vadd.f32 %v8115_v52, %v2790_v44  ;;  %6202 = vmatprep.mubr.f32.mxu0 %v2827_v3 }
 0x263   : > { %6203 = vmatmul.mubr.f32.gmra.mrb[64].mxu0 %v2828_v34  ;;  %v2830_v58 = vmax.f32 %v2796_v61, 0.0  ;;  %v3812_v34 = vld [vmem:[%s8859_s11 + $0x10] sm:$0xff]  ;;  %v3813_v61 = vld [vmem:[%s8859_s11 + $0x18] sm:$0xff] }
 0x264   : > { %v2829_v57 = vmax.f32 %v2791_v11, 0.0  ;;  %v6154_v23 = vpop.f32.mrb[36].mxu1  ;;  %v6698_v44 = vpack.c.bf16 %v3813_v61, %v3812_v34  ;;  %v3814_v11 = vld [vmem:[%s8859_s11 + $0x20] sm:$0xff] }
 0x265   : > { %v2806_v6 = vadd.f32 %v6154_v23, %v8115_v52  ;;  %v2800_v25 = vpop.f32.mrb[37].mxu1  ;;  %v3816_v23 = vld [vmem:[%s8859_s11 + $0x30] sm:$0xff] }
 0x266   : > { %v2801_v37 = vadd.f32 %v8115_v52, %v2800_v25  ;;  %6205 = vmatprep.mubr.f32.mxu0 %v2829_v57  ;;  %v3815_v57 = vld [vmem:[%s8859_s11 + $0x28] sm:$0xff] }
 0x267   : > { %6206 = vmatmul.mubr.f32.gmra.mrb[66].mxu0 %v2830_v58  ;;  %v2832_v30 = vmax.f32 %v2806_v6, 0.0  ;;  %v3817_v58 = vld [vmem:[%s8859_s11 + $0x38] sm:$0xff]  ;;  %v4376_v6 = vld [vmem:[%s8860_s4] sm:$0xff]  ;;  %v4377_v25 = vld [vmem:[%s8860_s4 + $0x8] sm:$0xff] }
 0x268   : > { %v2831_v12 = vmax.f32 %v2801_v37, 0.0  ;;  %v6157_v53 = vpop.f32.mrb[38].mxu1 }
 0x269   : > { %v2816_v5 = vadd.f32 %v6157_v53, %v8115_v52  ;;  %v2810_v8 = vpop.f32.mrb[39].mxu1 }
 0x26a   : > { %v2811_v39 = vadd.f32 %v8115_v52, %v2810_v8  ;;  %6208 = vmatprep.mubr.f32.mxu0 %v2831_v12  ;;  %v6702_v52 = vpack.c.bf16 %v3815_v57, %v3814_v11 }
 0x26b   : > { %6209 = vmatmul.mubr.f32.gmra.mrb[68].mxu0 %v2832_v30  ;;  %v2834_v48 = vmax.f32 %v2816_v5, 0.0 }
 0x26c   : > { %v2833_v3 = vmax.f32 %v2811_v39, 0.0 }
 0x26e   : > { %6211 = vmatprep.mubr.f32.mxu0 %v2833_v3 }
 0x26f   : > { %6212 = vmatmul.mubr.f32.gmra.mrb[70].mxu0 %v2834_v48 }
 0x270   : > { %6270 = vmatprep.mubr.msk.f32.mxu0 %vm1250_vm0, %v7810_v40  ;;  %v6706_v40 = vpack.c.bf16 %v3817_v58, %v3816_v23 }
 0x273   : > { %6271 = vmatmul.mubr.msk.f32.vlgmr.msra.gmra.mrb[72].mxu0 %vm1250_vm0, %v7790_v56  ;;  %v6742_v56 = vpack.c.bf16 %v4377_v25, %v4376_v6 }
 0x274   : > { %6697 = vmatpush3.bf16.msra.mxu0 %v6694_v46  ;;  %6273 = vmatprep.mubr.msk.f32.mxu0 %vm1250_vm0, %v7835_v33  ;;  %v4378_v33 = vld [vmem:[%s8860_s4 + $0x10] sm:$0xff] }
 0x275   : > { %6699 = vmatprep.subr.bf16.mxu0 %v6698_v44 }
 0x277   : > { %6274 = vmatmul.mubr.msk.f32.gmra.mrb[74].mxu0 %vm1250_vm0, %v7856_v32  ;;  %v4379_v32 = vld [vmem:[%s8860_s4 + $0x18] sm:$0xff] }
 0x278   : > { %6276 = vmatprep.mubr.msk.f32.mxu0 %vm1250_vm0, %v7875_v4  ;;  %6701 = vmatpush3.bf16.msra.mxu0 %v6698_v44  ;;  %v3019_v4 = vld [vmem:[%s8861_s15] sm:$0xff] }
 0x279   : > { %6703 = vmatprep.subr.bf16.mxu0 %v6702_v52 }
 0x27b   : > { %6277 = vmatmul.mubr.msk.f32.gmra.mrb[76].mxu0 %vm1250_vm0, %v7893_v24  ;;  %v3020_v24 = vld [vmem:[%s8861_s15 + $0x8] sm:$0xff] }
 0x27c   : > { %6279 = vmatprep.mubr.msk.f32.mxu0 %vm1250_vm0, %v7921_v59  ;;  %6705 = vmatpush3.bf16.msra.mxu0 %v6702_v52  ;;  %v6630_v59 = vpack.c.bf16 %v3020_v24, %v3019_v4 }
 0x27d   : > { %6707 = vmatprep.subr.bf16.mxu0 %v6706_v40 }
 0x27e   : > { %6631 = vmatprep.subr.bf16.mxu1 %v6630_v59 }
 0x27f   : > { %6280 = vmatmul.mubr.msk.f32.gmra.mrb[78].mxu0 %vm1250_vm0, %v7935_v21  ;;  %v6746_v21 = vpack.c.bf16 %v4379_v32, %v4378_v33  ;;  %6633 = vmatpush3.bf16.msra.mxu1 %v6630_v59 }
 0x280   : > { %6282 = vmatprep.mubr.msk.f32.mxu0 %vm1250_vm0, %v7949_v18  ;;  %6709 = vmatpush3.bf16.msra.mxu0 %v6706_v40  ;;  %v4380_v18 = vld [vmem:[%s8860_s4 + $0x20] sm:$0xff] }
 0x281   : > { %6743 = vmatprep.subr.bf16.mxu0 %v6742_v56 }
 0x283   : > { %6283 = vmatmul.mubr.msk.f32.gmra.mrb[80].mxu0 %vm1250_vm0, %v7972_v41  ;;  %v4381_v41 = vld [vmem:[%s8860_s4 + $0x28] sm:$0xff] }
 0x284   : > { %6285 = vmatprep.mubr.msk.f32.mxu0 %vm1250_vm0, %v7984_v51  ;;  %v6750_v51 = vpack.c.bf16 %v4381_v41, %v4380_v18 }
 0x287   : > { %6286 = vmatmul.mubr.msk.f32.gmra.mrb[82].mxu0 %vm1250_vm0, %v8002_v9  ;;  %v4382_v9 = vld [vmem:[%s8860_s4 + $0x30] sm:$0xff] }
 0x288   : > { %6288 = vmatprep.mubr.msk.f32.mxu0 %vm1250_vm0, %v8016_v22  ;;  %v4383_v22 = vld [vmem:[%s8860_s4 + $0x38] sm:$0xff] }
 0x28b   : > { %6289 = vmatmul.mubr.msk.f32.gmra.mrb[84].mxu0 %vm1250_vm0, %v8029_v60  ;;  %v3021_v60 = vld [vmem:[%s8861_s15 + $0x10] sm:$0xff] }
 0x28c   : > { %6291 = vmatprep.mubr.msk.f32.mxu0 %vm1250_vm0, %v8042_v31  ;;  %v8868_v31 = vld [vmem:[#allocation25_spill] sm:$0xff] }
 0x28f   : > { %6292 = vmatmul.mubr.msk.f32.gmra.mrb[86].mxu0 %vm1250_vm0, %v8063_v19 }
 0x290   : > { %6366 = vmatprep.mubr.msk.f32.mxu0 %vm1250_vm0, %v7818_v54  ;;  %v3022_v54 = vld [vmem:[%s8861_s15 + $0x18] sm:$0xff] }
 0x291   : > { %v6634_v19 = vpack.c.bf16 %v3022_v54, %v3021_v60 }
 0x293   : > { %6367 = vmatmul.mubr.msk.f32.vlgmr.msra.gmra.mrb[88].mxu0 %vm1250_vm0, %v7794_v27  ;;  %v6754_v27 = vpack.c.bf16 %v4383_v22, %v4382_v9  ;;  %6635 = vmatprep.subr.bf16.mxu1 %v6634_v19  ;;  %v8303_v9 = vld [vmem:[%s8869_s1] ss:$0 sm:$0xff]  ;;  %s8875_s1 = sld [smem:[#allocation20_spill]] }
 0x294   : > { %6369 = vmatprep.mubr.msk.f32.mxu0 %vm1250_vm0, %v7844_v20  ;;  %6745 = vmatpush3.bf16.msra.mxu0 %v6742_v56  ;;  %v3023_v20 = vld [vmem:[%s8861_s15 + $0x20] sm:$0xff] }
 0x295   : > { %6747 = vmatprep.subr.bf16.mxu0 %v6746_v21  ;;  %6637 = vmatpush3.bf16.msra.mxu1 %v6634_v19 }
 0x297   : > { %6370 = vmatmul.mubr.msk.f32.gmra.mrb[90].mxu0 %vm1250_vm0, %v7865_v49  ;;  %v3024_v49 = vld [vmem:[%s8861_s15 + $0x28] sm:$0xff] }
 0x298   : > { %6372 = vmatprep.mubr.msk.f32.mxu0 %vm1250_vm0, %v7885_v42  ;;  %6749 = vmatpush3.bf16.msra.mxu0 %v6746_v21  ;;  %v6638_v42 = vpack.c.bf16 %v3024_v49, %v3023_v20  ;;  %v3422_v20 = vld [vmem:[%s8862_s18 + $0x18] sm:$0xff] }
 0x299   : > { %6751 = vmatprep.subr.bf16.mxu0 %v6750_v51 }
 0x29a   : > { %6639 = vmatprep.subr.bf16.mxu1 %v6638_v42 }
 0x29b   : > { %6373 = vmatmul.mubr.msk.f32.gmra.mrb[92].mxu0 %vm1250_vm0, %v7907_v16  ;;  %6641 = vmatpush3.bf16.msra.mxu1 %v6638_v42  ;;  %v3025_v16 = vld [vmem:[%s8861_s15 + $0x30] sm:$0xff] }
 0x29c   : > { %6375 = vmatprep.mubr.msk.f32.mxu0 %vm1250_vm0, %v7929_v0  ;;  %6753 = vmatpush3.bf16.msra.mxu0 %v6750_v51  ;;  %v3026_v0 = vld [vmem:[%s8861_s15 + $0x38] sm:$0xff] }
 0x29d   : > { %6755 = vmatprep.subr.bf16.mxu0 %v6754_v27 }
 0x29f   : > { %6376 = vmatmul.mubr.msk.f32.gmra.mrb[94].mxu0 %vm1250_vm0, %v7945_v17  ;;  %v6642_v17 = vpack.c.bf16 %v3026_v0, %v3025_v16 }
 0x2a0   : > { %6378 = vmatprep.mubr.msk.f32.mxu0 %vm1250_vm0, %v7956_v26  ;;  %6757 = vmatpush3.bf16.msra.mxu0 %v6754_v27  ;;  %v3419_v26 = vld [vmem:[%s8862_s18] sm:$0xff]  ;;  %v3421_v27 = vld [vmem:[%s8862_s18 + $0x10] sm:$0xff] }
 0x2a1   : > { %6643 = vmatprep.subr.bf16.mxu1 %v6642_v17 }
 0x2a2   : > { %6645 = vmatpush3.bf16.msra.mxu1 %v6642_v17 }
 0x2a3   : > { %6379 = vmatmul.mubr.msk.f32.gmra.mrb[96].mxu0 %vm1250_vm0, %v7976_v47  ;;  %v3420_v47 = vld [vmem:[%s8862_s18 + $0x8] sm:$0xff] }
 0x2a4   : > { %6381 = vmatprep.mubr.msk.f32.mxu0 %vm1250_vm0, %v7988_v50  ;;  %v8234_v50 = vpack.c.bf16 %v3420_v47, %v3419_v26  ;;  %v6666_v26 = vpack.c.bf16 %v3422_v20, %v3421_v27 }
 0x2a6   : > { %6663 = vmatprep.subr.bf16.mxu1 %v8234_v50 }
 0x2a7   : > { %6382 = vmatmul.mubr.msk.f32.gmra.mrb[98].mxu0 %vm1250_vm0, %v8006_v13  ;;  %v8865_v13 = vld [vmem:[#allocation22_spill] sm:$0xff] }
 0x2a8   : > { %6384 = vmatprep.mubr.msk.f32.mxu0 %vm1250_vm0, %v8020_v43  ;;  %v8866_v43 = vld [vmem:[#allocation23_spill] sm:$0xff] }
 0x2ab   : > { %6385 = vmatmul.mubr.msk.f32.gmra.mrb[100].mxu0 %vm1250_vm0, %v8033_v7  ;;  %v8867_v7 = vld [vmem:[#allocation24_spill] sm:$0xff] }
 0x2ac   : > { %6387 = vmatprep.mubr.msk.f32.mxu0 %vm1250_vm0, %v8046_v10  ;;  %v5335_v10 = vld [vmem:[%s8863_s28] ss:$0 sm:$0xff]  ;;  %s8873_s28 = sld [smem:[#allocation18_spill]] }
 0x2af   : > { %6388 = vmatmul.mubr.msk.f32.gmra.mrb[102].mxu0 %vm1250_vm0, %v8067_v63 }
 0x2b0   : > { %6462 = vmatprep.mubr.msk.f32.mxu0 %vm1250_vm0, %v7826_v2 }
 0x2b3   : > { %6463 = vmatmul.mubr.msk.f32.vlgmr.msra.gmra.mrb[104].mxu0 %vm1250_vm0, %v7813_v36 }
 0x2b4   : > { %6465 = vmatprep.mubr.msk.f32.mxu0 %vm1250_vm0, %v7853_v29 }
 0x2b7   : > { %6466 = vmatmul.mubr.msk.f32.gmra.mrb[106].mxu0 %vm1250_vm0, %v7871_v62 }
 0x2b8   : > { %6468 = vmatprep.mubr.msk.f32.mxu0 %vm1250_vm0, %v7899_v28 }
 0x2bb   : > { %6469 = vmatmul.mubr.msk.f32.gmra.mrb[108].mxu0 %vm1250_vm0, %v7915_v38 }
 0x2bc   : > { %6471 = vmatprep.mubr.msk.f32.mxu0 %vm1250_vm0, %v7940_v55 }
 0x2bf   : > { %6472 = vmatmul.mubr.msk.f32.gmra.mrb[110].mxu0 %vm1250_vm0, %v7959_v15 }
 0x2c0   : > { %6474 = vmatprep.mubr.msk.f32.mxu0 %vm1250_vm0, %v7961_v35 }
 0x2c3   : > { %6475 = vmatmul.mubr.msk.f32.gmra.mrb[112].mxu0 %vm1250_vm0, %v7981_v45 }
 0x2c4   : > { %6477 = vmatprep.mubr.msk.f32.mxu0 %vm1250_vm0, %v7994_v1 }
 0x2c7   : > { %6478 = vmatmul.mubr.msk.f32.gmra.mrb[114].mxu0 %vm1250_vm0, %v8009_v14 }
 0x2c8   : > { %6480 = vmatprep.mubr.msk.f32.mxu0 %vm1250_vm0, %v8865_v13 }
 0x2cb   : > { %6481 = vmatmul.mubr.msk.f32.gmra.mrb[116].mxu0 %vm1250_vm0, %v8866_v43 }
 0x2cc   : > { %6483 = vmatprep.mubr.msk.f32.mxu0 %vm1250_vm0, %v8867_v7 }
 0x2cf   : > { %6484 = vmatmul.mubr.msk.f32.gmra.mrb[118].mxu0 %vm1250_vm0, %v8868_v31 }
 0x306   : > { %v6096_v63 = vpop.f32.mrb[40].mxu0 }
 0x307   : > { %v2570_v46 = vadd.f32 %v6096_v63, %v5335_v10  ;;  %v2564_v37 = vpop.f32.mrb[41].mxu0  ;;  %v3424_v63 = vld [vmem:[%s8862_s18 + $0x28] sm:$0xff] }
 0x308   : > { %v2565_v12 = vadd.f32 %v5335_v10, %v2564_v37 }
 0x309   : > { %2644 = vst.msk [vmem:[%s8272_s26 + $0x8] sm:$0xff] %vm1250_vm0, %v2570_v46 }
 0x30a   : > { %2643 = vst.msk [vmem:[%s8272_s26] sm:$0xff] %vm1250_vm0, %v2565_v12  ;;  %v6099_v53 = vpop.f32.mrb[42].mxu0 }
 0x30b   : > { %v2580_v30 = vadd.f32 %v6099_v53, %v5335_v10  ;;  %v2574_v5 = vpop.f32.mrb[43].mxu0 }
 0x30c   : > { %v2575_v8 = vadd.f32 %v5335_v10, %v2574_v5 }
 0x30d   : > { %2646 = vst.msk [vmem:[%s8272_s26 + $0x18] sm:$0xff] %vm1250_vm0, %v2580_v30 }
 0x30e   : > { %2645 = vst.msk [vmem:[%s8272_s26 + $0x10] sm:$0xff] %vm1250_vm0, %v2575_v8  ;;  %v6102_v39 = vpop.f32.mrb[44].mxu0 }
 0x30f   : > { %v2590_v3 = vadd.f32 %v6102_v39, %v5335_v10  ;;  %v2584_v48 = vpop.f32.mrb[45].mxu0  ;;  %v3425_v39 = vld [vmem:[%s8862_s18 + $0x30] sm:$0xff] }
 0x310   : > { %v2585_v34 = vadd.f32 %v5335_v10, %v2584_v48 }
 0x311   : > { %2648 = vst.msk [vmem:[%s8272_s26 + $0x28] sm:$0xff] %vm1250_vm0, %v2590_v3  ;;  %v3426_v3 = vld [vmem:[%s8862_s18 + $0x38] sm:$0xff] }
 0x312   : > { %2647 = vst.msk [vmem:[%s8272_s26 + $0x20] sm:$0xff] %vm1250_vm0, %v2585_v34  ;;  %v6105_v61 = vpop.f32.mrb[46].mxu0 }
 0x313   : > { %v2600_v44 = vadd.f32 %v6105_v61, %v5335_v10  ;;  %v2594_v11 = vpop.f32.mrb[47].mxu0 }
 0x314   : > { %v2595_v57 = vadd.f32 %v5335_v10, %v2594_v11  ;;  %v6674_v11 = vpack.c.bf16 %v3426_v3, %v3425_v39  ;;  %v3987_v39 = vld [vmem:[%s8871_s6 + $0x8] sm:$0xff] }
 0x315   : > { %2650 = vst.msk [vmem:[%s8272_s26 + $0x38] sm:$0xff] %vm1250_vm0, %v2600_v44 }
 0x316   : > { %2649 = vst.msk [vmem:[%s8272_s26 + $0x30] sm:$0xff] %vm1250_vm0, %v2595_v57  ;;  %v6108_v52 = vpop.f32.mrb[48].mxu0 }
 0x317   : > { %v2610_v23 = vadd.f32 %v6108_v52, %v5335_v10  ;;  %v2604_v58 = vpop.f32.mrb[49].mxu0  ;;  %v3427_v52 = vld [vmem:[%s8862_s18 + $0x40] sm:$0xff] }
 0x318   : > { %v2605_v40 = vadd.f32 %v5335_v10, %v2604_v58 }
 0x319   : > { %2652 = vst.msk [vmem:[%s8272_s26 + $0x48] sm:$0xff] %vm1250_vm0, %v2610_v23  ;;  %v3428_v23 = vld [vmem:[%s8862_s18 + $0x48] sm:$0xff] }
 0x31a   : > { %2651 = vst.msk [vmem:[%s8272_s26 + $0x40] sm:$0xff] %vm1250_vm0, %v2605_v40  ;;  %v6111_v6 = vpop.f32.mrb[50].mxu0 }
 0x31b   : > { %v2620_v25 = vadd.f32 %v6111_v6, %v5335_v10  ;;  %v2614_v56 = vpop.f32.mrb[51].mxu0 }
 0x31c   : > { %v2615_v33 = vadd.f32 %v5335_v10, %v2614_v56 }
 0x31d   : > { %2654 = vst.msk [vmem:[%s8272_s26 + $0x58] sm:$0xff] %vm1250_vm0, %v2620_v25 }
 0x31e   : > { %2653 = vst.msk [vmem:[%s8272_s26 + $0x50] sm:$0xff] %vm1250_vm0, %v2615_v33  ;;  %v6114_v32 = vpop.f32.mrb[52].mxu0  ;;  %v6678_v33 = vpack.c.bf16 %v3428_v23, %v3427_v52 }
 0x31f   : > { %v2630_v4 = vadd.f32 %v6114_v32, %v5335_v10  ;;  %v2624_v24 = vpop.f32.mrb[53].mxu0 }
 0x320   : > { %v2625_v59 = vadd.f32 %v5335_v10, %v2624_v24  ;;  %v3430_v24 = vld [vmem:[%s8862_s18 + $0x58] sm:$0xff] }
 0x321   : > { %2656 = vst.msk [vmem:[%s8272_s26 + $0x68] sm:$0xff] %vm1250_vm0, %v2630_v4  ;;  %v3429_v4 = vld [vmem:[%s8862_s18 + $0x50] sm:$0xff] }
 0x322   : > { %2655 = vst.msk [vmem:[%s8272_s26 + $0x60] sm:$0xff] %vm1250_vm0, %v2625_v59  ;;  %v6117_v21 = vpop.f32.mrb[54].mxu0 }
 0x323   : > { %v2640_v18 = vadd.f32 %v6117_v21, %v5335_v10  ;;  %v2634_v41 = vpop.f32.mrb[55].mxu0 }
 0x324   : > { %v2635_v51 = vadd.f32 %v5335_v10, %v2634_v41  ;;  %v3423_v10 = vld [vmem:[%s8862_s18 + $0x20] sm:$0xff] }
 0x325   : > { %2658 = vst.msk [vmem:[%s8272_s26 + $0x78] sm:$0xff] %vm1250_vm0, %v2640_v18  ;;  %v6670_v5 = vpack.c.bf16 %v3424_v63, %v3423_v10 }
 0x326   : > { %2657 = vst.msk [vmem:[%s8272_s26 + $0x70] sm:$0xff] %vm1250_vm0, %v2635_v51  ;;  %v6192_v22 = vpop.f32.mrb[56].mxu0  ;;  %s8428_s26 = scalar_lea.vmem %s7376_s16, %s5280_s23  ;;  %s8877_s23 = sld [smem:[#allocation11_spill]] }
 0x327   : > { %v2930_v60 = vadd.f32 %v6192_v22, %v8303_v9  ;;  %v2924_v54 = vpop.f32.mrb[57].mxu0  ;;  %v6682_v22 = vpack.c.bf16 %v3430_v24, %v3429_v4 }
 0x328   : > { %v2925_v19 = vadd.f32 %v8303_v9, %v2924_v54  ;;  %v3431_v54 = vld [vmem:[%s8862_s18 + $0x60] sm:$0xff] }
 0x329   : > { %v3004_v16 = vmax.f32 %v2930_v60, 0.0 }
 0x32a   : > { %v3003_v49 = vmax.f32 %v2925_v19, 0.0  ;;  %v6195_v42 = vpop.f32.mrb[58].mxu0  ;;  %v3432_v19 = vld [vmem:[%s8862_s18 + $0x68] sm:$0xff] }
 0x32b   : > { %v2940_v0 = vadd.f32 %v6195_v42, %v8303_v9  ;;  %v2934_v17 = vpop.f32.mrb[59].mxu0 }
 0x32c   : > { %v2935_v47 = vadd.f32 %v8303_v9, %v2934_v17  ;;  %6230 = vmatprep.mubr.msk.f32.mxu1 %vm1250_vm0, %v3003_v49 }
 0x32d   : > { %6231 = vmatmul.mubr.msk.f32.vlgmr.msra.gmra.mrb[40].mxu1 %vm1250_vm0, %v3004_v16  ;;  %v3006_v12 = vmax.f32 %v2940_v0, 0.0  ;;  %v6686_v0 = vpack.c.bf16 %v3432_v19, %v3431_v54 }
 0x32e   : > { %v3005_v46 = vmax.f32 %v2935_v47, 0.0  ;;  %v6198_v37 = vpop.f32.mrb[60].mxu0  ;;  %6665 = vmatpush3.bf16.msra.mxu1 %v8234_v50  ;;  %v3434_v47 = vld [vmem:[%s8862_s18 + $0x78] sm:$0xff] }
 0x32f   : > { %v2950_v53 = vadd.f32 %v6198_v37, %v8303_v9  ;;  %v2944_v30 = vpop.f32.mrb[61].mxu0  ;;  %6667 = vmatprep.subr.bf16.mxu1 %v6666_v26 }
 0x330   : > { %v2945_v8 = vadd.f32 %v8303_v9, %v2944_v30  ;;  %6233 = vmatprep.mubr.msk.f32.mxu1 %vm1250_vm0, %v3005_v46 }
 0x331   : > { %6234 = vmatmul.mubr.msk.f32.gmra.mrb[42].mxu1 %vm1250_vm0, %v3006_v12  ;;  %v3008_v50 = vmax.f32 %v2950_v53, 0.0 }
 0x332   : > { %v3007_v48 = vmax.f32 %v2945_v8, 0.0  ;;  %v6201_v34 = vpop.f32.mrb[62].mxu0  ;;  %6669 = vmatpush3.bf16.msra.mxu1 %v6666_v26  ;;  %v3433_v26 = vld [vmem:[%s8862_s18 + $0x70] sm:$0xff]  ;;  %v3986_v8 = vld [vmem:[%s8871_s6] sm:$0xff] }
 0x333   : > { %v2960_v61 = vadd.f32 %v6201_v34, %v8303_v9  ;;  %v2954_v44 = vpop.f32.mrb[63].mxu0  ;;  %6671 = vmatprep.subr.bf16.mxu1 %v6670_v5  ;;  %v6690_v53 = vpack.c.bf16 %v3434_v47, %v3433_v26 }
 0x334   : > { %v2955_v57 = vadd.f32 %v8303_v9, %v2954_v44  ;;  %6236 = vmatprep.mubr.msk.f32.mxu1 %vm1250_vm0, %v3007_v48  ;;  %v6710_v44 = vpack.c.bf16 %v3987_v39, %v3986_v8 }
 0x335   : > { %6237 = vmatmul.mubr.msk.f32.gmra.mrb[44].mxu1 %vm1250_vm0, %v3008_v50  ;;  %v3010_v6 = vmax.f32 %v2960_v61, 0.0 }
 0x336   : > { %v3009_v58 = vmax.f32 %v2955_v57, 0.0  ;;  %v6204_v40 = vpop.f32.mrb[64].mxu0  ;;  %6673 = vmatpush3.bf16.msra.mxu1 %v6670_v5  ;;  %v8354_v5 = vld [vmem:[%s8870_s2] ss:$0 sm:$0xff]  ;;  %v3989_v57 = vld [vmem:[%s8871_s6 + $0x18] sm:$0xff]  ;;  %s8513_s2 = scalar_lea.vmem %s8875_s1, %s7403_s14  ;;  %s8653_s1 = scalar_lea.vmem %s7381_s22, %s7403_s14 }
 0x337   : > { %v2970_v25 = vadd.f32 %v6204_v40, %v8303_v9  ;;  %v2964_v56 = vpop.f32.mrb[65].mxu0  ;;  %6675 = vmatprep.subr.bf16.mxu1 %v6674_v11 }
 0x338   : > { %v2965_v32 = vadd.f32 %v8303_v9, %v2964_v56  ;;  %6239 = vmatprep.mubr.msk.f32.mxu1 %vm1250_vm0, %v3009_v58 }
 0x339   : > { %6240 = vmatmul.mubr.msk.f32.gmra.mrb[46].mxu1 %vm1250_vm0, %v3010_v6  ;;  %v3012_v18 = vmax.f32 %v2970_v25, 0.0 }
 0x33a   : > { %v3011_v59 = vmax.f32 %v2965_v32, 0.0  ;;  %v6207_v21 = vpop.f32.mrb[66].mxu0  ;;  %6677 = vmatpush3.bf16.msra.mxu1 %v6674_v11  ;;  %v3988_v11 = vld [vmem:[%s8871_s6 + $0x10] sm:$0xff]  ;;  %v3991_v32 = vld [vmem:[%s8871_s6 + $0x28] sm:$0xff] }
 0x33b   : > { %v2980_v41 = vadd.f32 %v6207_v21, %v8303_v9  ;;  %v2974_v51 = vpop.f32.mrb[67].mxu0  ;;  %6679 = vmatprep.subr.bf16.mxu1 %v6678_v33  ;;  %v6714_v25 = vpack.c.bf16 %v3989_v57, %v3988_v11 }
 0x33c   : > { %v2975_v60 = vadd.f32 %v8303_v9, %v2974_v51  ;;  %6242 = vmatprep.mubr.msk.f32.mxu1 %vm1250_vm0, %v3011_v59 }
 0x33d   : > { %6243 = vmatmul.mubr.msk.f32.gmra.mrb[48].mxu1 %vm1250_vm0, %v3012_v18  ;;  %v3014_v49 = vmax.f32 %v2980_v41, 0.0 }
 0x33e   : > { %v3013_v27 = vmax.f32 %v2975_v60, 0.0  ;;  %v6210_v20 = vpop.f32.mrb[68].mxu0  ;;  %6681 = vmatpush3.bf16.msra.mxu1 %v6678_v33  ;;  %v3990_v33 = vld [vmem:[%s8871_s6 + $0x20] sm:$0xff]  ;;  %v3993_v60 = vld [vmem:[%s8871_s6 + $0x38] sm:$0xff] }
 0x33f   : > { %v2990_v42 = vadd.f32 %v6210_v20, %v8303_v9  ;;  %v2984_v16 = vpop.f32.mrb[69].mxu0  ;;  %6683 = vmatprep.subr.bf16.mxu1 %v6682_v22  ;;  %v6718_v41 = vpack.c.bf16 %v3991_v32, %v3990_v33 }
 0x340   : > { %v2985_v17 = vadd.f32 %v8303_v9, %v2984_v16  ;;  %6245 = vmatprep.mubr.msk.f32.mxu1 %vm1250_vm0, %v3013_v27 }
 0x341   : > { %6246 = vmatmul.mubr.msk.f32.gmra.mrb[50].mxu1 %vm1250_vm0, %v3014_v49  ;;  %v3016_v46 = vmax.f32 %v2990_v42, 0.0 }
 0x342   : > { %v3015_v10 = vmax.f32 %v2985_v17, 0.0  ;;  %v6213_v63 = vpop.f32.mrb[70].mxu0  ;;  %6685 = vmatpush3.bf16.msra.mxu1 %v6682_v22  ;;  %v3992_v22 = vld [vmem:[%s8871_s6 + $0x30] sm:$0xff]  ;;  %v3995_v17 = vld [vmem:[%s8871_s6 + $0x48] sm:$0xff] }
 0x343   : > { %v3000_v37 = vadd.f32 %v6213_v63, %v8303_v9  ;;  %v2994_v12 = vpop.f32.mrb[71].mxu0  ;;  %6687 = vmatprep.subr.bf16.mxu1 %v6686_v0  ;;  %v6722_v42 = vpack.c.bf16 %v3993_v60, %v3992_v22  ;;  %v4661_v22 = vld [vmem:[%s8873_s28 + $0x18] sm:$0xff] }
 0x344   : > { %v2995_v30 = vadd.f32 %v8303_v9, %v2994_v12  ;;  %6248 = vmatprep.mubr.msk.f32.mxu1 %vm1250_vm0, %v3015_v10 }
 0x345   : > { %6249 = vmatmul.mubr.msk.f32.gmra.mrb[52].mxu1 %vm1250_vm0, %v3016_v46  ;;  %v3018_v34 = vmax.f32 %v3000_v37, 0.0 }
 0x346   : > { %v3017_v3 = vmax.f32 %v2995_v30, 0.0  ;;  %v6272_v48 = vpop.f32.mrb[72].mxu0  ;;  %6689 = vmatpush3.bf16.msra.mxu1 %v6686_v0  ;;  %v3994_v0 = vld [vmem:[%s8871_s6 + $0x40] sm:$0xff]  ;;  %v3997_v30 = vld [vmem:[%s8871_s6 + $0x58] sm:$0xff] }
 0x347   : > { %v3330_v50 = vadd.f32 %v6272_v48, %v8354_v5  ;;  %v3324_v61 = vpop.f32.mrb[73].mxu0  ;;  %6691 = vmatprep.subr.bf16.mxu1 %v6690_v53  ;;  %v6726_v37 = vpack.c.bf16 %v3995_v17, %v3994_v0  ;;  %v4663_v0 = vld [vmem:[%s8873_s28 + $0x28] sm:$0xff]  ;;  %v4665_v17 = vld [vmem:[%s8873_s28 + $0x38] sm:$0xff] }
 0x348   : > { %v3325_v9 = vadd.f32 %v8354_v5, %v3324_v61  ;;  %6251 = vmatprep.mubr.msk.f32.mxu1 %vm1250_vm0, %v3017_v3 }
 0x349   : > { %6252 = vmatmul.mubr.msk.f32.gmra.mrb[54].mxu1 %vm1250_vm0, %v3018_v34  ;;  %v3404_v58 = vmax.f32 %v3330_v50, 0.0 }
 0x34a   : > { %v3403_v52 = vmax.f32 %v3325_v9, 0.0  ;;  %v6275_v23 = vpop.f32.mrb[74].mxu0  ;;  %6693 = vmatpush3.bf16.msra.mxu1 %v6690_v53  ;;  %v3996_v53 = vld [vmem:[%s8871_s6 + $0x50] sm:$0xff]  ;;  %v3999_v9 = vld [vmem:[%s8871_s6 + $0x68] sm:$0xff] }
 0x34b   : > { %v3340_v40 = vadd.f32 %v6275_v23, %v8354_v5  ;;  %v3334_v6 = vpop.f32.mrb[75].mxu0  ;;  %6711 = vmatprep.subr.bf16.mxu1 %v6710_v44  ;;  %v6730_v50 = vpack.c.bf16 %v3997_v30, %v3996_v53  ;;  %v4662_v53 = vld [vmem:[%s8873_s28 + $0x20] sm:$0xff]  ;;  %v4664_v30 = vld [vmem:[%s8873_s28 + $0x30] sm:$0xff] }
 0x34c   : > { %v3335_v56 = vadd.f32 %v8354_v5, %v3334_v6  ;;  %6326 = vmatprep.mubr.f32.mxu1 %v3403_v52 }
 0x34d   : > { %6327 = vmatmul.mubr.f32.vlgmr.msra.gmra.mrb[56].mxu1 %v3404_v58  ;;  %v3406_v59 = vmax.f32 %v3340_v40, 0.0 }
 0x34e   : > { %v3405_v4 = vmax.f32 %v3335_v56, 0.0  ;;  %v6278_v24 = vpop.f32.mrb[76].mxu0  ;;  %6713 = vmatpush3.bf16.msra.mxu1 %v6710_v44  ;;  %v3998_v44 = vld [vmem:[%s8871_s6 + $0x60] sm:$0xff]  ;;  %v4001_v56 = vld [vmem:[%s8871_s6 + $0x78] sm:$0xff] }
 0x34f   : > { %v3350_v21 = vadd.f32 %v6278_v24, %v8354_v5  ;;  %v3344_v18 = vpop.f32.mrb[77].mxu0  ;;  %6715 = vmatprep.subr.bf16.mxu1 %v6714_v25  ;;  %v6734_v40 = vpack.c.bf16 %v3999_v9, %v3998_v44 }
 0x350   : > { %v3345_v51 = vadd.f32 %v8354_v5, %v3344_v18  ;;  %6329 = vmatprep.mubr.f32.mxu1 %v3405_v4 }
 0x351   : > { %6330 = vmatmul.mubr.f32.gmra.mrb[58].mxu1 %v3406_v59  ;;  %v3408_v27 = vmax.f32 %v3350_v21, 0.0 }
 0x352   : > { %v3407_v54 = vmax.f32 %v3345_v51, 0.0  ;;  %v6281_v19 = vpop.f32.mrb[78].mxu0  ;;  %6717 = vmatpush3.bf16.msra.mxu1 %v6714_v25  ;;  %v4000_v25 = vld [vmem:[%s8871_s6 + $0x70] sm:$0xff]  ;;  %v4659_v51 = vld [vmem:[%s8873_s28 + $0x8] sm:$0xff] }
 0x353   : > { %v3360_v20 = vadd.f32 %v6281_v19, %v8354_v5  ;;  %v3354_v49 = vpop.f32.mrb[79].mxu0  ;;  %6719 = vmatprep.subr.bf16.mxu1 %v6718_v41  ;;  %v6738_v21 = vpack.c.bf16 %v4001_v56, %v4000_v25 }
 0x354   : > { %v3355_v16 = vadd.f32 %v8354_v5, %v3354_v49  ;;  %6332 = vmatprep.mubr.f32.mxu1 %v3407_v54  ;;  %v6758_v49 = vpack.c.bf16 %v4661_v22, %v4659_v51 }
 0x355   : > { %6333 = vmatmul.mubr.f32.gmra.mrb[60].mxu1 %v3408_v27  ;;  %v3410_v10 = vmax.f32 %v3360_v20, 0.0 }
 0x356   : > { %v3409_v26 = vmax.f32 %v3355_v16, 0.0  ;;  %v6284_v47 = vpop.f32.mrb[80].mxu0  ;;  %6721 = vmatpush3.bf16.msra.mxu1 %v6718_v41  ;;  %v8392_v41 = vld [vmem:[%s8872_s7] ss:$0 sm:$0xff]  ;;  %s8876_s7 = sld [smem:[#allocation10_spill]] }
 0x357   : > { %v3370_v63 = vadd.f32 %v6284_v47, %v8354_v5  ;;  %v3364_v46 = vpop.f32.mrb[81].mxu0  ;;  %6723 = vmatprep.subr.bf16.mxu1 %v6722_v42 }
 0x358   : > { %v3365_v12 = vadd.f32 %v8354_v5, %v3364_v46  ;;  %6335 = vmatprep.mubr.f32.mxu1 %v3409_v26 }
 0x359   : > { %6336 = vmatmul.mubr.f32.gmra.mrb[62].mxu1 %v3410_v10  ;;  %v3412_v3 = vmax.f32 %v3370_v63, 0.0 }
 0x35a   : > { %v3411_v8 = vmax.f32 %v3365_v12, 0.0  ;;  %v6287_v39 = vpop.f32.mrb[82].mxu0  ;;  %6725 = vmatpush3.bf16.msra.mxu1 %v6722_v42  ;;  %v4658_v42 = vld [vmem:[%s8873_s28] sm:$0xff]  ;;  %v6762_v12 = vpack.c.bf16 %v4665_v17, %v4663_v0 }
 0x35b   : > { %v3380_v48 = vadd.f32 %v6287_v39, %v8354_v5  ;;  %v3374_v34 = vpop.f32.mrb[83].mxu0  ;;  %6727 = vmatprep.subr.bf16.mxu1 %v6726_v37  ;;  %v4667_v39 = vld [vmem:[%s8873_s28 + $0x48] sm:$0xff] }
 0x35c   : > { %v3375_v61 = vadd.f32 %v8354_v5, %v3374_v34  ;;  %6338 = vmatprep.mubr.f32.mxu1 %v3411_v8 }
 0x35d   : > { %6339 = vmatmul.mubr.f32.gmra.mrb[64].mxu1 %v3412_v3  ;;  %v3414_v52 = vmax.f32 %v3380_v48, 0.0  ;;  %v4669_v3 = vld [vmem:[%s8873_s28 + $0x58] sm:$0xff] }
 0x35e   : > { %v3413_v11 = vmax.f32 %v3375_v61, 0.0  ;;  %v6290_v57 = vpop.f32.mrb[84].mxu0  ;;  %6729 = vmatpush3.bf16.msra.mxu1 %v6726_v37 }
 0x35f   : > { %v3390_v23 = vadd.f32 %v6290_v57, %v8354_v5  ;;  %v3384_v58 = vpop.f32.mrb[85].mxu0  ;;  %6731 = vmatprep.subr.bf16.mxu1 %v6730_v50  ;;  %v4666_v57 = vld [vmem:[%s8873_s28 + $0x40] sm:$0xff] }
 0x360   : > { %v3385_v6 = vadd.f32 %v8354_v5, %v3384_v58  ;;  %6341 = vmatprep.mubr.f32.mxu1 %v3413_v11  ;;  %v6766_v11 = vpack.c.bf16 %v4669_v3, %v4667_v39  ;;  %v4671_v58 = vld [vmem:[%s8873_s28 + $0x68] sm:$0xff] }
 0x361   : > { %6342 = vmatmul.mubr.f32.gmra.mrb[66].mxu1 %v3414_v52  ;;  %v3416_v4 = vmax.f32 %v3390_v23, 0.0  ;;  %v4668_v52 = vld [vmem:[%s8873_s28 + $0x50] sm:$0xff] }
 0x362   : > { %v3415_v33 = vmax.f32 %v3385_v6, 0.0  ;;  %v6293_v32 = vpop.f32.mrb[86].mxu0  ;;  %6733 = vmatpush3.bf16.msra.mxu1 %v6730_v50  ;;  %v6764_v50 = vpack.c.bf16 %v4664_v30, %v4662_v53  ;;  %v6768_v56 = vpack.c.bf16 %v4668_v52, %v4666_v57 }
 0x363   : > { %v3400_v24 = vadd.f32 %v6293_v32, %v8354_v5  ;;  %v3394_v59 = vpop.f32.mrb[87].mxu0  ;;  %6735 = vmatprep.subr.bf16.mxu1 %v6734_v40 }
 0x364   : > { %v3395_v18 = vadd.f32 %v8354_v5, %v3394_v59  ;;  %6344 = vmatprep.mubr.f32.mxu1 %v3415_v33  ;;  %v4660_v5 = vld [vmem:[%s8873_s28 + $0x10] sm:$0xff]  ;;  %v4670_v59 = vld [vmem:[%s8873_s28 + $0x60] sm:$0xff] }
 0x365   : > { %6345 = vmatmul.mubr.f32.gmra.mrb[68].mxu1 %v3416_v4  ;;  %v3418_v19 = vmax.f32 %v3400_v24, 0.0  ;;  %v6760_v10 = vpack.c.bf16 %v4660_v5, %v4658_v42 }
 0x366   : > { %v3417_v60 = vmax.f32 %v3395_v18, 0.0  ;;  %v6368_v54 = vpop.f32.mrb[88].mxu0  ;;  %6737 = vmatpush3.bf16.msra.mxu1 %v6734_v40  ;;  %v4673_v40 = vld [vmem:[%s8873_s28 + $0x78] sm:$0xff] }
 0x367   : > { %v3897_v27 = vadd.f32 %v6368_v54, %v8392_v41  ;;  %v3891_v20 = vpop.f32.mrb[89].mxu0  ;;  %6739 = vmatprep.subr.bf16.mxu1 %v6738_v21  ;;  %v6770_v24 = vpack.c.bf16 %v4673_v40, %v4671_v58 }
 0x368   : > { %v3892_v16 = vadd.f32 %v8392_v41, %v3891_v20  ;;  %6347 = vmatprep.mubr.f32.mxu1 %v3417_v60 }
 0x369   : > { %6348 = vmatmul.mubr.f32.gmra.mrb[70].mxu1 %v3418_v19  ;;  %v3971_v63 = vmax.f32 %v3897_v27, 0.0 }
 0x36a   : > { %v3970_v26 = vmax.f32 %v3892_v16, 0.0  ;;  %v6371_v47 = vpop.f32.mrb[90].mxu0  ;;  %6741 = vmatpush3.bf16.msra.mxu1 %v6738_v21  ;;  %v4672_v21 = vld [vmem:[%s8873_s28 + $0x70] sm:$0xff] }
 0x36b   : > { %v3907_v46 = vadd.f32 %v6371_v47, %v8392_v41  ;;  %v3901_v37 = vpop.f32.mrb[91].mxu0  ;;  %6759 = vmatprep.subr.bf16.mxu1 %v6758_v49  ;;  %v6772_v60 = vpack.c.bf16 %v4672_v21, %v4670_v59 }
 0x36c   : > { %v3902_v8 = vadd.f32 %v8392_v41, %v3901_v37  ;;  %6422 = vmatprep.mubr.f32.mxu1 %v3970_v26 }
 0x36d   : > { %6423 = vmatmul.mubr.f32.vlgmr.msra.gmra.mrb[72].mxu1 %v3971_v63  ;;  %v3973_v61 = vmax.f32 %v3907_v46, 0.0 }
 0x36e   : > { %v3972_v48 = vmax.f32 %v3902_v8, 0.0  ;;  %v6374_v34 = vpop.f32.mrb[92].mxu0  ;;  %6761 = vmatpush1.bf16.msra.mxu1 %v6760_v10 }
 0x36f   : > { %v3917_v44 = vadd.f32 %v6374_v34, %v8392_v41  ;;  %v3911_v9 = vpop.f32.mrb[93].mxu0  ;;  %6763 = vmatprep.subr.bf16.mxu1 %v6762_v12 }
 0x370   : > { %v3912_v23 = vadd.f32 %v8392_v41, %v3911_v9  ;;  %6425 = vmatprep.mubr.f32.mxu1 %v3972_v48 }
 0x371   : > { %6426 = vmatmul.mubr.f32.gmra.mrb[74].mxu1 %v3973_v61  ;;  %v3975_v33 = vmax.f32 %v3917_v44, 0.0 }
 0x372   : > { %v3974_v6 = vmax.f32 %v3912_v23, 0.0  ;;  %v6377_v25 = vpop.f32.mrb[94].mxu0  ;;  %6765 = vmatpush1.bf16.msra.mxu1 %v6764_v50 }
 0x373   : > { %v3927_v32 = vadd.f32 %v6377_v25, %v8392_v41  ;;  %v3921_v4 = vpop.f32.mrb[95].mxu0  ;;  %6767 = vmatprep.subr.bf16.mxu1 %v6766_v11  ;;  %v7199_v11 = vmov 0.0  }
 0x374   : > { %v3922_v18 = vadd.f32 %v8392_v41, %v3921_v4  ;;  %6428 = vmatprep.mubr.f32.mxu1 %v3974_v6 }
 0x375   : > { %6429 = vmatmul.mubr.f32.gmra.mrb[76].mxu1 %v3975_v33  ;;  %v3977_v54 = vmax.f32 %v3927_v32, 0.0 }
 0x376   : > { %v3976_v51 = vmax.f32 %v3922_v18, 0.0  ;;  %v6380_v22 = vpop.f32.mrb[96].mxu0  ;;  %6769 = vmatpush1.bf16.msra.mxu1 %v6768_v56 }
 0x377   : > { %v3937_v19 = vadd.f32 %v6380_v22, %v8392_v41  ;;  %v3931_v27 = vpop.f32.mrb[97].mxu0  ;;  %6771 = vmatprep.subr.bf16.mxu1 %v6770_v24 }
 0x378   : > { %v3932_v20 = vadd.f32 %v8392_v41, %v3931_v27  ;;  %6431 = vmatprep.mubr.f32.mxu1 %v3976_v51 }
 0x379   : > { %6432 = vmatmul.mubr.f32.gmra.mrb[78].mxu1 %v3977_v54  ;;  %v3979_v5 = vmax.f32 %v3937_v19, 0.0 }
 0x37a   : > { %v3978_v49 = vmax.f32 %v3932_v20, 0.0  ;;  %v6383_v42 = vpop.f32.mrb[98].mxu0  ;;  %6773 = vmatpush1.bf16.msra.mxu1 %v6772_v60 }
 0x37b   : > { %v3947_v16 = vadd.f32 %v6383_v42, %v8392_v41  ;;  %v3941_v0 = vpop.f32.mrb[99].mxu0 }
 0x37c   : > { %v3942_v17 = vadd.f32 %v8392_v41, %v3941_v0  ;;  %6434 = vmatprep.mubr.f32.mxu1 %v3978_v49 }
 0x37d   : > { %6435 = vmatmul.mubr.f32.gmra.mrb[80].mxu1 %v3979_v5  ;;  %v3981_v10 = vmax.f32 %v3947_v16, 0.0 }
 0x37e   : > { %v3980_v26 = vmax.f32 %v3942_v17, 0.0  ;;  %v6386_v47 = vpop.f32.mrb[100].mxu0 }
 0x37f   : > { %v3957_v63 = vadd.f32 %v6386_v47, %v8392_v41  ;;  %v3951_v46 = vpop.f32.mrb[101].mxu0 }
 0x380   : > { %v3952_v37 = vadd.f32 %v8392_v41, %v3951_v46  ;;  %6437 = vmatprep.mubr.f32.mxu1 %v3980_v26 }
 0x381   : > { %6438 = vmatmul.mubr.f32.gmra.mrb[82].mxu1 %v3981_v10  ;;  %v3983_v30 = vmax.f32 %v3957_v63, 0.0 }
 0x382   : > { %v3982_v12 = vmax.f32 %v3952_v37, 0.0  ;;  %v6389_v53 = vpop.f32.mrb[102].mxu0 }
 0x383   : > { %v3967_v8 = vadd.f32 %v6389_v53, %v8392_v41  ;;  %v3961_v39 = vpop.f32.mrb[103].mxu0 }
 0x384   : > { %v3962_v3 = vadd.f32 %v8392_v41, %v3961_v39  ;;  %6440 = vmatprep.mubr.f32.mxu1 %v3982_v12 }
 0x385   : > { %6441 = vmatmul.mubr.f32.gmra.mrb[84].mxu1 %v3983_v30  ;;  %v3985_v50 = vmax.f32 %v3967_v8, 0.0 }
 0x386   : > { %v3984_v48 = vmax.f32 %v3962_v3, 0.0  ;;  %v6464_v34 = vpop.f32.mrb[104].mxu0 }
 0x387   : > { %v5527_v61 = vpack.c.bf16 %v6464_v34, %v6464_v34  ;;  %v4498_v44 = vpop.f32.mrb[105].mxu0 }
 0x388   : > { %v5526_v9 = vpack.c.bf16 %v4498_v44, %v4498_v44  ;;  %6443 = vmatprep.mubr.f32.mxu1 %v3984_v48  ;;  %v8544_v44 = vld [vmem:[%s8876_s7] ss:$0 sm:$0xff] }
 0x389   : > { %4643 = vst.msk [vmem:[%s8428_s26 + $0x4] sm:$0xf] %vm4641_vm1, %v5527_v61  ;;  %6444 = vmatmul.mubr.f32.gmra.mrb[86].mxu1 %v3985_v50 }
 0x38a   : > { %4642 = vst.msk [vmem:[%s8428_s26] sm:$0xf] %vm4641_vm1, %v5526_v9  ;;  %v6467_v41 = vpop.f32.mrb[106].mxu0  ;;  %4738 = vmatprep.mubr.f32.mxu1 %v7199_v11 }
 0x38b   : > { %v5529_v57 = vpack.c.bf16 %v6467_v41, %v6467_v41  ;;  %v4508_v52 = vpop.f32.mrb[107].mxu0 }
 0x38c   : > { %v5528_v23 = vpack.c.bf16 %v4508_v52, %v4508_v52  ;;  %v8553_v52 = vld [vmem:[%s8877_s23] ss:$0 sm:$0xff]  ;;  %s8783_s23 = scalar_lea.vmem %s7371_s20, %s7403_s14 }
 0x38d   : > { %4645 = vst.msk [vmem:[%s8428_s26 + $0xc] sm:$0xf] %vm4641_vm1, %v5529_v57  ;;  %5491 = vmatmul.mubr.msk.f32.vlgmr.msra.gmra.mrb[88].mxu1 %vm1250_vm0, %v7826_v2 }
 0x38e   : > { %4644 = vst.msk [vmem:[%s8428_s26 + $0x8] sm:$0xf] %vm4641_vm1, %v5528_v23  ;;  %v6470_v58 = vpop.f32.mrb[108].mxu0  ;;  %4744 = vmatprep.mubr.f32.mxu1 %v7199_v11 }
 0x38f   : > { %v5531_v40 = vpack.c.bf16 %v6470_v58, %v6470_v58  ;;  %v4518_v6 = vpop.f32.mrb[109].mxu0 }
 0x390   : > { %v5530_v25 = vpack.c.bf16 %v4518_v6, %v4518_v6 }
 0x391   : > { %4647 = vst.msk [vmem:[%s8428_s26 + $0x14] sm:$0xf] %vm4641_vm1, %v5531_v40  ;;  %5492 = vmatmul.mubr.msk.f32.gmra.mrb[90].mxu1 %vm1250_vm0, %v7813_v36 }
 0x392   : > { %4646 = vst.msk [vmem:[%s8428_s26 + $0x10] sm:$0xf] %vm4641_vm1, %v5530_v25  ;;  %v6473_v56 = vpop.f32.mrb[110].mxu0  ;;  %4750 = vmatprep.mubr.f32.mxu1 %v7199_v11 }
 0x393   : > { %v5533_v2 = vpack.c.bf16 %v6473_v56, %v6473_v56  ;;  %v4528_v33 = vpop.f32.mrb[111].mxu0 }
 0x394   : > { %v5532_v32 = vpack.c.bf16 %v4528_v33, %v4528_v33 }
 0x395   : > { %4649 = vst.msk [vmem:[%s8428_s26 + $0x1c] sm:$0xf] %vm4641_vm1, %v5533_v2  ;;  %5493 = vmatmul.mubr.msk.f32.gmra.mrb[92].mxu1 %vm1250_vm0, %v7853_v29 }
 0x396   : > { %4648 = vst.msk [vmem:[%s8428_s26 + $0x18] sm:$0xf] %vm4641_vm1, %v5532_v32  ;;  %v6476_v4 = vpop.f32.mrb[112].mxu0  ;;  %4756 = vmatprep.mubr.f32.mxu1 %v7199_v11 }
 0x397   : > { %v5535_v36 = vpack.c.bf16 %v6476_v4, %v6476_v4  ;;  %v4538_v24 = vpop.f32.mrb[113].mxu0 }
 0x398   : > { %v5534_v59 = vpack.c.bf16 %v4538_v24, %v4538_v24 }
 0x399   : > { %4651 = vst.msk [vmem:[%s8428_s26 + $0x24] sm:$0xf] %vm4641_vm1, %v5535_v36  ;;  %5494 = vmatmul.mubr.msk.f32.gmra.mrb[94].mxu1 %vm1250_vm0, %v7871_v62 }
 0x39a   : > { %4650 = vst.msk [vmem:[%s8428_s26 + $0x20] sm:$0xf] %vm4641_vm1, %v5534_v59  ;;  %v6479_v21 = vpop.f32.mrb[114].mxu0  ;;  %4762 = vmatprep.mubr.f32.mxu1 %v7199_v11 }
 0x39b   : > { %v5537_v29 = vpack.c.bf16 %v6479_v21, %v6479_v21  ;;  %v4548_v18 = vpop.f32.mrb[115].mxu0 }
 0x39c   : > { %v5536_v51 = vpack.c.bf16 %v4548_v18, %v4548_v18 }
 0x39d   : > { %4653 = vst.msk [vmem:[%s8428_s26 + $0x2c] sm:$0xf] %vm4641_vm1, %v5537_v29  ;;  %5495 = vmatmul.mubr.msk.f32.gmra.mrb[96].mxu1 %vm1250_vm0, %v7899_v28 }
 0x39e   : > { %4652 = vst.msk [vmem:[%s8428_s26 + $0x28] sm:$0xf] %vm4641_vm1, %v5536_v51  ;;  %v6482_v22 = vpop.f32.mrb[116].mxu0  ;;  %4768 = vmatprep.mubr.f32.mxu1 %v7199_v11 }
 0x39f   : > { %v5539_v62 = vpack.c.bf16 %v6482_v22, %v6482_v22  ;;  %v4558_v60 = vpop.f32.mrb[117].mxu0 }
 0x3a0   : > { %v5538_v54 = vpack.c.bf16 %v4558_v60, %v4558_v60 }
 0x3a1   : > { %4655 = vst.msk [vmem:[%s8428_s26 + $0x34] sm:$0xf] %vm4641_vm1, %v5539_v62  ;;  %5496 = vmatmul.mubr.msk.f32.gmra.mrb[98].mxu1 %vm1250_vm0, %v7915_v38  ;;  %v5370_v38 = vld [vmem:[%s8874_s0] ss:$0 sm:$0xff]  ;;  %s8879_s0 = sld [smem:[#allocation16_spill]] }
 0x3a2   : > { %4654 = vst.msk [vmem:[%s8428_s26 + $0x30] sm:$0xf] %vm4641_vm1, %v5538_v54  ;;  %v6485_v19 = vpop.f32.mrb[118].mxu0  ;;  %4774 = vmatprep.mubr.f32.mxu1 %v7199_v11 }
 0x3a3   : > { %v5541_v28 = vpack.c.bf16 %v6485_v19, %v6485_v19  ;;  %v4568_v27 = vpop.f32.mrb[119].mxu0 }
 0x3a4   : > { %v5540_v20 = vpack.c.bf16 %v4568_v27, %v4568_v27 }
 0x3a5   : > { %4657 = vst.msk [vmem:[%s8428_s26 + $0x3c] sm:$0xf] %vm4641_vm1, %v5541_v28  ;;  %5497 = vmatmul.mubr.msk.f32.gmra.mrb[100].mxu1 %vm1250_vm0, %v7940_v55 }
 0x3a6   : > { %4656 = vst.msk [vmem:[%s8428_s26 + $0x38] sm:$0xf] %vm4641_vm1, %v5540_v20  ;;  %4780 = vmatprep.mubr.f32.mxu1 %v7199_v11  ;;  %s8878_s26 = sld [smem:[#allocation15_spill]] }
 0x3a9   : > { %5498 = vmatmul.mubr.msk.f32.gmra.mrb[102].mxu1 %vm1250_vm0, %v7959_v15 }
 0x3aa   : > { %4786 = vmatprep.mubr.f32.mxu1 %v7199_v11 }
 0x3ad   : > { %5499 = vmatmul.mubr.msk.f32.gmra.mrb[104].mxu1 %vm1250_vm0, %v7961_v35 }
 0x3ae   : > { %4792 = vmatprep.mubr.f32.mxu1 %v7199_v11 }
 0x3b1   : > { %5500 = vmatmul.mubr.msk.f32.gmra.mrb[106].mxu1 %vm1250_vm0, %v7981_v45 }
 0x3b2   : > { %4798 = vmatprep.mubr.f32.mxu1 %v7199_v11 }
 0x3b5   : > { %5501 = vmatmul.mubr.msk.f32.gmra.mrb[108].mxu1 %vm1250_vm0, %v7994_v1 }
 0x3b6   : > { %4804 = vmatprep.mubr.f32.mxu1 %v7199_v11 }
 0x3b9   : > { %5502 = vmatmul.mubr.msk.f32.gmra.mrb[110].mxu1 %vm1250_vm0, %v8009_v14 }
 0x3ba   : > { %4810 = vmatprep.mubr.f32.mxu1 %v7199_v11 }
 0x3bd   : > { %5503 = vmatmul.mubr.msk.f32.gmra.mrb[112].mxu1 %vm1250_vm0, %v8865_v13 }
 0x3be   : > { %4816 = vmatprep.mubr.f32.mxu1 %v7199_v11 }
 0x3c1   : > { %5504 = vmatmul.mubr.msk.f32.gmra.mrb[114].mxu1 %vm1250_vm0, %v8866_v43 }
 0x3c2   : > { %4822 = vmatprep.mubr.f32.mxu1 %v7199_v11 }
 0x3c5   : > { %5505 = vmatmul.mubr.msk.f32.gmra.mrb[116].mxu1 %vm1250_vm0, %v8867_v7 }
 0x3c6   : > { %4828 = vmatprep.mubr.f32.mxu1 %v7199_v11 }
 0x3c9   : > { %5506 = vmatmul.mubr.msk.f32.gmra.mrb[118].mxu1 %vm1250_vm0, %v8868_v31 }
 0x400   : > { %v6232_v55 = vpop.f32.mrb[40].mxu1 }
 0x401   : > { %v3154_v15 = vadd.f32 %v6232_v55, %v5370_v38  ;;  %v3148_v35 = vpop.f32.mrb[41].mxu1 }
 0x402   : > { %v3149_v45 = vadd.f32 %v5370_v38, %v3148_v35 }
 0x403   : > { %3228 = vst.msk [vmem:[%s8513_s2 + $0x8] sm:$0xff] %vm1250_vm0, %v3154_v15 }
 0x404   : > { %3227 = vst.msk [vmem:[%s8513_s2] sm:$0xff] %vm1250_vm0, %v3149_v45  ;;  %v6235_v1 = vpop.f32.mrb[42].mxu1 }
 0x405   : > { %v3164_v14 = vadd.f32 %v6235_v1, %v5370_v38  ;;  %v3158_v13 = vpop.f32.mrb[43].mxu1 }
 0x406   : > { %v3159_v43 = vadd.f32 %v5370_v38, %v3158_v13 }
 0x407   : > { %3230 = vst.msk [vmem:[%s8513_s2 + $0x18] sm:$0xff] %vm1250_vm0, %v3164_v14 }
 0x408   : > { %3229 = vst.msk [vmem:[%s8513_s2 + $0x10] sm:$0xff] %vm1250_vm0, %v3159_v43  ;;  %v6238_v7 = vpop.f32.mrb[44].mxu1 }
 0x409   : > { %v3174_v31 = vadd.f32 %v6238_v7, %v5370_v38  ;;  %v3168_v49 = vpop.f32.mrb[45].mxu1 }
 0x40a   : > { %v3169_v42 = vadd.f32 %v5370_v38, %v3168_v49 }
 0x40b   : > { %3232 = vst.msk [vmem:[%s8513_s2 + $0x28] sm:$0xff] %vm1250_vm0, %v3174_v31 }
 0x40c   : > { %3231 = vst.msk [vmem:[%s8513_s2 + $0x20] sm:$0xff] %vm1250_vm0, %v3169_v42  ;;  %v6241_v5 = vpop.f32.mrb[46].mxu1 }
 0x40d   : > { %v3184_v16 = vadd.f32 %v6241_v5, %v5370_v38  ;;  %v3178_v0 = vpop.f32.mrb[47].mxu1 }
 0x40e   : > { %v3179_v17 = vadd.f32 %v5370_v38, %v3178_v0 }
 0x40f   : > { %3234 = vst.msk [vmem:[%s8513_s2 + $0x38] sm:$0xff] %vm1250_vm0, %v3184_v16 }
 0x410   : > { %3233 = vst.msk [vmem:[%s8513_s2 + $0x30] sm:$0xff] %vm1250_vm0, %v3179_v17  ;;  %v6244_v26 = vpop.f32.mrb[48].mxu1 }
 0x411   : > { %v3194_v47 = vadd.f32 %v6244_v26, %v5370_v38  ;;  %v3188_v10 = vpop.f32.mrb[49].mxu1 }
 0x412   : > { %v3189_v63 = vadd.f32 %v5370_v38, %v3188_v10 }
 0x413   : > { %3236 = vst.msk [vmem:[%s8513_s2 + $0x48] sm:$0xff] %vm1250_vm0, %v3194_v47 }
 0x414   : > { %3235 = vst.msk [vmem:[%s8513_s2 + $0x40] sm:$0xff] %vm1250_vm0, %v3189_v63  ;;  %v6247_v46 = vpop.f32.mrb[50].mxu1 }
 0x415   : > { %v3204_v37 = vadd.f32 %v6247_v46, %v5370_v38  ;;  %v3198_v12 = vpop.f32.mrb[51].mxu1 }
 0x416   : > { %v3199_v53 = vadd.f32 %v5370_v38, %v3198_v12 }
 0x417   : > { %3238 = vst.msk [vmem:[%s8513_s2 + $0x58] sm:$0xff] %vm1250_vm0, %v3204_v37 }
 0x418   : > { %3237 = vst.msk [vmem:[%s8513_s2 + $0x50] sm:$0xff] %vm1250_vm0, %v3199_v53  ;;  %v6250_v30 = vpop.f32.mrb[52].mxu1 }
 0x419   : > { %v3214_v8 = vadd.f32 %v6250_v30, %v5370_v38  ;;  %v3208_v39 = vpop.f32.mrb[53].mxu1 }
 0x41a   : > { %v3209_v3 = vadd.f32 %v5370_v38, %v3208_v39 }
 0x41b   : > { %3240 = vst.msk [vmem:[%s8513_s2 + $0x68] sm:$0xff] %vm1250_vm0, %v3214_v8 }
 0x41c   : > { %3239 = vst.msk [vmem:[%s8513_s2 + $0x60] sm:$0xff] %vm1250_vm0, %v3209_v3  ;;  %v6253_v48 = vpop.f32.mrb[54].mxu1 }
 0x41d   : > { %v3224_v34 = vadd.f32 %v6253_v48, %v5370_v38  ;;  %v3218_v50 = vpop.f32.mrb[55].mxu1 }
 0x41e   : > { %v3219_v61 = vadd.f32 %v5370_v38, %v3218_v50 }
 0x41f   : > { %3242 = vst.msk [vmem:[%s8513_s2 + $0x78] sm:$0xff] %vm1250_vm0, %v3224_v34 }
 0x420   : > { %3241 = vst.msk [vmem:[%s8513_s2 + $0x70] sm:$0xff] %vm1250_vm0, %v3219_v61  ;;  %v6328_v9 = vpop.f32.mrb[56].mxu1  ;;  %s8882_s2 = sld [smem:[#allocation21_spill]] }
 0x421   : > { %v3514_v41 = vadd.f32 %v6328_v9, %v8544_v44  ;;  %v3508_v11 = vpop.f32.mrb[57].mxu1 }
 0x422   : > { %v3509_v57 = vadd.f32 %v8544_v44, %v3508_v11 }
 0x423   : > { %v3588_v23 = vmax.f32 %v3514_v41, 0.0 }
 0x424   : > { %v3587_v58 = vmax.f32 %v3509_v57, 0.0  ;;  %v6331_v40 = vpop.f32.mrb[58].mxu1 }
 0x425   : > { %v3524_v6 = vadd.f32 %v6331_v40, %v8544_v44  ;;  %v3518_v25 = vpop.f32.mrb[59].mxu1  ;;  %v3611_v56 = vmul.f32 %v8553_v52, %v3588_v23 }
 0x426   : > { %v3519_v2 = vadd.f32 %v8544_v44, %v3518_v25  ;;  %v3610_v33 = vmul.f32 %v8553_v52, %v3587_v58  ;;  %s8728_s7 = scalar_lea.vmem %s8882_s2, %s7403_s14 }
 0x427   : > { %v3590_v32 = vmax.f32 %v3524_v6, 0.0  ;;  %v3629_v4 = vsel %vm1250_vm0, %v3611_v56, 0.0  ;;  %v8595_v56 = vld [vmem:[%s8878_s26] ss:$0 sm:$0xff] }
 0x428   : > { %v3589_v36 = vmax.f32 %v3519_v2, 0.0  ;;  %3630 = vadd.xlane.f32.xlu1 %v3629_v4  ;;  %v6334_v24 = vpop.f32.mrb[60].mxu1  ;;  %v3626_v59 = vsel %vm1250_vm0, %v3610_v33, 0.0 }
 0x429   : > { %v3534_v21 = vadd.f32 %v6334_v24, %v8544_v44  ;;  %v3528_v29 = vpop.f32.mrb[61].mxu1  ;;  %3627 = vadd.xlane.f32.xlu0 %v3626_v59  ;;  %v3613_v18 = vmul.f32 %v8553_v52, %v3590_v32 }
 0x42a   : > { %v3529_v51 = vadd.f32 %v8544_v44, %v3528_v29  ;;  %v3612_v22 = vmul.f32 %v8553_v52, %v3589_v36 }
 0x42b   : > { %v3592_v62 = vmax.f32 %v3534_v21, 0.0  ;;  %v3635_v60 = vsel %vm1250_vm0, %v3613_v18, 0.0 }
 0x42c   : > { %v3591_v54 = vmax.f32 %v3529_v51, 0.0  ;;  %3636 = vadd.xlane.f32.xlu1 %v3635_v60  ;;  %v6337_v19 = vpop.f32.mrb[62].mxu1  ;;  %v3632_v28 = vsel %vm1250_vm0, %v3612_v22, 0.0  ;;  %v8605_v51 = vld [vmem:[%s8879_s0] ss:$0 sm:$0xff] }
 0x42d   : > { %v3544_v27 = vadd.f32 %v6337_v19, %v8544_v44  ;;  %v3538_v20 = vpop.f32.mrb[63].mxu1  ;;  %3633 = vadd.xlane.f32.xlu0 %v3632_v28  ;;  %v3615_v38 = vmul.f32 %v8553_v52, %v3592_v62 }
 0x42e   : > { %v3539_v55 = vadd.f32 %v8544_v44, %v3538_v20  ;;  %v3614_v15 = vmul.f32 %v8553_v52, %v3591_v54 }
 0x42f   : > { %v3594_v35 = vmax.f32 %v3544_v27, 0.0  ;;  %v3641_v45 = vsel %vm1250_vm0, %v3615_v38, 0.0 }
 0x430   : > { %v3593_v1 = vmax.f32 %v3539_v55, 0.0  ;;  %3642 = vadd.xlane.f32.xlu1 %v3641_v45  ;;  %v6340_v14 = vpop.f32.mrb[64].mxu1  ;;  %v3638_v13 = vsel %vm1250_vm0, %v3614_v15, 0.0 }
 0x431   : > { %v3554_v43 = vadd.f32 %v6340_v14, %v8544_v44  ;;  %v3548_v7 = vpop.f32.mrb[65].mxu1  ;;  %3639 = vadd.xlane.f32.xlu0 %v3638_v13  ;;  %v3617_v31 = vmul.f32 %v8553_v52, %v3594_v35 }
 0x432   : > { %v3549_v49 = vadd.f32 %v8544_v44, %v3548_v7  ;;  %v3616_v42 = vmul.f32 %v8553_v52, %v3593_v1 }
 0x433   : > { %v3596_v5 = vmax.f32 %v3554_v43, 0.0  ;;  %v3647_v16 = vsel %vm1250_vm0, %v3617_v31, 0.0 }
 0x434   : > { %v3595_v0 = vmax.f32 %v3549_v49, 0.0  ;;  %3648 = vadd.xlane.f32.xlu1 %v3647_v16  ;;  %v6343_v17 = vpop.f32.mrb[66].mxu1  ;;  %v3644_v26 = vsel %vm1250_vm0, %v3616_v42, 0.0 }
 0x435   : > { %v3564_v47 = vadd.f32 %v6343_v17, %v8544_v44  ;;  %v3558_v10 = vpop.f32.mrb[67].mxu1  ;;  %3645 = vadd.xlane.f32.xlu0 %v3644_v26  ;;  %v3619_v63 = vmul.f32 %v8553_v52, %v3596_v5 }
 0x436   : > { %v3559_v46 = vadd.f32 %v8544_v44, %v3558_v10  ;;  %v3618_v37 = vmul.f32 %v8553_v52, %v3595_v0 }
 0x437   : > { %v3598_v12 = vmax.f32 %v3564_v47, 0.0  ;;  %v3653_v53 = vsel %vm1250_vm0, %v3619_v63, 0.0 }
 0x438   : > { %v3597_v30 = vmax.f32 %v3559_v46, 0.0  ;;  %3654 = vadd.xlane.f32.xlu1 %v3653_v53  ;;  %v6346_v8 = vpop.f32.mrb[68].mxu1  ;;  %v3650_v39 = vsel %vm1250_vm0, %v3618_v37, 0.0 }
 0x439   : > { %v3574_v3 = vadd.f32 %v6346_v8, %v8544_v44  ;;  %v3568_v48 = vpop.f32.mrb[69].mxu1  ;;  %3651 = vadd.xlane.f32.xlu0 %v3650_v39  ;;  %v3621_v34 = vmul.f32 %v8553_v52, %v3598_v12 }
 0x43a   : > { %v3569_v50 = vadd.f32 %v8544_v44, %v3568_v48  ;;  %v3620_v61 = vmul.f32 %v8553_v52, %v3597_v30 }
 0x43b   : > { %v3600_v9 = vmax.f32 %v3574_v3, 0.0  ;;  %v3659_v41 = vsel %vm1250_vm0, %v3621_v34, 0.0 }
 0x43c   : > { %v3599_v11 = vmax.f32 %v3569_v50, 0.0  ;;  %3660 = vadd.xlane.f32.xlu1 %v3659_v41  ;;  %v6349_v57 = vpop.f32.mrb[70].mxu1  ;;  %v3656_v23 = vsel %vm1250_vm0, %v3620_v61, 0.0 }
 0x43d   : > { %v3584_v58 = vadd.f32 %v6349_v57, %v8544_v44  ;;  %v3578_v40 = vpop.f32.mrb[71].mxu1  ;;  %3657 = vadd.xlane.f32.xlu0 %v3656_v23  ;;  %v3623_v6 = vmul.f32 %v8553_v52, %v3600_v9 }
 0x43e   : > { %v3579_v25 = vadd.f32 %v8544_v44, %v3578_v40  ;;  %v3622_v2 = vmul.f32 %v8553_v52, %v3599_v11 }
 0x43f   : > { %v3602_v33 = vmax.f32 %v3584_v58, 0.0  ;;  %v3665_v32 = vsel %vm1250_vm0, %v3623_v6, 0.0 }
 0x440   : > { %v3601_v4 = vmax.f32 %v3579_v25, 0.0  ;;  %3666 = vadd.xlane.f32.xlu1 %v3665_v32  ;;  %v6424_v36 = vpop.f32.mrb[72].mxu1  ;;  %v3662_v24 = vsel %vm1250_vm0, %v3622_v2, 0.0 }
 0x441   : > { %v4081_v59 = vadd.f32 %v6424_v36, %v8595_v56  ;;  %v4075_v21 = vpop.f32.mrb[73].mxu1  ;;  %3663 = vadd.xlane.f32.xlu0 %v3662_v24  ;;  %v3625_v29 = vmul.f32 %v8553_v52, %v3602_v33 }
 0x442   : > { %v4076_v44 = vadd.f32 %v8595_v56, %v4075_v21  ;;  %v3624_v18 = vmul.f32 %v8553_v52, %v3601_v4 }
 0x443   : > { %v4155_v22 = vmax.f32 %v4081_v59, 0.0  ;;  %v3671_v62 = vsel %vm1250_vm0, %v3625_v29, 0.0 }
 0x444   : > { %v4154_v60 = vmax.f32 %v4076_v44, 0.0  ;;  %3672 = vadd.xlane.f32.xlu1 %v3671_v62  ;;  %v6427_v54 = vpop.f32.mrb[74].mxu1  ;;  %v3668_v19 = vsel %vm1250_vm0, %v3624_v18, 0.0 }
 0x445   : > { %v4091_v28 = vadd.f32 %v6427_v54, %v8595_v56  ;;  %v4085_v27 = vpop.f32.mrb[75].mxu1  ;;  %3669 = vadd.xlane.f32.xlu0 %v3668_v19  ;;  %v4178_v20 = vmul.f32 %v8605_v51, %v4155_v22 }
 0x446   : > { %v4086_v38 = vadd.f32 %v8595_v56, %v4085_v27  ;;  %v4177_v52 = vmul.f32 %v8605_v51, %v4154_v60 }
 0x447   : > { %v4157_v55 = vmax.f32 %v4091_v28, 0.0  ;;  %v4196_v15 = vsel %vm1250_vm0, %v4178_v20, 0.0 }
 0x448   : > { %v4156_v35 = vmax.f32 %v4086_v38, 0.0  ;;  %4197 = vadd.xlane.f32.xlu1 %v4196_v15  ;;  %v6430_v45 = vpop.f32.mrb[76].mxu1  ;;  %v4193_v1 = vsel %vm1250_vm0, %v4177_v52, 0.0 }
 0x449   : > { %v4101_v14 = vadd.f32 %v6430_v45, %v8595_v56  ;;  %v4095_v13 = vpop.f32.mrb[77].mxu1  ;;  %4194 = vadd.xlane.f32.xlu0 %v4193_v1  ;;  %v4180_v43 = vmul.f32 %v8605_v51, %v4157_v55 }
 0x44a   : > { %v4096_v7 = vadd.f32 %v8595_v56, %v4095_v13  ;;  %v4179_v31 = vmul.f32 %v8605_v51, %v4156_v35 }
 0x44b   : > { %v4159_v49 = vmax.f32 %v4101_v14, 0.0  ;;  %v4202_v42 = vsel %vm1250_vm0, %v4180_v43, 0.0 }
 0x44c   : > { %v4158_v5 = vmax.f32 %v4096_v7, 0.0  ;;  %4203 = vadd.xlane.f32.xlu1 %v4202_v42  ;;  %v6433_v16 = vpop.f32.mrb[78].mxu1  ;;  %v4199_v0 = vsel %vm1250_vm0, %v4179_v31, 0.0 }
 0x44d   : > { %v4111_v17 = vadd.f32 %v6433_v16, %v8595_v56  ;;  %v4105_v26 = vpop.f32.mrb[79].mxu1  ;;  %4200 = vadd.xlane.f32.xlu0 %v4199_v0  ;;  %v4182_v47 = vmul.f32 %v8605_v51, %v4159_v49 }
 0x44e   : > { %v4106_v10 = vadd.f32 %v8595_v56, %v4105_v26  ;;  %v4181_v63 = vmul.f32 %v8605_v51, %v4158_v5 }
 0x44f   : > { %v4161_v46 = vmax.f32 %v4111_v17, 0.0  ;;  %v4208_v37 = vsel %vm1250_vm0, %v4182_v47, 0.0 }
 0x450   : > { %v4160_v12 = vmax.f32 %v4106_v10, 0.0  ;;  %4209 = vadd.xlane.f32.xlu1 %v4208_v37  ;;  %v6436_v53 = vpop.f32.mrb[80].mxu1  ;;  %v4205_v30 = vsel %vm1250_vm0, %v4181_v63, 0.0 }
 0x451   : > { %v4121_v8 = vadd.f32 %v6436_v53, %v8595_v56  ;;  %v4115_v39 = vpop.f32.mrb[81].mxu1  ;;  %4206 = vadd.xlane.f32.xlu0 %v4205_v30  ;;  %v4184_v3 = vmul.f32 %v8605_v51, %v4161_v46 }
 0x452   : > { %v4116_v48 = vadd.f32 %v8595_v56, %v4115_v39  ;;  %v4183_v34 = vmul.f32 %v8605_v51, %v4160_v12 }
 0x453   : > { %v4163_v50 = vmax.f32 %v4121_v8, 0.0  ;;  %v4214_v61 = vsel %vm1250_vm0, %v4184_v3, 0.0 }
 0x454   : > { %v4162_v9 = vmax.f32 %v4116_v48, 0.0  ;;  %4215 = vadd.xlane.f32.xlu1 %v4214_v61  ;;  %v6439_v41 = vpop.f32.mrb[82].mxu1  ;;  %v4211_v11 = vsel %vm1250_vm0, %v4183_v34, 0.0 }
 0x455   : > { %v4131_v57 = vadd.f32 %v6439_v41, %v8595_v56  ;;  %v4125_v23 = vpop.f32.mrb[83].mxu1  ;;  %4212 = vadd.xlane.f32.xlu0 %v4211_v11  ;;  %v4186_v58 = vmul.f32 %v8605_v51, %v4163_v50 }
 0x456   : > { %v4126_v40 = vadd.f32 %v8595_v56, %v4125_v23  ;;  %v4185_v6 = vmul.f32 %v8605_v51, %v4162_v9 }
 0x457   : > { %v4165_v25 = vmax.f32 %v4131_v57, 0.0  ;;  %v4220_v2 = vsel %vm1250_vm0, %v4186_v58, 0.0 }
 0x458   : > { %v4164_v33 = vmax.f32 %v4126_v40, 0.0  ;;  %4221 = vadd.xlane.f32.xlu1 %v4220_v2  ;;  %v6442_v32 = vpop.f32.mrb[84].mxu1  ;;  %v4217_v4 = vsel %vm1250_vm0, %v4185_v6, 0.0 }
 0x459   : > { %v4141_v36 = vadd.f32 %v6442_v32, %v8595_v56  ;;  %v4135_v24 = vpop.f32.mrb[85].mxu1  ;;  %4218 = vadd.xlane.f32.xlu0 %v4217_v4  ;;  %v4188_v59 = vmul.f32 %v8605_v51, %v4165_v25 }
 0x45a   : > { %v4136_v21 = vadd.f32 %v8595_v56, %v4135_v24  ;;  %v4187_v29 = vmul.f32 %v8605_v51, %v4164_v33 }
 0x45b   : > { %v4167_v44 = vmax.f32 %v4141_v36, 0.0  ;;  %v4226_v18 = vsel %vm1250_vm0, %v4188_v59, 0.0 }
 0x45c   : > { %v4166_v22 = vmax.f32 %v4136_v21, 0.0  ;;  %4227 = vadd.xlane.f32.xlu1 %v4226_v18  ;;  %v6445_v62 = vpop.f32.mrb[86].mxu1  ;;  %v4223_v60 = vsel %vm1250_vm0, %v4187_v29, 0.0 }
 0x45d   : > { %v4151_v54 = vadd.f32 %v6445_v62, %v8595_v56  ;;  %v4145_v19 = vpop.f32.mrb[87].mxu1  ;;  %4224 = vadd.xlane.f32.xlu0 %v4223_v60  ;;  %v4190_v28 = vmul.f32 %v8605_v51, %v4167_v44  ;;  %v8711_v62 = vld [vmem:[#allocation2] ss:$0 sm:$0xff] }
 0x45e   : > { %v4146_v27 = vadd.f32 %v8595_v56, %v4145_v19  ;;  %v4189_v20 = vmul.f32 %v8605_v51, %v4166_v22 }
 0x45f   : > { %v4169_v38 = vmax.f32 %v4151_v54, 0.0  ;;  %v4232_v52 = vsel %vm1250_vm0, %v4190_v28, 0.0 }
 0x460   : > { %v4168_v55 = vmax.f32 %v4146_v27, 0.0  ;;  %4233 = vadd.xlane.f32.xlu1 %v4232_v52  ;;  %v4740_v15 = vpop.f32.mrb[88].mxu1  ;;  %v4229_v35 = vsel %vm1250_vm0, %v4189_v20, 0.0 }
 0x461   : > { %v4742_v45 = vpop.f32.mrb[89].mxu1  ;;  %4230 = vadd.xlane.f32.xlu0 %v4229_v35  ;;  %v4192_v56 = vmul.f32 %v8605_v51, %v4169_v38 }
 0x462   : > { %v5542_v14 = vpack.c.bf16 %v4742_v45, %v4740_v15  ;;  %v4191_v13 = vmul.f32 %v8605_v51, %v4168_v55 }
 0x463   : > { %v4238_v43 = vsel %vm1250_vm0, %v4192_v56, 0.0 }
 0x464   : > { %4934 = vst.msk [vmem:[%s8653_s1] sm:$0xff] %vm8655_vm4, %v5542_v14  ;;  %4239 = vadd.xlane.f32.xlu1 %v4238_v43  ;;  %v4746_v7 = vpop.f32.mrb[90].mxu1  ;;  %v4235_v31 = vsel %vm1250_vm0, %v4191_v13, 0.0 }
 0x465   : > { %v4748_v49 = vpop.f32.mrb[91].mxu1  ;;  %4236 = vadd.xlane.f32.xlu0 %v4235_v31 }
 0x466   : > { %v5543_v42 = vpack.c.bf16 %v4748_v49, %v4746_v7 }
 0x468   : > { %4935 = vst.msk [vmem:[%s8653_s1 + $0x8] sm:$0xff] %vm8655_vm4, %v5543_v42  ;;  %v4752_v5 = vpop.f32.mrb[92].mxu1 }
 0x469   : > { %v4754_v51 = vpop.f32.mrb[93].mxu1 }
 0x46a   : > { %v5544_v16 = vpack.c.bf16 %v4754_v51, %v4752_v5 }
 0x46c   : > { %4936 = vst.msk [vmem:[%s8653_s1 + $0x10] sm:$0xff] %vm8655_vm4, %v5544_v16  ;;  %v4758_v0 = vpop.f32.mrb[94].mxu1 }
 0x46d   : > { %v4760_v17 = vpop.f32.mrb[95].mxu1 }
 0x46e   : > { %v5545_v26 = vpack.c.bf16 %v4760_v17, %v4758_v0 }
 0x470   : > { %4937 = vst.msk [vmem:[%s8653_s1 + $0x18] sm:$0xff] %vm8655_vm4, %v5545_v26  ;;  %v4764_v47 = vpop.f32.mrb[96].mxu1 }
 0x471   : > { %v4766_v10 = vpop.f32.mrb[97].mxu1 }
 0x472   : > { %v5546_v63 = vpack.c.bf16 %v4766_v10, %v4764_v47 }
 0x474   : > { %4938 = vst.msk [vmem:[%s8653_s1 + $0x20] sm:$0xff] %vm8655_vm4, %v5546_v63  ;;  %v4770_v46 = vpop.f32.mrb[98].mxu1 }
 0x475   : > { %v4772_v37 = vpop.f32.mrb[99].mxu1 }
 0x476   : > { %v5547_v12 = vpack.c.bf16 %v4772_v37, %v4770_v46 }
 0x478   : > { %4939 = vst.msk [vmem:[%s8653_s1 + $0x28] sm:$0xff] %vm8655_vm4, %v5547_v12  ;;  %v4776_v53 = vpop.f32.mrb[100].mxu1 }
 0x479   : > { %v4778_v30 = vpop.f32.mrb[101].mxu1 }
 0x47a   : > { %v5548_v8 = vpack.c.bf16 %v4778_v30, %v4776_v53 }
 0x47c   : > { %4940 = vst.msk [vmem:[%s8653_s1 + $0x30] sm:$0xff] %vm8655_vm4, %v5548_v8  ;;  %v4782_v39 = vpop.f32.mrb[102].mxu1 }
 0x47d   : > { %v4784_v3 = vpop.f32.mrb[103].mxu1 }
 0x47e   : > { %v5549_v48 = vpack.c.bf16 %v4784_v3, %v4782_v39 }
 0x480   : > { %4941 = vst.msk [vmem:[%s8653_s1 + $0x38] sm:$0xff] %vm8655_vm4, %v5549_v48  ;;  %v4788_v34 = vpop.f32.mrb[104].mxu1 }
 0x481   : > { %v4790_v50 = vpop.f32.mrb[105].mxu1 }
 0x482   : > { %v5550_v61 = vpack.c.bf16 %v4790_v50, %v4788_v34 }
 0x484   : > { %4942 = vst.msk [vmem:[%s8653_s1 + $0x40] sm:$0xff] %vm8655_vm4, %v5550_v61  ;;  %v4794_v9 = vpop.f32.mrb[106].mxu1 }
 0x485   : > { %v4796_v41 = vpop.f32.mrb[107].mxu1 }
 0x486   : > { %v5551_v11 = vpack.c.bf16 %v4796_v41, %v4794_v9 }
 0x488   : > { %4943 = vst.msk [vmem:[%s8653_s1 + $0x48] sm:$0xff] %vm8655_vm4, %v5551_v11  ;;  %v4800_v57 = vpop.f32.mrb[108].mxu1 }
 0x489   : > { %v4802_v23 = vpop.f32.mrb[109].mxu1 }
 0x48a   : > { %v5552_v58 = vpack.c.bf16 %v4802_v23, %v4800_v57 }
 0x48c   : > { %4944 = vst.msk [vmem:[%s8653_s1 + $0x50] sm:$0xff] %vm8655_vm4, %v5552_v58  ;;  %v4806_v40 = vpop.f32.mrb[110].mxu1 }
 0x48d   : > { %v4808_v6 = vpop.f32.mrb[111].mxu1 }
 0x48e   : > { %v5553_v25 = vpack.c.bf16 %v4808_v6, %v4806_v40 }
 0x490   : > { %4945 = vst.msk [vmem:[%s8653_s1 + $0x58] sm:$0xff] %vm8655_vm4, %v5553_v25  ;;  %v4812_v2 = vpop.f32.mrb[112].mxu1 }
 0x491   : > { %v4814_v33 = vpop.f32.mrb[113].mxu1 }
 0x492   : > { %v5554_v32 = vpack.c.bf16 %v4814_v33, %v4812_v2 }
 0x494   : > { %4946 = vst.msk [vmem:[%s8653_s1 + $0x60] sm:$0xff] %vm8655_vm4, %v5554_v32  ;;  %v4818_v4 = vpop.f32.mrb[114].mxu1 }
 0x495   : > { %v4820_v36 = vpop.f32.mrb[115].mxu1 }
 0x496   : > { %v5555_v24 = vpack.c.bf16 %v4820_v36, %v4818_v4 }
 0x498   : > { %4947 = vst.msk [vmem:[%s8653_s1 + $0x68] sm:$0xff] %vm8655_vm4, %v5555_v24  ;;  %v4824_v59 = vpop.f32.mrb[116].mxu1 }
 0x499   : > { %v4826_v21 = vpop.f32.mrb[117].mxu1 }
 0x49a   : > { %v5556_v29 = vpack.c.bf16 %v4826_v21, %v4824_v59 }
 0x49c   : > { %4948 = vst.msk [vmem:[%s8653_s1 + $0x70] sm:$0xff] %vm8655_vm4, %v5556_v29  ;;  %v4830_v44 = vpop.f32.mrb[118].mxu1 }
 0x49d   : > { %v4832_v18 = vpop.f32.mrb[119].mxu1 }
 0x49e   : > { %v5557_v22 = vpack.c.bf16 %v4832_v18, %v4830_v44 }
 0x4a0   : > { %4949 = vst.msk [vmem:[%s8653_s1 + $0x78] sm:$0xff] %vm8655_vm4, %v5557_v22 }
 0x4b5   : > { %v3631_v60 = vpop.xlane.xlu1 %3630 }
 0x4b6   : > { %v3682_v54 = vadd.f32 %v8711_v62, %v3631_v60  ;;  %v3628_v19 = vpop.xlane.xlu0 %3627  ;;  %v8737_v60 = vld [vmem:[#allocation3] ss:$0 sm:$0xff] }
 0x4b7   : > { %v3681_v28 = vadd.f32 %v8711_v62, %v3628_v19 }
 0x4b8   : > { %v5408_v27 = vmul.f32 -1.442695, %v3682_v54 }
 0x4b9   : > { %v5407_v20 = vmul.f32 -1.442695, %v3681_v28  ;;  %v3637_v38 = vpop.xlane.xlu1 %3636 }
 0x4ba   : > { %6995 = vpow2.f32 %v5408_v27  ;;  %v3684_v52 = vadd.f32 %v8711_v62, %v3637_v38  ;;  %v3634_v55 = vpop.xlane.xlu0 %3633 }
 0x4bb   : > { %6997 = vpow2.f32 %v5407_v20  ;;  %v3683_v15 = vadd.f32 %v8711_v62, %v3634_v55 }
 0x4bc   : > { %v5410_v35 = vmul.f32 -1.442695, %v3684_v52 }
 0x4bd   : > { %v5409_v45 = vmul.f32 -1.442695, %v3683_v15  ;;  %v3643_v1 = vpop.xlane.xlu1 %3642 }
 0x4be   : > { %6999 = vpow2.f32 %v5410_v35  ;;  %v3686_v56 = vadd.f32 %v8711_v62, %v3643_v1  ;;  %v3640_v14 = vpop.xlane.xlu0 %3639 }
 0x4bf   : > { %7001 = vpow2.f32 %v5409_v45  ;;  %v3685_v13 = vadd.f32 %v8711_v62, %v3640_v14 }
 0x4c0   : > { %v5412_v43 = vmul.f32 -1.442695, %v3686_v56 }
 0x4c1   : > { %v5411_v7 = vmul.f32 -1.442695, %v3685_v13  ;;  %v3649_v31 = vpop.xlane.xlu1 %3648 }
 0x4c2   : > { %7003 = vpow2.f32 %v5412_v43  ;;  %v3688_v49 = vadd.f32 %v8711_v62, %v3649_v31  ;;  %v3646_v42 = vpop.xlane.xlu0 %3645 }
 0x4c3   : > { %7005 = vpow2.f32 %v5411_v7  ;;  %v3687_v5 = vadd.f32 %v8711_v62, %v3646_v42 }
 0x4c4   : > { %v6996_v51 = vpop.eup %6995  ;;  %v5414_v16 = vmul.f32 -1.442695, %v3688_v49 }
 0x4c5   : > { %v6998_v0 = vpop.eup %6997  ;;  %v3746_v17 = vadd.f32 1.0, %v6996_v51  ;;  %v5413_v26 = vmul.f32 -1.442695, %v3687_v5  ;;  %v3655_v47 = vpop.xlane.xlu1 %3654 }
 0x4c6   : > { %v3745_v10 = vadd.f32 1.0, %v6998_v0  ;;  %7007 = vpow2.f32 %v5414_v16  ;;  %v3690_v63 = vadd.f32 %v8711_v62, %v3655_v47  ;;  %v3652_v46 = vpop.xlane.xlu0 %3651 }
 0x4c7   : > { %7009 = vrcp.f32 %v3746_v17  ;;  %v3689_v37 = vadd.f32 %v8711_v62, %v3652_v46 }
 0x4c8   : > { %v7000_v12 = vpop.eup %6999  ;;  %7011 = vrcp.f32 %v3745_v10  ;;  %v5416_v53 = vmul.f32 -1.442695, %v3690_v63 }
 0x4c9   : > { %v7002_v30 = vpop.eup %7001  ;;  %v3748_v8 = vadd.f32 1.0, %v7000_v12  ;;  %7013 = vpow2.f32 %v5413_v26  ;;  %v5415_v39 = vmul.f32 -1.442695, %v3689_v37  ;;  %v3661_v3 = vpop.xlane.xlu1 %3660 }
 0x4ca   : > { %v3747_v48 = vadd.f32 1.0, %v7002_v30  ;;  %7015 = vpow2.f32 %v5416_v53  ;;  %v3692_v34 = vadd.f32 %v8711_v62, %v3661_v3  ;;  %v3658_v50 = vpop.xlane.xlu0 %3657 }
 0x4cb   : > { %7017 = vrcp.f32 %v3748_v8  ;;  %v3691_v61 = vadd.f32 %v8711_v62, %v3658_v50 }
 0x4cc   : > { %v7004_v9 = vpop.eup %7003  ;;  %7019 = vrcp.f32 %v3747_v48  ;;  %v5418_v41 = vmul.f32 -1.442695, %v3692_v34 }
 0x4cd   : > { %v7006_v11 = vpop.eup %7005  ;;  %v3750_v57 = vadd.f32 1.0, %v7004_v9  ;;  %7021 = vpow2.f32 %v5415_v39  ;;  %v5417_v23 = vmul.f32 -1.442695, %v3691_v61  ;;  %v3667_v58 = vpop.xlane.xlu1 %3666 }
 0x4ce   : > { %v3749_v40 = vadd.f32 1.0, %v7006_v11  ;;  %7023 = vpow2.f32 %v5418_v41  ;;  %v3694_v6 = vadd.f32 %v8711_v62, %v3667_v58  ;;  %v3664_v25 = vpop.xlane.xlu0 %3663 }
 0x4cf   : > { %7025 = vrcp.f32 %v3750_v57  ;;  %v3693_v2 = vadd.f32 %v8711_v62, %v3664_v25 }
 0x4d0   : > { %v7008_v33 = vpop.eup %7007  ;;  %7027 = vrcp.f32 %v3749_v40  ;;  %v5420_v32 = vmul.f32 -1.442695, %v3694_v6 }
 0x4d1   : > { %v7010_v4 = vpop.eup %7009  ;;  %v3752_v36 = vadd.f32 1.0, %v7008_v33  ;;  %7029 = vpow2.f32 %v5417_v23  ;;  %v5419_v24 = vmul.f32 -1.442695, %v3693_v2  ;;  %v3673_v59 = vpop.xlane.xlu1 %3672 }
 0x4d2   : > { %v7012_v21 = vpop.eup %7011  ;;  %3795 = vst.msk [vmem:[%s8728_s7 + $0x8] sm:$0xff] %vm3793_vm5, %v7010_v4  ;;  %7031 = vpow2.f32 %v5420_v32  ;;  %v3696_v29 = vadd.f32 %v8711_v62, %v3673_v59  ;;  %v3670_v44 = vpop.xlane.xlu0 %3669 }
 0x4d3   : > { %v7014_v18 = vpop.eup %7013  ;;  %3794 = vst.msk [vmem:[%s8728_s7] sm:$0xff] %vm3793_vm5, %v7012_v21  ;;  %7033 = vrcp.f32 %v3752_v36  ;;  %v3695_v22 = vadd.f32 %v8711_v62, %v3670_v44 }
 0x4d4   : > { %v7016_v54 = vpop.eup %7015  ;;  %v3751_v19 = vadd.f32 1.0, %v7014_v18  ;;  %7035 = vpow2.f32 %v5419_v24  ;;  %v5422_v28 = vmul.f32 -1.442695, %v3696_v29 }
 0x4d5   : > { %v7018_v27 = vpop.eup %7017  ;;  %v3754_v20 = vadd.f32 1.0, %v7016_v54  ;;  %v5421_v38 = vmul.f32 -1.442695, %v3695_v22  ;;  %v4198_v52 = vpop.xlane.xlu1 %4197 }
 0x4d6   : > { %v7020_v55 = vpop.eup %7019  ;;  %3797 = vst.msk [vmem:[%s8728_s7 + $0x18] sm:$0xff] %vm3793_vm5, %v7018_v27  ;;  %7037 = vrcp.f32 %v3751_v19  ;;  %v4249_v15 = vadd.f32 %v8737_v60, %v4198_v52  ;;  %v4195_v35 = vpop.xlane.xlu0 %4194 }
 0x4d7   : > { %v7022_v62 = vpop.eup %7021  ;;  %3796 = vst.msk [vmem:[%s8728_s7 + $0x10] sm:$0xff] %vm3793_vm5, %v7020_v55  ;;  %7039 = vrcp.f32 %v3754_v20  ;;  %v4248_v45 = vadd.f32 %v8737_v60, %v4195_v35 }
 0x4d8   : > { %v7024_v1 = vpop.eup %7023  ;;  %v3753_v56 = vadd.f32 1.0, %v7022_v62  ;;  %7041 = vpow2.f32 %v5422_v28  ;;  %v5444_v14 = vmul.f32 -1.442695, %v4249_v15 }
 0x4d9   : > { %v7026_v13 = vpop.eup %7025  ;;  %v3756_v43 = vadd.f32 1.0, %v7024_v1  ;;  %7043 = vpow2.f32 %v5421_v38  ;;  %v5443_v7 = vmul.f32 -1.442695, %v4248_v45  ;;  %v4204_v31 = vpop.xlane.xlu1 %4203 }
 0x4da   : > { %v7028_v49 = vpop.eup %7027  ;;  %3799 = vst.msk [vmem:[%s8728_s7 + $0x28] sm:$0xff] %vm3793_vm5, %v7026_v13  ;;  %7045 = vrcp.f32 %v3753_v56  ;;  %v4251_v42 = vadd.f32 %v8737_v60, %v4204_v31  ;;  %v4201_v5 = vpop.xlane.xlu0 %4200 }
 0x4db   : > { %v7030_v51 = vpop.eup %7029  ;;  %3798 = vst.msk [vmem:[%s8728_s7 + $0x20] sm:$0xff] %vm3793_vm5, %v7028_v49  ;;  %7047 = vrcp.f32 %v3756_v43  ;;  %v4250_v16 = vadd.f32 %v8737_v60, %v4201_v5 }
 0x4dc   : > { %v7032_v0 = vpop.eup %7031  ;;  %v3755_v17 = vadd.f32 1.0, %v7030_v51  ;;  %7049 = vpow2.f32 %v5444_v14  ;;  %v5446_v26 = vmul.f32 -1.442695, %v4251_v42 }
 0x4dd   : > { %v7034_v47 = vpop.eup %7033  ;;  %v3758_v10 = vadd.f32 1.0, %v7032_v0  ;;  %7051 = vpow2.f32 %v5443_v7  ;;  %v4210_v63 = vpop.xlane.xlu1 %4209  ;;  %v5445_v37 = vmul.f32 -1.442695, %v4250_v16 }
 0x4de   : > { %v7036_v46 = vpop.eup %7035  ;;  %3801 = vst.msk [vmem:[%s8728_s7 + $0x38] sm:$0xff] %vm3793_vm5, %v7034_v47  ;;  %7053 = vrcp.f32 %v3755_v17  ;;  %v4253_v12 = vadd.f32 %v8737_v60, %v4210_v63  ;;  %v4207_v53 = vpop.xlane.xlu0 %4206 }
 0x4df   : > { %7055 = vrcp.f32 %v3758_v10  ;;  %v3757_v30 = vadd.f32 1.0, %v7036_v46  ;;  %v4252_v8 = vadd.f32 %v8737_v60, %v4207_v53 }
 0x4e0   : > { %v7038_v39 = vpop.eup %7037  ;;  %7057 = vpow2.f32 %v5446_v26  ;;  %v5448_v3 = vmul.f32 -1.442695, %v4253_v12 }
 0x4e1   : > { %v7040_v48 = vpop.eup %7039  ;;  %3800 = vst.msk [vmem:[%s8728_s7 + $0x30] sm:$0xff] %vm3793_vm5, %v7038_v39  ;;  %7059 = vrcp.f32 %v3757_v30  ;;  %v5447_v34 = vmul.f32 -1.442695, %v4252_v8  ;;  %v4216_v50 = vpop.xlane.xlu1 %4215 }
 0x4e2   : > { %v7042_v61 = vpop.eup %7041  ;;  %3803 = vst.msk [vmem:[%s8728_s7 + $0x48] sm:$0xff] %vm3793_vm5, %v7040_v48  ;;  %7061 = vpow2.f32 %v5445_v37  ;;  %v4255_v9 = vadd.f32 %v8737_v60, %v4216_v50  ;;  %v4213_v41 = vpop.xlane.xlu0 %4212 }
 0x4e3   : > { %v7044_v11 = vpop.eup %7043  ;;  %v3760_v57 = vadd.f32 1.0, %v7042_v61  ;;  %7063 = vpow2.f32 %v5448_v3  ;;  %v4254_v23 = vadd.f32 %v8737_v60, %v4213_v41 }
 0x4e4   : > { %v7046_v58 = vpop.eup %7045  ;;  %v3759_v40 = vadd.f32 1.0, %v7044_v11  ;;  %7065 = vpow2.f32 %v5447_v34  ;;  %v5450_v6 = vmul.f32 -1.442695, %v4255_v9 }
 0x4e5   : > { %v7048_v25 = vpop.eup %7047  ;;  %3802 = vst.msk [vmem:[%s8728_s7 + $0x40] sm:$0xff] %vm3793_vm5, %v7046_v58  ;;  %7067 = vrcp.f32 %v3760_v57  ;;  %v5449_v2 = vmul.f32 -1.442695, %v4254_v23  ;;  %v4222_v33 = vpop.xlane.xlu1 %4221 }
 0x4e6   : > { %v7050_v32 = vpop.eup %7049  ;;  %3805 = vst.msk [vmem:[%s8728_s7 + $0x58] sm:$0xff] %vm3793_vm5, %v7048_v25  ;;  %7069 = vrcp.f32 %v3759_v40  ;;  %v4257_v4 = vadd.f32 %v8737_v60, %v4222_v33  ;;  %v4219_v36 = vpop.xlane.xlu0 %4218 }
 0x4e7   : > { %v7052_v24 = vpop.eup %7051  ;;  %v4313_v59 = vadd.f32 1.0, %v7050_v32  ;;  %7071 = vpow2.f32 %v5450_v6  ;;  %v4256_v21 = vadd.f32 %v8737_v60, %v4219_v36 }
 0x4e8   : > { %v7054_v29 = vpop.eup %7053  ;;  %v4312_v44 = vadd.f32 1.0, %v7052_v24  ;;  %7073 = vpow2.f32 %v5449_v2  ;;  %v5452_v18 = vmul.f32 -1.442695, %v4257_v4 }
 0x4e9   : > { %v7056_v22 = vpop.eup %7055  ;;  %3804 = vst.msk [vmem:[%s8728_s7 + $0x50] sm:$0xff] %vm3793_vm5, %v7054_v29  ;;  %7075 = vrcp.f32 %v4313_v59  ;;  %v5451_v54 = vmul.f32 -1.442695, %v4256_v21  ;;  %v4228_v19 = vpop.xlane.xlu1 %4227 }
 0x4ea   : > { %v7058_v28 = vpop.eup %7057  ;;  %3807 = vst.msk [vmem:[%s8728_s7 + $0x68] sm:$0xff] %vm3793_vm5, %v7056_v22  ;;  %7077 = vrcp.f32 %v4312_v44  ;;  %v4259_v27 = vadd.f32 %v8737_v60, %v4228_v19  ;;  %v4225_v20 = vpop.xlane.xlu0 %4224 }
 0x4eb   : > { %v7060_v38 = vpop.eup %7059  ;;  %v4315_v52 = vadd.f32 1.0, %v7058_v28  ;;  %7079 = vpow2.f32 %v5452_v18  ;;  %v4258_v55 = vadd.f32 %v8737_v60, %v4225_v20 }
 0x4ec   : > { %v7062_v15 = vpop.eup %7061  ;;  %3806 = vst.msk [vmem:[%s8728_s7 + $0x60] sm:$0xff] %vm3793_vm5, %v7060_v38  ;;  %7081 = vpow2.f32 %v5451_v54  ;;  %v5454_v35 = vmul.f32 -1.442695, %v4259_v27 }
 0x4ed   : > { %v7064_v62 = vpop.eup %7063  ;;  %7083 = vrcp.f32 %v4315_v52  ;;  %v4314_v45 = vadd.f32 1.0, %v7062_v15  ;;  %v4234_v1 = vpop.xlane.xlu1 %4233  ;;  %v5453_v13 = vmul.f32 -1.442695, %v4258_v55 }
 0x4ee   : > { %v7066_v56 = vpop.eup %7065  ;;  %v4317_v14 = vadd.f32 1.0, %v7064_v62  ;;  %7085 = vpow2.f32 %v5454_v35  ;;  %v4261_v43 = vadd.f32 %v8737_v60, %v4234_v1  ;;  %v4231_v7 = vpop.xlane.xlu0 %4230 }
 0x4ef   : > { %v7068_v31 = vpop.eup %7067  ;;  %7087 = vrcp.f32 %v4314_v45  ;;  %v4316_v49 = vadd.f32 1.0, %v7066_v56  ;;  %v4260_v42 = vadd.f32 %v8737_v60, %v4231_v7 }
 0x4f0   : > { %v7070_v5 = vpop.eup %7069  ;;  %3809 = vst.msk [vmem:[%s8728_s7 + $0x78] sm:$0xff] %vm3793_vm5, %v7068_v31  ;;  %7089 = vrcp.f32 %v4317_v14  ;;  %v5456_v51 = vmul.f32 -1.442695, %v4261_v43 }
 0x4f1   : > { %v7072_v16 = vpop.eup %7071  ;;  %3808 = vst.msk [vmem:[%s8728_s7 + $0x70] sm:$0xff] %vm3793_vm5, %v7070_v5  ;;  %7091 = vrcp.f32 %v4316_v49  ;;  %v4240_v0 = vpop.xlane.xlu1 %4239  ;;  %v5455_v47 = vmul.f32 -1.442695, %v4260_v42 }
 0x4f2   : > { %v7074_v17 = vpop.eup %7073  ;;  %v4319_v26 = vadd.f32 1.0, %v7072_v16  ;;  %7093 = vpow2.f32 %v5453_v13  ;;  %v4263_v10 = vadd.f32 %v8737_v60, %v4240_v0  ;;  %v4237_v63 = vpop.xlane.xlu0 %4236 }
 0x4f3   : > { %v7076_v46 = vpop.eup %7075  ;;  %v4318_v37 = vadd.f32 1.0, %v7074_v17  ;;  %7095 = vpow2.f32 %v5456_v51  ;;  %v4262_v12 = vadd.f32 %v8737_v60, %v4237_v63 }
 0x4f4   : > { %v7078_v53 = vpop.eup %7077  ;;  %4361 = vst.msk [vmem:[%s8783_s23 + $0x8] sm:$0xff] %vm3793_vm5, %v7076_v46  ;;  %7097 = vrcp.f32 %v4319_v26  ;;  %v5458_v30 = vmul.f32 -1.442695, %v4263_v10 }
 0x4f5   : > { %v7080_v8 = vpop.eup %7079  ;;  %4360 = vst.msk [vmem:[%s8783_s23] sm:$0xff] %vm3793_vm5, %v7078_v53  ;;  %7099 = vrcp.f32 %v4318_v37  ;;  %v5457_v48 = vmul.f32 -1.442695, %v4262_v12 }
 0x4f6   : > { %v7082_v39 = vpop.eup %7081  ;;  %v4321_v3 = vadd.f32 1.0, %v7080_v8  ;;  %7101 = vpow2.f32 %v5455_v47 }
 0x4f7   : > { %v7084_v34 = vpop.eup %7083  ;;  %v4320_v50 = vadd.f32 1.0, %v7082_v39  ;;  %7103 = vpow2.f32 %v5458_v30 }
 0x4f8   : > { %v7086_v60 = vpop.eup %7085  ;;  %4363 = vst.msk [vmem:[%s8783_s23 + $0x18] sm:$0xff] %vm3793_vm5, %v7084_v34  ;;  %7105 = vrcp.f32 %v4321_v3 }
 0x4f9   : > { %v7088_v61 = vpop.eup %7087  ;;  %7107 = vrcp.f32 %v4320_v50  ;;  %v4323_v9 = vadd.f32 1.0, %v7086_v60 }
 0x4fa   : > { %v7090_v41 = vpop.eup %7089  ;;  %4362 = vst.msk [vmem:[%s8783_s23 + $0x10] sm:$0xff] %vm3793_vm5, %v7088_v61  ;;  %7109 = vpow2.f32 %v5457_v48 }
 0x4fb   : > { %v7092_v11 = vpop.eup %7091  ;;  %4365 = vst.msk [vmem:[%s8783_s23 + $0x28] sm:$0xff] %vm3793_vm5, %v7090_v41  ;;  %7111 = vrcp.f32 %v4323_v9 }
 0x4fc   : > { %v7094_v57 = vpop.eup %7093  ;;  %4364 = vst.msk [vmem:[%s8783_s23 + $0x20] sm:$0xff] %vm3793_vm5, %v7092_v11 }
 0x4fd   : > { %v7096_v23 = vpop.eup %7095  ;;  %v4322_v58 = vadd.f32 1.0, %v7094_v57 }
 0x4fe   : > { %v7098_v40 = vpop.eup %7097  ;;  %v4325_v6 = vadd.f32 1.0, %v7096_v23 }
 0x4ff   : > { %v7100_v25 = vpop.eup %7099  ;;  %4367 = vst.msk [vmem:[%s8783_s23 + $0x38] sm:$0xff] %vm3793_vm5, %v7098_v40  ;;  %7113 = vrcp.f32 %v4322_v58 }
 0x500   : > { %v7102_v2 = vpop.eup %7101  ;;  %4366 = vst.msk [vmem:[%s8783_s23 + $0x30] sm:$0xff] %vm3793_vm5, %v7100_v25  ;;  %7115 = vrcp.f32 %v4325_v6 }
 0x501   : > { %v7104_v33 = vpop.eup %7103  ;;  %v4324_v32 = vadd.f32 1.0, %v7102_v2 }
 0x502   : > { %v7106_v4 = vpop.eup %7105  ;;  %v4327_v36 = vadd.f32 1.0, %v7104_v33 }
 0x503   : > { %v7108_v24 = vpop.eup %7107  ;;  %4369 = vst.msk [vmem:[%s8783_s23 + $0x48] sm:$0xff] %vm3793_vm5, %v7106_v4  ;;  %7117 = vrcp.f32 %v4324_v32 }
 0x504   : > { %v7110_v59 = vpop.eup %7109  ;;  %4368 = vst.msk [vmem:[%s8783_s23 + $0x40] sm:$0xff] %vm3793_vm5, %v7108_v24  ;;  %7119 = vrcp.f32 %v4327_v36 }
 0x505   : > { %v7112_v21 = vpop.eup %7111  ;;  %v4326_v29 = vadd.f32 1.0, %v7110_v59 }
 0x506   : > { %4371 = vst.msk [vmem:[%s8783_s23 + $0x58] sm:$0xff] %vm3793_vm5, %v7112_v21 }
 0x507   : > { %7121 = vrcp.f32 %v4326_v29 }
 0x509   : > { %v7114_v44 = vpop.eup %7113 }
 0x50a   : > { %v7116_v18 = vpop.eup %7115  ;;  %4370 = vst.msk [vmem:[%s8783_s23 + $0x50] sm:$0xff] %vm3793_vm5, %v7114_v44 }
 0x50b   : > { %4373 = vst.msk [vmem:[%s8783_s23 + $0x68] sm:$0xff] %vm3793_vm5, %v7116_v18 }
 0x50d   : > { %v7118_v22 = vpop.eup %7117 }
 0x50e   : > { %v7120_v54 = vpop.eup %7119  ;;  %4372 = vst.msk [vmem:[%s8783_s23 + $0x60] sm:$0xff] %vm3793_vm5, %v7118_v22 }
 0x50f   : > { %4375 = vst.msk [vmem:[%s8783_s23 + $0x78] sm:$0xff] %vm3793_vm5, %v7120_v54 }
 0x511   : > { %v7122_v19 = vpop.eup %7121 }
 0x512   : > { %4374 = vst.msk [vmem:[%s8783_s23 + $0x70] sm:$0xff] %vm3793_vm5, %v7122_v19 }
 0x513 PF: > { %s88_s12 = sadd.s32 1, %s7161_s12  }
 0x514   : > { %p85_p4 = scmp.ge.s32.totalorder %s88_s12, 4  }
 0x516   :  { %87 = sbr.rel (!%p85_p4) target bundleno = 64 (0x40), region = 281 }

</bundles_post_ra>
